<compile_context>
chip_gen: v6e
topology: v6e:2x2x1
jax: 0.10.0
libtpu: 0.0.40
codegen_flags: <defaults>
</compile_context>

<pallas_src>
import jax
import jax.numpy as jnp
from jax.experimental import pallas as pl
from jax.experimental.pallas import tpu as pltpu


# ---------------------------------------------------------------------------
# Pallas kernels
# ---------------------------------------------------------------------------
def _conv_gemm_kernel(p_ref, w_ref, b_ref, o_ref):
    """out(Cout, TM) = relu(W(Cout, K) @ P(K, TM) + b(Cout, 1)).

    Transposed orientation: the big spatial dim TM is the lane dim, so the
    output stores are lane-dense (no masked vst on Cout = 6/16/32/64).
    """
    y = jnp.dot(w_ref[...], p_ref[...], preferred_element_type=jnp.float32)
    y = jnp.maximum(y + b_ref[...], 0.0)          # bias broadcast over lanes
    o_ref[...] = y.astype(o_ref.dtype)


def _max9_kernel(*refs):
    """Elementwise max of 9 lane-dense slabs (max_pool2d kernel=3, stride=3)."""
    o_ref = refs[-1]
    m = refs[0][...]
    for r in refs[1:-1]:
        m = jnp.maximum(m, r[...])
    o_ref[...] = m


def _fc_stack_kernel(x_ref,
                     w1_ref, b1_ref, w2_ref, b2_ref, w3_ref, b3_ref,
                     w4_ref, b4_ref, w5_ref, b5_ref, o_ref):
    """fc1..fc5 fused in a single kernel; weights are VMEM resident."""

    def dense(h, w_ref, b_ref):
        y = jnp.dot(h, w_ref[...], preferred_element_type=jnp.float32)
        return y + b_ref[...]

    h = x_ref[...]                                           # (M, 1024) bf16
    h = jnp.maximum(dense(h, w1_ref, b1_ref), 0.0).astype(jnp.bfloat16)
    h = jnp.maximum(dense(h, w2_ref, b2_ref), 0.0).astype(jnp.bfloat16)
    h = jnp.maximum(dense(h, w3_ref, b3_ref), 0.0).astype(jnp.bfloat16)
    h = jnp.maximum(dense(h, w4_ref, b4_ref), 0.0).astype(jnp.bfloat16)
    y = dense(h, w5_ref, b5_ref)                             # (M, 1) f32
    # exact sigmoid (division keeps the result in [0, 1] even when exp sats)
    o_ref[...] = 1.0 / (1.0 + jnp.exp(-y))


# ---------------------------------------------------------------------------
# Conv layer: XLA patch gather (lane-dense layout) + Pallas GEMM
# ---------------------------------------------------------------------------
_TM_CANDIDATES = (6144, 4608, 4096, 3072, 2048, 1536, 1024, 512, 256, 128)


def _pick_lane_tile(m):
    """Largest 128-multiple that divides m exactly (else use the full dim)."""
    for cand in _TM_CANDIDATES:
        if m % cand == 0:
            return cand
    return m


def conv2d_relu(x, w2, b2, kh, kw):
    """nn.Conv2d (valid, stride 1) + ReLU.

    x : (N, Cin, H, W) bf16 activations (NCHW, torch layout)
    w2: (Cout, Cin*kh*kw) bf16, b2: (Cout, 1) f32  (pre-reshaped once)
    returns (N, Cout, Ho, Wo) bf16.
    """
    N, Cin, H, W = x.shape
    Cout, K = w2.shape
    assert K == Cin * kh * kw
    Ho, Wo = H - kh + 1, W - kw + 1
    M = Ho * Wo

    # im2col directly in (N, K, M) order: K = (cin, i, j) major->minor,
    # M = (y, x).  Only contiguous-merge reshapes, no transposes.
    # TODO(synk): the patch gather itself still runs in XLA; fully fusing it
    # into the kernel needs in-kernel lane rotations (left for a follow-up).
    slices = [x[:, :, i:i + Ho, j:j + Wo]
              for i in range(kh) for j in range(kw)]
    p = jnp.stack(slices, axis=2)                 # (N, Cin, kh*kw, Ho, Wo)
    p = p.reshape(N, K, M)

    tm = _pick_lane_tile(M)                       # conv1: 6144, others: full M
    grid = (N, M // tm)

    out = pl.pallas_call(
        _conv_gemm_kernel,
        out_shape=jax.ShapeDtypeStruct((N, Cout, M), x.dtype),
        grid=grid,
        in_specs=[
            pl.BlockSpec((None, K, tm), lambda n, m: (n, 0, m)),
            pl.BlockSpec((Cout, K), lambda n, m: (0, 0)),
            pl.BlockSpec((Cout, 1), lambda n, m: (0, 0)),
        ],
        out_specs=pl.BlockSpec((None, Cout, tm), lambda n, m: (n, 0, m)),
        compiler_params=pltpu.CompilerParams(
            dimension_semantics=("parallel", "parallel")),
    )(p, w2, b2)
    return out.reshape(N, Cout, Ho, Wo)           # free split of the last dim


# ---------------------------------------------------------------------------
# Max pool 3x3 / stride 3 (floor mode), lane-dense Pallas max-of-9
# ---------------------------------------------------------------------------
def max_pool3(x):
    """F.max_pool2d(x, 3) on an NCHW tensor."""
    N, C, H, W = x.shape
    Ho, Wo = H // 3, W // 3
    R, M = N * C, Ho * Wo
    # TODO(synk): the 3x3 window extraction is XLA strided-slice glue; the
    # reduction itself (and the lane-dense store) is the Pallas kernel.
    slices = [
        x[:, :, dy:3 * Ho:3, dx:3 * Wo:3].reshape(R, M)
        for dy in range(3) for dx in range(3)
    ]
    out = pl.pallas_call(
        _max9_kernel,
        out_shape=jax.ShapeDtypeStruct((R, M), x.dtype),
        grid=(1,),
        in_specs=[pl.BlockSpec((R, M), lambda i: (0, 0))] * 9,
        out_specs=pl.BlockSpec((R, M), lambda i: (0, 0)),
        compiler_params=pltpu.CompilerParams(
            dimension_semantics=("arbitrary",)),
    )(*slices)
    return out.reshape(N, C, Ho, Wo)


# ---------------------------------------------------------------------------
# Fused fully-connected stack (fc1..fc5 + sigmoid) in one pallas_call
# ---------------------------------------------------------------------------
def fc_stack(x, prep):
    Mb = x.shape[0]
    args = [x]
    in_specs = [pl.BlockSpec(x.shape, lambda i: (0, 0))]
    for li in range(1, 6):
        w = prep[f"fc{li}_w"]
        b = prep[f"fc{li}_b"]
        args += [w, b]
        in_specs += [pl.BlockSpec(w.shape, lambda i: (0, 0)),
                     pl.BlockSpec(b.shape, lambda i: (0, 0))]
    return pl.pallas_call(
        _fc_stack_kernel,
        out_shape=jax.ShapeDtypeStruct((Mb, 1), jnp.float32),
        grid=(1,),
        in_specs=in_specs,
        out_specs=pl.BlockSpec((Mb, 1), lambda i: (0, 0)),
        compiler_params=pltpu.CompilerParams(
            dimension_semantics=("arbitrary",)),
    )(*args)


# ---------------------------------------------------------------------------
# Network
# ---------------------------------------------------------------------------
def net_forward(x, prep):
    x = x.astype(jnp.bfloat16)
    x = conv2d_relu(x, prep["conv1_w"], prep["conv1_b"], 5, 5)
    x = max_pool3(x)
    x = conv2d_relu(x, prep["conv2_w"], prep["conv2_b"], 5, 5)
    x = max_pool3(x)
    x = conv2d_relu(x, prep["conv3_w"], prep["conv3_b"], 3, 3)
    x = max_pool3(x)
    x = conv2d_relu(x, prep["conv4_w"], prep["conv4_b"], 3, 3)
    N = x.shape[0]
    x = x.reshape(N, -1)        # NCHW flatten -> (N, 1024), matches torch .view
    return fc_stack(x, prep)    # (N, 1) f32 in [0, 1]


def prepare_params(params):
    """One-time weight layout prep (runs once, outside the forward):
       conv w -> (Cout, Cin*kh*kw) bf16, conv b -> (Cout, 1) f32,
       fc   w -> transposed (K, N)  bf16, fc   b -> (1, N)    f32."""
    prep = {}
    for i in range(1, 5):
        w = params[f"conv{i}_w"]
        prep[f"conv{i}_w"] = w.reshape(w.shape[0], -1).astype(jnp.bfloat16)
        prep[f"conv{i}_b"] = params[f"conv{i}_b"].reshape(-1, 1).astype(jnp.float32)
    for i in range(1, 6):
        w = params[f"fc{i}_w"]
        prep[f"fc{i}_w"] = w.T.astype(jnp.bfloat16)
        prep[f"fc{i}_b"] = params[f"fc{i}_b"].reshape(1, -1).astype(jnp.float32)
    return prep


def init_params(key):
    shapes = {
        "conv1_w": (6, 1, 5, 5), "conv1_b": (6,),
        "conv2_w": (16, 6, 5, 5), "conv2_b": (16,),
        "conv3_w": (32, 16, 3, 3), "conv3_b": (32,),
        "conv4_w": (64, 32, 3, 3), "conv4_b": (64,),
        "fc1_w": (256, 1024), "fc1_b": (256,),
        "fc2_w": (64, 256), "fc2_b": (64,),
        "fc3_w": (16, 64), "fc3_b": (16,),
        "fc4_w": (4, 16), "fc4_b": (4,),
        "fc5_w": (1, 4), "fc5_b": (1,),
    }
    params = {}
    keys = jax.random.split(key, len(shapes))
    for k, (name, shape) in zip(keys, shapes.items()):
        scale = 0.05 if name.endswith("_w") else 0.01
        params[name] = scale * jax.random.normal(k, shape, dtype=jnp.float32)
    return params


if __name__ == "__main__":
    key = jax.random.PRNGKey(0)
    kx, kp = jax.random.split(key)
    # input implied by the module: (batch, 1, 196, 196)
    x = jax.random.normal(kx, (2, 1, 196, 196), dtype=jnp.float32)
    params = init_params(kp)
    prep = prepare_params(params)      # weight layout prep done once, up front

    fwd = jax.jit(net_forward)
    y = jax.block_until_ready(fwd(x, prep))

    assert y.shape == (2, 1), y.shape
    assert bool(jnp.all((y >= 0.0) & (y <= 1.0))), y
    print("KERNEL_OK")
</pallas_src>

<mosaic_0001>
module attributes {stable_mosaic.version = 11 : i64} {
  func.func @_conv_gemm_kernel(%arg0: i32, %arg1: i32, %arg2: memref<1x25x6144xbf16, #tpu.memory_space<vmem>>, %arg3: memref<6x25xbf16, #tpu.memory_space<vmem>>, %arg4: memref<6x1xf32, #tpu.memory_space<vmem>>, %arg5: memref<1x6x6144xbf16, #tpu.memory_space<vmem>>) attributes {dimension_semantics = [#tpu.dimension_semantics<parallel>, #tpu.dimension_semantics<parallel>], iteration_bounds = array<i64: 2, 6>, scalar_prefetch = 0 : i64, scratch_operands = 0 : i64, tpu.core_type = #tpu.core_type<tc>, window_params = [{transform_indices = @transform_0, window_bounds = array<i64: 1, 25, 6144>}, {pipeline_mode = #tpu.pipeline_mode<synchronous>, transform_indices = @transform_1, window_bounds = array<i64: 6, 25>}, {pipeline_mode = #tpu.pipeline_mode<synchronous>, transform_indices = @transform_2, window_bounds = array<i64: 6, 1>}, {transform_indices = @transform_3, window_bounds = array<i64: 1, 6, 6144>}]} {
    %c0 = arith.constant 0 : index
    %c0_0 = arith.constant 0 : index
    %0 = vector.load %arg3[%c0, %c0_0] : memref<6x25xbf16, #tpu.memory_space<vmem>>, vector<6x25xbf16>
    %c0_1 = arith.constant 0 : index
    %c0_2 = arith.constant 0 : index
    %c0_3 = arith.constant 0 : index
    %1 = vector.load %arg2[%c0_1, %c0_2, %c0_3] : memref<1x25x6144xbf16, #tpu.memory_space<vmem>>, vector<1x25x6144xbf16>
    %2 = vector.shape_cast %1 : vector<1x25x6144xbf16> to vector<25x6144xbf16>
    %cst = arith.constant dense<0.000000e+00> : vector<6x6144xf32>
    %3 = tpu.matmul %0, %2, %cst {dimension_numbers = #tpu.dot_dimension_numbers<[1], [0], [0], [1], [0, 0, 1, 1], [], []>} : vector<6x25xbf16>, vector<25x6144xbf16>, vector<6x6144xf32> -> vector<6x6144xf32>
    %c0_4 = arith.constant 0 : index
    %c0_5 = arith.constant 0 : index
    %4 = vector.load %arg4[%c0_4, %c0_5] : memref<6x1xf32, #tpu.memory_space<vmem>>, vector<6x1xf32>
    %5 = vector.broadcast %4 : vector<6x1xf32> to vector<6x6144xf32>
    %6 = arith.addf %3, %5 : vector<6x6144xf32>
    %cst_6 = arith.constant 0.000000e+00 : f32
    %7 = vector.broadcast %cst_6 : f32 to vector<6x6144xf32>
    %8 = arith.maximumf %6, %7 : vector<6x6144xf32>
    %9 = arith.truncf %8 : vector<6x6144xf32> to vector<6x6144xbf16>
    %c0_7 = arith.constant 0 : index
    %c0_8 = arith.constant 0 : index
    %c0_9 = arith.constant 0 : index
    %10 = vector.load %arg5[%c0_7, %c0_8, %c0_9] : memref<1x6x6144xbf16, #tpu.memory_space<vmem>>, vector<1x6x6144xbf16>
    %11 = vector.shape_cast %10 : vector<1x6x6144xbf16> to vector<6x6144xbf16>
    %12 = vector.shape_cast %9 : vector<6x6144xbf16> to vector<1x6x6144xbf16>
    tpu.vector_store %arg5[%c0_7, %c0_8, %c0_9], %12 {strides = array<i32>} : memref<1x6x6144xbf16, #tpu.memory_space<vmem>>, vector<1x6x6144xbf16>,
    return
  }
  func.func @transform_0(%arg0: i32, %arg1: i32) -> (i32, i32, i32) {
    %c0_i32 = arith.constant 0 : i32
    %c0_i32_0 = arith.constant 0 : i32
    return %arg0, %c0_i32, %arg1 : i32, i32, i32
  }
  func.func @transform_1(%arg0: i32, %arg1: i32) -> (i32, i32) {
    %c0_i32 = arith.constant 0 : i32
    %c0_i32_0 = arith.constant 0 : i32
    %c0_i32_1 = arith.constant 0 : i32
    return %c0_i32, %c0_i32_0 : i32, i32
  }
  func.func @transform_2(%arg0: i32, %arg1: i32) -> (i32, i32) {
    %c0_i32 = arith.constant 0 : i32
    %c0_i32_0 = arith.constant 0 : i32
    %c0_i32_1 = arith.constant 0 : i32
    return %c0_i32, %c0_i32_0 : i32, i32
  }
  func.func @transform_3(%arg0: i32, %arg1: i32) -> (i32, i32, i32) {
    %c0_i32 = arith.constant 0 : i32
    %c0_i32_0 = arith.constant 0 : i32
    return %arg0, %c0_i32, %arg1 : i32, i32, i32
  }
}

module attributes {stable_mosaic.version = 11 : i64} {
  func.func @_max9_kernel(%arg0: i32, %arg1: memref<12x4096xbf16, #tpu.memory_space<vmem>>, %arg2: memref<12x4096xbf16, #tpu.memory_space<vmem>>, %arg3: memref<12x4096xbf16, #tpu.memory_space<vmem>>, %arg4: memref<12x4096xbf16, #tpu.memory_space<vmem>>, %arg5: memref<12x4096xbf16, #tpu.memory_space<vmem>>, %arg6: memref<12x4096xbf16, #tpu.memory_space<vmem>>, %arg7: memref<12x4096xbf16, #tpu.memory_space<vmem>>, %arg8: memref<12x4096xbf16, #tpu.memory_space<vmem>>, %arg9: memref<12x4096xbf16, #tpu.memory_space<vmem>>, %arg10: memref<12x4096xbf16, #tpu.memory_space<vmem>>) attributes {dimension_semantics = [#tpu.dimension_semantics<arbitrary>], iteration_bounds = array<i64: 1>, scalar_prefetch = 0 : i64, scratch_operands = 0 : i64, tpu.core_type = #tpu.core_type<tc>, window_params = [{pipeline_mode = #tpu.pipeline_mode<synchronous>, transform_indices = @transform_0, window_bounds = array<i64: 12, 4096>}, {pipeline_mode = #tpu.pipeline_mode<synchronous>, transform_indices = @transform_1, window_bounds = array<i64: 12, 4096>}, {pipeline_mode = #tpu.pipeline_mode<synchronous>, transform_indices = @transform_2, window_bounds = array<i64: 12, 4096>}, {pipeline_mode = #tpu.pipeline_mode<synchronous>, transform_indices = @transform_3, window_bounds = array<i64: 12, 4096>}, {pipeline_mode = #tpu.pipeline_mode<synchronous>, transform_indices = @transform_4, window_bounds = array<i64: 12, 4096>}, {pipeline_mode = #tpu.pipeline_mode<synchronous>, transform_indices = @transform_5, window_bounds = array<i64: 12, 4096>}, {pipeline_mode = #tpu.pipeline_mode<synchronous>, transform_indices = @transform_6, window_bounds = array<i64: 12, 4096>}, {pipeline_mode = #tpu.pipeline_mode<synchronous>, transform_indices = @transform_7, window_bounds = array<i64: 12, 4096>}, {pipeline_mode = #tpu.pipeline_mode<synchronous>, transform_indices = @transform_8, window_bounds = array<i64: 12, 4096>}, {pipeline_mode = #tpu.pipeline_mode<synchronous>, transform_indices = @transform_9, window_bounds = array<i64: 12, 4096>}]} {
    %c0 = arith.constant 0 : index
    %c0_0 = arith.constant 0 : index
    %0 = vector.load %arg1[%c0, %c0_0] : memref<12x4096xbf16, #tpu.memory_space<vmem>>, vector<12x4096xbf16>
    %c0_1 = arith.constant 0 : index
    %c0_2 = arith.constant 0 : index
    %1 = vector.load %arg2[%c0_1, %c0_2] : memref<12x4096xbf16, #tpu.memory_space<vmem>>, vector<12x4096xbf16>
    %2 = arith.maximumf %0, %1 : vector<12x4096xbf16>
    %c0_3 = arith.constant 0 : index
    %c0_4 = arith.constant 0 : index
    %3 = vector.load %arg3[%c0_3, %c0_4] : memref<12x4096xbf16, #tpu.memory_space<vmem>>, vector<12x4096xbf16>
    %4 = arith.maximumf %2, %3 : vector<12x4096xbf16>
    %c0_5 = arith.constant 0 : index
    %c0_6 = arith.constant 0 : index
    %5 = vector.load %arg4[%c0_5, %c0_6] : memref<12x4096xbf16, #tpu.memory_space<vmem>>, vector<12x4096xbf16>
    %6 = arith.maximumf %4, %5 : vector<12x4096xbf16>
    %c0_7 = arith.constant 0 : index
    %c0_8 = arith.constant 0 : index
    %7 = vector.load %arg5[%c0_7, %c0_8] : memref<12x4096xbf16, #tpu.memory_space<vmem>>, vector<12x4096xbf16>
    %8 = arith.maximumf %6, %7 : vector<12x4096xbf16>
    %c0_9 = arith.constant 0 : index
    %c0_10 = arith.constant 0 : index
    %9 = vector.load %arg6[%c0_9, %c0_10] : memref<12x4096xbf16, #tpu.memory_space<vmem>>, vector<12x4096xbf16>
    %10 = arith.maximumf %8, %9 : vector<12x4096xbf16>
    %c0_11 = arith.constant 0 : index
    %c0_12 = arith.constant 0 : index
    %11 = vector.load %arg7[%c0_11, %c0_12] : memref<12x4096xbf16, #tpu.memory_space<vmem>>, vector<12x4096xbf16>
    %12 = arith.maximumf %10, %11 : vector<12x4096xbf16>
    %c0_13 = arith.constant 0 : index
    %c0_14 = arith.constant 0 : index
    %13 = vector.load %arg8[%c0_13, %c0_14] : memref<12x4096xbf16, #tpu.memory_space<vmem>>, vector<12x4096xbf16>
    %14 = arith.maximumf %12, %13 : vector<12x4096xbf16>
    %c0_15 = arith.constant 0 : index
    %c0_16 = arith.constant 0 : index
    %15 = vector.load %arg9[%c0_15, %c0_16] : memref<12x4096xbf16, #tpu.memory_space<vmem>>, vector<12x4096xbf16>
    %16 = arith.maximumf %14, %15 : vector<12x4096xbf16>
    %c0_17 = arith.constant 0 : index
    %c0_18 = arith.constant 0 : index
    %17 = vector.load %arg10[%c0_17, %c0_18] : memref<12x4096xbf16, #tpu.memory_space<vmem>>, vector<12x4096xbf16>
    tpu.vector_store %arg10[%c0_17, %c0_18], %16 {strides = array<i32>} : memref<12x4096xbf16, #tpu.memory_space<vmem>>, vector<12x4096xbf16>,
    return
  }
  func.func @transform_0(%arg0: i32) -> (i32, i32) {
    %c0_i32 = arith.constant 0 : i32
    %c0_i32_0 = arith.constant 0 : i32
    %c0_i32_1 = arith.constant 0 : i32
    return %c0_i32, %c0_i32_0 : i32, i32
  }
  func.func @transform_1(%arg0: i32) -> (i32, i32) {
    %c0_i32 = arith.constant 0 : i32
    %c0_i32_0 = arith.constant 0 : i32
    %c0_i32_1 = arith.constant 0 : i32
    return %c0_i32, %c0_i32_0 : i32, i32
  }
  func.func @transform_2(%arg0: i32) -> (i32, i32) {
    %c0_i32 = arith.constant 0 : i32
    %c0_i32_0 = arith.constant 0 : i32
    %c0_i32_1 = arith.constant 0 : i32
    return %c0_i32, %c0_i32_0 : i32, i32
  }
  func.func @transform_3(%arg0: i32) -> (i32, i32) {
    %c0_i32 = arith.constant 0 : i32
    %c0_i32_0 = arith.constant 0 : i32
    %c0_i32_1 = arith.constant 0 : i32
    return %c0_i32, %c0_i32_0 : i32, i32
  }
  func.func @transform_4(%arg0: i32) -> (i32, i32) {
    %c0_i32 = arith.constant 0 : i32
    %c0_i32_0 = arith.constant 0 : i32
    %c0_i32_1 = arith.constant 0 : i32
    return %c0_i32, %c0_i32_0 : i32, i32
  }
  func.func @transform_5(%arg0: i32) -> (i32, i32) {
    %c0_i32 = arith.constant 0 : i32
    %c0_i32_0 = arith.constant 0 : i32
    %c0_i32_1 = arith.constant 0 : i32
    return %c0_i32, %c0_i32_0 : i32, i32
  }
  func.func @transform_6(%arg0: i32) -> (i32, i32) {
    %c0_i32 = arith.constant 0 : i32
    %c0_i32_0 = arith.constant 0 : i32
    %c0_i32_1 = arith.constant 0 : i32
    return %c0_i32, %c0_i32_0 : i32, i32
  }
  func.func @transform_7(%arg0: i32) -> (i32, i32) {
    %c0_i32 = arith.constant 0 : i32
    %c0_i32_0 = arith.constant 0 : i32
    %c0_i32_1 = arith.constant 0 : i32
    return %c0_i32, %c0_i32_0 : i32, i32
  }
  func.func @transform_8(%arg0: i32) -> (i32, i32) {
    %c0_i32 = arith.constant 0 : i32
    %c0_i32_0 = arith.constant 0 : i32
    %c0_i32_1 = arith.constant 0 : i32
    return %c0_i32, %c0_i32_0 : i32, i32
  }
  func.func @transform_9(%arg0: i32) -> (i32, i32) {
    %c0_i32 = arith.constant 0 : i32
    %c0_i32_0 = arith.constant 0 : i32
    %c0_i32_1 = arith.constant 0 : i32
    return %c0_i32, %c0_i32_0 : i32, i32
  }
}

module attributes {stable_mosaic.version = 11 : i64} {
  func.func @_conv_gemm_kernel(%arg0: i32, %arg1: i32, %arg2: memref<1x150x3600xbf16, #tpu.memory_space<vmem>>, %arg3: memref<16x150xbf16, #tpu.memory_space<vmem>>, %arg4: memref<16x1xf32, #tpu.memory_space<vmem>>, %arg5: memref<1x16x3600xbf16, #tpu.memory_space<vmem>>) attributes {dimension_semantics = [#tpu.dimension_semantics<parallel>, #tpu.dimension_semantics<parallel>], iteration_bounds = array<i64: 2, 1>, scalar_prefetch = 0 : i64, scratch_operands = 0 : i64, tpu.core_type = #tpu.core_type<tc>, window_params = [{transform_indices = @transform_0, window_bounds = array<i64: 1, 150, 3600>}, {pipeline_mode = #tpu.pipeline_mode<synchronous>, transform_indices = @transform_1, window_bounds = array<i64: 16, 150>}, {pipeline_mode = #tpu.pipeline_mode<synchronous>, transform_indices = @transform_2, window_bounds = array<i64: 16, 1>}, {transform_indices = @transform_3, window_bounds = array<i64: 1, 16, 3600>}]} {
    %c0 = arith.constant 0 : index
    %c0_0 = arith.constant 0 : index
    %0 = vector.load %arg3[%c0, %c0_0] : memref<16x150xbf16, #tpu.memory_space<vmem>>, vector<16x150xbf16>
    %c0_1 = arith.constant 0 : index
    %c0_2 = arith.constant 0 : index
    %c0_3 = arith.constant 0 : index
    %1 = vector.load %arg2[%c0_1, %c0_2, %c0_3] : memref<1x150x3600xbf16, #tpu.memory_space<vmem>>, vector<1x150x3600xbf16>
    %2 = vector.shape_cast %1 : vector<1x150x3600xbf16> to vector<150x3600xbf16>
    %cst = arith.constant dense<0.000000e+00> : vector<16x3600xf32>
    %3 = tpu.matmul %0, %2, %cst {dimension_numbers = #tpu.dot_dimension_numbers<[1], [0], [0], [1], [0, 0, 1, 1], [], []>} : vector<16x150xbf16>, vector<150x3600xbf16>, vector<16x3600xf32> -> vector<16x3600xf32>
    %c0_4 = arith.constant 0 : index
    %c0_5 = arith.constant 0 : index
    %4 = vector.load %arg4[%c0_4, %c0_5] : memref<16x1xf32, #tpu.memory_space<vmem>>, vector<16x1xf32>
    %5 = vector.broadcast %4 : vector<16x1xf32> to vector<16x3600xf32>
    %6 = arith.addf %3, %5 : vector<16x3600xf32>
    %cst_6 = arith.constant 0.000000e+00 : f32
    %7 = vector.broadcast %cst_6 : f32 to vector<16x3600xf32>
    %8 = arith.maximumf %6, %7 : vector<16x3600xf32>
    %9 = arith.truncf %8 : vector<16x3600xf32> to vector<16x3600xbf16>
    %c0_7 = arith.constant 0 : index
    %c0_8 = arith.constant 0 : index
    %c0_9 = arith.constant 0 : index
    %10 = vector.load %arg5[%c0_7, %c0_8, %c0_9] : memref<1x16x3600xbf16, #tpu.memory_space<vmem>>, vector<1x16x3600xbf16>
    %11 = vector.shape_cast %10 : vector<1x16x3600xbf16> to vector<16x3600xbf16>
    %12 = vector.shape_cast %9 : vector<16x3600xbf16> to vector<1x16x3600xbf16>
    tpu.vector_store %arg5[%c0_7, %c0_8, %c0_9], %12 {strides = array<i32>} : memref<1x16x3600xbf16, #tpu.memory_space<vmem>>, vector<1x16x3600xbf16>,
    return
  }
  func.func @transform_0(%arg0: i32, %arg1: i32) -> (i32, i32, i32) {
    %c0_i32 = arith.constant 0 : i32
    %c0_i32_0 = arith.constant 0 : i32
    return %arg0, %c0_i32, %arg1 : i32, i32, i32
  }
  func.func @transform_1(%arg0: i32, %arg1: i32) -> (i32, i32) {
    %c0_i32 = arith.constant 0 : i32
    %c0_i32_0 = arith.constant 0 : i32
    %c0_i32_1 = arith.constant 0 : i32
    return %c0_i32, %c0_i32_0 : i32, i32
  }
  func.func @transform_2(%arg0: i32, %arg1: i32) -> (i32, i32) {
    %c0_i32 = arith.constant 0 : i32
    %c0_i32_0 = arith.constant 0 : i32
    %c0_i32_1 = arith.constant 0 : i32
    return %c0_i32, %c0_i32_0 : i32, i32
  }
  func.func @transform_3(%arg0: i32, %arg1: i32) -> (i32, i32, i32) {
    %c0_i32 = arith.constant 0 : i32
    %c0_i32_0 = arith.constant 0 : i32
    return %arg0, %c0_i32, %arg1 : i32, i32, i32
  }
}

module attributes {stable_mosaic.version = 11 : i64} {
  func.func @_max9_kernel(%arg0: i32, %arg1: memref<32x400xbf16, #tpu.memory_space<vmem>>, %arg2: memref<32x400xbf16, #tpu.memory_space<vmem>>, %arg3: memref<32x400xbf16, #tpu.memory_space<vmem>>, %arg4: memref<32x400xbf16, #tpu.memory_space<vmem>>, %arg5: memref<32x400xbf16, #tpu.memory_space<vmem>>, %arg6: memref<32x400xbf16, #tpu.memory_space<vmem>>, %arg7: memref<32x400xbf16, #tpu.memory_space<vmem>>, %arg8: memref<32x400xbf16, #tpu.memory_space<vmem>>, %arg9: memref<32x400xbf16, #tpu.memory_space<vmem>>, %arg10: memref<32x400xbf16, #tpu.memory_space<vmem>>) attributes {dimension_semantics = [#tpu.dimension_semantics<arbitrary>], iteration_bounds = array<i64: 1>, scalar_prefetch = 0 : i64, scratch_operands = 0 : i64, tpu.core_type = #tpu.core_type<tc>, window_params = [{pipeline_mode = #tpu.pipeline_mode<synchronous>, transform_indices = @transform_0, window_bounds = array<i64: 32, 400>}, {pipeline_mode = #tpu.pipeline_mode<synchronous>, transform_indices = @transform_1, window_bounds = array<i64: 32, 400>}, {pipeline_mode = #tpu.pipeline_mode<synchronous>, transform_indices = @transform_2, window_bounds = array<i64: 32, 400>}, {pipeline_mode = #tpu.pipeline_mode<synchronous>, transform_indices = @transform_3, window_bounds = array<i64: 32, 400>}, {pipeline_mode = #tpu.pipeline_mode<synchronous>, transform_indices = @transform_4, window_bounds = array<i64: 32, 400>}, {pipeline_mode = #tpu.pipeline_mode<synchronous>, transform_indices = @transform_5, window_bounds = array<i64: 32, 400>}, {pipeline_mode = #tpu.pipeline_mode<synchronous>, transform_indices = @transform_6, window_bounds = array<i64: 32, 400>}, {pipeline_mode = #tpu.pipeline_mode<synchronous>, transform_indices = @transform_7, window_bounds = array<i64: 32, 400>}, {pipeline_mode = #tpu.pipeline_mode<synchronous>, transform_indices = @transform_8, window_bounds = array<i64: 32, 400>}, {pipeline_mode = #tpu.pipeline_mode<synchronous>, transform_indices = @transform_9, window_bounds = array<i64: 32, 400>}]} {
    %c0 = arith.constant 0 : index
    %c0_0 = arith.constant 0 : index
    %0 = vector.load %arg1[%c0, %c0_0] : memref<32x400xbf16, #tpu.memory_space<vmem>>, vector<32x400xbf16>
    %c0_1 = arith.constant 0 : index
    %c0_2 = arith.constant 0 : index
    %1 = vector.load %arg2[%c0_1, %c0_2] : memref<32x400xbf16, #tpu.memory_space<vmem>>, vector<32x400xbf16>
    %2 = arith.maximumf %0, %1 : vector<32x400xbf16>
    %c0_3 = arith.constant 0 : index
    %c0_4 = arith.constant 0 : index
    %3 = vector.load %arg3[%c0_3, %c0_4] : memref<32x400xbf16, #tpu.memory_space<vmem>>, vector<32x400xbf16>
    %4 = arith.maximumf %2, %3 : vector<32x400xbf16>
    %c0_5 = arith.constant 0 : index
    %c0_6 = arith.constant 0 : index
    %5 = vector.load %arg4[%c0_5, %c0_6] : memref<32x400xbf16, #tpu.memory_space<vmem>>, vector<32x400xbf16>
    %6 = arith.maximumf %4, %5 : vector<32x400xbf16>
    %c0_7 = arith.constant 0 : index
    %c0_8 = arith.constant 0 : index
    %7 = vector.load %arg5[%c0_7, %c0_8] : memref<32x400xbf16, #tpu.memory_space<vmem>>, vector<32x400xbf16>
    %8 = arith.maximumf %6, %7 : vector<32x400xbf16>
    %c0_9 = arith.constant 0 : index
    %c0_10 = arith.constant 0 : index
    %9 = vector.load %arg6[%c0_9, %c0_10] : memref<32x400xbf16, #tpu.memory_space<vmem>>, vector<32x400xbf16>
    %10 = arith.maximumf %8, %9 : vector<32x400xbf16>
    %c0_11 = arith.constant 0 : index
    %c0_12 = arith.constant 0 : index
    %11 = vector.load %arg7[%c0_11, %c0_12] : memref<32x400xbf16, #tpu.memory_space<vmem>>, vector<32x400xbf16>
    %12 = arith.maximumf %10, %11 : vector<32x400xbf16>
    %c0_13 = arith.constant 0 : index
    %c0_14 = arith.constant 0 : index
    %13 = vector.load %arg8[%c0_13, %c0_14] : memref<32x400xbf16, #tpu.memory_space<vmem>>, vector<32x400xbf16>
    %14 = arith.maximumf %12, %13 : vector<32x400xbf16>
    %c0_15 = arith.constant 0 : index
    %c0_16 = arith.constant 0 : index
    %15 = vector.load %arg9[%c0_15, %c0_16] : memref<32x400xbf16, #tpu.memory_space<vmem>>, vector<32x400xbf16>
    %16 = arith.maximumf %14, %15 : vector<32x400xbf16>
    %c0_17 = arith.constant 0 : index
    %c0_18 = arith.constant 0 : index
    %17 = vector.load %arg10[%c0_17, %c0_18] : memref<32x400xbf16, #tpu.memory_space<vmem>>, vector<32x400xbf16>
    tpu.vector_store %arg10[%c0_17, %c0_18], %16 {strides = array<i32>} : memref<32x400xbf16, #tpu.memory_space<vmem>>, vector<32x400xbf16>,
    return
  }
  func.func @transform_0(%arg0: i32) -> (i32, i32) {
    %c0_i32 = arith.constant 0 : i32
    %c0_i32_0 = arith.constant 0 : i32
    %c0_i32_1 = arith.constant 0 : i32
    return %c0_i32, %c0_i32_0 : i32, i32
  }
  func.func @transform_1(%arg0: i32) -> (i32, i32) {
    %c0_i32 = arith.constant 0 : i32
    %c0_i32_0 = arith.constant 0 : i32
    %c0_i32_1 = arith.constant 0 : i32
    return %c0_i32, %c0_i32_0 : i32, i32
  }
  func.func @transform_2(%arg0: i32) -> (i32, i32) {
    %c0_i32 = arith.constant 0 : i32
    %c0_i32_0 = arith.constant 0 : i32
    %c0_i32_1 = arith.constant 0 : i32
    return %c0_i32, %c0_i32_0 : i32, i32
  }
  func.func @transform_3(%arg0: i32) -> (i32, i32) {
    %c0_i32 = arith.constant 0 : i32
    %c0_i32_0 = arith.constant 0 : i32
    %c0_i32_1 = arith.constant 0 : i32
    return %c0_i32, %c0_i32_0 : i32, i32
  }
  func.func @transform_4(%arg0: i32) -> (i32, i32) {
    %c0_i32 = arith.constant 0 : i32
    %c0_i32_0 = arith.constant 0 : i32
    %c0_i32_1 = arith.constant 0 : i32
    return %c0_i32, %c0_i32_0 : i32, i32
  }
  func.func @transform_5(%arg0: i32) -> (i32, i32) {
    %c0_i32 = arith.constant 0 : i32
    %c0_i32_0 = arith.constant 0 : i32
    %c0_i32_1 = arith.constant 0 : i32
    return %c0_i32, %c0_i32_0 : i32, i32
  }
  func.func @transform_6(%arg0: i32) -> (i32, i32) {
    %c0_i32 = arith.constant 0 : i32
    %c0_i32_0 = arith.constant 0 : i32
    %c0_i32_1 = arith.constant 0 : i32
    return %c0_i32, %c0_i32_0 : i32, i32
  }
  func.func @transform_7(%arg0: i32) -> (i32, i32) {
    %c0_i32 = arith.constant 0 : i32
    %c0_i32_0 = arith.constant 0 : i32
    %c0_i32_1 = arith.constant 0 : i32
    return %c0_i32, %c0_i32_0 : i32, i32
  }
  func.func @transform_8(%arg0: i32) -> (i32, i32) {
    %c0_i32 = arith.constant 0 : i32
    %c0_i32_0 = arith.constant 0 : i32
    %c0_i32_1 = arith.constant 0 : i32
    return %c0_i32, %c0_i32_0 : i32, i32
  }
  func.func @transform_9(%arg0: i32) -> (i32, i32) {
    %c0_i32 = arith.constant 0 : i32
    %c0_i32_0 = arith.constant 0 : i32
    %c0_i32_1 = arith.constant 0 : i32
    return %c0_i32, %c0_i32_0 : i32, i32
  }
}

module attributes {stable_mosaic.version = 11 : i64} {
  func.func @_conv_gemm_kernel(%arg0: i32, %arg1: i32, %arg2: memref<1x144x324xbf16, #tpu.memory_space<vmem>>, %arg3: memref<32x144xbf16, #tpu.memory_space<vmem>>, %arg4: memref<32x1xf32, #tpu.memory_space<vmem>>, %arg5: memref<1x32x324xbf16, #tpu.memory_space<vmem>>) attributes {dimension_semantics = [#tpu.dimension_semantics<parallel>, #tpu.dimension_semantics<parallel>], iteration_bounds = array<i64: 2, 1>, scalar_prefetch = 0 : i64, scratch_operands = 0 : i64, tpu.core_type = #tpu.core_type<tc>, window_params = [{transform_indices = @transform_0, window_bounds = array<i64: 1, 144, 324>}, {pipeline_mode = #tpu.pipeline_mode<synchronous>, transform_indices = @transform_1, window_bounds = array<i64: 32, 144>}, {pipeline_mode = #tpu.pipeline_mode<synchronous>, transform_indices = @transform_2, window_bounds = array<i64: 32, 1>}, {transform_indices = @transform_3, window_bounds = array<i64: 1, 32, 324>}]} {
    %c0 = arith.constant 0 : index
    %c0_0 = arith.constant 0 : index
    %0 = vector.load %arg3[%c0, %c0_0] : memref<32x144xbf16, #tpu.memory_space<vmem>>, vector<32x144xbf16>
    %c0_1 = arith.constant 0 : index
    %c0_2 = arith.constant 0 : index
    %c0_3 = arith.constant 0 : index
    %1 = vector.load %arg2[%c0_1, %c0_2, %c0_3] : memref<1x144x324xbf16, #tpu.memory_space<vmem>>, vector<1x144x324xbf16>
    %2 = vector.shape_cast %1 : vector<1x144x324xbf16> to vector<144x324xbf16>
    %cst = arith.constant dense<0.000000e+00> : vector<32x324xf32>
    %3 = tpu.matmul %0, %2, %cst {dimension_numbers = #tpu.dot_dimension_numbers<[1], [0], [0], [1], [0, 0, 1, 1], [], []>} : vector<32x144xbf16>, vector<144x324xbf16>, vector<32x324xf32> -> vector<32x324xf32>
    %c0_4 = arith.constant 0 : index
    %c0_5 = arith.constant 0 : index
    %4 = vector.load %arg4[%c0_4, %c0_5] : memref<32x1xf32, #tpu.memory_space<vmem>>, vector<32x1xf32>
    %5 = vector.broadcast %4 : vector<32x1xf32> to vector<32x324xf32>
    %6 = arith.addf %3, %5 : vector<32x324xf32>
    %cst_6 = arith.constant 0.000000e+00 : f32
    %7 = vector.broadcast %cst_6 : f32 to vector<32x324xf32>
    %8 = arith.maximumf %6, %7 : vector<32x324xf32>
    %9 = arith.truncf %8 : vector<32x324xf32> to vector<32x324xbf16>
    %c0_7 = arith.constant 0 : index
    %c0_8 = arith.constant 0 : index
    %c0_9 = arith.constant 0 : index
    %10 = vector.load %arg5[%c0_7, %c0_8, %c0_9] : memref<1x32x324xbf16, #tpu.memory_space<vmem>>, vector<1x32x324xbf16>
    %11 = vector.shape_cast %10 : vector<1x32x324xbf16> to vector<32x324xbf16>
    %12 = vector.shape_cast %9 : vector<32x324xbf16> to vector<1x32x324xbf16>
    tpu.vector_store %arg5[%c0_7, %c0_8, %c0_9], %12 {strides = array<i32>} : memref<1x32x324xbf16, #tpu.memory_space<vmem>>, vector<1x32x324xbf16>,
    return
  }
  func.func @transform_0(%arg0: i32, %arg1: i32) -> (i32, i32, i32) {
    %c0_i32 = arith.constant 0 : i32
    %c0_i32_0 = arith.constant 0 : i32
    return %arg0, %c0_i32, %arg1 : i32, i32, i32
  }
  func.func @transform_1(%arg0: i32, %arg1: i32) -> (i32, i32) {
    %c0_i32 = arith.constant 0 : i32
    %c0_i32_0 = arith.constant 0 : i32
    %c0_i32_1 = arith.constant 0 : i32
    return %c0_i32, %c0_i32_0 : i32, i32
  }
  func.func @transform_2(%arg0: i32, %arg1: i32) -> (i32, i32) {
    %c0_i32 = arith.constant 0 : i32
    %c0_i32_0 = arith.constant 0 : i32
    %c0_i32_1 = arith.constant 0 : i32
    return %c0_i32, %c0_i32_0 : i32, i32
  }
  func.func @transform_3(%arg0: i32, %arg1: i32) -> (i32, i32, i32) {
    %c0_i32 = arith.constant 0 : i32
    %c0_i32_0 = arith.constant 0 : i32
    return %arg0, %c0_i32, %arg1 : i32, i32, i32
  }
}

module attributes {stable_mosaic.version = 11 : i64} {
  func.func @_max9_kernel(%arg0: i32, %arg1: memref<64x36xbf16, #tpu.memory_space<vmem>>, %arg2: memref<64x36xbf16, #tpu.memory_space<vmem>>, %arg3: memref<64x36xbf16, #tpu.memory_space<vmem>>, %arg4: memref<64x36xbf16, #tpu.memory_space<vmem>>, %arg5: memref<64x36xbf16, #tpu.memory_space<vmem>>, %arg6: memref<64x36xbf16, #tpu.memory_space<vmem>>, %arg7: memref<64x36xbf16, #tpu.memory_space<vmem>>, %arg8: memref<64x36xbf16, #tpu.memory_space<vmem>>, %arg9: memref<64x36xbf16, #tpu.memory_space<vmem>>, %arg10: memref<64x36xbf16, #tpu.memory_space<vmem>>) attributes {dimension_semantics = [#tpu.dimension_semantics<arbitrary>], iteration_bounds = array<i64: 1>, scalar_prefetch = 0 : i64, scratch_operands = 0 : i64, tpu.core_type = #tpu.core_type<tc>, window_params = [{pipeline_mode = #tpu.pipeline_mode<synchronous>, transform_indices = @transform_0, window_bounds = array<i64: 64, 36>}, {pipeline_mode = #tpu.pipeline_mode<synchronous>, transform_indices = @transform_1, window_bounds = array<i64: 64, 36>}, {pipeline_mode = #tpu.pipeline_mode<synchronous>, transform_indices = @transform_2, window_bounds = array<i64: 64, 36>}, {pipeline_mode = #tpu.pipeline_mode<synchronous>, transform_indices = @transform_3, window_bounds = array<i64: 64, 36>}, {pipeline_mode = #tpu.pipeline_mode<synchronous>, transform_indices = @transform_4, window_bounds = array<i64: 64, 36>}, {pipeline_mode = #tpu.pipeline_mode<synchronous>, transform_indices = @transform_5, window_bounds = array<i64: 64, 36>}, {pipeline_mode = #tpu.pipeline_mode<synchronous>, transform_indices = @transform_6, window_bounds = array<i64: 64, 36>}, {pipeline_mode = #tpu.pipeline_mode<synchronous>, transform_indices = @transform_7, window_bounds = array<i64: 64, 36>}, {pipeline_mode = #tpu.pipeline_mode<synchronous>, transform_indices = @transform_8, window_bounds = array<i64: 64, 36>}, {pipeline_mode = #tpu.pipeline_mode<synchronous>, transform_indices = @transform_9, window_bounds = array<i64: 64, 36>}]} {
    %c0 = arith.constant 0 : index
    %c0_0 = arith.constant 0 : index
    %0 = vector.load %arg1[%c0, %c0_0] : memref<64x36xbf16, #tpu.memory_space<vmem>>, vector<64x36xbf16>
    %c0_1 = arith.constant 0 : index
    %c0_2 = arith.constant 0 : index
    %1 = vector.load %arg2[%c0_1, %c0_2] : memref<64x36xbf16, #tpu.memory_space<vmem>>, vector<64x36xbf16>
    %2 = arith.maximumf %0, %1 : vector<64x36xbf16>
    %c0_3 = arith.constant 0 : index
    %c0_4 = arith.constant 0 : index
    %3 = vector.load %arg3[%c0_3, %c0_4] : memref<64x36xbf16, #tpu.memory_space<vmem>>, vector<64x36xbf16>
    %4 = arith.maximumf %2, %3 : vector<64x36xbf16>
    %c0_5 = arith.constant 0 : index
    %c0_6 = arith.constant 0 : index
    %5 = vector.load %arg4[%c0_5, %c0_6] : memref<64x36xbf16, #tpu.memory_space<vmem>>, vector<64x36xbf16>
    %6 = arith.maximumf %4, %5 : vector<64x36xbf16>
    %c0_7 = arith.constant 0 : index
    %c0_8 = arith.constant 0 : index
    %7 = vector.load %arg5[%c0_7, %c0_8] : memref<64x36xbf16, #tpu.memory_space<vmem>>, vector<64x36xbf16>
    %8 = arith.maximumf %6, %7 : vector<64x36xbf16>
    %c0_9 = arith.constant 0 : index
    %c0_10 = arith.constant 0 : index
    %9 = vector.load %arg6[%c0_9, %c0_10] : memref<64x36xbf16, #tpu.memory_space<vmem>>, vector<64x36xbf16>
    %10 = arith.maximumf %8, %9 : vector<64x36xbf16>
    %c0_11 = arith.constant 0 : index
    %c0_12 = arith.constant 0 : index
    %11 = vector.load %arg7[%c0_11, %c0_12] : memref<64x36xbf16, #tpu.memory_space<vmem>>, vector<64x36xbf16>
    %12 = arith.maximumf %10, %11 : vector<64x36xbf16>
    %c0_13 = arith.constant 0 : index
    %c0_14 = arith.constant 0 : index
    %13 = vector.load %arg8[%c0_13, %c0_14] : memref<64x36xbf16, #tpu.memory_space<vmem>>, vector<64x36xbf16>
    %14 = arith.maximumf %12, %13 : vector<64x36xbf16>
    %c0_15 = arith.constant 0 : index
    %c0_16 = arith.constant 0 : index
    %15 = vector.load %arg9[%c0_15, %c0_16] : memref<64x36xbf16, #tpu.memory_space<vmem>>, vector<64x36xbf16>
    %16 = arith.maximumf %14, %15 : vector<64x36xbf16>
    %c0_17 = arith.constant 0 : index
    %c0_18 = arith.constant 0 : index
    %17 = vector.load %arg10[%c0_17, %c0_18] : memref<64x36xbf16, #tpu.memory_space<vmem>>, vector<64x36xbf16>
    tpu.vector_store %arg10[%c0_17, %c0_18], %16 {strides = array<i32>} : memref<64x36xbf16, #tpu.memory_space<vmem>>, vector<64x36xbf16>,
    return
  }
  func.func @transform_0(%arg0: i32) -> (i32, i32) {
    %c0_i32 = arith.constant 0 : i32
    %c0_i32_0 = arith.constant 0 : i32
    %c0_i32_1 = arith.constant 0 : i32
    return %c0_i32, %c0_i32_0 : i32, i32
  }
  func.func @transform_1(%arg0: i32) -> (i32, i32) {
    %c0_i32 = arith.constant 0 : i32
    %c0_i32_0 = arith.constant 0 : i32
    %c0_i32_1 = arith.constant 0 : i32
    return %c0_i32, %c0_i32_0 : i32, i32
  }
  func.func @transform_2(%arg0: i32) -> (i32, i32) {
    %c0_i32 = arith.constant 0 : i32
    %c0_i32_0 = arith.constant 0 : i32
    %c0_i32_1 = arith.constant 0 : i32
    return %c0_i32, %c0_i32_0 : i32, i32
  }
  func.func @transform_3(%arg0: i32) -> (i32, i32) {
    %c0_i32 = arith.constant 0 : i32
    %c0_i32_0 = arith.constant 0 : i32
    %c0_i32_1 = arith.constant 0 : i32
    return %c0_i32, %c0_i32_0 : i32, i32
  }
  func.func @transform_4(%arg0: i32) -> (i32, i32) {
    %c0_i32 = arith.constant 0 : i32
    %c0_i32_0 = arith.constant 0 : i32
    %c0_i32_1 = arith.constant 0 : i32
    return %c0_i32, %c0_i32_0 : i32, i32
  }
  func.func @transform_5(%arg0: i32) -> (i32, i32) {
    %c0_i32 = arith.constant 0 : i32
    %c0_i32_0 = arith.constant 0 : i32
    %c0_i32_1 = arith.constant 0 : i32
    return %c0_i32, %c0_i32_0 : i32, i32
  }
  func.func @transform_6(%arg0: i32) -> (i32, i32) {
    %c0_i32 = arith.constant 0 : i32
    %c0_i32_0 = arith.constant 0 : i32
    %c0_i32_1 = arith.constant 0 : i32
    return %c0_i32, %c0_i32_0 : i32, i32
  }
  func.func @transform_7(%arg0: i32) -> (i32, i32) {
    %c0_i32 = arith.constant 0 : i32
    %c0_i32_0 = arith.constant 0 : i32
    %c0_i32_1 = arith.constant 0 : i32
    return %c0_i32, %c0_i32_0 : i32, i32
  }
  func.func @transform_8(%arg0: i32) -> (i32, i32) {
    %c0_i32 = arith.constant 0 : i32
    %c0_i32_0 = arith.constant 0 : i32
    %c0_i32_1 = arith.constant 0 : i32
    return %c0_i32, %c0_i32_0 : i32, i32
  }
  func.func @transform_9(%arg0: i32) -> (i32, i32) {
    %c0_i32 = arith.constant 0 : i32
    %c0_i32_0 = arith.constant 0 : i32
    %c0_i32_1 = arith.constant 0 : i32
    return %c0_i32, %c0_i32_0 : i32, i32
  }
}

module attributes {stable_mosaic.version = 11 : i64} {
  func.func @_conv_gemm_kernel(%arg0: i32, %arg1: i32, %arg2: memref<1x288x16xbf16, #tpu.memory_space<vmem>>, %arg3: memref<64x288xbf16, #tpu.memory_space<vmem>>, %arg4: memref<64x1xf32, #tpu.memory_space<vmem>>, %arg5: memref<1x64x16xbf16, #tpu.memory_space<vmem>>) attributes {dimension_semantics = [#tpu.dimension_semantics<parallel>, #tpu.dimension_semantics<parallel>], iteration_bounds = array<i64: 2, 1>, scalar_prefetch = 0 : i64, scratch_operands = 0 : i64, tpu.core_type = #tpu.core_type<tc>, window_params = [{transform_indices = @transform_0, window_bounds = array<i64: 1, 288, 16>}, {pipeline_mode = #tpu.pipeline_mode<synchronous>, transform_indices = @transform_1, window_bounds = array<i64: 64, 288>}, {pipeline_mode = #tpu.pipeline_mode<synchronous>, transform_indices = @transform_2, window_bounds = array<i64: 64, 1>}, {transform_indices = @transform_3, window_bounds = array<i64: 1, 64, 16>}]} {
    %c0 = arith.constant 0 : index
    %c0_0 = arith.constant 0 : index
    %0 = vector.load %arg3[%c0, %c0_0] : memref<64x288xbf16, #tpu.memory_space<vmem>>, vector<64x288xbf16>
    %c0_1 = arith.constant 0 : index
    %c0_2 = arith.constant 0 : index
    %c0_3 = arith.constant 0 : index
    %1 = vector.load %arg2[%c0_1, %c0_2, %c0_3] : memref<1x288x16xbf16, #tpu.memory_space<vmem>>, vector<1x288x16xbf16>
    %2 = vector.shape_cast %1 : vector<1x288x16xbf16> to vector<288x16xbf16>
    %cst = arith.constant dense<0.000000e+00> : vector<64x16xf32>
    %3 = tpu.matmul %0, %2, %cst {dimension_numbers = #tpu.dot_dimension_numbers<[1], [0], [0], [1], [0, 0, 1, 1], [], []>} : vector<64x288xbf16>, vector<288x16xbf16>, vector<64x16xf32> -> vector<64x16xf32>
    %c0_4 = arith.constant 0 : index
    %c0_5 = arith.constant 0 : index
    %4 = vector.load %arg4[%c0_4, %c0_5] : memref<64x1xf32, #tpu.memory_space<vmem>>, vector<64x1xf32>
    %5 = vector.broadcast %4 : vector<64x1xf32> to vector<64x16xf32>
    %6 = arith.addf %3, %5 : vector<64x16xf32>
    %cst_6 = arith.constant 0.000000e+00 : f32
    %7 = vector.broadcast %cst_6 : f32 to vector<64x16xf32>
    %8 = arith.maximumf %6, %7 : vector<64x16xf32>
    %9 = arith.truncf %8 : vector<64x16xf32> to vector<64x16xbf16>
    %c0_7 = arith.constant 0 : index
    %c0_8 = arith.constant 0 : index
    %c0_9 = arith.constant 0 : index
    %10 = vector.load %arg5[%c0_7, %c0_8, %c0_9] : memref<1x64x16xbf16, #tpu.memory_space<vmem>>, vector<1x64x16xbf16>
    %11 = vector.shape_cast %10 : vector<1x64x16xbf16> to vector<64x16xbf16>
    %12 = vector.shape_cast %9 : vector<64x16xbf16> to vector<1x64x16xbf16>
    tpu.vector_store %arg5[%c0_7, %c0_8, %c0_9], %12 {strides = array<i32>} : memref<1x64x16xbf16, #tpu.memory_space<vmem>>, vector<1x64x16xbf16>,
    return
  }
  func.func @transform_0(%arg0: i32, %arg1: i32) -> (i32, i32, i32) {
    %c0_i32 = arith.constant 0 : i32
    %c0_i32_0 = arith.constant 0 : i32
    return %arg0, %c0_i32, %arg1 : i32, i32, i32
  }
  func.func @transform_1(%arg0: i32, %arg1: i32) -> (i32, i32) {
    %c0_i32 = arith.constant 0 : i32
    %c0_i32_0 = arith.constant 0 : i32
    %c0_i32_1 = arith.constant 0 : i32
    return %c0_i32, %c0_i32_0 : i32, i32
  }
  func.func @transform_2(%arg0: i32, %arg1: i32) -> (i32, i32) {
    %c0_i32 = arith.constant 0 : i32
    %c0_i32_0 = arith.constant 0 : i32
    %c0_i32_1 = arith.constant 0 : i32
    return %c0_i32, %c0_i32_0 : i32, i32
  }
  func.func @transform_3(%arg0: i32, %arg1: i32) -> (i32, i32, i32) {
    %c0_i32 = arith.constant 0 : i32
    %c0_i32_0 = arith.constant 0 : i32
    return %arg0, %c0_i32, %arg1 : i32, i32, i32
  }
}

module attributes {stable_mosaic.version = 11 : i64} {
  func.func @_fc_stack_kernel(%arg0: i32, %arg1: memref<2x1024xbf16, #tpu.memory_space<vmem>>, %arg2: memref<1024x256xbf16, #tpu.memory_space<vmem>>, %arg3: memref<1x256xf32, #tpu.memory_space<vmem>>, %arg4: memref<256x64xbf16, #tpu.memory_space<vmem>>, %arg5: memref<1x64xf32, #tpu.memory_space<vmem>>, %arg6: memref<64x16xbf16, #tpu.memory_space<vmem>>, %arg7: memref<1x16xf32, #tpu.memory_space<vmem>>, %arg8: memref<16x4xbf16, #tpu.memory_space<vmem>>, %arg9: memref<1x4xf32, #tpu.memory_space<vmem>>, %arg10: memref<4x1xbf16, #tpu.memory_space<vmem>>, %arg11: memref<1x1xf32, #tpu.memory_space<vmem>>, %arg12: memref<2x1xf32, #tpu.memory_space<vmem>>) attributes {dimension_semantics = [#tpu.dimension_semantics<arbitrary>], iteration_bounds = array<i64: 1>, scalar_prefetch = 0 : i64, scratch_operands = 0 : i64, tpu.core_type = #tpu.core_type<tc>, window_params = [{pipeline_mode = #tpu.pipeline_mode<synchronous>, transform_indices = @transform_0, window_bounds = array<i64: 2, 1024>}, {pipeline_mode = #tpu.pipeline_mode<synchronous>, transform_indices = @transform_1, window_bounds = array<i64: 1024, 256>}, {pipeline_mode = #tpu.pipeline_mode<synchronous>, transform_indices = @transform_2, window_bounds = array<i64: 1, 256>}, {pipeline_mode = #tpu.pipeline_mode<synchronous>, transform_indices = @transform_3, window_bounds = array<i64: 256, 64>}, {pipeline_mode = #tpu.pipeline_mode<synchronous>, transform_indices = @transform_4, window_bounds = array<i64: 1, 64>}, {pipeline_mode = #tpu.pipeline_mode<synchronous>, transform_indices = @transform_5, window_bounds = array<i64: 64, 16>}, {pipeline_mode = #tpu.pipeline_mode<synchronous>, transform_indices = @transform_6, window_bounds = array<i64: 1, 16>}, {pipeline_mode = #tpu.pipeline_mode<synchronous>, transform_indices = @transform_7, window_bounds = array<i64: 16, 4>}, {pipeline_mode = #tpu.pipeline_mode<synchronous>, transform_indices = @transform_8, window_bounds = array<i64: 1, 4>}, {pipeline_mode = #tpu.pipeline_mode<synchronous>, transform_indices = @transform_9, window_bounds = array<i64: 4, 1>}, {pipeline_mode = #tpu.pipeline_mode<synchronous>, transform_indices = @transform_10, window_bounds = array<i64: 1, 1>}, {pipeline_mode = #tpu.pipeline_mode<synchronous>, transform_indices = @transform_11, window_bounds = array<i64: 2, 1>}]} {
    %c0 = arith.constant 0 : index
    %c0_0 = arith.constant 0 : index
    %0 = vector.load %arg1[%c0, %c0_0] : memref<2x1024xbf16, #tpu.memory_space<vmem>>, vector<2x1024xbf16>
    %c0_1 = arith.constant 0 : index
    %c0_2 = arith.constant 0 : index
    %1 = vector.load %arg2[%c0_1, %c0_2] : memref<1024x256xbf16, #tpu.memory_space<vmem>>, vector<1024x256xbf16>
    %cst = arith.constant dense<0.000000e+00> : vector<2x256xf32>
    %2 = tpu.matmul %0, %1, %cst {dimension_numbers = #tpu.dot_dimension_numbers<[1], [0], [0], [1], [0, 0, 1, 1], [], []>} : vector<2x1024xbf16>, vector<1024x256xbf16>, vector<2x256xf32> -> vector<2x256xf32>
    %c0_3 = arith.constant 0 : index
    %c0_4 = arith.constant 0 : index
    %3 = vector.load %arg3[%c0_3, %c0_4] : memref<1x256xf32, #tpu.memory_space<vmem>>, vector<1x256xf32>
    %4 = vector.broadcast %3 : vector<1x256xf32> to vector<2x256xf32>
    %5 = arith.addf %2, %4 : vector<2x256xf32>
    %cst_5 = arith.constant 0.000000e+00 : f32
    %6 = vector.broadcast %cst_5 : f32 to vector<2x256xf32>
    %7 = arith.maximumf %5, %6 : vector<2x256xf32>
    %8 = arith.truncf %7 : vector<2x256xf32> to vector<2x256xbf16>
    %c0_6 = arith.constant 0 : index
    %c0_7 = arith.constant 0 : index
    %9 = vector.load %arg4[%c0_6, %c0_7] : memref<256x64xbf16, #tpu.memory_space<vmem>>, vector<256x64xbf16>
    %cst_8 = arith.constant dense<0.000000e+00> : vector<2x64xf32>
    %10 = tpu.matmul %8, %9, %cst_8 {dimension_numbers = #tpu.dot_dimension_numbers<[1], [0], [0], [1], [0, 0, 1, 1], [], []>} : vector<2x256xbf16>, vector<256x64xbf16>, vector<2x64xf32> -> vector<2x64xf32>
    %c0_9 = arith.constant 0 : index
    %c0_10 = arith.constant 0 : index
    %11 = vector.load %arg5[%c0_9, %c0_10] : memref<1x64xf32, #tpu.memory_space<vmem>>, vector<1x64xf32>
    %12 = vector.broadcast %11 : vector<1x64xf32> to vector<2x64xf32>
    %13 = arith.addf %10, %12 : vector<2x64xf32>
    %cst_11 = arith.constant 0.000000e+00 : f32
    %14 = vector.broadcast %cst_11 : f32 to vector<2x64xf32>
    %15 = arith.maximumf %13, %14 : vector<2x64xf32>
    %16 = arith.truncf %15 : vector<2x64xf32> to vector<2x64xbf16>
    %c0_12 = arith.constant 0 : index
    %c0_13 = arith.constant 0 : index
    %17 = vector.load %arg6[%c0_12, %c0_13] : memref<64x16xbf16, #tpu.memory_space<vmem>>, vector<64x16xbf16>
    %cst_14 = arith.constant dense<0.000000e+00> : vector<2x16xf32>
    %18 = tpu.matmul %16, %17, %cst_14 {dimension_numbers = #tpu.dot_dimension_numbers<[1], [0], [0], [1], [0, 0, 1, 1], [], []>} : vector<2x64xbf16>, vector<64x16xbf16>, vector<2x16xf32> -> vector<2x16xf32>
    %c0_15 = arith.constant 0 : index
    %c0_16 = arith.constant 0 : index
    %19 = vector.load %arg7[%c0_15, %c0_16] : memref<1x16xf32, #tpu.memory_space<vmem>>, vector<1x16xf32>
    %20 = vector.broadcast %19 : vector<1x16xf32> to vector<2x16xf32>
    %21 = arith.addf %18, %20 : vector<2x16xf32>
    %cst_17 = arith.constant 0.000000e+00 : f32
    %22 = vector.broadcast %cst_17 : f32 to vector<2x16xf32>
    %23 = arith.maximumf %21, %22 : vector<2x16xf32>
    %24 = arith.truncf %23 : vector<2x16xf32> to vector<2x16xbf16>
    %c0_18 = arith.constant 0 : index
    %c0_19 = arith.constant 0 : index
    %25 = vector.load %arg8[%c0_18, %c0_19] : memref<16x4xbf16, #tpu.memory_space<vmem>>, vector<16x4xbf16>
    %cst_20 = arith.constant dense<0.000000e+00> : vector<2x4xf32>
    %26 = tpu.matmul %24, %25, %cst_20 {dimension_numbers = #tpu.dot_dimension_numbers<[1], [0], [0], [1], [0, 0, 1, 1], [], []>} : vector<2x16xbf16>, vector<16x4xbf16>, vector<2x4xf32> -> vector<2x4xf32>
    %c0_21 = arith.constant 0 : index
    %c0_22 = arith.constant 0 : index
    %27 = vector.load %arg9[%c0_21, %c0_22] : memref<1x4xf32, #tpu.memory_space<vmem>>, vector<1x4xf32>
    %28 = vector.broadcast %27 : vector<1x4xf32> to vector<2x4xf32>
    %29 = arith.addf %26, %28 : vector<2x4xf32>
    %cst_23 = arith.constant 0.000000e+00 : f32
    %30 = vector.broadcast %cst_23 : f32 to vector<2x4xf32>
    %31 = arith.maximumf %29, %30 : vector<2x4xf32>
    %32 = arith.truncf %31 : vector<2x4xf32> to vector<2x4xbf16>
    %c0_24 = arith.constant 0 : index
    %c0_25 = arith.constant 0 : index
    %33 = vector.load %arg10[%c0_24, %c0_25] : memref<4x1xbf16, #tpu.memory_space<vmem>>, vector<4x1xbf16>
    %cst_26 = arith.constant dense<0.000000e+00> : vector<2x1xf32>
    %34 = tpu.matmul %32, %33, %cst_26 {dimension_numbers = #tpu.dot_dimension_numbers<[1], [0], [0], [1], [0, 0, 1, 1], [], []>} : vector<2x4xbf16>, vector<4x1xbf16>, vector<2x1xf32> -> vector<2x1xf32>
    %c0_27 = arith.constant 0 : index
    %c0_28 = arith.constant 0 : index
    %35 = vector.load %arg11[%c0_27, %c0_28] : memref<1x1xf32, #tpu.memory_space<vmem>>, vector<1x1xf32>
    %36 = vector.broadcast %35 : vector<1x1xf32> to vector<2x1xf32>
    %37 = arith.addf %34, %36 : vector<2x1xf32>
    %cst_29 = arith.constant 0.000000e+00 : f32
    %38 = vector.broadcast %cst_29 : f32 to vector<2x1xf32>
    %39 = arith.subf %38, %37 : vector<2x1xf32>
    %40 = math.exp %39 : vector<2x1xf32>
    %cst_30 = arith.constant 1.000000e+00 : f32
    %41 = vector.broadcast %cst_30 : f32 to vector<2x1xf32>
    %42 = arith.addf %41, %40 : vector<2x1xf32>
    %cst_31 = arith.constant 1.000000e+00 : f32
    %43 = vector.broadcast %cst_31 : f32 to vector<2x1xf32>
    %44 = arith.divf %43, %42 : vector<2x1xf32>
    %c0_32 = arith.constant 0 : index
    %c0_33 = arith.constant 0 : index
    %45 = vector.load %arg12[%c0_32, %c0_33] : memref<2x1xf32, #tpu.memory_space<vmem>>, vector<2x1xf32>
    tpu.vector_store %arg12[%c0_32, %c0_33], %44 {strides = array<i32>} : memref<2x1xf32, #tpu.memory_space<vmem>>, vector<2x1xf32>,
    return
  }
  func.func @transform_0(%arg0: i32) -> (i32, i32) {
    %c0_i32 = arith.constant 0 : i32
    %c0_i32_0 = arith.constant 0 : i32
    %c0_i32_1 = arith.constant 0 : i32
    return %c0_i32, %c0_i32_0 : i32, i32
  }
  func.func @transform_1(%arg0: i32) -> (i32, i32) {
    %c0_i32 = arith.constant 0 : i32
    %c0_i32_0 = arith.constant 0 : i32
    %c0_i32_1 = arith.constant 0 : i32
    return %c0_i32, %c0_i32_0 : i32, i32
  }
  func.func @transform_2(%arg0: i32) -> (i32, i32) {
    %c0_i32 = arith.constant 0 : i32
    %c0_i32_0 = arith.constant 0 : i32
    %c0_i32_1 = arith.constant 0 : i32
    return %c0_i32, %c0_i32_0 : i32, i32
  }
  func.func @transform_3(%arg0: i32) -> (i32, i32) {
    %c0_i32 = arith.constant 0 : i32
    %c0_i32_0 = arith.constant 0 : i32
    %c0_i32_1 = arith.constant 0 : i32
    return %c0_i32, %c0_i32_0 : i32, i32
  }
  func.func @transform_4(%arg0: i32) -> (i32, i32) {
    %c0_i32 = arith.constant 0 : i32
    %c0_i32_0 = arith.constant 0 : i32
    %c0_i32_1 = arith.constant 0 : i32
    return %c0_i32, %c0_i32_0 : i32, i32
  }
  func.func @transform_5(%arg0: i32) -> (i32, i32) {
    %c0_i32 = arith.constant 0 : i32
    %c0_i32_0 = arith.constant 0 : i32
    %c0_i32_1 = arith.constant 0 : i32
    return %c0_i32, %c0_i32_0 : i32, i32
  }
  func.func @transform_6(%arg0: i32) -> (i32, i32) {
    %c0_i32 = arith.constant 0 : i32
    %c0_i32_0 = arith.constant 0 : i32
    %c0_i32_1 = arith.constant 0 : i32
    return %c0_i32, %c0_i32_0 : i32, i32
  }
  func.func @transform_7(%arg0: i32) -> (i32, i32) {
    %c0_i32 = arith.constant 0 : i32
    %c0_i32_0 = arith.constant 0 : i32
    %c0_i32_1 = arith.constant 0 : i32
    return %c0_i32, %c0_i32_0 : i32, i32
  }
  func.func @transform_8(%arg0: i32) -> (i32, i32) {
    %c0_i32 = arith.constant 0 : i32
    %c0_i32_0 = arith.constant 0 : i32
    %c0_i32_1 = arith.constant 0 : i32
    return %c0_i32, %c0_i32_0 : i32, i32
  }
  func.func @transform_9(%arg0: i32) -> (i32, i32) {
    %c0_i32 = arith.constant 0 : i32
    %c0_i32_0 = arith.constant 0 : i32
    %c0_i32_1 = arith.constant 0 : i32
    return %c0_i32, %c0_i32_0 : i32, i32
  }
  func.func @transform_10(%arg0: i32) -> (i32, i32) {
    %c0_i32 = arith.constant 0 : i32
    %c0_i32_0 = arith.constant 0 : i32
    %c0_i32_1 = arith.constant 0 : i32
    return %c0_i32, %c0_i32_0 : i32, i32
  }
  func.func @transform_11(%arg0: i32) -> (i32, i32) {
    %c0_i32 = arith.constant 0 : i32
    %c0_i32_0 = arith.constant 0 : i32
    %c0_i32_1 = arith.constant 0 : i32
    return %c0_i32, %c0_i32_0 : i32, i32
  }
}

</mosaic_0001>

<bundles_post_ra>
// kernel: net_forward.8
= control target key start
LH: loop header
LB: loop body
LE: loop exit
PB: predicated region body
PF: predicated region fallthrough
CT: control target
= control target key end

     0   :  { %s2756_s12 = smov 0   ;;  %s2758_s13 = smov 0   ;;  %s3414_s0 = inlined_call_operand.vmem [shape: bf16[2,25,36864], index: 0, kind: input, shape index: {}]   ;;  %s3415_s1 = inlined_call_operand.vmem [shape: bf16[6,25], index: 1, kind: input, shape index: {}]   ;;  %s3416_s2 = inlined_call_operand.vmem [shape: f32[6,1], index: 2, kind: input, shape index: {}]   ;;  %s3417_s3 = inlined_call_operand.vmem [shape: bf16[2,6,36864], index: 3, kind: output, shape index: {}]  }
   0x1   :  { %s2760_s14 = smov 0   ;;  %s2762_s15 = smov 0  }
   0x2   :  { %s2764_s16 = smov 0   ;;  %s2766_s17 = smov 0  }
   0x3   :  { %s2768_s18 = smov 0  }
   0x4 LB: > { %s22_s19 = sadd.s32 1, %s2724_s16  ;;  %s25_s20 = sadd.s32 1, %s2728_s17  ;;  %s2732_s18 = sphi %s2768_s18, %s13_s18   ;;  %s2728_s17 = sphi %s2766_s17, %s3423_s17   ;;  %s2724_s16 = sphi %s2764_s16, %s3422_s16   ;;  %s2720_s15 = sphi %s2762_s15, %s3421_s15   ;;  %s2716_s14 = sphi %s2760_s14, %s3420_s14   ;;  %s2712_s13 = sphi %s2758_s13, %s3419_s13   ;;  %s2708_s12 = sphi %s2756_s12, %s3418_s12  }
   0x5   : > { %p23_p0 = scmp.ge.s32.totalorder %s22_s19, 6  ;;  %p41_p1 = scmp.ne.s32.totalorder %s2712_s13, %s2708_s12 }
   0x6   : > { %p42_p2 = scmp.eq.s32.totalorder %s2732_s18, 0  ;;  %s34_s24 = sadd.s32 1, %s2712_s13 }
   0x7   : > { %s3425_s19 = smov (%p23_p0, %s22_s19), 0  ;;  %s3427_s20 = smov (!%p23_p0, %s25_s20), %s2728_s17 }
   0x8   : > { %p43_p3 = por %p42_p2, %p41_p1  ;;  %p27_p4 = scmp.ge.s32.totalorder %s3427_s20, 2 }
   0x9   : > { %s30_s21 = ssub.s32 %s2724_s16, %s3425_s19  ;;  %p2441_p6 = scmp.ge.s32.totalorder %s2732_s18, 12 }
   0xa   : > { %s3429_s20 = smov (%p27_p4, %s3427_s20), 0 }
   0xb   : > { %s29_s22 = ssub.s32 %s2728_s17, %s3429_s20  ;;  %143 = sbr.rel (%p2441_p6) target bundleno = 73 (0x49), region = 24 }
   0xc   : > { %s31_s23 = sor.u32 %s30_s21, %s29_s22 }
   0xd   : > { %p32_p5 = scmp.eq.s32.totalorder %s31_s23, 0 }
   0xf   : > { %s2807_s25 = scalar_select %p32_p5, %s2712_s13, %s34_s24  }
  0x10   : > { %146 = sbr.rel (!%p43_p3) target bundleno = 73 (0x49), region = 28  ;;  %s148_s26 = sand.u32 (%p43_p3), 1, %s2712_s13  }
  0x11   : > { %s151_s27 = smul.u32 (%p43_p3), 48, %s2724_s16 }
  0x12   : > { %s2615_s28 = smul.u32 (%p43_p3), 768, %s148_s26 }
  0x13   : > { %s2616_s29 = smul.u32 (%p43_p3), 1152, %s2728_s17 }
  0x14   : > { %s2821_s8 = scalar_lea.vmem (%p43_p3), [#allocation2], %s2615_s28 }
  0x15   : > { %s153_s30 = sadd.s32 %s2616_s29, %s151_s27 }
  0x16   : > { %s2442_s4 = sshll.u32 %s153_s30, 2 }
  0x17   : > { %s2816_s7 = scalar_lea.vmem %s3414_s0, %s2442_s4 }
  0x18   : > { %v168_v0 = vld [vmem:[%s2816_s7] sm:$0xff]  ;;  %v170_v1 = vld [vmem:[%s2816_s7 + $0x8] sm:$0xff]  ;;  %v172_v2 = vld [vmem:[%s2816_s7 + $0x10] sm:$0xff] }
  0x19   : > { %169 = vst [vmem:[%s2821_s8] sm:$0xff] %v168_v0  ;;  %171 = vst [vmem:[%s2821_s8 + $0x8] sm:$0xff] %v170_v1  ;;  %v174_v3 = vld [vmem:[%s2816_s7 + $0x18] sm:$0xff]  ;;  %v176_v4 = vld [vmem:[%s2816_s7 + $0x20] sm:$0xff] }
  0x1a   : > { %173 = vst [vmem:[%s2821_s8 + $0x10] sm:$0xff] %v172_v2  ;;  %v178_v5 = vld [vmem:[%s2816_s7 + $0x28] sm:$0xff]  ;;  %175 = vst [vmem:[%s2821_s8 + $0x18] sm:$0xff] %v174_v3  ;;  %v180_v6 = vld [vmem:[%s2816_s7 + $0x30] sm:$0xff] }
  0x1b   : > { %177 = vst [vmem:[%s2821_s8 + $0x20] sm:$0xff] %v176_v4  ;;  %179 = vst [vmem:[%s2821_s8 + $0x28] sm:$0xff] %v178_v5  ;;  %v182_v7 = vld [vmem:[%s2816_s7 + $0x38] sm:$0xff]  ;;  %v184_v8 = vld [vmem:[%s2816_s7 + $0x40] sm:$0xff] }
  0x1c   : > { %181 = vst [vmem:[%s2821_s8 + $0x30] sm:$0xff] %v180_v6  ;;  %183 = vst [vmem:[%s2821_s8 + $0x38] sm:$0xff] %v182_v7  ;;  %v186_v9 = vld [vmem:[%s2816_s7 + $0x48] sm:$0xff]  ;;  %v188_v10 = vld [vmem:[%s2816_s7 + $0x50] sm:$0xff] }
  0x1d   : > { %185 = vst [vmem:[%s2821_s8 + $0x40] sm:$0xff] %v184_v8  ;;  %v190_v11 = vld [vmem:[%s2816_s7 + $0x58] sm:$0xff]  ;;  %187 = vst [vmem:[%s2821_s8 + $0x48] sm:$0xff] %v186_v9  ;;  %v192_v12 = vld [vmem:[%s2816_s7 + $0x60] sm:$0xff] }
  0x1e   : > { %189 = vst [vmem:[%s2821_s8 + $0x50] sm:$0xff] %v188_v10  ;;  %191 = vst [vmem:[%s2821_s8 + $0x58] sm:$0xff] %v190_v11  ;;  %v194_v13 = vld [vmem:[%s2816_s7 + $0x68] sm:$0xff]  ;;  %v196_v14 = vld [vmem:[%s2816_s7 + $0x70] sm:$0xff] }
  0x1f   : > { %193 = vst [vmem:[%s2821_s8 + $0x60] sm:$0xff] %v192_v12  ;;  %195 = vst [vmem:[%s2821_s8 + $0x68] sm:$0xff] %v194_v13  ;;  %v198_v15 = vld [vmem:[%s2816_s7 + $0x78] sm:$0xff]  ;;  %v200_v16 = vld [vmem:[%s2816_s7 + $0x80] sm:$0xff] }
  0x20   : > { %197 = vst [vmem:[%s2821_s8 + $0x70] sm:$0xff] %v196_v14  ;;  %v202_v17 = vld [vmem:[%s2816_s7 + $0x88] sm:$0xff]  ;;  %199 = vst [vmem:[%s2821_s8 + $0x78] sm:$0xff] %v198_v15  ;;  %v204_v18 = vld [vmem:[%s2816_s7 + $0x90] sm:$0xff] }
  0x21   : > { %201 = vst [vmem:[%s2821_s8 + $0x80] sm:$0xff] %v200_v16  ;;  %203 = vst [vmem:[%s2821_s8 + $0x88] sm:$0xff] %v202_v17  ;;  %v206_v19 = vld [vmem:[%s2816_s7 + $0x98] sm:$0xff]  ;;  %v208_v20 = vld [vmem:[%s2816_s7 + $0xa0] sm:$0xff] }
  0x22   : > { %205 = vst [vmem:[%s2821_s8 + $0x90] sm:$0xff] %v204_v18  ;;  %207 = vst [vmem:[%s2821_s8 + $0x98] sm:$0xff] %v206_v19  ;;  %v210_v21 = vld [vmem:[%s2816_s7 + $0xa8] sm:$0xff]  ;;  %v212_v22 = vld [vmem:[%s2816_s7 + $0xb0] sm:$0xff] }
  0x23   : > { %209 = vst [vmem:[%s2821_s8 + $0xa0] sm:$0xff] %v208_v20  ;;  %v214_v23 = vld [vmem:[%s2816_s7 + $0xb8] sm:$0xff]  ;;  %211 = vst [vmem:[%s2821_s8 + $0xa8] sm:$0xff] %v210_v21  ;;  %v216_v24 = vld [vmem:[%s2816_s7 + $0x480] sm:$0xff] }
  0x24   : > { %213 = vst [vmem:[%s2821_s8 + $0xb0] sm:$0xff] %v212_v22  ;;  %215 = vst [vmem:[%s2821_s8 + $0xb8] sm:$0xff] %v214_v23  ;;  %v218_v25 = vld [vmem:[%s2816_s7 + $0x488] sm:$0xff]  ;;  %v220_v26 = vld [vmem:[%s2816_s7 + $0x490] sm:$0xff] }
  0x25   : > { %217 = vst [vmem:[%s2821_s8 + $0xc0] sm:$0xff] %v216_v24  ;;  %219 = vst [vmem:[%s2821_s8 + $0xc8] sm:$0xff] %v218_v25  ;;  %v222_v27 = vld [vmem:[%s2816_s7 + $0x498] sm:$0xff]  ;;  %v224_v28 = vld [vmem:[%s2816_s7 + $0x4a0] sm:$0xff] }
  0x26   : > { %221 = vst [vmem:[%s2821_s8 + $0xd0] sm:$0xff] %v220_v26  ;;  %v226_v29 = vld [vmem:[%s2816_s7 + $0x4a8] sm:$0xff]  ;;  %223 = vst [vmem:[%s2821_s8 + $0xd8] sm:$0xff] %v222_v27  ;;  %v228_v30 = vld [vmem:[%s2816_s7 + $0x4b0] sm:$0xff] }
  0x27   : > { %225 = vst [vmem:[%s2821_s8 + $0xe0] sm:$0xff] %v224_v28  ;;  %227 = vst [vmem:[%s2821_s8 + $0xe8] sm:$0xff] %v226_v29  ;;  %v230_v31 = vld [vmem:[%s2816_s7 + $0x4b8] sm:$0xff]  ;;  %v232_v32 = vld [vmem:[%s2816_s7 + $0x4c0] sm:$0xff] }
  0x28   : > { %229 = vst [vmem:[%s2821_s8 + $0xf0] sm:$0xff] %v228_v30  ;;  %231 = vst [vmem:[%s2821_s8 + $0xf8] sm:$0xff] %v230_v31  ;;  %v234_v33 = vld [vmem:[%s2816_s7 + $0x4c8] sm:$0xff]  ;;  %v236_v34 = vld [vmem:[%s2816_s7 + $0x4d0] sm:$0xff] }
  0x29   : > { %233 = vst [vmem:[%s2821_s8 + $0x100] sm:$0xff] %v232_v32  ;;  %v238_v35 = vld [vmem:[%s2816_s7 + $0x4d8] sm:$0xff]  ;;  %235 = vst [vmem:[%s2821_s8 + $0x108] sm:$0xff] %v234_v33  ;;  %v240_v36 = vld [vmem:[%s2816_s7 + $0x4e0] sm:$0xff] }
  0x2a   : > { %237 = vst [vmem:[%s2821_s8 + $0x110] sm:$0xff] %v236_v34  ;;  %239 = vst [vmem:[%s2821_s8 + $0x118] sm:$0xff] %v238_v35  ;;  %v242_v37 = vld [vmem:[%s2816_s7 + $0x4e8] sm:$0xff]  ;;  %v244_v38 = vld [vmem:[%s2816_s7 + $0x4f0] sm:$0xff] }
  0x2b   : > { %241 = vst [vmem:[%s2821_s8 + $0x120] sm:$0xff] %v240_v36  ;;  %243 = vst [vmem:[%s2821_s8 + $0x128] sm:$0xff] %v242_v37  ;;  %v246_v39 = vld [vmem:[%s2816_s7 + $0x4f8] sm:$0xff]  ;;  %v248_v40 = vld [vmem:[%s2816_s7 + $0x500] sm:$0xff] }
  0x2c   : > { %245 = vst [vmem:[%s2821_s8 + $0x130] sm:$0xff] %v244_v38  ;;  %v250_v41 = vld [vmem:[%s2816_s7 + $0x508] sm:$0xff]  ;;  %247 = vst [vmem:[%s2821_s8 + $0x138] sm:$0xff] %v246_v39  ;;  %v252_v42 = vld [vmem:[%s2816_s7 + $0x510] sm:$0xff] }
  0x2d   : > { %249 = vst [vmem:[%s2821_s8 + $0x140] sm:$0xff] %v248_v40  ;;  %251 = vst [vmem:[%s2821_s8 + $0x148] sm:$0xff] %v250_v41  ;;  %v254_v43 = vld [vmem:[%s2816_s7 + $0x518] sm:$0xff]  ;;  %v256_v44 = vld [vmem:[%s2816_s7 + $0x520] sm:$0xff] }
  0x2e   : > { %253 = vst [vmem:[%s2821_s8 + $0x150] sm:$0xff] %v252_v42  ;;  %255 = vst [vmem:[%s2821_s8 + $0x158] sm:$0xff] %v254_v43  ;;  %v258_v45 = vld [vmem:[%s2816_s7 + $0x528] sm:$0xff]  ;;  %v260_v46 = vld [vmem:[%s2816_s7 + $0x530] sm:$0xff] }
  0x2f   : > { %257 = vst [vmem:[%s2821_s8 + $0x160] sm:$0xff] %v256_v44  ;;  %v262_v47 = vld [vmem:[%s2816_s7 + $0x538] sm:$0xff]  ;;  %259 = vst [vmem:[%s2821_s8 + $0x168] sm:$0xff] %v258_v45  ;;  %v264_v48 = vld [vmem:[%s2816_s7 + $0x900] sm:$0xff] }
  0x30   : > { %261 = vst [vmem:[%s2821_s8 + $0x170] sm:$0xff] %v260_v46  ;;  %263 = vst [vmem:[%s2821_s8 + $0x178] sm:$0xff] %v262_v47  ;;  %v266_v49 = vld [vmem:[%s2816_s7 + $0x908] sm:$0xff]  ;;  %v268_v50 = vld [vmem:[%s2816_s7 + $0x910] sm:$0xff] }
  0x31   : > { %265 = vst [vmem:[%s2821_s8 + $0x180] sm:$0xff] %v264_v48  ;;  %267 = vst [vmem:[%s2821_s8 + $0x188] sm:$0xff] %v266_v49  ;;  %v270_v51 = vld [vmem:[%s2816_s7 + $0x918] sm:$0xff]  ;;  %v272_v52 = vld [vmem:[%s2816_s7 + $0x920] sm:$0xff] }
  0x32   : > { %269 = vst [vmem:[%s2821_s8 + $0x190] sm:$0xff] %v268_v50  ;;  %v274_v53 = vld [vmem:[%s2816_s7 + $0x928] sm:$0xff]  ;;  %271 = vst [vmem:[%s2821_s8 + $0x198] sm:$0xff] %v270_v51  ;;  %v276_v54 = vld [vmem:[%s2816_s7 + $0x930] sm:$0xff] }
  0x33   : > { %273 = vst [vmem:[%s2821_s8 + $0x1a0] sm:$0xff] %v272_v52  ;;  %275 = vst [vmem:[%s2821_s8 + $0x1a8] sm:$0xff] %v274_v53  ;;  %v278_v55 = vld [vmem:[%s2816_s7 + $0x938] sm:$0xff]  ;;  %v280_v56 = vld [vmem:[%s2816_s7 + $0x940] sm:$0xff] }
  0x34   : > { %277 = vst [vmem:[%s2821_s8 + $0x1b0] sm:$0xff] %v276_v54  ;;  %279 = vst [vmem:[%s2821_s8 + $0x1b8] sm:$0xff] %v278_v55  ;;  %v282_v57 = vld [vmem:[%s2816_s7 + $0x948] sm:$0xff]  ;;  %v284_v58 = vld [vmem:[%s2816_s7 + $0x950] sm:$0xff] }
  0x35   : > { %281 = vst [vmem:[%s2821_s8 + $0x1c0] sm:$0xff] %v280_v56  ;;  %v286_v59 = vld [vmem:[%s2816_s7 + $0x958] sm:$0xff]  ;;  %283 = vst [vmem:[%s2821_s8 + $0x1c8] sm:$0xff] %v282_v57  ;;  %v288_v60 = vld [vmem:[%s2816_s7 + $0x960] sm:$0xff] }
  0x36   : > { %285 = vst [vmem:[%s2821_s8 + $0x1d0] sm:$0xff] %v284_v58  ;;  %287 = vst [vmem:[%s2821_s8 + $0x1d8] sm:$0xff] %v286_v59  ;;  %v290_v61 = vld [vmem:[%s2816_s7 + $0x968] sm:$0xff]  ;;  %v292_v62 = vld [vmem:[%s2816_s7 + $0x970] sm:$0xff] }
  0x37   : > { %289 = vst [vmem:[%s2821_s8 + $0x1e0] sm:$0xff] %v288_v60  ;;  %291 = vst [vmem:[%s2821_s8 + $0x1e8] sm:$0xff] %v290_v61  ;;  %v294_v63 = vld [vmem:[%s2816_s7 + $0x978] sm:$0xff]  ;;  %v296_v0 = vld [vmem:[%s2816_s7 + $0x980] sm:$0xff] }
  0x38   : > { %293 = vst [vmem:[%s2821_s8 + $0x1f0] sm:$0xff] %v292_v62  ;;  %v298_v1 = vld [vmem:[%s2816_s7 + $0x988] sm:$0xff]  ;;  %295 = vst [vmem:[%s2821_s8 + $0x1f8] sm:$0xff] %v294_v63  ;;  %v300_v2 = vld [vmem:[%s2816_s7 + $0x990] sm:$0xff] }
  0x39   : > { %297 = vst [vmem:[%s2821_s8 + $0x200] sm:$0xff] %v296_v0  ;;  %299 = vst [vmem:[%s2821_s8 + $0x208] sm:$0xff] %v298_v1  ;;  %v302_v3 = vld [vmem:[%s2816_s7 + $0x998] sm:$0xff]  ;;  %v304_v4 = vld [vmem:[%s2816_s7 + $0x9a0] sm:$0xff] }
  0x3a   : > { %301 = vst [vmem:[%s2821_s8 + $0x210] sm:$0xff] %v300_v2  ;;  %303 = vst [vmem:[%s2821_s8 + $0x218] sm:$0xff] %v302_v3  ;;  %v306_v5 = vld [vmem:[%s2816_s7 + $0x9a8] sm:$0xff]  ;;  %v308_v6 = vld [vmem:[%s2816_s7 + $0x9b0] sm:$0xff] }
  0x3b   : > { %305 = vst [vmem:[%s2821_s8 + $0x220] sm:$0xff] %v304_v4  ;;  %v310_v7 = vld [vmem:[%s2816_s7 + $0x9b8] sm:$0xff]  ;;  %307 = vst [vmem:[%s2821_s8 + $0x228] sm:$0xff] %v306_v5  ;;  %v312_v8 = vld [vmem:[%s2816_s7 + $0xd80] sm:$0xff] }
  0x3c   : > { %309 = vst [vmem:[%s2821_s8 + $0x230] sm:$0xff] %v308_v6  ;;  %311 = vst [vmem:[%s2821_s8 + $0x238] sm:$0xff] %v310_v7  ;;  %v314_v9 = vld [vmem:[%s2816_s7 + $0xd88] sm:$0xff]  ;;  %v316_v10 = vld [vmem:[%s2816_s7 + $0xd90] sm:$0xff] }
  0x3d   : > { %313 = vst [vmem:[%s2821_s8 + $0x240] sm:$0xff] %v312_v8  ;;  %315 = vst [vmem:[%s2821_s8 + $0x248] sm:$0xff] %v314_v9  ;;  %v318_v11 = vld [vmem:[%s2816_s7 + $0xd98] sm:$0xff]  ;;  %v320_v12 = vld [vmem:[%s2816_s7 + $0xda0] sm:$0xff] }
  0x3e   : > { %317 = vst [vmem:[%s2821_s8 + $0x250] sm:$0xff] %v316_v10  ;;  %v322_v13 = vld [vmem:[%s2816_s7 + $0xda8] sm:$0xff]  ;;  %319 = vst [vmem:[%s2821_s8 + $0x258] sm:$0xff] %v318_v11  ;;  %v324_v14 = vld [vmem:[%s2816_s7 + $0xdb0] sm:$0xff] }
  0x3f   : > { %321 = vst [vmem:[%s2821_s8 + $0x260] sm:$0xff] %v320_v12  ;;  %323 = vst [vmem:[%s2821_s8 + $0x268] sm:$0xff] %v322_v13  ;;  %v326_v15 = vld [vmem:[%s2816_s7 + $0xdb8] sm:$0xff]  ;;  %v328_v16 = vld [vmem:[%s2816_s7 + $0xdc0] sm:$0xff] }
  0x40   : > { %325 = vst [vmem:[%s2821_s8 + $0x270] sm:$0xff] %v324_v14  ;;  %327 = vst [vmem:[%s2821_s8 + $0x278] sm:$0xff] %v326_v15  ;;  %v330_v17 = vld [vmem:[%s2816_s7 + $0xdc8] sm:$0xff]  ;;  %v332_v18 = vld [vmem:[%s2816_s7 + $0xdd0] sm:$0xff] }
  0x41   : > { %329 = vst [vmem:[%s2821_s8 + $0x280] sm:$0xff] %v328_v16  ;;  %v334_v19 = vld [vmem:[%s2816_s7 + $0xdd8] sm:$0xff]  ;;  %331 = vst [vmem:[%s2821_s8 + $0x288] sm:$0xff] %v330_v17  ;;  %v336_v20 = vld [vmem:[%s2816_s7 + $0xde0] sm:$0xff] }
  0x42   : > { %333 = vst [vmem:[%s2821_s8 + $0x290] sm:$0xff] %v332_v18  ;;  %335 = vst [vmem:[%s2821_s8 + $0x298] sm:$0xff] %v334_v19  ;;  %v338_v21 = vld [vmem:[%s2816_s7 + $0xde8] sm:$0xff]  ;;  %v340_v22 = vld [vmem:[%s2816_s7 + $0xdf0] sm:$0xff] }
  0x43   : > { %337 = vst [vmem:[%s2821_s8 + $0x2a0] sm:$0xff] %v336_v20  ;;  %339 = vst [vmem:[%s2821_s8 + $0x2a8] sm:$0xff] %v338_v21  ;;  %v342_v23 = vld [vmem:[%s2816_s7 + $0xdf8] sm:$0xff]  ;;  %v344_v24 = vld [vmem:[%s2816_s7 + $0xe00] sm:$0xff] }
  0x44   : > { %341 = vst [vmem:[%s2821_s8 + $0x2b0] sm:$0xff] %v340_v22  ;;  %v346_v25 = vld [vmem:[%s2816_s7 + $0xe08] sm:$0xff]  ;;  %343 = vst [vmem:[%s2821_s8 + $0x2b8] sm:$0xff] %v342_v23  ;;  %v348_v26 = vld [vmem:[%s2816_s7 + $0xe10] sm:$0xff] }
  0x45   : > { %345 = vst [vmem:[%s2821_s8 + $0x2c0] sm:$0xff] %v344_v24  ;;  %347 = vst [vmem:[%s2821_s8 + $0x2c8] sm:$0xff] %v346_v25  ;;  %v350_v27 = vld [vmem:[%s2816_s7 + $0xe18] sm:$0xff]  ;;  %v352_v28 = vld [vmem:[%s2816_s7 + $0xe20] sm:$0xff] }
  0x46   : > { %349 = vst [vmem:[%s2821_s8 + $0x2d0] sm:$0xff] %v348_v26  ;;  %351 = vst [vmem:[%s2821_s8 + $0x2d8] sm:$0xff] %v350_v27  ;;  %v354_v29 = vld [vmem:[%s2816_s7 + $0xe28] sm:$0xff]  ;;  %v356_v30 = vld [vmem:[%s2816_s7 + $0xe30] sm:$0xff] }
  0x47   : > { %353 = vst [vmem:[%s2821_s8 + $0x2e0] sm:$0xff] %v352_v28  ;;  %v358_v31 = vld [vmem:[%s2816_s7 + $0xe38] sm:$0xff]  ;;  %355 = vst [vmem:[%s2821_s8 + $0x2e8] sm:$0xff] %v354_v29 }
  0x48   : > { %357 = vst [vmem:[%s2821_s8 + $0x2f0] sm:$0xff] %v356_v30  ;;  %359 = vst [vmem:[%s2821_s8 + $0x2f8] sm:$0xff] %v358_v31 }
  0x49 PF: > { %p2443_p7 = scmp.ge.s32.totalorder %s2732_s18, 1  ;;  %p364_p8 = scmp.lt.s32.totalorder %s2732_s18, 13 }
  0x4b   : > { %p365_p9 = pnand %p2443_p7, %p364_p8 }
  0x4c   : > { %s371_s9 = sand.u32 (!%p365_p9), 1, %s2708_s12   ;;  %p400_p10 = scmp.lt.s32.totalorder (!%p365_p9), %s2720_s15, 1 }
  0x4d   : > { %368 = sbr.rel (%p365_p9) target bundleno = 387 (0x183), region = 51 }
  0x4e   : > { %s2617_s10 = smul.u32 (!%p365_p9), 768, %s371_s9 }
  0x4f   : > { %s399_s24 = smul.u32 (!%p365_p9), 48, %s2716_s14 }
  0x50   : > { %s3021_s22 = scalar_lea.vmem (!%p365_p9), [#allocation2], %s2617_s10 }
  0x51   : > { %p402_p11 = scmp.lt.s32.totalorder (!%p365_p9), %s399_s24, 287 }
  0x52   : > { %vm949_vm0 = vcmask 1043456   ;;  %vm950_vm1 = vcmask 1044480   ;;  %v2734_v32 = vmov 65535   ;;  %v2735_v34 = vmov 0   ;;  %v507_v35 = vld [vmem:[%s3416_s2] sm:$0x3f] }
  0x53   : > { %v951_v33 = vsel %vm949_vm0, 4294967295, %v2734_v32  ;;  %1129 = vmatprep.mubr.bf16.mxu0 %v2735_v34  ;;  %1170 = vmatprep.mubr.bf16.mxu1 %v2735_v34  ;;  %v459_v36 = vld [vmem:[%s3021_s22 + $0x180] sm:$0xff]  ;;  %v460_v39 = vld [vmem:[%s3021_s22 + $0x188] sm:$0xff]  ;;  %v461_v49 = vld [vmem:[%s3021_s22 + $0x190] sm:$0xff]  ;;  %vm945_vm2 = vcmask 203776   ;;  %s3431_s15 = smov (!%p400_p10, %s2720_s15), 1 }
  0x54   : > { %2677 = vset.pattern.permute.xlu0 %v2735_v34  ;;  %v483_v37 = vld [vmem:[%s3021_s22 + $0x240] sm:$0x11]  ;;  %v3025_v38 = vsel %vm950_vm1, %v951_v33, 0  ;;  %v484_v41 = vld [vmem:[%s3021_s22 + $0x248] sm:$0x11]  ;;  %v462_v54 = vld [vmem:[%s3021_s22 + $0x198] sm:$0xff] }
  0x55   : > { %510 = vperm.xlu0 %2677, %v507_v35   ;;  %v2494_v40 = vcombine.high %v459_v36, %v483_v37  ;;  %v2493_v42 = vcombine.low %v459_v36, %v483_v37  ;;  %v411_v43 = vld [vmem:[%s3021_s22] sm:$0xff]  ;;  %v2496_v45 = vcombine.high %v460_v39, %v484_v41  ;;  %v2495_v46 = vcombine.low %v460_v39, %v484_v41  ;;  %v412_v47 = vld [vmem:[%s3021_s22 + $0x8] sm:$0xff]  ;;  %v485_v53 = vld [vmem:[%s3021_s22 + $0x250] sm:$0x11]  ;;  %s2618_s26 = smul.u32 288, %s3431_s15  ;;  %s3433_s24 = smov (!%p402_p11, %s399_s24), 287 }
  0x56   : > { %v435_v44 = vld [vmem:[%s3021_s22 + $0xc0] sm:$0xff]  ;;  %v436_v48 = vld [vmem:[%s3021_s22 + $0xc8] sm:$0xff]  ;;  %v486_v55 = vld [vmem:[%s3021_s22 + $0x258] sm:$0x11]  ;;  %v2498_v59 = vcombine.high %v461_v49, %v485_v53  ;;  %v2497_v62 = vcombine.low %v461_v49, %v485_v53 }
  0x57   : > { %v957_v50 = vand.u32 %v2494_v40, %v3025_v38  ;;  %v954_v51 = vand.u32 %v2493_v42, %v3025_v38  ;;  %v2446_v52 = vcombine.high %v411_v43, %v435_v44  ;;  %v963_v56 = vand.u32 %v2496_v45, %v3025_v38  ;;  %v413_v2 = vld [vmem:[%s3021_s22 + $0x10] sm:$0xff]  ;;  %v414_v5 = vld [vmem:[%s3021_s22 + $0x18] sm:$0xff]  ;;  %v463_v6 = vld [vmem:[%s3021_s22 + $0x1a0] sm:$0xff]  ;;  %s405_s27 = sadd.s32 %s2618_s26, %s3433_s24 }
  0x58   : > { %v960_v57 = vand.u32 %v2495_v46, %v3025_v38  ;;  %v2448_v58 = vcombine.high %v412_v47, %v436_v48  ;;  %v2500_v60 = vcombine.high %v462_v54, %v486_v55  ;;  %v2445_v61 = vcombine.low %v411_v43, %v435_v44  ;;  %v437_v3 = vld [vmem:[%s3021_s22 + $0xd0] sm:$0xff]  ;;  %v487_v7 = vld [vmem:[%s3021_s22 + $0x260] sm:$0x11]  ;;  %v438_v8 = vld [vmem:[%s3021_s22 + $0xd8] sm:$0xff]  ;;  %s2444_s28 = sshll.u32 %s405_s27, 2 }
  0x59   : > { %1109 = vmatprep.subr.bf16.mxu0 %v957_v50  ;;  %1150 = vmatprep.subr.bf16.mxu1 %v963_v56  ;;  %v2447_v63 = vcombine.low %v412_v47, %v436_v48  ;;  %v969_v0 = vand.u32 %v2498_v59, %v3025_v38  ;;  %v2499_v1 = vcombine.low %v462_v54, %v486_v55  ;;  %v464_v9 = vld [vmem:[%s3021_s22 + $0x1a8] sm:$0xff]  ;;  %v3054_v11 = vld [vmem:[%s3415_s1] sm:$0x7]  ;;  %v465_v27 = vld [vmem:[%s3021_s22 + $0x1b0] sm:$0xff]  ;;  %s3323_s29 = scalar_lea.vmem %s3417_s3, %s2444_s28 }
  0x5a   : > { %1110 = vmatpush1.bf16.msra.mxu0 %v954_v51  ;;  %1151 = vmatpush1.bf16.msra.mxu1 %v960_v57  ;;  %v975_v4 = vand.u32 %v2500_v60, %v3025_v38  ;;  %v488_v10 = vld [vmem:[%s3021_s22 + $0x268] sm:$0x11]  ;;  %v966_v12 = vand.u32 %v2497_v62, %v3025_v38  ;;  %v2450_v14 = vcombine.high %v413_v2, %v437_v3  ;;  %v415_v23 = vld [vmem:[%s3021_s22 + $0x20] sm:$0xff]  ;;  %v489_v28 = vld [vmem:[%s3021_s22 + $0x270] sm:$0x11] }
  0x5b   : > { %1111 = vmatprep.subr.bf16.mxu0 %v2446_v52  ;;  %1152 = vmatprep.subr.bf16.mxu1 %v2448_v58  ;;  %v972_v13 = vand.u32 %v2499_v1, %v3025_v38  ;;  %v2502_v15 = vcombine.high %v463_v6, %v487_v7  ;;  %v2452_v16 = vcombine.high %v414_v5, %v438_v8  ;;  %v439_v24 = vld [vmem:[%s3021_s22 + $0xe0] sm:$0xff]  ;;  %v416_v26 = vld [vmem:[%s3021_s22 + $0x28] sm:$0xff]  ;;  %v466_v30 = vld [vmem:[%s3021_s22 + $0x1b8] sm:$0xff] }
  0x5c   : > { %v2504_v17 = vcombine.high %v464_v9, %v488_v10  ;;  %v2449_v18 = vcombine.low %v413_v2, %v437_v3  ;;  %v2501_v19 = vcombine.low %v463_v6, %v487_v7  ;;  %v2451_v20 = vcombine.low %v414_v5, %v438_v8  ;;  %v440_v29 = vld [vmem:[%s3021_s22 + $0xe8] sm:$0xff]  ;;  %v490_v31 = vld [vmem:[%s3021_s22 + $0x278] sm:$0x11]  ;;  %v3081_v42 = vld [vmem:[%s3021_s22 + $0x30] sm:$0xff] }
  0x5d   : > { %v981_v21 = vand.u32 %v2502_v15, %v3025_v38  ;;  %v2503_v22 = vcombine.low %v464_v9, %v488_v10  ;;  %v2454_v35 = vcombine.high %v415_v23, %v439_v24  ;;  %v2506_v36 = vcombine.high %v465_v27, %v489_v28  ;;  %v441_v46 = vld [vmem:[%s3021_s22 + $0xf0] sm:$0xff]  ;;  %v467_v47 = vld [vmem:[%s3021_s22 + $0x1c0] sm:$0xff]  ;;  %v468_v50 = vld [vmem:[%s3021_s22 + $0x1c8] sm:$0xff] }
  0x5e   : > { %1112 = vmatpush1.bf16.msra.mxu0 %v2445_v61  ;;  %1153 = vmatpush1.bf16.msra.mxu1 %v2447_v63  ;;  %v987_v25 = vand.u32 %v2504_v17, %v3025_v38  ;;  %v978_v32 = vand.u32 %v2501_v19, %v3025_v38  ;;  %v2456_v37 = vcombine.high %v416_v26, %v440_v29  ;;  %v491_v48 = vld [vmem:[%s3021_s22 + $0x280] sm:$0x11]  ;;  %v492_v51 = vld [vmem:[%s3021_s22 + $0x288] sm:$0x11]  ;;  %v418_v52 = vld [vmem:[%s3021_s22 + $0x38] sm:$0xff] }
  0x5f   : > { %1191 = vmatprep.subr.bf16.mxu0 %v969_v0  ;;  %1232 = vmatprep.subr.bf16.mxu1 %v975_v4  ;;  %v984_v33 = vand.u32 %v2503_v22, %v3025_v38  ;;  %v2508_v39 = vcombine.high %v466_v30, %v490_v31  ;;  %v2453_v40 = vcombine.low %v415_v23, %v439_v24  ;;  %v442_v53 = vld [vmem:[%s3021_s22 + $0xf8] sm:$0xff]  ;;  %v3098_v60 = vld [vmem:[%s3021_s22 + $0x40] sm:$0xff]  ;;  %v477_v63 = vld [vmem:[%s3021_s22 + $0x210] sm:$0xff] }
  0x60   : > { %v2505_v41 = vcombine.low %v465_v27, %v489_v28  ;;  %v2455_v43 = vcombine.low %v416_v26, %v440_v29  ;;  %v993_v44 = vand.u32 %v2506_v36, %v3025_v38  ;;  %v2507_v45 = vcombine.low %v466_v30, %v490_v31  ;;  %v3101_v61 = vld [vmem:[%s3021_s22 + $0x100] sm:$0xff]  ;;  %v501_v0 = vld [vmem:[%s3021_s22 + $0x2d0] sm:$0x11]  ;;  %v478_v3 = vld [vmem:[%s3021_s22 + $0x218] sm:$0xff] }
  0x61   : > { %2541 = vmatmul.mubr.msk.bf16.vlgmr.msra.gmra.mxu0 %vm945_vm2, %v3054_v11  ;;  %2542 = vmatmul.mubr.msk.bf16.vlgmr.msra.gmra.mxu1 %vm945_vm2, %v3054_v11  ;;  %v999_v49 = vand.u32 %v2508_v39, %v3025_v38  ;;  %v2458_v55 = vcombine.high %v3081_v42, %v441_v46  ;;  %v2510_v56 = vcombine.high %v467_v47, %v491_v48  ;;  %v502_v4 = vld [vmem:[%s3021_s22 + $0x2d8] sm:$0x11]  ;;  %v3116_v8 = vld [vmem:[%s3021_s22 + $0x48] sm:$0xff]  ;;  %v505_v39 = vld [vmem:[%s3021_s22 + $0x2f0] sm:$0x11] }
  0x62   : > { %1192 = vmatpush1.bf16.msra.mxu0 %v966_v12  ;;  %1233 = vmatpush1.bf16.msra.mxu1 %v972_v13  ;;  %v990_v54 = vand.u32 %v2505_v41, %v3025_v38  ;;  %v996_v57 = vand.u32 %v2507_v45, %v3025_v38  ;;  %v2509_v58 = vcombine.low %v467_v47, %v491_v48  ;;  %v3119_v9 = vld [vmem:[%s3021_s22 + $0x108] sm:$0xff]  ;;  %v3124_v13 = vld [vmem:[%s3021_s22 + $0x1d0] sm:$0xff]  ;;  %v470_v26 = vld [vmem:[%s3021_s22 + $0x1d8] sm:$0xff] }
  0x63   : > { %1193 = vmatprep.subr.bf16.mxu0 %v2450_v14  ;;  %1234 = vmatprep.subr.bf16.mxu1 %v2452_v16  ;;  %v2512_v59 = vcombine.high %v468_v50, %v492_v51  ;;  %v2460_v62 = vcombine.high %v418_v52, %v442_v53  ;;  %v2457_v1 = vcombine.low %v3081_v42, %v441_v46  ;;  %v3127_v14 = vld [vmem:[%s3021_s22 + $0x290] sm:$0x11]  ;;  %v479_v16 = vld [vmem:[%s3021_s22 + $0x220] sm:$0xff]  ;;  %v504_v22 = vld [vmem:[%s3021_s22 + $0x2e8] sm:$0x11] }
  0x64   : > { %1211 = vmatprep.mubr.bf16.mxu0 %v2735_v34  ;;  %1252 = vmatprep.mubr.bf16.mxu1 %v2735_v34  ;;  %v2511_v2 = vcombine.low %v468_v50, %v492_v51  ;;  %v2459_v5 = vcombine.low %v418_v52, %v442_v53  ;;  %v1005_v6 = vand.u32 %v2510_v56, %v3025_v38  ;;  %v494_v27 = vld [vmem:[%s3021_s22 + $0x298] sm:$0x11] }
  0x65   : > { %v2461_v7 = vcombine.low %v3098_v60, %v3101_v61  ;;  %v1011_v10 = vand.u32 %v2512_v59, %v3025_v38  ;;  %v1002_v12 = vand.u32 %v2509_v58, %v3025_v38  ;;  %v2529_v15 = vcombine.low %v477_v63, %v501_v0  ;;  %v506_v45 = vld [vmem:[%s3021_s22 + $0x2f8] sm:$0x11] }
  0x66   : > { %1194 = vmatpush1.bf16.msra.mxu0 %v2449_v18  ;;  %1235 = vmatpush1.bf16.msra.mxu1 %v2451_v20  ;;  %v2530_v17 = vcombine.high %v477_v63, %v501_v0  ;;  %v2531_v18 = vcombine.low %v478_v3, %v502_v4  ;;  %v2532_v19 = vcombine.high %v478_v3, %v502_v4  ;;  %v503_v20 = vld [vmem:[%s3021_s22 + $0x2e0] sm:$0x11]  ;;  %v422_v59 = vld [vmem:[%s3021_s22 + $0x58] sm:$0xff]  ;;  %v472_v3 = vld [vmem:[%s3021_s22 + $0x1e8] sm:$0xff] }
  0x67   : > { %1273 = vmatprep.subr.bf16.mxu0 %v981_v21  ;;  %1314 = vmatprep.subr.bf16.mxu1 %v987_v25  ;;  %v480_v21 = vld [vmem:[%s3021_s22 + $0x228] sm:$0xff]  ;;  %v1008_v23 = vand.u32 %v2511_v2, %v3025_v38  ;;  %v2462_v24 = vcombine.high %v3098_v60, %v3101_v61  ;;  %v2463_v25 = vcombine.low %v3116_v8, %v3119_v9  ;;  %v495_v63 = vld [vmem:[%s3021_s22 + $0x2a0] sm:$0x11]  ;;  %v446_v2 = vld [vmem:[%s3021_s22 + $0x118] sm:$0xff] }
  0x68   : > { %v3143_v28 = vand.u32 %v2529_v15, %v3025_v38  ;;  %v2514_v29 = vcombine.high %v3124_v13, %v3127_v14  ;;  %v3148_v30 = vand.u32 %v2530_v17, %v3025_v38  ;;  %v3151_v31 = vand.u32 %v2532_v19, %v3025_v38  ;;  %v496_v4 = vld [vmem:[%s3021_s22 + $0x2a8] sm:$0x11]  ;;  %v423_v17 = vld [vmem:[%s3021_s22 + $0x60] sm:$0xff] }
  0x69   : > { %2543 = vmatmul.mubr.msk.bf16.vlgmr.msra.gmra.mxu0 %vm945_vm2, %v3054_v11  ;;  %2544 = vmatmul.mubr.msk.bf16.vlgmr.msra.gmra.mxu1 %vm945_vm2, %v3054_v11  ;;  %v2535_v36 = vcombine.low %v480_v21, %v504_v22  ;;  %v2513_v41 = vcombine.low %v3124_v13, %v3127_v14  ;;  %v2516_v42 = vcombine.high %v470_v26, %v494_v27 }
  0x6a   : > { %1274 = vmatpush1.bf16.msra.mxu0 %v978_v32  ;;  %1315 = vmatpush1.bf16.msra.mxu1 %v984_v33  ;;  %v3154_v32 = vand.u32 %v2531_v18, %v3025_v38  ;;  %v2533_v33 = vcombine.low %v479_v16, %v503_v20  ;;  %v2515_v46 = vcombine.low %v470_v26, %v494_v27  ;;  %v447_v18 = vld [vmem:[%s3021_s22 + $0x120] sm:$0xff] }
  0x6b   : > { %1275 = vmatprep.subr.bf16.mxu0 %v2454_v35  ;;  %1316 = vmatprep.subr.bf16.mxu1 %v2456_v37  ;;  %v2534_v35 = vcombine.high %v479_v16, %v503_v20  ;;  %v481_v37 = vld [vmem:[%s3021_s22 + $0x230] sm:$0xff]  ;;  %v1017_v53 = vand.u32 %v2514_v29, %v3025_v38  ;;  %v1023_v58 = vand.u32 %v2516_v42, %v3025_v38  ;;  %v424_v20 = vld [vmem:[%s3021_s22 + $0x68] sm:$0xff] }
  0x6c   : > { %1293 = vmatprep.mubr.bf16.mxu0 %v2735_v34  ;;  %1334 = vmatprep.mubr.bf16.mxu1 %v2735_v34  ;;  %v3170_v48 = vand.u32 %v2533_v33, %v3025_v38  ;;  %v2537_v51 = vcombine.low %v481_v37, %v505_v39  ;;  %v2538_v52 = vcombine.high %v481_v37, %v505_v39 }
  0x6d   : > { %v3167_v47 = vand.u32 %v2534_v35, %v3025_v38  ;;  %v2468_v13 = vcombine.high %v422_v59, %v446_v2  ;;  %v2520_v14 = vcombine.high %v472_v3, %v496_v4  ;;  %v2519_v16 = vcombine.low %v472_v3, %v496_v4 }
  0x6e   : > { %1276 = vmatpush1.bf16.msra.mxu0 %v2453_v40  ;;  %1317 = vmatpush1.bf16.msra.mxu1 %v2455_v43  ;;  %v2464_v40 = vcombine.high %v3116_v8, %v3119_v9  ;;  %v2536_v43 = vcombine.high %v480_v21, %v504_v22  ;;  %v3189_v0 = vand.u32 %v2538_v52, %v3025_v38  ;;  %v473_v21 = vld [vmem:[%s3021_s22 + $0x1f0] sm:$0xff]  ;;  %v499_v52 = vld [vmem:[%s3021_s22 + $0x2c0] sm:$0x11] }
  0x6f   : > { %1355 = vmatprep.subr.bf16.mxu0 %v993_v44  ;;  %1396 = vmatprep.subr.bf16.mxu1 %v999_v49  ;;  %v482_v44 = vld [vmem:[%s3021_s22 + $0x238] sm:$0xff]  ;;  %v3173_v49 = vand.u32 %v2535_v36, %v3025_v38  ;;  %v1014_v8 = vand.u32 %v2513_v41, %v3025_v38  ;;  %v1020_v9 = vand.u32 %v2515_v46, %v3025_v38  ;;  %v497_v22 = vld [vmem:[%s3021_s22 + $0x2b0] sm:$0x11] }
  0x70   : > { %v3178_v50 = vand.u32 %v2536_v43, %v3025_v38  ;;  %v2539_v56 = vcombine.low %v482_v44, %v506_v45  ;;  %v1035_v19 = vand.u32 %v2520_v14, %v3025_v38  ;;  %v1032_v27 = vand.u32 %v2519_v16, %v3025_v38  ;;  %v425_v43 = vld [vmem:[%s3021_s22 + $0x70] sm:$0xff]  ;;  %v426_v46 = vld [vmem:[%s3021_s22 + $0x78] sm:$0xff]  ;;  %v428_v14 = vld [vmem:[%s3021_s22 + $0x88] sm:$0xff] }
  0x71   : > { %2545 = vmatmul.mubr.msk.bf16.vlgmr.msra.gmra.mxu0 %vm945_vm2, %v3054_v11  ;;  %2546 = vmatmul.mubr.msk.bf16.vlgmr.msra.gmra.mxu1 %vm945_vm2, %v3054_v11  ;;  %v2470_v29 = vcombine.high %v423_v17, %v447_v18  ;;  %v2522_v33 = vcombine.high %v473_v21, %v497_v22  ;;  %v2469_v37 = vcombine.low %v423_v17, %v447_v18 }
  0x72   : > { %1356 = vmatpush1.bf16.msra.mxu0 %v990_v54  ;;  %1397 = vmatpush1.bf16.msra.mxu1 %v996_v57  ;;  %v421_v54 = vld [vmem:[%s3021_s22 + $0x50] sm:$0xff]  ;;  %v2540_v57 = vcombine.high %v482_v44, %v506_v45  ;;  %v2521_v39 = vcombine.low %v473_v21, %v497_v22  ;;  %v454_v21 = vld [vmem:[%s3021_s22 + $0x158] sm:$0xff] }
  0x73   : > { %1357 = vmatprep.subr.bf16.mxu0 %v2458_v55  ;;  %1398 = vmatprep.subr.bf16.mxu1 %v2460_v62  ;;  %v445_v55 = vld [vmem:[%s3021_s22 + $0x110] sm:$0xff]  ;;  %v471_v62 = vld [vmem:[%s3021_s22 + $0x1e0] sm:$0xff]  ;;  %v1041_v41 = vand.u32 %v2522_v33, %v3025_v38 }
  0x74   : > { %1375 = vmatprep.mubr.bf16.mxu0 %v2735_v34  ;;  %1416 = vmatprep.mubr.bf16.mxu1 %v2735_v34  ;;  %v2465_v60 = vcombine.low %v421_v54, %v445_v55  ;;  %v2517_v61 = vcombine.low %v471_v62, %v495_v63  ;;  %v449_v44 = vld [vmem:[%s3021_s22 + $0x130] sm:$0xff] }
  0x76   : > { %1358 = vmatpush1.bf16.msra.mxu0 %v2457_v1  ;;  %1399 = vmatpush1.bf16.msra.mxu1 %v2459_v5  ;;  %v3192_v1 = vand.u32 %v2537_v51, %v3025_v38  ;;  %v3199_v5 = vand.u32 %v2540_v57, %v3025_v38  ;;  %v1026_v26 = vand.u32 %v2517_v61, %v3025_v38  ;;  %v475_v51 = vld [vmem:[%s3021_s22 + $0x200] sm:$0xff] }
  0x77   : > { %1437 = vmatprep.subr.bf16.mxu0 %v1005_v6  ;;  %1478 = vmatprep.subr.bf16.mxu1 %v1011_v10  ;;  %v3202_v6 = vand.u32 %v2539_v56, %v3025_v38  ;;  %v2466_v10 = vcombine.high %v421_v54, %v445_v55  ;;  %v476_v54 = vld [vmem:[%s3021_s22 + $0x208] sm:$0xff]  ;;  %v1038_v56 = vand.u32 %v2521_v39, %v3025_v38 }
  0x78   : > { %v500_v55 = vld [vmem:[%s3021_s22 + $0x2c8] sm:$0x11]  ;;  %v2525_v3 = vcombine.low %v475_v51, %v499_v52 }
  0x79   : > { %2547 = vmatmul.mubr.msk.bf16.vlgmr.msra.gmra.mxu0 %vm945_vm2, %v3054_v11  ;;  %2548 = vmatmul.mubr.msk.bf16.vlgmr.msra.gmra.mxu1 %vm945_vm2, %v3054_v11 }
  0x7a   : > { %1438 = vmatpush1.bf16.msra.mxu0 %v1002_v12  ;;  %1479 = vmatpush1.bf16.msra.mxu1 %v1008_v23  ;;  %v2518_v12 = vcombine.high %v471_v62, %v495_v63  ;;  %v448_v23 = vld [vmem:[%s3021_s22 + $0x128] sm:$0xff]  ;;  %v2528_v63 = vcombine.high %v476_v54, %v500_v55  ;;  %v1050_v61 = vand.u32 %v2525_v3, %v3025_v38 }
  0x7b   : > { %1439 = vmatprep.subr.bf16.mxu0 %v2462_v24  ;;  %1480 = vmatprep.subr.bf16.mxu1 %v2464_v40  ;;  %v474_v24 = vld [vmem:[%s3021_s22 + $0x1f8] sm:$0xff]  ;;  %v2472_v35 = vcombine.high %v424_v20, %v448_v23  ;;  %v2471_v40 = vcombine.low %v424_v20, %v448_v23 }
  0x7c   : > { %1457 = vmatprep.mubr.bf16.mxu0 %v2735_v34  ;;  %1498 = vmatprep.mubr.bf16.mxu1 %v2735_v34  ;;  %v1029_v15 = vand.u32 %v2518_v12, %v3025_v38  ;;  %v427_v12 = vld [vmem:[%s3021_s22 + $0x80] sm:$0xff]  ;;  %v430_v20 = vld [vmem:[%s3021_s22 + $0x98] sm:$0xff] }
  0x7d   : > { %v2484_v23 = vcombine.high %v430_v20, %v454_v21 }
  0x7e   : > { %1440 = vmatpush1.bf16.msra.mxu0 %v2461_v7  ;;  %1481 = vmatpush1.bf16.msra.mxu1 %v2463_v25  ;;  %v2467_v7 = vcombine.low %v422_v59, %v446_v2  ;;  %v498_v25 = vld [vmem:[%s3021_s22 + $0x2b8] sm:$0x11]  ;;  %v2526_v59 = vcombine.high %v475_v51, %v499_v52  ;;  %v2473_v2 = vcombine.low %v425_v43, %v449_v44 }
  0x7f   : > { %1519 = vmatprep.subr.bf16.mxu0 %v1017_v53  ;;  %1560 = vmatprep.subr.bf16.mxu1 %v1023_v58  ;;  %v2524_v36 = vcombine.high %v474_v24, %v498_v25  ;;  %v2523_v42 = vcombine.low %v474_v24, %v498_v25  ;;  %v450_v53 = vld [vmem:[%s3021_s22 + $0x138] sm:$0xff]  ;;  %v2474_v58 = vcombine.high %v425_v43, %v449_v44 }
  0x80   : > { %v2476_v62 = vcombine.high %v426_v46, %v450_v53  ;;  %v2475_v4 = vcombine.low %v426_v46, %v450_v53  ;;  %v2483_v25 = vcombine.low %v430_v20, %v454_v21 }
  0x81   : > { %2549 = vmatmul.mubr.msk.bf16.vlgmr.msra.gmra.mxu0 %vm945_vm2, %v3054_v11  ;;  %2550 = vmatmul.mubr.msk.bf16.vlgmr.msra.gmra.mxu1 %vm945_vm2, %v3054_v11  ;;  %v1047_v45 = vand.u32 %v2524_v36, %v3025_v38  ;;  %v1044_v57 = vand.u32 %v2523_v42, %v3025_v38  ;;  %v458_v36 = vld [vmem:[%s3021_s22 + $0x178] sm:$0xff] }
  0x82   : > { %1520 = vmatpush1.bf16.msra.mxu0 %v1014_v8  ;;  %1561 = vmatpush1.bf16.msra.mxu1 %v1020_v9  ;;  %v1053_v8 = vand.u32 %v2526_v59, %v3025_v38  ;;  %v2527_v9 = vcombine.low %v476_v54, %v500_v55 }
  0x83   : > { %1521 = vmatprep.subr.bf16.mxu0 %v2466_v10  ;;  %1562 = vmatprep.subr.bf16.mxu1 %v2468_v13  ;;  %v1059_v10 = vand.u32 %v2528_v63, %v3025_v38  ;;  %v451_v13 = vld [vmem:[%s3021_s22 + $0x140] sm:$0xff] }
  0x84   : > { %1539 = vmatprep.mubr.bf16.mxu0 %v2735_v34  ;;  %1580 = vmatprep.mubr.bf16.mxu1 %v2735_v34  ;;  %v2477_v17 = vcombine.low %v427_v12, %v451_v13 }
  0x86   : > { %1522 = vmatpush1.bf16.msra.mxu0 %v2465_v60  ;;  %1563 = vmatpush1.bf16.msra.mxu1 %v2467_v7  ;;  %v452_v60 = vld [vmem:[%s3021_s22 + $0x148] sm:$0xff]  ;;  %v1056_v7 = vand.u32 %v2527_v9, %v3025_v38  ;;  %v429_v38 = vld [vmem:[%s3021_s22 + $0x90] sm:$0xff] }
  0x87   : > { %1601 = vmatprep.subr.bf16.mxu0 %v1029_v15  ;;  %1642 = vmatprep.subr.bf16.mxu1 %v1035_v19  ;;  %v2478_v15 = vcombine.high %v427_v12, %v451_v13  ;;  %v2480_v16 = vcombine.high %v428_v14, %v452_v60  ;;  %v2479_v18 = vcombine.low %v428_v14, %v452_v60  ;;  %v453_v19 = vld [vmem:[%s3021_s22 + $0x150] sm:$0xff] }
  0x88   : > { %v2482_v22 = vcombine.high %v429_v38, %v453_v19  ;;  %v2481_v24 = vcombine.low %v429_v38, %v453_v19 }
  0x89   : > { %2551 = vmatmul.mubr.msk.bf16.vlgmr.msra.gmra.mxu0 %vm945_vm2, %v3054_v11  ;;  %2552 = vmatmul.mubr.msk.bf16.vlgmr.msra.gmra.mxu1 %vm945_vm2, %v3054_v11 }
  0x8a   : > { %1602 = vmatpush1.bf16.msra.mxu0 %v1026_v26  ;;  %1643 = vmatpush1.bf16.msra.mxu1 %v1032_v27  ;;  %v455_v26 = vld [vmem:[%s3021_s22 + $0x160] sm:$0xff]  ;;  %v456_v27 = vld [vmem:[%s3021_s22 + $0x168] sm:$0xff] }
  0x8b   : > { %1603 = vmatprep.subr.bf16.mxu0 %v2470_v29  ;;  %1644 = vmatprep.subr.bf16.mxu1 %v2472_v35  ;;  %v457_v35 = vld [vmem:[%s3021_s22 + $0x170] sm:$0xff] }
  0x8c   : > { %1621 = vmatprep.mubr.bf16.mxu0 %v2735_v34  ;;  %1662 = vmatprep.mubr.bf16.mxu1 %v2735_v34 }
  0x8e   : > { %1604 = vmatpush1.bf16.msra.mxu0 %v2469_v37  ;;  %1645 = vmatpush1.bf16.msra.mxu1 %v2471_v40 }
  0x8f   : > { %1683 = vmatprep.subr.bf16.mxu0 %v1041_v41  ;;  %1724 = vmatprep.subr.bf16.mxu1 %v1047_v45 }
  0x91   : > { %2553 = vmatmul.mubr.msk.bf16.vlgmr.msra.gmra.mxu0 %vm945_vm2, %v3054_v11  ;;  %2554 = vmatmul.mubr.msk.bf16.vlgmr.msra.gmra.mxu1 %vm945_vm2, %v3054_v11 }
  0x92   : > { %1684 = vmatpush1.bf16.msra.mxu0 %v1038_v56  ;;  %1725 = vmatpush1.bf16.msra.mxu1 %v1044_v57 }
  0x93   : > { %1685 = vmatprep.subr.bf16.mxu0 %v2474_v58  ;;  %1726 = vmatprep.subr.bf16.mxu1 %v2476_v62 }
  0x94   : > { %1703 = vmatprep.mubr.bf16.mxu0 %v2735_v34  ;;  %1744 = vmatprep.mubr.bf16.mxu1 %v2735_v34 }
  0x96   : > { %1686 = vmatpush1.bf16.msra.mxu0 %v2473_v2  ;;  %1727 = vmatpush1.bf16.msra.mxu1 %v2475_v4 }
  0x97   : > { %1765 = vmatprep.subr.bf16.mxu0 %v1053_v8  ;;  %1806 = vmatprep.subr.bf16.mxu1 %v1059_v10 }
  0x99   : > { %2555 = vmatmul.mubr.msk.bf16.vlgmr.msra.gmra.mxu0 %vm945_vm2, %v3054_v11  ;;  %2556 = vmatmul.mubr.msk.bf16.vlgmr.msra.gmra.mxu1 %vm945_vm2, %v3054_v11 }
  0x9a   : > { %1766 = vmatpush1.bf16.msra.mxu0 %v1050_v61  ;;  %1807 = vmatpush1.bf16.msra.mxu1 %v1056_v7 }
  0x9b   : > { %1767 = vmatprep.subr.bf16.mxu0 %v2478_v15  ;;  %1808 = vmatprep.subr.bf16.mxu1 %v2480_v16 }
  0x9c   : > { %1785 = vmatprep.mubr.bf16.mxu0 %v2735_v34  ;;  %1826 = vmatprep.mubr.bf16.mxu1 %v2735_v34 }
  0x9e   : > { %1768 = vmatpush1.bf16.msra.mxu0 %v2477_v17  ;;  %1809 = vmatpush1.bf16.msra.mxu1 %v2479_v18 }
  0x9f   : > { %1847 = vmatprep.subr.bf16.mxu0 %v3148_v30  ;;  %1888 = vmatprep.subr.bf16.mxu1 %v3151_v31  ;;  %v431_v30 = vld [vmem:[%s3021_s22 + $0xa0] sm:$0xff]  ;;  %v432_v31 = vld [vmem:[%s3021_s22 + $0xa8] sm:$0xff] }
  0xa0   : > { %v2485_v29 = vcombine.low %v431_v30, %v455_v26  ;;  %v2487_v33 = vcombine.low %v432_v31, %v456_v27 }
  0xa1   : > { %2557 = vmatmul.mubr.msk.bf16.vlgmr.msra.gmra.mxu0 %vm945_vm2, %v3054_v11  ;;  %2558 = vmatmul.mubr.msk.bf16.vlgmr.msra.gmra.mxu1 %vm945_vm2, %v3054_v11 }
  0xa2   : > { %1848 = vmatpush1.bf16.msra.mxu0 %v3143_v28  ;;  %1889 = vmatpush1.bf16.msra.mxu1 %v3154_v32  ;;  %v2486_v28 = vcombine.high %v431_v30, %v455_v26  ;;  %v2488_v32 = vcombine.high %v432_v31, %v456_v27 }
  0xa3   : > { %1849 = vmatprep.subr.bf16.mxu0 %v2482_v22  ;;  %1890 = vmatprep.subr.bf16.mxu1 %v2484_v23 }
  0xa4   : > { %1867 = vmatprep.mubr.bf16.mxu0 %v2735_v34  ;;  %1908 = vmatprep.mubr.bf16.mxu1 %v2735_v34 }
  0xa6   : > { %1850 = vmatpush1.bf16.msra.mxu0 %v2481_v24  ;;  %1891 = vmatpush1.bf16.msra.mxu1 %v2483_v25 }
  0xa7   : > { %1929 = vmatprep.subr.bf16.mxu0 %v3167_v47  ;;  %1970 = vmatprep.subr.bf16.mxu1 %v3178_v50  ;;  %v433_v47 = vld [vmem:[%s3021_s22 + $0xb0] sm:$0xff]  ;;  %v434_v50 = vld [vmem:[%s3021_s22 + $0xb8] sm:$0xff] }
  0xa8   : > { %v2490_v37 = vcombine.high %v433_v47, %v457_v35 }
  0xa9   : > { %2559 = vmatmul.mubr.msk.bf16.vlgmr.msra.gmra.mxu0 %vm945_vm2, %v3054_v11  ;;  %2560 = vmatmul.mubr.msk.bf16.vlgmr.msra.gmra.mxu1 %vm945_vm2, %v3054_v11 }
  0xaa   : > { %1930 = vmatpush1.bf16.msra.mxu0 %v3170_v48  ;;  %1971 = vmatpush1.bf16.msra.mxu1 %v3173_v49  ;;  %v2492_v48 = vcombine.high %v434_v50, %v458_v36  ;;  %v2489_v49 = vcombine.low %v433_v47, %v457_v35 }
  0xab   : > { %1931 = vmatprep.subr.bf16.mxu0 %v2486_v28  ;;  %1972 = vmatprep.subr.bf16.mxu1 %v2488_v32 }
  0xac   : > { %1949 = vmatprep.mubr.bf16.mxu0 %v2735_v34  ;;  %1990 = vmatprep.mubr.bf16.mxu1 %v2735_v34 }
  0xae   : > { %1932 = vmatpush1.bf16.msra.mxu0 %v2485_v29  ;;  %1973 = vmatpush1.bf16.msra.mxu1 %v2487_v33 }
  0xaf   : > { %2011 = vmatprep.subr.bf16.mxu0 %v3189_v0  ;;  %2052 = vmatprep.subr.bf16.mxu1 %v3199_v5  ;;  %v2491_v0 = vcombine.low %v434_v50, %v458_v36 }
  0xb1   : > { %2561 = vmatmul.mubr.msk.bf16.vlgmr.msra.gmra.mxu0 %vm945_vm2, %v3054_v11  ;;  %2562 = vmatmul.mubr.msk.bf16.vlgmr.msra.gmra.mxu1 %vm945_vm2, %v3054_v11 }
  0xb2   : > { %2012 = vmatpush1.bf16.msra.mxu0 %v3192_v1  ;;  %2053 = vmatpush1.bf16.msra.mxu1 %v3202_v6 }
  0xb3   : > { %2013 = vmatprep.subr.bf16.mxu0 %v2490_v37  ;;  %2054 = vmatprep.subr.bf16.mxu1 %v2492_v48 }
  0xb4   : > { %2031 = vmatprep.mubr.bf16.mxu0 %v2735_v34  ;;  %2072 = vmatprep.mubr.bf16.mxu1 %v2735_v34 }
  0xb6   : > { %2014 = vmatpush1.bf16.msra.mxu0 %v2489_v49  ;;  %2055 = vmatpush1.bf16.msra.mxu1 %v2491_v0 }
  0xb9   : > { %2563 = vmatmul.mubr.msk.bf16.vlgmr.msra.gmra.mxu0 %vm945_vm2, %v3054_v11  ;;  %2564 = vmatmul.mubr.msk.bf16.vlgmr.msra.gmra.mxu1 %vm945_vm2, %v3054_v11 }
  0xd0   : > { %v3314_v1 = vpop.permute.xlu0 %510 }
 0x121   : > { %v1131_v5 = vpop.f32.mrf.mxu0  ;;  %v1172_v6 = vpop.f32.mrf.mxu1 }
 0x122   : > { %v1132_v34 = vadd.f32 %v1131_v5, %v3314_v1  ;;  %v1173_v40 = vadd.f32 %v1172_v6, %v3314_v1 }
 0x123   : > { %v1133_v39 = vpop.f32.mrf.mxu0  ;;  %v1174_v11 = vpop.f32.mrf.mxu1 }
 0x124   : > { %v1134_v41 = vadd.f32 %v1133_v39, %v3314_v1  ;;  %v1175_v42 = vadd.f32 %v1174_v11, %v3314_v1  ;;  %v2081_v44 = vmax.f32 %v1132_v34, 0.0  ;;  %v2083_v51 = vmax.f32 %v1173_v40, 0.0 }
 0x125   : > { %v1135_v43 = vpop.f32.mrf.mxu0  ;;  %v1176_v46 = vpop.f32.mrf.mxu1 }
 0x126   : > { %v2082_v45 = vmax.f32 %v1134_v41, 0.0  ;;  %v2084_v52 = vmax.f32 %v1175_v42, 0.0 }
 0x127   : > { %v1136_v53 = vpop.f32.mrf.mxu0  ;;  %v1177_v55 = vpop.f32.mrf.mxu1 }
 0x128   : > { %v2591_v54 = vpack.c.bf16 %v2082_v45, %v2081_v44  ;;  %v2592_v56 = vpack.c.bf16 %v2084_v52, %v2083_v51 }
 0x129   : > { %v1213_v57 = vpop.f32.mrf.mxu0  ;;  %v1254_v59 = vpop.f32.mrf.mxu1 }
 0x12a   : > { %2321 = vst [vmem:[%s3323_s29] sm:$0x77] %v2591_v54  ;;  %v1214_v58 = vadd.f32 %v1213_v57, %v3314_v1  ;;  %2322 = vst [vmem:[%s3323_s29 + $0x8] sm:$0x77] %v2592_v56  ;;  %v1255_v62 = vadd.f32 %v1254_v59, %v3314_v1 }
 0x12b   : > { %v1215_v63 = vpop.f32.mrf.mxu0  ;;  %v1256_v3 = vpop.f32.mrf.mxu1 }
 0x12c   : > { %v1216_v2 = vadd.f32 %v1215_v63, %v3314_v1  ;;  %v1257_v4 = vadd.f32 %v1256_v3, %v3314_v1  ;;  %v2085_v9 = vmax.f32 %v1214_v58, 0.0  ;;  %v2087_v13 = vmax.f32 %v1255_v62, 0.0 }
 0x12d   : > { %v1217_v8 = vpop.f32.mrf.mxu0  ;;  %v1258_v12 = vpop.f32.mrf.mxu1 }
 0x12e   : > { %v2086_v10 = vmax.f32 %v1216_v2, 0.0  ;;  %v2088_v14 = vmax.f32 %v1257_v4, 0.0 }
 0x12f   : > { %v1218_v60 = vpop.f32.mrf.mxu0  ;;  %v1259_v7 = vpop.f32.mrf.mxu1 }
 0x130   : > { %v2593_v61 = vpack.c.bf16 %v2086_v10, %v2085_v9  ;;  %v2594_v15 = vpack.c.bf16 %v2088_v14, %v2087_v13 }
 0x131   : > { %v1295_v16 = vpop.f32.mrf.mxu0  ;;  %v1336_v18 = vpop.f32.mrf.mxu1 }
 0x132   : > { %2323 = vst [vmem:[%s3323_s29 + $0x10] sm:$0x77] %v2593_v61  ;;  %v1296_v17 = vadd.f32 %v1295_v16, %v3314_v1  ;;  %2324 = vst [vmem:[%s3323_s29 + $0x18] sm:$0x77] %v2594_v15  ;;  %v1337_v38 = vadd.f32 %v1336_v18, %v3314_v1 }
 0x133   : > { %v1297_v19 = vpop.f32.mrf.mxu0  ;;  %v1338_v21 = vpop.f32.mrf.mxu1 }
 0x134   : > { %v1298_v20 = vadd.f32 %v1297_v19, %v3314_v1  ;;  %v1339_v22 = vadd.f32 %v1338_v21, %v3314_v1  ;;  %v2089_v24 = vmax.f32 %v1296_v17, 0.0  ;;  %v2091_v26 = vmax.f32 %v1337_v38, 0.0 }
 0x135   : > { %v1299_v23 = vpop.f32.mrf.mxu0  ;;  %v1340_v30 = vpop.f32.mrf.mxu1 }
 0x136   : > { %v2090_v25 = vmax.f32 %v1298_v20, 0.0  ;;  %v2092_v31 = vmax.f32 %v1339_v22, 0.0 }
 0x137   : > { %v1300_v27 = vpop.f32.mrf.mxu0  ;;  %v1341_v32 = vpop.f32.mrf.mxu1 }
 0x138   : > { %v2595_v28 = vpack.c.bf16 %v2090_v25, %v2089_v24  ;;  %v2596_v29 = vpack.c.bf16 %v2092_v31, %v2091_v26 }
 0x139   : > { %v1377_v33 = vpop.f32.mrf.mxu0  ;;  %v1418_v35 = vpop.f32.mrf.mxu1 }
 0x13a   : > { %2325 = vst [vmem:[%s3323_s29 + $0x20] sm:$0x77] %v2595_v28  ;;  %v1378_v47 = vadd.f32 %v1377_v33, %v3314_v1  ;;  %2326 = vst [vmem:[%s3323_s29 + $0x28] sm:$0x77] %v2596_v29  ;;  %v1419_v50 = vadd.f32 %v1418_v35, %v3314_v1 }
 0x13b   : > { %v1379_v36 = vpop.f32.mrf.mxu0  ;;  %v1420_v48 = vpop.f32.mrf.mxu1 }
 0x13c   : > { %v1380_v37 = vadd.f32 %v1379_v36, %v3314_v1  ;;  %v1421_v49 = vadd.f32 %v1420_v48, %v3314_v1  ;;  %v2093_v5 = vmax.f32 %v1378_v47, 0.0  ;;  %v2095_v39 = vmax.f32 %v1419_v50, 0.0 }
 0x13d   : > { %v1381_v0 = vpop.f32.mrf.mxu0  ;;  %v1422_v34 = vpop.f32.mrf.mxu1 }
 0x13e   : > { %v2094_v6 = vmax.f32 %v1380_v37, 0.0  ;;  %v2096_v40 = vmax.f32 %v1421_v49, 0.0 }
 0x13f   : > { %v1382_v41 = vpop.f32.mrf.mxu0  ;;  %v1423_v42 = vpop.f32.mrf.mxu1 }
 0x140   : > { %v2597_v11 = vpack.c.bf16 %v2094_v6, %v2093_v5  ;;  %v2598_v43 = vpack.c.bf16 %v2096_v40, %v2095_v39 }
 0x141   : > { %v1459_v44 = vpop.f32.mrf.mxu0  ;;  %v1500_v46 = vpop.f32.mrf.mxu1 }
 0x142   : > { %2327 = vst [vmem:[%s3323_s29 + $0x30] sm:$0x77] %v2597_v11  ;;  %v1460_v45 = vadd.f32 %v1459_v44, %v3314_v1  ;;  %2328 = vst [vmem:[%s3323_s29 + $0x38] sm:$0x77] %v2598_v43  ;;  %v1501_v51 = vadd.f32 %v1500_v46, %v3314_v1 }
 0x143   : > { %v1461_v52 = vpop.f32.mrf.mxu0  ;;  %v1502_v54 = vpop.f32.mrf.mxu1 }
 0x144   : > { %v1462_v53 = vadd.f32 %v1461_v52, %v3314_v1  ;;  %v1503_v55 = vadd.f32 %v1502_v54, %v3314_v1  ;;  %v2097_v57 = vmax.f32 %v1460_v45, 0.0  ;;  %v2099_v62 = vmax.f32 %v1501_v51, 0.0 }
 0x145   : > { %v1463_v56 = vpop.f32.mrf.mxu0  ;;  %v1504_v59 = vpop.f32.mrf.mxu1 }
 0x146   : > { %v2098_v58 = vmax.f32 %v1462_v53, 0.0  ;;  %v2100_v63 = vmax.f32 %v1503_v55, 0.0 }
 0x147   : > { %v1464_v2 = vpop.f32.mrf.mxu0  ;;  %v1505_v4 = vpop.f32.mrf.mxu1 }
 0x148   : > { %v2599_v3 = vpack.c.bf16 %v2098_v58, %v2097_v57  ;;  %v2600_v8 = vpack.c.bf16 %v2100_v63, %v2099_v62 }
 0x149   : > { %v1541_v9 = vpop.f32.mrf.mxu0  ;;  %v1582_v12 = vpop.f32.mrf.mxu1 }
 0x14a   : > { %2329 = vst [vmem:[%s3323_s29 + $0x40] sm:$0x77] %v2599_v3  ;;  %v1542_v10 = vadd.f32 %v1541_v9, %v3314_v1  ;;  %2330 = vst [vmem:[%s3323_s29 + $0x48] sm:$0x77] %v2600_v8  ;;  %v1583_v13 = vadd.f32 %v1582_v12, %v3314_v1 }
 0x14b   : > { %v1543_v14 = vpop.f32.mrf.mxu0  ;;  %v1584_v61 = vpop.f32.mrf.mxu1 }
 0x14c   : > { %v1544_v60 = vadd.f32 %v1543_v14, %v3314_v1  ;;  %v1585_v7 = vadd.f32 %v1584_v61, %v3314_v1  ;;  %v2101_v16 = vmax.f32 %v1542_v10, 0.0  ;;  %v2103_v38 = vmax.f32 %v1583_v13, 0.0 }
 0x14d   : > { %v1545_v15 = vpop.f32.mrf.mxu0  ;;  %v1586_v18 = vpop.f32.mrf.mxu1 }
 0x14e   : > { %v2102_v17 = vmax.f32 %v1544_v60, 0.0  ;;  %v2104_v19 = vmax.f32 %v1585_v7, 0.0 }
 0x14f   : > { %v1546_v20 = vpop.f32.mrf.mxu0  ;;  %v1587_v22 = vpop.f32.mrf.mxu1 }
 0x150   : > { %v2601_v21 = vpack.c.bf16 %v2102_v17, %v2101_v16  ;;  %v2602_v23 = vpack.c.bf16 %v2104_v19, %v2103_v38 }
 0x151   : > { %v1623_v24 = vpop.f32.mrf.mxu0  ;;  %v1664_v30 = vpop.f32.mrf.mxu1 }
 0x152   : > { %2331 = vst [vmem:[%s3323_s29 + $0x50] sm:$0x77] %v2601_v21  ;;  %v1624_v25 = vadd.f32 %v1623_v24, %v3314_v1  ;;  %2332 = vst [vmem:[%s3323_s29 + $0x58] sm:$0x77] %v2602_v23  ;;  %v1665_v26 = vadd.f32 %v1664_v30, %v3314_v1 }
 0x153   : > { %v1625_v31 = vpop.f32.mrf.mxu0  ;;  %v1666_v28 = vpop.f32.mrf.mxu1 }
 0x154   : > { %v1626_v27 = vadd.f32 %v1625_v31, %v3314_v1  ;;  %v1667_v32 = vadd.f32 %v1666_v28, %v3314_v1  ;;  %v2105_v33 = vmax.f32 %v1624_v25, 0.0  ;;  %v2107_v50 = vmax.f32 %v1665_v26, 0.0 }
 0x155   : > { %v1627_v29 = vpop.f32.mrf.mxu0  ;;  %v1668_v35 = vpop.f32.mrf.mxu1 }
 0x156   : > { %v2106_v47 = vmax.f32 %v1626_v27, 0.0  ;;  %v2108_v36 = vmax.f32 %v1667_v32, 0.0 }
 0x157   : > { %v1628_v37 = vpop.f32.mrf.mxu0  ;;  %v1669_v49 = vpop.f32.mrf.mxu1 }
 0x158   : > { %v2603_v48 = vpack.c.bf16 %v2106_v47, %v2105_v33  ;;  %v2604_v0 = vpack.c.bf16 %v2108_v36, %v2107_v50 }
 0x159   : > { %v1705_v5 = vpop.f32.mrf.mxu0  ;;  %v1746_v34 = vpop.f32.mrf.mxu1 }
 0x15a   : > { %2333 = vst [vmem:[%s3323_s29 + $0x60] sm:$0x77] %v2603_v48  ;;  %v1706_v6 = vadd.f32 %v1705_v5, %v3314_v1  ;;  %2334 = vst [vmem:[%s3323_s29 + $0x68] sm:$0x77] %v2604_v0  ;;  %v1747_v39 = vadd.f32 %v1746_v34, %v3314_v1 }
 0x15b   : > { %v1707_v40 = vpop.f32.mrf.mxu0  ;;  %v1748_v11 = vpop.f32.mrf.mxu1 }
 0x15c   : > { %v1708_v41 = vadd.f32 %v1707_v40, %v3314_v1  ;;  %v1749_v42 = vadd.f32 %v1748_v11, %v3314_v1  ;;  %v2109_v44 = vmax.f32 %v1706_v6, 0.0  ;;  %v2111_v51 = vmax.f32 %v1747_v39, 0.0 }
 0x15d   : > { %v1709_v43 = vpop.f32.mrf.mxu0  ;;  %v1750_v46 = vpop.f32.mrf.mxu1 }
 0x15e   : > { %v2110_v45 = vmax.f32 %v1708_v41, 0.0  ;;  %v2112_v52 = vmax.f32 %v1749_v42, 0.0 }
 0x15f   : > { %v1710_v53 = vpop.f32.mrf.mxu0  ;;  %v1751_v55 = vpop.f32.mrf.mxu1 }
 0x160   : > { %v2605_v54 = vpack.c.bf16 %v2110_v45, %v2109_v44  ;;  %v2606_v56 = vpack.c.bf16 %v2112_v52, %v2111_v51 }
 0x161   : > { %v1787_v57 = vpop.f32.mrf.mxu0  ;;  %v1828_v59 = vpop.f32.mrf.mxu1 }
 0x162   : > { %2335 = vst [vmem:[%s3323_s29 + $0x70] sm:$0x77] %v2605_v54  ;;  %v1788_v58 = vadd.f32 %v1787_v57, %v3314_v1  ;;  %2336 = vst [vmem:[%s3323_s29 + $0x78] sm:$0x77] %v2606_v56  ;;  %v1829_v62 = vadd.f32 %v1828_v59, %v3314_v1 }
 0x163   : > { %v1789_v63 = vpop.f32.mrf.mxu0  ;;  %v1830_v3 = vpop.f32.mrf.mxu1 }
 0x164   : > { %v1790_v2 = vadd.f32 %v1789_v63, %v3314_v1  ;;  %v1831_v4 = vadd.f32 %v1830_v3, %v3314_v1  ;;  %v2113_v9 = vmax.f32 %v1788_v58, 0.0  ;;  %v2115_v13 = vmax.f32 %v1829_v62, 0.0 }
 0x165   : > { %v1791_v8 = vpop.f32.mrf.mxu0  ;;  %v1832_v12 = vpop.f32.mrf.mxu1 }
 0x166   : > { %v2114_v10 = vmax.f32 %v1790_v2, 0.0  ;;  %v2116_v14 = vmax.f32 %v1831_v4, 0.0 }
 0x167   : > { %v1792_v60 = vpop.f32.mrf.mxu0  ;;  %v1833_v7 = vpop.f32.mrf.mxu1 }
 0x168   : > { %v2607_v61 = vpack.c.bf16 %v2114_v10, %v2113_v9  ;;  %v2608_v15 = vpack.c.bf16 %v2116_v14, %v2115_v13 }
 0x169   : > { %v1869_v16 = vpop.f32.mrf.mxu0  ;;  %v1910_v18 = vpop.f32.mrf.mxu1 }
 0x16a   : > { %2337 = vst [vmem:[%s3323_s29 + $0x80] sm:$0x77] %v2607_v61  ;;  %v1870_v17 = vadd.f32 %v1869_v16, %v3314_v1  ;;  %2338 = vst [vmem:[%s3323_s29 + $0x88] sm:$0x77] %v2608_v15  ;;  %v1911_v38 = vadd.f32 %v1910_v18, %v3314_v1 }
 0x16b   : > { %v1871_v19 = vpop.f32.mrf.mxu0  ;;  %v1912_v21 = vpop.f32.mrf.mxu1 }
 0x16c   : > { %v1872_v20 = vadd.f32 %v1871_v19, %v3314_v1  ;;  %v1913_v22 = vadd.f32 %v1912_v21, %v3314_v1  ;;  %v2117_v24 = vmax.f32 %v1870_v17, 0.0  ;;  %v2119_v26 = vmax.f32 %v1911_v38, 0.0 }
 0x16d   : > { %v1873_v23 = vpop.f32.mrf.mxu0  ;;  %v1914_v30 = vpop.f32.mrf.mxu1 }
 0x16e   : > { %v2118_v25 = vmax.f32 %v1872_v20, 0.0  ;;  %v2120_v31 = vmax.f32 %v1913_v22, 0.0 }
 0x16f   : > { %v1874_v27 = vpop.f32.mrf.mxu0  ;;  %v1915_v32 = vpop.f32.mrf.mxu1 }
 0x170   : > { %v2609_v28 = vpack.c.bf16 %v2118_v25, %v2117_v24  ;;  %v2610_v29 = vpack.c.bf16 %v2120_v31, %v2119_v26 }
 0x171   : > { %v1951_v33 = vpop.f32.mrf.mxu0  ;;  %v1992_v35 = vpop.f32.mrf.mxu1 }
 0x172   : > { %2339 = vst [vmem:[%s3323_s29 + $0x90] sm:$0x77] %v2609_v28  ;;  %v1952_v47 = vadd.f32 %v1951_v33, %v3314_v1  ;;  %2340 = vst [vmem:[%s3323_s29 + $0x98] sm:$0x77] %v2610_v29  ;;  %v1993_v50 = vadd.f32 %v1992_v35, %v3314_v1 }
 0x173   : > { %v1953_v36 = vpop.f32.mrf.mxu0  ;;  %v1994_v48 = vpop.f32.mrf.mxu1 }
 0x174   : > { %v1954_v37 = vadd.f32 %v1953_v36, %v3314_v1  ;;  %v1995_v49 = vadd.f32 %v1994_v48, %v3314_v1  ;;  %v2121_v5 = vmax.f32 %v1952_v47, 0.0  ;;  %v2123_v39 = vmax.f32 %v1993_v50, 0.0 }
 0x175   : > { %v1955_v0 = vpop.f32.mrf.mxu0  ;;  %v1996_v34 = vpop.f32.mrf.mxu1 }
 0x176   : > { %v2122_v6 = vmax.f32 %v1954_v37, 0.0  ;;  %v2124_v40 = vmax.f32 %v1995_v49, 0.0 }
 0x177   : > { %v1956_v41 = vpop.f32.mrf.mxu0  ;;  %v1997_v42 = vpop.f32.mrf.mxu1 }
 0x178   : > { %v2611_v11 = vpack.c.bf16 %v2122_v6, %v2121_v5  ;;  %v2612_v43 = vpack.c.bf16 %v2124_v40, %v2123_v39 }
 0x179   : > { %v2033_v44 = vpop.f32.mrf.mxu0  ;;  %v2074_v46 = vpop.f32.mrf.mxu1 }
 0x17a   : > { %2341 = vst [vmem:[%s3323_s29 + $0xa0] sm:$0x77] %v2611_v11  ;;  %v2034_v45 = vadd.f32 %v2033_v44, %v3314_v1  ;;  %2342 = vst [vmem:[%s3323_s29 + $0xa8] sm:$0x77] %v2612_v43  ;;  %v2075_v51 = vadd.f32 %v2074_v46, %v3314_v1 }
 0x17b   : > { %v2035_v52 = vpop.f32.mrf.mxu0  ;;  %v2076_v54 = vpop.f32.mrf.mxu1 }
 0x17c   : > { %v2036_v53 = vadd.f32 %v2035_v52, %v3314_v1  ;;  %v2077_v55 = vadd.f32 %v2076_v54, %v3314_v1  ;;  %v2125_v57 = vmax.f32 %v2034_v45, 0.0  ;;  %v2127_v62 = vmax.f32 %v2075_v51, 0.0 }
 0x17d   : > { %v2037_v56 = vpop.f32.mrf.mxu0  ;;  %v2078_v59 = vpop.f32.mrf.mxu1 }
 0x17e   : > { %v2126_v58 = vmax.f32 %v2036_v53, 0.0  ;;  %v2128_v63 = vmax.f32 %v2077_v55, 0.0 }
 0x17f   : > { %v2038_v2 = vpop.f32.mrf.mxu0  ;;  %v2079_v4 = vpop.f32.mrf.mxu1 }
 0x180   : > { %v2613_v3 = vpack.c.bf16 %v2126_v58, %v2125_v57  ;;  %v2614_v8 = vpack.c.bf16 %v2128_v63, %v2127_v62 }
 0x182   : > { %2343 = vst [vmem:[%s3323_s29 + $0xb0] sm:$0x77] %v2613_v3  ;;  %2344 = vst [vmem:[%s3323_s29 + $0xb8] sm:$0x77] %v2614_v8 }
 0x183 PF: > { %s13_s18 = sadd.s32 1, %s2732_s18   ;;  %s3418_s12 = smov %s2712_s13 }
 0x184   : > { %p10_p12 = scmp.ge.s32.totalorder %s13_s18, 14   ;;  %s3419_s13 = smov %s2807_s25 }
 0x185   : > { %s3420_s14 = smov %s2724_s16  ;;  %s3421_s15 = smov %s2728_s17 }
 0x186   : > { %s3422_s16 = smov %s3425_s19  ;;  %s3423_s17 = smov %s3429_s20 }
 0x187   :  { %12 = sbr.rel (!%p10_p12) target bundleno = 4 (0x4), region = 90 }

// kernel: net_forward.9
= control target key start
LH: loop header
LB: loop body
LE: loop exit
PB: predicated region body
PF: predicated region fallthrough
CT: control target
= control target key end

     0   :  { %s1622_s0 = inlined_call_operand.vmem [shape: bf16[12,4096], index: 0, kind: input, shape index: {}]   ;;  %s1623_s1 = inlined_call_operand.vmem [shape: bf16[12,4096], index: 1, kind: input, shape index: {}]   ;;  %s1624_s2 = inlined_call_operand.vmem [shape: bf16[12,4096], index: 2, kind: input, shape index: {}]   ;;  %s1625_s3 = inlined_call_operand.vmem [shape: bf16[12,4096], index: 3, kind: input, shape index: {}]   ;;  %s1626_s4 = inlined_call_operand.vmem [shape: bf16[12,4096], index: 4, kind: input, shape index: {}]   ;;  %s1627_s5 = inlined_call_operand.vmem [shape: bf16[12,4096], index: 5, kind: input, shape index: {}]   ;;  %s1628_s6 = inlined_call_operand.vmem [shape: bf16[12,4096], index: 6, kind: input, shape index: {}]   ;;  %s1629_s7 = inlined_call_operand.vmem [shape: bf16[12,4096], index: 7, kind: input, shape index: {}]   ;;  %s1630_s8 = inlined_call_operand.vmem [shape: bf16[12,4096], index: 8, kind: input, shape index: {}]   ;;  %s1631_s9 = inlined_call_operand.vmem [shape: bf16[12,4096], index: 9, kind: output, shape index: {}]  }
   0x1   :  { %v32_v0 = vld [vmem:[%s1622_s0] sm:$0xff]  ;;  %v33_v6 = vld [vmem:[%s1622_s0 + $0x8] sm:$0xff]  ;;  %v34_v15 = vld [vmem:[%s1622_s0 + $0x10] sm:$0xff] }
   0x2   :  { %v64_v1 = vld [vmem:[%s1623_s1] sm:$0xff]  ;;  %v65_v7 = vld [vmem:[%s1623_s1 + $0x8] sm:$0xff]  ;;  %v66_v16 = vld [vmem:[%s1623_s1 + $0x10] sm:$0xff] }
   0x3   :  { %v128_v2 = vld [vmem:[%s1624_s2] sm:$0xff]  ;;  %v96_v3 = vmax.bf16 %v64_v1, %v32_v0  ;;  %v129_v8 = vld [vmem:[%s1624_s2 + $0x8] sm:$0xff]  ;;  %v97_v10 = vmax.bf16 %v65_v7, %v33_v6  ;;  %v130_v17 = vld [vmem:[%s1624_s2 + $0x10] sm:$0xff]  ;;  %v98_v20 = vmax.bf16 %v66_v16, %v34_v15 }
   0x4   :  { %v192_v4 = vld [vmem:[%s1625_s3] sm:$0xff]  ;;  %v193_v13 = vld [vmem:[%s1625_s3 + $0x8] sm:$0xff]  ;;  %v194_v24 = vld [vmem:[%s1625_s3 + $0x10] sm:$0xff] }
   0x5   :  { %v160_v5 = vmax.bf16 %v128_v2, %v96_v3  ;;  %v256_v9 = vld [vmem:[%s1626_s4] sm:$0xff]  ;;  %v161_v14 = vmax.bf16 %v129_v8, %v97_v10  ;;  %v257_v19 = vld [vmem:[%s1626_s4 + $0x8] sm:$0xff]  ;;  %v162_v26 = vmax.bf16 %v130_v17, %v98_v20  ;;  %v35_v27 = vld [vmem:[%s1622_s0 + $0x18] sm:$0xff] }
   0x6   :  { %v320_v12 = vld [vmem:[%s1627_s5] sm:$0xff]  ;;  %v321_v23 = vld [vmem:[%s1627_s5 + $0x8] sm:$0xff]  ;;  %v67_v28 = vld [vmem:[%s1623_s1 + $0x18] sm:$0xff] }
   0x7   :  { %v224_v11 = vmax.bf16 %v192_v4, %v160_v5  ;;  %v384_v21 = vld [vmem:[%s1628_s6] sm:$0xff]  ;;  %v225_v22 = vmax.bf16 %v193_v13, %v161_v14  ;;  %v131_v29 = vld [vmem:[%s1624_s2 + $0x18] sm:$0xff]  ;;  %v258_v33 = vld [vmem:[%s1626_s4 + $0x10] sm:$0xff]  ;;  %v99_v34 = vmax.bf16 %v67_v28, %v35_v27  ;;  %v226_v37 = vmax.bf16 %v194_v24, %v162_v26 }
   0x8   :  { %v448_v30 = vld [vmem:[%s1629_s7] sm:$0xff]  ;;  %v385_v36 = vld [vmem:[%s1628_s6 + $0x8] sm:$0xff]  ;;  %v322_v38 = vld [vmem:[%s1627_s5 + $0x10] sm:$0xff] }
   0x9   :  { %v288_v18 = vmax.bf16 %v256_v9, %v224_v11  ;;  %v512_v31 = vld [vmem:[%s1630_s8] sm:$0xff]  ;;  %v289_v32 = vmax.bf16 %v257_v19, %v225_v22  ;;  %v195_v39 = vld [vmem:[%s1625_s3 + $0x18] sm:$0xff]  ;;  %v163_v41 = vmax.bf16 %v131_v29, %v99_v34  ;;  %v449_v46 = vld [vmem:[%s1629_s7 + $0x8] sm:$0xff]  ;;  %v290_v48 = vmax.bf16 %v258_v33, %v226_v37 }
   0xa   :  { %v36_v42 = vld [vmem:[%s1622_s0 + $0x20] sm:$0xff]  ;;  %v513_v47 = vld [vmem:[%s1630_s8 + $0x8] sm:$0xff]  ;;  %v259_v49 = vld [vmem:[%s1626_s4 + $0x18] sm:$0xff] }
   0xb   :  { %v352_v25 = vmax.bf16 %v320_v12, %v288_v18  ;;  %v353_v40 = vmax.bf16 %v321_v23, %v289_v32  ;;  %v68_v43 = vld [vmem:[%s1623_s1 + $0x20] sm:$0xff]  ;;  %v386_v52 = vld [vmem:[%s1628_s6 + $0x10] sm:$0xff]  ;;  %v227_v53 = vmax.bf16 %v195_v39, %v163_v41  ;;  %v323_v54 = vld [vmem:[%s1627_s5 + $0x18] sm:$0xff]  ;;  %v354_v57 = vmax.bf16 %v322_v38, %v290_v48 }
   0xc   :  { %v132_v44 = vld [vmem:[%s1624_s2 + $0x20] sm:$0xff]  ;;  %v100_v50 = vmax.bf16 %v68_v43, %v36_v42  ;;  %v37_v59 = vld [vmem:[%s1622_s0 + $0x28] sm:$0xff]  ;;  %v450_v63 = vld [vmem:[%s1629_s7 + $0x10] sm:$0xff] }
   0xd   :  { %v416_v35 = vmax.bf16 %v384_v21, %v352_v25  ;;  %v417_v51 = vmax.bf16 %v385_v36, %v353_v40  ;;  %v196_v55 = vld [vmem:[%s1625_s3 + $0x20] sm:$0xff]  ;;  %v69_v60 = vld [vmem:[%s1623_s1 + $0x28] sm:$0xff]  ;;  %v514_v0 = vld [vmem:[%s1630_s8 + $0x10] sm:$0xff]  ;;  %v291_v1 = vmax.bf16 %v259_v49, %v227_v53  ;;  %v418_v4 = vmax.bf16 %v386_v52, %v354_v57 }
   0xe   :  { %v164_v58 = vmax.bf16 %v132_v44, %v100_v50  ;;  %v133_v61 = vld [vmem:[%s1624_s2 + $0x28] sm:$0xff]  ;;  %v260_v2 = vld [vmem:[%s1626_s4 + $0x20] sm:$0xff]  ;;  %v101_v3 = vmax.bf16 %v69_v60, %v37_v59  ;;  %v387_v5 = vld [vmem:[%s1628_s6 + $0x18] sm:$0xff] }
   0xf   :  { %v480_v45 = vmax.bf16 %v448_v30, %v416_v35  ;;  %v481_v62 = vmax.bf16 %v449_v46, %v417_v51  ;;  %v324_v7 = vld [vmem:[%s1627_s5 + $0x20] sm:$0xff]  ;;  %v197_v8 = vld [vmem:[%s1625_s3 + $0x28] sm:$0xff]  ;;  %v355_v10 = vmax.bf16 %v323_v54, %v291_v1  ;;  %v38_v12 = vld [vmem:[%s1622_s0 + $0x30] sm:$0xff]  ;;  %v482_v15 = vmax.bf16 %v450_v63, %v418_v4 }
  0x10   :  { %v228_v6 = vmax.bf16 %v196_v55, %v164_v58  ;;  %v165_v11 = vmax.bf16 %v133_v61, %v101_v3  ;;  %v70_v13 = vld [vmem:[%s1623_s1 + $0x30] sm:$0xff]  ;;  %v451_v16 = vld [vmem:[%s1629_s7 + $0x18] sm:$0xff]  ;;  %v261_v19 = vld [vmem:[%s1626_s4 + $0x28] sm:$0xff] }
  0x11   :  { %v544_v56 = vmax.bf16 %v512_v31, %v480_v45  ;;  %v545_v9 = vmax.bf16 %v513_v47, %v481_v62  ;;  %v134_v14 = vld [vmem:[%s1624_s2 + $0x30] sm:$0xff]  ;;  %v515_v17 = vld [vmem:[%s1630_s8 + $0x18] sm:$0xff]  ;;  %v102_v20 = vmax.bf16 %v70_v13, %v38_v12  ;;  %v419_v21 = vmax.bf16 %v387_v5, %v355_v10  ;;  %v388_v22 = vld [vmem:[%s1628_s6 + $0x20] sm:$0xff] }
  0x12   :  { %v292_v18 = vmax.bf16 %v260_v2, %v228_v6  ;;  %v229_v23 = vmax.bf16 %v197_v8, %v165_v11  ;;  %v325_v24 = vld [vmem:[%s1627_s5 + $0x28] sm:$0xff]  ;;  %v198_v25 = vld [vmem:[%s1625_s3 + $0x30] sm:$0xff]  ;;  %v546_v26 = vmax.bf16 %v514_v0, %v482_v15  ;;  %v39_v29 = vld [vmem:[%s1622_s0 + $0x38] sm:$0xff] }
  0x13   :  { %576 = vst [vmem:[%s1631_s9] sm:$0xff] %v544_v56  ;;  %577 = vst [vmem:[%s1631_s9 + $0x8] sm:$0xff] %v545_v9  ;;  %v166_v28 = vmax.bf16 %v134_v14, %v102_v20  ;;  %v71_v30 = vld [vmem:[%s1623_s1 + $0x38] sm:$0xff]  ;;  %v483_v32 = vmax.bf16 %v451_v16, %v419_v21  ;;  %v452_v33 = vld [vmem:[%s1629_s7 + $0x20] sm:$0xff] }
  0x14   :  { %v356_v27 = vmax.bf16 %v324_v7, %v292_v18  ;;  %v135_v31 = vld [vmem:[%s1624_s2 + $0x38] sm:$0xff]  ;;  %v516_v34 = vld [vmem:[%s1630_s8 + $0x20] sm:$0xff]  ;;  %v293_v35 = vmax.bf16 %v261_v19, %v229_v23  ;;  %v262_v36 = vld [vmem:[%s1626_s4 + $0x30] sm:$0xff]  ;;  %v103_v37 = vmax.bf16 %v71_v30, %v39_v29  ;;  %578 = vst [vmem:[%s1631_s9 + $0x10] sm:$0xff] %v546_v26 }
  0x15   :  { %v389_v39 = vld [vmem:[%s1628_s6 + $0x28] sm:$0xff]  ;;  %v230_v40 = vmax.bf16 %v198_v25, %v166_v28  ;;  %v326_v41 = vld [vmem:[%s1627_s5 + $0x30] sm:$0xff]  ;;  %v199_v42 = vld [vmem:[%s1625_s3 + $0x38] sm:$0xff]  ;;  %v547_v43 = vmax.bf16 %v515_v17, %v483_v32 }
  0x16   :  { %v420_v38 = vmax.bf16 %v388_v22, %v356_v27  ;;  %v357_v44 = vmax.bf16 %v325_v24, %v293_v35  ;;  %v167_v45 = vmax.bf16 %v135_v31, %v103_v37  ;;  %v40_v46 = vld [vmem:[%s1622_s0 + $0x40] sm:$0xff]  ;;  %v453_v50 = vld [vmem:[%s1629_s7 + $0x28] sm:$0xff]  ;;  %v263_v53 = vld [vmem:[%s1626_s4 + $0x38] sm:$0xff] }
  0x17   :  { %v72_v47 = vld [vmem:[%s1623_s1 + $0x40] sm:$0xff]  ;;  %v517_v51 = vld [vmem:[%s1630_s8 + $0x28] sm:$0xff]  ;;  %v294_v52 = vmax.bf16 %v262_v36, %v230_v40  ;;  %579 = vst [vmem:[%s1631_s9 + $0x18] sm:$0xff] %v547_v43  ;;  %v390_v56 = vld [vmem:[%s1628_s6 + $0x30] sm:$0xff] }
  0x18   :  { %v136_v48 = vld [vmem:[%s1624_s2 + $0x40] sm:$0xff]  ;;  %v484_v49 = vmax.bf16 %v452_v33, %v420_v38  ;;  %v104_v54 = vmax.bf16 %v72_v47, %v40_v46  ;;  %v421_v55 = vmax.bf16 %v389_v39, %v357_v44  ;;  %v231_v57 = vmax.bf16 %v199_v42, %v167_v45  ;;  %v327_v58 = vld [vmem:[%s1627_s5 + $0x38] sm:$0xff]  ;;  %v41_v63 = vld [vmem:[%s1622_s0 + $0x48] sm:$0xff] }
  0x19   :  { %v200_v59 = vld [vmem:[%s1625_s3 + $0x40] sm:$0xff]  ;;  %v358_v61 = vmax.bf16 %v326_v41, %v294_v52  ;;  %v73_v0 = vld [vmem:[%s1623_s1 + $0x48] sm:$0xff]  ;;  %v454_v3 = vld [vmem:[%s1629_s7 + $0x30] sm:$0xff] }
  0x1a   :  { %v548_v60 = vmax.bf16 %v516_v34, %v484_v49  ;;  %v168_v62 = vmax.bf16 %v136_v48, %v104_v54  ;;  %v137_v1 = vld [vmem:[%s1624_s2 + $0x48] sm:$0xff]  ;;  %v485_v2 = vmax.bf16 %v453_v50, %v421_v55  ;;  %v518_v4 = vld [vmem:[%s1630_s8 + $0x30] sm:$0xff]  ;;  %v295_v5 = vmax.bf16 %v263_v53, %v231_v57  ;;  %v264_v6 = vld [vmem:[%s1626_s4 + $0x40] sm:$0xff] }
  0x1b   :  { %v105_v7 = vmax.bf16 %v73_v0, %v41_v63  ;;  %v422_v8 = vmax.bf16 %v390_v56, %v358_v61  ;;  %v391_v9 = vld [vmem:[%s1628_s6 + $0x38] sm:$0xff]  ;;  %v328_v11 = vld [vmem:[%s1627_s5 + $0x40] sm:$0xff]  ;;  %v201_v12 = vld [vmem:[%s1625_s3 + $0x48] sm:$0xff] }
  0x1c   :  { %580 = vst [vmem:[%s1631_s9 + $0x20] sm:$0xff] %v548_v60  ;;  %v232_v10 = vmax.bf16 %v200_v59, %v168_v62  ;;  %v549_v13 = vmax.bf16 %v517_v51, %v485_v2  ;;  %v359_v14 = vmax.bf16 %v327_v58, %v295_v5  ;;  %v42_v16 = vld [vmem:[%s1622_s0 + $0x50] sm:$0xff]  ;;  %v455_v20 = vld [vmem:[%s1629_s7 + $0x38] sm:$0xff]  ;;  %v265_v23 = vld [vmem:[%s1626_s4 + $0x48] sm:$0xff] }
  0x1d   :  { %v169_v15 = vmax.bf16 %v137_v1, %v105_v7  ;;  %v74_v17 = vld [vmem:[%s1623_s1 + $0x50] sm:$0xff]  ;;  %v486_v19 = vmax.bf16 %v454_v3, %v422_v8  ;;  %v519_v21 = vld [vmem:[%s1630_s8 + $0x38] sm:$0xff]  ;;  %v392_v26 = vld [vmem:[%s1628_s6 + $0x40] sm:$0xff] }
  0x1e   :  { %v138_v18 = vld [vmem:[%s1624_s2 + $0x50] sm:$0xff]  ;;  %v296_v22 = vmax.bf16 %v264_v6, %v232_v10  ;;  %v106_v24 = vmax.bf16 %v74_v17, %v42_v16  ;;  %581 = vst [vmem:[%s1631_s9 + $0x28] sm:$0xff] %v549_v13  ;;  %v423_v25 = vmax.bf16 %v391_v9, %v359_v14  ;;  %v329_v28 = vld [vmem:[%s1627_s5 + $0x48] sm:$0xff]  ;;  %v43_v33 = vld [vmem:[%s1622_s0 + $0x58] sm:$0xff] }
  0x1f   :  { %v233_v27 = vmax.bf16 %v201_v12, %v169_v15  ;;  %v202_v29 = vld [vmem:[%s1625_s3 + $0x50] sm:$0xff]  ;;  %v550_v30 = vmax.bf16 %v518_v4, %v486_v19  ;;  %v75_v34 = vld [vmem:[%s1623_s1 + $0x58] sm:$0xff]  ;;  %v456_v37 = vld [vmem:[%s1629_s7 + $0x40] sm:$0xff] }
  0x20   :  { %v360_v31 = vmax.bf16 %v328_v11, %v296_v22  ;;  %v170_v32 = vmax.bf16 %v138_v18, %v106_v24  ;;  %v139_v35 = vld [vmem:[%s1624_s2 + $0x58] sm:$0xff]  ;;  %v487_v36 = vmax.bf16 %v455_v20, %v423_v25  ;;  %v520_v38 = vld [vmem:[%s1630_s8 + $0x40] sm:$0xff]  ;;  %v266_v40 = vld [vmem:[%s1626_s4 + $0x50] sm:$0xff]  ;;  %v107_v41 = vmax.bf16 %v75_v34, %v43_v33 }
  0x21   :  { %v297_v39 = vmax.bf16 %v265_v23, %v233_v27  ;;  %582 = vst [vmem:[%s1631_s9 + $0x30] sm:$0xff] %v550_v30  ;;  %v393_v43 = vld [vmem:[%s1628_s6 + $0x48] sm:$0xff]  ;;  %v330_v45 = vld [vmem:[%s1627_s5 + $0x50] sm:$0xff]  ;;  %v203_v46 = vld [vmem:[%s1625_s3 + $0x58] sm:$0xff] }
  0x22   :  { %v424_v42 = vmax.bf16 %v392_v26, %v360_v31  ;;  %v234_v44 = vmax.bf16 %v202_v29, %v170_v32  ;;  %v551_v47 = vmax.bf16 %v519_v21, %v487_v36  ;;  %v171_v49 = vmax.bf16 %v139_v35, %v107_v41  ;;  %v44_v50 = vld [vmem:[%s1622_s0 + $0x60] sm:$0xff]  ;;  %v457_v54 = vld [vmem:[%s1629_s7 + $0x48] sm:$0xff]  ;;  %v267_v57 = vld [vmem:[%s1626_s4 + $0x58] sm:$0xff] }
  0x23   :  { %v361_v48 = vmax.bf16 %v329_v28, %v297_v39  ;;  %v76_v51 = vld [vmem:[%s1623_s1 + $0x60] sm:$0xff]  ;;  %v521_v55 = vld [vmem:[%s1630_s8 + $0x48] sm:$0xff]  ;;  %v394_v60 = vld [vmem:[%s1628_s6 + $0x50] sm:$0xff] }
  0x24   :  { %v140_v52 = vld [vmem:[%s1624_s2 + $0x60] sm:$0xff]  ;;  %v488_v53 = vmax.bf16 %v456_v37, %v424_v42  ;;  %v298_v56 = vmax.bf16 %v266_v40, %v234_v44  ;;  %v108_v58 = vmax.bf16 %v76_v51, %v44_v50  ;;  %583 = vst [vmem:[%s1631_s9 + $0x38] sm:$0xff] %v551_v47  ;;  %v235_v61 = vmax.bf16 %v203_v46, %v171_v49  ;;  %v331_v62 = vld [vmem:[%s1627_s5 + $0x58] sm:$0xff]  ;;  %v45_v3 = vld [vmem:[%s1622_s0 + $0x68] sm:$0xff] }
  0x25   :  { %v425_v59 = vmax.bf16 %v393_v43, %v361_v48  ;;  %v204_v63 = vld [vmem:[%s1625_s3 + $0x60] sm:$0xff]  ;;  %v77_v4 = vld [vmem:[%s1623_s1 + $0x68] sm:$0xff]  ;;  %v458_v7 = vld [vmem:[%s1629_s7 + $0x50] sm:$0xff] }
  0x26   :  { %v552_v0 = vmax.bf16 %v520_v38, %v488_v53  ;;  %v362_v1 = vmax.bf16 %v330_v45, %v298_v56  ;;  %v172_v2 = vmax.bf16 %v140_v52, %v108_v58  ;;  %v141_v5 = vld [vmem:[%s1624_s2 + $0x68] sm:$0xff]  ;;  %v522_v8 = vld [vmem:[%s1630_s8 + $0x50] sm:$0xff]  ;;  %v299_v9 = vmax.bf16 %v267_v57, %v235_v61  ;;  %v268_v10 = vld [vmem:[%s1626_s4 + $0x60] sm:$0xff] }
  0x27   :  { %v489_v6 = vmax.bf16 %v457_v54, %v425_v59  ;;  %v109_v11 = vmax.bf16 %v77_v4, %v45_v3  ;;  %v395_v13 = vld [vmem:[%s1628_s6 + $0x58] sm:$0xff]  ;;  %v332_v15 = vld [vmem:[%s1627_s5 + $0x60] sm:$0xff]  ;;  %v205_v16 = vld [vmem:[%s1625_s3 + $0x68] sm:$0xff] }
  0x28   :  { %584 = vst [vmem:[%s1631_s9 + $0x40] sm:$0xff] %v552_v0  ;;  %v426_v12 = vmax.bf16 %v394_v60, %v362_v1  ;;  %v236_v14 = vmax.bf16 %v204_v63, %v172_v2  ;;  %v363_v18 = vmax.bf16 %v331_v62, %v299_v9  ;;  %v46_v20 = vld [vmem:[%s1622_s0 + $0x70] sm:$0xff]  ;;  %v459_v24 = vld [vmem:[%s1629_s7 + $0x58] sm:$0xff]  ;;  %v269_v27 = vld [vmem:[%s1626_s4 + $0x68] sm:$0xff] }
  0x29   :  { %v553_v17 = vmax.bf16 %v521_v55, %v489_v6  ;;  %v173_v19 = vmax.bf16 %v141_v5, %v109_v11  ;;  %v78_v21 = vld [vmem:[%s1623_s1 + $0x70] sm:$0xff]  ;;  %v523_v25 = vld [vmem:[%s1630_s8 + $0x58] sm:$0xff]  ;;  %v396_v30 = vld [vmem:[%s1628_s6 + $0x60] sm:$0xff] }
  0x2a   :  { %v142_v22 = vld [vmem:[%s1624_s2 + $0x70] sm:$0xff]  ;;  %v490_v23 = vmax.bf16 %v458_v7, %v426_v12  ;;  %v300_v26 = vmax.bf16 %v268_v10, %v236_v14  ;;  %v110_v28 = vmax.bf16 %v78_v21, %v46_v20  ;;  %v427_v29 = vmax.bf16 %v395_v13, %v363_v18  ;;  %v333_v32 = vld [vmem:[%s1627_s5 + $0x68] sm:$0xff]  ;;  %v47_v37 = vld [vmem:[%s1622_s0 + $0x78] sm:$0xff] }
  0x2b   :  { %585 = vst [vmem:[%s1631_s9 + $0x48] sm:$0xff] %v553_v17  ;;  %v237_v31 = vmax.bf16 %v205_v16, %v173_v19  ;;  %v206_v33 = vld [vmem:[%s1625_s3 + $0x70] sm:$0xff]  ;;  %v79_v38 = vld [vmem:[%s1623_s1 + $0x78] sm:$0xff]  ;;  %v460_v41 = vld [vmem:[%s1629_s7 + $0x60] sm:$0xff] }
  0x2c   :  { %v554_v34 = vmax.bf16 %v522_v8, %v490_v23  ;;  %v364_v35 = vmax.bf16 %v332_v15, %v300_v26  ;;  %v174_v36 = vmax.bf16 %v142_v22, %v110_v28  ;;  %v143_v39 = vld [vmem:[%s1624_s2 + $0x78] sm:$0xff]  ;;  %v491_v40 = vmax.bf16 %v459_v24, %v427_v29  ;;  %v524_v42 = vld [vmem:[%s1630_s8 + $0x60] sm:$0xff]  ;;  %v270_v44 = vld [vmem:[%s1626_s4 + $0x70] sm:$0xff] }
  0x2d   :  { %v301_v43 = vmax.bf16 %v269_v27, %v237_v31  ;;  %v111_v45 = vmax.bf16 %v79_v38, %v47_v37  ;;  %v397_v47 = vld [vmem:[%s1628_s6 + $0x68] sm:$0xff]  ;;  %v334_v49 = vld [vmem:[%s1627_s5 + $0x70] sm:$0xff]  ;;  %v207_v50 = vld [vmem:[%s1625_s3 + $0x78] sm:$0xff] }
  0x2e   :  { %586 = vst [vmem:[%s1631_s9 + $0x50] sm:$0xff] %v554_v34  ;;  %v428_v46 = vmax.bf16 %v396_v30, %v364_v35  ;;  %v238_v48 = vmax.bf16 %v206_v33, %v174_v36  ;;  %v555_v51 = vmax.bf16 %v523_v25, %v491_v40  ;;  %v48_v54 = vld [vmem:[%s1622_s0 + $0x80] sm:$0x33]  ;;  %v461_v58 = vld [vmem:[%s1629_s7 + $0x68] sm:$0xff]  ;;  %v271_v61 = vld [vmem:[%s1626_s4 + $0x78] sm:$0xff] }
  0x2f   :  { %v365_v52 = vmax.bf16 %v333_v32, %v301_v43  ;;  %v175_v53 = vmax.bf16 %v143_v39, %v111_v45  ;;  %v80_v55 = vld [vmem:[%s1623_s1 + $0x80] sm:$0x33]  ;;  %v525_v59 = vld [vmem:[%s1630_s8 + $0x68] sm:$0xff]  ;;  %v398_v0 = vld [vmem:[%s1628_s6 + $0x70] sm:$0xff] }
  0x30   :  { %v144_v56 = vld [vmem:[%s1624_s2 + $0x80] sm:$0x33]  ;;  %v492_v57 = vmax.bf16 %v460_v41, %v428_v46  ;;  %v302_v60 = vmax.bf16 %v270_v44, %v238_v48  ;;  %v112_v62 = vmax.bf16 %v80_v55, %v48_v54  ;;  %587 = vst [vmem:[%s1631_s9 + $0x58] sm:$0xff] %v555_v51  ;;  %v335_v2 = vld [vmem:[%s1627_s5 + $0x78] sm:$0xff]  ;;  %v49_v7 = vld [vmem:[%s1622_s0 + $0x88] sm:$0x33] }
  0x31   :  { %v429_v63 = vmax.bf16 %v397_v47, %v365_v52  ;;  %v239_v1 = vmax.bf16 %v207_v50, %v175_v53  ;;  %v208_v3 = vld [vmem:[%s1625_s3 + $0x80] sm:$0x33]  ;;  %v81_v8 = vld [vmem:[%s1623_s1 + $0x88] sm:$0x33]  ;;  %v462_v11 = vld [vmem:[%s1629_s7 + $0x70] sm:$0xff] }
  0x32   :  { %v556_v4 = vmax.bf16 %v524_v42, %v492_v57  ;;  %v366_v5 = vmax.bf16 %v334_v49, %v302_v60  ;;  %v176_v6 = vmax.bf16 %v144_v56, %v112_v62  ;;  %v145_v9 = vld [vmem:[%s1624_s2 + $0x88] sm:$0x33]  ;;  %v526_v12 = vld [vmem:[%s1630_s8 + $0x70] sm:$0xff]  ;;  %v272_v14 = vld [vmem:[%s1626_s4 + $0x80] sm:$0x33]  ;;  %v113_v15 = vmax.bf16 %v81_v8, %v49_v7 }
  0x33   :  { %v493_v10 = vmax.bf16 %v461_v58, %v429_v63  ;;  %v303_v13 = vmax.bf16 %v271_v61, %v239_v1  ;;  %v399_v17 = vld [vmem:[%s1628_s6 + $0x78] sm:$0xff]  ;;  %v336_v19 = vld [vmem:[%s1627_s5 + $0x80] sm:$0x33]  ;;  %v209_v20 = vld [vmem:[%s1625_s3 + $0x88] sm:$0x33] }
  0x34   :  { %588 = vst [vmem:[%s1631_s9 + $0x60] sm:$0xff] %v556_v4  ;;  %v430_v16 = vmax.bf16 %v398_v0, %v366_v5  ;;  %v240_v18 = vmax.bf16 %v208_v3, %v176_v6  ;;  %v177_v23 = vmax.bf16 %v145_v9, %v113_v15  ;;  %v50_v24 = vld [vmem:[%s1622_s0 + $0x90] sm:$0x33]  ;;  %v463_v28 = vld [vmem:[%s1629_s7 + $0x78] sm:$0xff]  ;;  %v273_v31 = vld [vmem:[%s1626_s4 + $0x88] sm:$0x33] }
  0x35   :  { %v557_v21 = vmax.bf16 %v525_v59, %v493_v10  ;;  %v367_v22 = vmax.bf16 %v335_v2, %v303_v13  ;;  %v82_v25 = vld [vmem:[%s1623_s1 + $0x90] sm:$0x33]  ;;  %v527_v29 = vld [vmem:[%s1630_s8 + $0x78] sm:$0xff]  ;;  %v400_v34 = vld [vmem:[%s1628_s6 + $0x80] sm:$0x33] }
  0x36   :  { %v146_v26 = vld [vmem:[%s1624_s2 + $0x90] sm:$0x33]  ;;  %v494_v27 = vmax.bf16 %v462_v11, %v430_v16  ;;  %v304_v30 = vmax.bf16 %v272_v14, %v240_v18  ;;  %v114_v32 = vmax.bf16 %v82_v25, %v50_v24  ;;  %v241_v35 = vmax.bf16 %v209_v20, %v177_v23  ;;  %v337_v36 = vld [vmem:[%s1627_s5 + $0x88] sm:$0x33]  ;;  %v51_v41 = vld [vmem:[%s1622_s0 + $0x98] sm:$0x33] }
  0x37   :  { %589 = vst [vmem:[%s1631_s9 + $0x68] sm:$0xff] %v557_v21  ;;  %v431_v33 = vmax.bf16 %v399_v17, %v367_v22  ;;  %v210_v37 = vld [vmem:[%s1625_s3 + $0x90] sm:$0x33]  ;;  %v83_v42 = vld [vmem:[%s1623_s1 + $0x98] sm:$0x33] }
  0x38   :  { %v558_v38 = vmax.bf16 %v526_v12, %v494_v27  ;;  %v368_v39 = vmax.bf16 %v336_v19, %v304_v30  ;;  %v178_v40 = vmax.bf16 %v146_v26, %v114_v32  ;;  %v147_v43 = vld [vmem:[%s1624_s2 + $0x98] sm:$0x33]  ;;  %v464_v45 = vld [vmem:[%s1629_s7 + $0x80] sm:$0x33]  ;;  %v305_v47 = vmax.bf16 %v273_v31, %v241_v35  ;;  %v274_v48 = vld [vmem:[%s1626_s4 + $0x90] sm:$0x33] }
  0x39   :  { %v495_v44 = vmax.bf16 %v463_v28, %v431_v33  ;;  %v528_v46 = vld [vmem:[%s1630_s8 + $0x80] sm:$0x33]  ;;  %v115_v49 = vmax.bf16 %v83_v42, %v51_v41  ;;  %v401_v51 = vld [vmem:[%s1628_s6 + $0x88] sm:$0x33]  ;;  %v338_v53 = vld [vmem:[%s1627_s5 + $0x90] sm:$0x33] }
  0x3a   :  { %590 = vst [vmem:[%s1631_s9 + $0x70] sm:$0xff] %v558_v38  ;;  %v432_v50 = vmax.bf16 %v400_v34, %v368_v39  ;;  %v242_v52 = vmax.bf16 %v210_v37, %v178_v40  ;;  %v211_v54 = vld [vmem:[%s1625_s3 + $0x98] sm:$0x33]  ;;  %v369_v56 = vmax.bf16 %v337_v36, %v305_v47  ;;  %v52_v58 = vld [vmem:[%s1622_s0 + $0xa0] sm:$0x33] }
  0x3b   :  { %v559_v55 = vmax.bf16 %v527_v29, %v495_v44  ;;  %v179_v57 = vmax.bf16 %v147_v43, %v115_v49  ;;  %v84_v59 = vld [vmem:[%s1623_s1 + $0xa0] sm:$0x33]  ;;  %v465_v62 = vld [vmem:[%s1629_s7 + $0x88] sm:$0x33]  ;;  %v275_v1 = vld [vmem:[%s1626_s4 + $0x98] sm:$0x33] }
  0x3c   :  { %v148_v60 = vld [vmem:[%s1624_s2 + $0xa0] sm:$0x33]  ;;  %v496_v61 = vmax.bf16 %v464_v45, %v432_v50  ;;  %v529_v63 = vld [vmem:[%s1630_s8 + $0x88] sm:$0x33]  ;;  %v306_v0 = vmax.bf16 %v274_v48, %v242_v52  ;;  %v116_v2 = vmax.bf16 %v84_v59, %v52_v58  ;;  %v433_v3 = vmax.bf16 %v401_v51, %v369_v56  ;;  %v402_v4 = vld [vmem:[%s1628_s6 + $0x90] sm:$0x33] }
  0x3d   :  { %591 = vst [vmem:[%s1631_s9 + $0x78] sm:$0xff] %v559_v55  ;;  %v243_v5 = vmax.bf16 %v211_v54, %v179_v57  ;;  %v339_v6 = vld [vmem:[%s1627_s5 + $0x98] sm:$0x33]  ;;  %v212_v7 = vld [vmem:[%s1625_s3 + $0xa0] sm:$0x33] }
  0x3e   :  { %v560_v8 = vmax.bf16 %v528_v46, %v496_v61  ;;  %v370_v9 = vmax.bf16 %v338_v53, %v306_v0  ;;  %v180_v10 = vmax.bf16 %v148_v60, %v116_v2  ;;  %v53_v11 = vld [vmem:[%s1622_s0 + $0xa8] sm:$0x33]  ;;  %v497_v14 = vmax.bf16 %v465_v62, %v433_v3  ;;  %v466_v15 = vld [vmem:[%s1629_s7 + $0x90] sm:$0x33]  ;;  %v276_v18 = vld [vmem:[%s1626_s4 + $0xa0] sm:$0x33] }
  0x3f   :  { %v85_v12 = vld [vmem:[%s1623_s1 + $0xa8] sm:$0x33]  ;;  %v530_v16 = vld [vmem:[%s1630_s8 + $0x90] sm:$0x33]  ;;  %v307_v17 = vmax.bf16 %v275_v1, %v243_v5  ;;  %v403_v21 = vld [vmem:[%s1628_s6 + $0x98] sm:$0x33] }
  0x40   :  { %v149_v13 = vld [vmem:[%s1624_s2 + $0xa8] sm:$0x33]  ;;  %v117_v19 = vmax.bf16 %v85_v12, %v53_v11  ;;  %592 = vst [vmem:[%s1631_s9 + $0x80] sm:$0x33] %v560_v8  ;;  %v434_v20 = vmax.bf16 %v402_v4, %v370_v9  ;;  %v244_v22 = vmax.bf16 %v212_v7, %v180_v10  ;;  %v340_v23 = vld [vmem:[%s1627_s5 + $0xa0] sm:$0x33]  ;;  %v561_v25 = vmax.bf16 %v529_v63, %v497_v14 }
  0x41   :  { %v213_v24 = vld [vmem:[%s1625_s3 + $0xa8] sm:$0x33]  ;;  %v371_v26 = vmax.bf16 %v339_v6, %v307_v17  ;;  %v54_v28 = vld [vmem:[%s1622_s0 + $0xb0] sm:$0x33]  ;;  %v467_v32 = vld [vmem:[%s1629_s7 + $0x98] sm:$0x33] }
  0x42   :  { %v181_v27 = vmax.bf16 %v149_v13, %v117_v19  ;;  %v86_v29 = vld [vmem:[%s1623_s1 + $0xb0] sm:$0x33]  ;;  %v498_v31 = vmax.bf16 %v466_v15, %v434_v20  ;;  %v531_v33 = vld [vmem:[%s1630_s8 + $0x98] sm:$0x33]  ;;  %v308_v34 = vmax.bf16 %v276_v18, %v244_v22  ;;  %v277_v35 = vld [vmem:[%s1626_s4 + $0xa8] sm:$0x33] }
  0x43   :  { %v150_v30 = vld [vmem:[%s1624_s2 + $0xb0] sm:$0x33]  ;;  %v118_v36 = vmax.bf16 %v86_v29, %v54_v28  ;;  %593 = vst [vmem:[%s1631_s9 + $0x88] sm:$0x33] %v561_v25  ;;  %v435_v37 = vmax.bf16 %v403_v21, %v371_v26  ;;  %v404_v38 = vld [vmem:[%s1628_s6 + $0xa0] sm:$0x33] }
  0x44   :  { %v245_v39 = vmax.bf16 %v213_v24, %v181_v27  ;;  %v341_v40 = vld [vmem:[%s1627_s5 + $0xa8] sm:$0x33]  ;;  %v214_v41 = vld [vmem:[%s1625_s3 + $0xb0] sm:$0x33]  ;;  %v562_v42 = vmax.bf16 %v530_v16, %v498_v31  ;;  %v372_v43 = vmax.bf16 %v340_v23, %v308_v34  ;;  %v55_v45 = vld [vmem:[%s1622_s0 + $0xb8] sm:$0x33] }
  0x45   :  { %v182_v44 = vmax.bf16 %v150_v30, %v118_v36  ;;  %v87_v46 = vld [vmem:[%s1623_s1 + $0xb8] sm:$0x33]  ;;  %v499_v48 = vmax.bf16 %v467_v32, %v435_v37  ;;  %v468_v49 = vld [vmem:[%s1629_s7 + $0xa0] sm:$0x33]  ;;  %v278_v52 = vld [vmem:[%s1626_s4 + $0xb0] sm:$0x33] }
  0x46   :  { %v151_v47 = vld [vmem:[%s1624_s2 + $0xb8] sm:$0x33]  ;;  %v532_v50 = vld [vmem:[%s1630_s8 + $0xa0] sm:$0x33]  ;;  %v309_v51 = vmax.bf16 %v277_v35, %v245_v39  ;;  %v119_v53 = vmax.bf16 %v87_v46, %v55_v45  ;;  %594 = vst [vmem:[%s1631_s9 + $0x90] sm:$0x33] %v562_v42  ;;  %v436_v54 = vmax.bf16 %v404_v38, %v372_v43 }
  0x47   :  { %v405_v55 = vld [vmem:[%s1628_s6 + $0xa8] sm:$0x33]  ;;  %v246_v56 = vmax.bf16 %v214_v41, %v182_v44  ;;  %v342_v57 = vld [vmem:[%s1627_s5 + $0xb0] sm:$0x33]  ;;  %v215_v58 = vld [vmem:[%s1625_s3 + $0xb8] sm:$0x33]  ;;  %v563_v59 = vmax.bf16 %v531_v33, %v499_v48 }
  0x48   :  { %v373_v60 = vmax.bf16 %v341_v40, %v309_v51  ;;  %v183_v61 = vmax.bf16 %v151_v47, %v119_v53  ;;  %v56_v62 = vld [vmem:[%s1622_s0 + $0xc0] sm:$0x33]  ;;  %v500_v1 = vmax.bf16 %v468_v49, %v436_v54  ;;  %v469_v2 = vld [vmem:[%s1629_s7 + $0xa8] sm:$0x33]  ;;  %v279_v5 = vld [vmem:[%s1626_s4 + $0xb8] sm:$0x33] }
  0x49   :  { %v88_v63 = vld [vmem:[%s1623_s1 + $0xc0] sm:$0x33]  ;;  %v533_v3 = vld [vmem:[%s1630_s8 + $0xa8] sm:$0x33]  ;;  %v310_v4 = vmax.bf16 %v278_v52, %v246_v56  ;;  %595 = vst [vmem:[%s1631_s9 + $0x98] sm:$0x33] %v563_v59 }
  0x4a   :  { %v152_v0 = vld [vmem:[%s1624_s2 + $0xc0] sm:$0x33]  ;;  %v120_v6 = vmax.bf16 %v88_v63, %v56_v62  ;;  %v437_v7 = vmax.bf16 %v405_v55, %v373_v60  ;;  %v406_v8 = vld [vmem:[%s1628_s6 + $0xb0] sm:$0x33]  ;;  %v247_v9 = vmax.bf16 %v215_v58, %v183_v61  ;;  %v343_v10 = vld [vmem:[%s1627_s5 + $0xb8] sm:$0x33]  ;;  %v564_v12 = vmax.bf16 %v532_v50, %v500_v1 }
  0x4b   :  { %v216_v11 = vld [vmem:[%s1625_s3 + $0xc0] sm:$0x33]  ;;  %v374_v13 = vmax.bf16 %v342_v57, %v310_v4  ;;  %v57_v15 = vld [vmem:[%s1622_s0 + $0xc8] sm:$0x33]  ;;  %v470_v19 = vld [vmem:[%s1629_s7 + $0xb0] sm:$0x33] }
  0x4c   :  { %v184_v14 = vmax.bf16 %v152_v0, %v120_v6  ;;  %v89_v16 = vld [vmem:[%s1623_s1 + $0xc8] sm:$0x33]  ;;  %v501_v18 = vmax.bf16 %v469_v2, %v437_v7  ;;  %v534_v20 = vld [vmem:[%s1630_s8 + $0xb0] sm:$0x33]  ;;  %v311_v21 = vmax.bf16 %v279_v5, %v247_v9  ;;  %v280_v22 = vld [vmem:[%s1626_s4 + $0xc0] sm:$0x33] }
  0x4d   :  { %v153_v17 = vld [vmem:[%s1624_s2 + $0xc8] sm:$0x33]  ;;  %v121_v23 = vmax.bf16 %v89_v16, %v57_v15  ;;  %596 = vst [vmem:[%s1631_s9 + $0xa0] sm:$0x33] %v564_v12  ;;  %v438_v24 = vmax.bf16 %v406_v8, %v374_v13  ;;  %v407_v25 = vld [vmem:[%s1628_s6 + $0xb8] sm:$0x33] }
  0x4e   :  { %v248_v26 = vmax.bf16 %v216_v11, %v184_v14  ;;  %v344_v27 = vld [vmem:[%s1627_s5 + $0xc0] sm:$0x33]  ;;  %v217_v28 = vld [vmem:[%s1625_s3 + $0xc8] sm:$0x33]  ;;  %v565_v29 = vmax.bf16 %v533_v3, %v501_v18  ;;  %v375_v30 = vmax.bf16 %v343_v10, %v311_v21  ;;  %v58_v32 = vld [vmem:[%s1622_s0 + $0xd0] sm:$0x33] }
  0x4f   :  { %v185_v31 = vmax.bf16 %v153_v17, %v121_v23  ;;  %v90_v33 = vld [vmem:[%s1623_s1 + $0xd0] sm:$0x33]  ;;  %v502_v35 = vmax.bf16 %v470_v19, %v438_v24  ;;  %v471_v36 = vld [vmem:[%s1629_s7 + $0xb8] sm:$0x33]  ;;  %v281_v39 = vld [vmem:[%s1626_s4 + $0xc8] sm:$0x33] }
  0x50   :  { %v154_v34 = vld [vmem:[%s1624_s2 + $0xd0] sm:$0x33]  ;;  %v535_v37 = vld [vmem:[%s1630_s8 + $0xb8] sm:$0x33]  ;;  %v312_v38 = vmax.bf16 %v280_v22, %v248_v26  ;;  %v122_v40 = vmax.bf16 %v90_v33, %v58_v32  ;;  %597 = vst [vmem:[%s1631_s9 + $0xa8] sm:$0x33] %v565_v29  ;;  %v439_v41 = vmax.bf16 %v407_v25, %v375_v30 }
  0x51   :  { %v408_v42 = vld [vmem:[%s1628_s6 + $0xc0] sm:$0x33]  ;;  %v249_v43 = vmax.bf16 %v217_v28, %v185_v31  ;;  %v345_v44 = vld [vmem:[%s1627_s5 + $0xc8] sm:$0x33]  ;;  %v218_v45 = vld [vmem:[%s1625_s3 + $0xd0] sm:$0x33]  ;;  %v566_v46 = vmax.bf16 %v534_v20, %v502_v35 }
  0x52   :  { %v376_v47 = vmax.bf16 %v344_v27, %v312_v38  ;;  %v186_v48 = vmax.bf16 %v154_v34, %v122_v40  ;;  %v59_v49 = vld [vmem:[%s1622_s0 + $0xd8] sm:$0x33]  ;;  %v503_v52 = vmax.bf16 %v471_v36, %v439_v41  ;;  %v472_v53 = vld [vmem:[%s1629_s7 + $0xc0] sm:$0x33]  ;;  %v282_v56 = vld [vmem:[%s1626_s4 + $0xd0] sm:$0x33] }
  0x53   :  { %v91_v50 = vld [vmem:[%s1623_s1 + $0xd8] sm:$0x33]  ;;  %v536_v54 = vld [vmem:[%s1630_s8 + $0xc0] sm:$0x33]  ;;  %v313_v55 = vmax.bf16 %v281_v39, %v249_v43  ;;  %598 = vst [vmem:[%s1631_s9 + $0xb0] sm:$0x33] %v566_v46 }
  0x54   :  { %v155_v51 = vld [vmem:[%s1624_s2 + $0xd8] sm:$0x33]  ;;  %v123_v57 = vmax.bf16 %v91_v50, %v59_v49  ;;  %v440_v58 = vmax.bf16 %v408_v42, %v376_v47  ;;  %v409_v59 = vld [vmem:[%s1628_s6 + $0xc8] sm:$0x33]  ;;  %v250_v60 = vmax.bf16 %v218_v45, %v186_v48  ;;  %v346_v61 = vld [vmem:[%s1627_s5 + $0xd0] sm:$0x33]  ;;  %v567_v63 = vmax.bf16 %v535_v37, %v503_v52 }
  0x55   :  { %v219_v62 = vld [vmem:[%s1625_s3 + $0xd8] sm:$0x33]  ;;  %v377_v0 = vmax.bf16 %v345_v44, %v313_v55  ;;  %v60_v2 = vld [vmem:[%s1622_s0 + $0xe0] sm:$0x33]  ;;  %v473_v6 = vld [vmem:[%s1629_s7 + $0xc8] sm:$0x33] }
  0x56   :  { %v187_v1 = vmax.bf16 %v155_v51, %v123_v57  ;;  %v92_v3 = vld [vmem:[%s1623_s1 + $0xe0] sm:$0x33]  ;;  %v504_v5 = vmax.bf16 %v472_v53, %v440_v58  ;;  %v537_v7 = vld [vmem:[%s1630_s8 + $0xc8] sm:$0x33]  ;;  %v314_v8 = vmax.bf16 %v282_v56, %v250_v60  ;;  %v283_v9 = vld [vmem:[%s1626_s4 + $0xd8] sm:$0x33] }
  0x57   :  { %v156_v4 = vld [vmem:[%s1624_s2 + $0xe0] sm:$0x33]  ;;  %v124_v10 = vmax.bf16 %v92_v3, %v60_v2  ;;  %599 = vst [vmem:[%s1631_s9 + $0xb8] sm:$0x33] %v567_v63  ;;  %v441_v11 = vmax.bf16 %v409_v59, %v377_v0  ;;  %v410_v12 = vld [vmem:[%s1628_s6 + $0xd0] sm:$0x33] }
  0x58   :  { %v251_v13 = vmax.bf16 %v219_v62, %v187_v1  ;;  %v347_v14 = vld [vmem:[%s1627_s5 + $0xd8] sm:$0x33]  ;;  %v220_v15 = vld [vmem:[%s1625_s3 + $0xe0] sm:$0x33]  ;;  %v568_v16 = vmax.bf16 %v536_v54, %v504_v5  ;;  %v378_v17 = vmax.bf16 %v346_v61, %v314_v8  ;;  %v61_v19 = vld [vmem:[%s1622_s0 + $0xe8] sm:$0x33] }
  0x59   :  { %v188_v18 = vmax.bf16 %v156_v4, %v124_v10  ;;  %v93_v20 = vld [vmem:[%s1623_s1 + $0xe8] sm:$0x33]  ;;  %v505_v22 = vmax.bf16 %v473_v6, %v441_v11  ;;  %v474_v23 = vld [vmem:[%s1629_s7 + $0xd0] sm:$0x33]  ;;  %v284_v26 = vld [vmem:[%s1626_s4 + $0xe0] sm:$0x33] }
  0x5a   :  { %v157_v21 = vld [vmem:[%s1624_s2 + $0xe8] sm:$0x33]  ;;  %v538_v24 = vld [vmem:[%s1630_s8 + $0xd0] sm:$0x33]  ;;  %v315_v25 = vmax.bf16 %v283_v9, %v251_v13  ;;  %v125_v27 = vmax.bf16 %v93_v20, %v61_v19  ;;  %600 = vst [vmem:[%s1631_s9 + $0xc0] sm:$0x33] %v568_v16  ;;  %v442_v28 = vmax.bf16 %v410_v12, %v378_v17 }
  0x5b   :  { %v411_v29 = vld [vmem:[%s1628_s6 + $0xd8] sm:$0x33]  ;;  %v252_v30 = vmax.bf16 %v220_v15, %v188_v18  ;;  %v348_v31 = vld [vmem:[%s1627_s5 + $0xe0] sm:$0x33]  ;;  %v221_v32 = vld [vmem:[%s1625_s3 + $0xe8] sm:$0x33]  ;;  %v569_v33 = vmax.bf16 %v537_v7, %v505_v22 }
  0x5c   :  { %v379_v34 = vmax.bf16 %v347_v14, %v315_v25  ;;  %v189_v35 = vmax.bf16 %v157_v21, %v125_v27  ;;  %v62_v36 = vld [vmem:[%s1622_s0 + $0xf0] sm:$0x33]  ;;  %v506_v39 = vmax.bf16 %v474_v23, %v442_v28  ;;  %v475_v40 = vld [vmem:[%s1629_s7 + $0xd8] sm:$0x33]  ;;  %v285_v43 = vld [vmem:[%s1626_s4 + $0xe8] sm:$0x33] }
  0x5d   :  { %v94_v37 = vld [vmem:[%s1623_s1 + $0xf0] sm:$0x33]  ;;  %v539_v41 = vld [vmem:[%s1630_s8 + $0xd8] sm:$0x33]  ;;  %v316_v42 = vmax.bf16 %v284_v26, %v252_v30  ;;  %601 = vst [vmem:[%s1631_s9 + $0xc8] sm:$0x33] %v569_v33 }
  0x5e   :  { %v158_v38 = vld [vmem:[%s1624_s2 + $0xf0] sm:$0x33]  ;;  %v126_v44 = vmax.bf16 %v94_v37, %v62_v36  ;;  %v443_v45 = vmax.bf16 %v411_v29, %v379_v34  ;;  %v412_v46 = vld [vmem:[%s1628_s6 + $0xe0] sm:$0x33]  ;;  %v253_v47 = vmax.bf16 %v221_v32, %v189_v35  ;;  %v349_v48 = vld [vmem:[%s1627_s5 + $0xe8] sm:$0x33]  ;;  %v570_v50 = vmax.bf16 %v538_v24, %v506_v39 }
  0x5f   :  { %v222_v49 = vld [vmem:[%s1625_s3 + $0xf0] sm:$0x33]  ;;  %v380_v51 = vmax.bf16 %v348_v31, %v316_v42  ;;  %v63_v53 = vld [vmem:[%s1622_s0 + $0xf8] sm:$0x33]  ;;  %v476_v57 = vld [vmem:[%s1629_s7 + $0xe0] sm:$0x33] }
  0x60   :  { %v190_v52 = vmax.bf16 %v158_v38, %v126_v44  ;;  %v95_v54 = vld [vmem:[%s1623_s1 + $0xf8] sm:$0x33]  ;;  %v507_v56 = vmax.bf16 %v475_v40, %v443_v45  ;;  %v317_v58 = vmax.bf16 %v285_v43, %v253_v47  ;;  %v286_v59 = vld [vmem:[%s1626_s4 + $0xf0] sm:$0x33]  ;;  %602 = vst [vmem:[%s1631_s9 + $0xd0] sm:$0x33] %v570_v50 }
  0x61   :  { %v159_v55 = vld [vmem:[%s1624_s2 + $0xf8] sm:$0x33]  ;;  %v127_v60 = vmax.bf16 %v95_v54, %v63_v53  ;;  %v444_v61 = vmax.bf16 %v412_v46, %v380_v51  ;;  %v413_v62 = vld [vmem:[%s1628_s6 + $0xe8] sm:$0x33]  ;;  %v540_v2 = vld [vmem:[%s1630_s8 + $0xe0] sm:$0x33] }
  0x62   :  { %v254_v63 = vmax.bf16 %v222_v49, %v190_v52  ;;  %v223_v0 = vld [vmem:[%s1625_s3 + $0xf8] sm:$0x33]  ;;  %v571_v1 = vmax.bf16 %v539_v41, %v507_v56  ;;  %v381_v3 = vmax.bf16 %v349_v48, %v317_v58  ;;  %v350_v4 = vld [vmem:[%s1627_s5 + $0xf0] sm:$0x33]  ;;  %v477_v7 = vld [vmem:[%s1629_s7 + $0xe8] sm:$0x33] }
  0x63   :  { %v191_v5 = vmax.bf16 %v159_v55, %v127_v60  ;;  %v508_v6 = vmax.bf16 %v476_v57, %v444_v61  ;;  %v287_v9 = vld [vmem:[%s1626_s4 + $0xf8] sm:$0x33]  ;;  %v414_v11 = vld [vmem:[%s1628_s6 + $0xf0] sm:$0x33]  ;;  %v541_v14 = vld [vmem:[%s1630_s8 + $0xe8] sm:$0x33] }
  0x64   :  { %v318_v8 = vmax.bf16 %v286_v59, %v254_v63  ;;  %603 = vst [vmem:[%s1631_s9 + $0xd8] sm:$0x33] %v571_v1  ;;  %v445_v10 = vmax.bf16 %v413_v62, %v381_v3  ;;  %v351_v16 = vld [vmem:[%s1627_s5 + $0xf8] sm:$0x33]  ;;  %v478_v18 = vld [vmem:[%s1629_s7 + $0xf0] sm:$0x33] }
  0x65   :  { %v255_v12 = vmax.bf16 %v223_v0, %v191_v5  ;;  %v572_v13 = vmax.bf16 %v540_v2, %v508_v6  ;;  %v415_v21 = vld [vmem:[%s1628_s6 + $0xf8] sm:$0x33]  ;;  %v542_v23 = vld [vmem:[%s1630_s8 + $0xf0] sm:$0x33] }
  0x66   :  { %v382_v15 = vmax.bf16 %v350_v4, %v318_v8  ;;  %v509_v17 = vmax.bf16 %v477_v7, %v445_v10  ;;  %v479_v26 = vld [vmem:[%s1629_s7 + $0xf8] sm:$0x33] }
  0x67   :  { %v319_v19 = vmax.bf16 %v287_v9, %v255_v12  ;;  %604 = vst [vmem:[%s1631_s9 + $0xe0] sm:$0x33] %v572_v13  ;;  %v543_v29 = vld [vmem:[%s1630_s8 + $0xf8] sm:$0x33] }
  0x68   :  { %v446_v20 = vmax.bf16 %v414_v11, %v382_v15  ;;  %v573_v22 = vmax.bf16 %v541_v14, %v509_v17 }
  0x69   :  { %v383_v24 = vmax.bf16 %v351_v16, %v319_v19 }
  0x6a   :  { %v510_v25 = vmax.bf16 %v478_v18, %v446_v20  ;;  %605 = vst [vmem:[%s1631_s9 + $0xe8] sm:$0x33] %v573_v22 }
  0x6b   :  { %v447_v27 = vmax.bf16 %v415_v21, %v383_v24 }
  0x6c   :  { %v574_v28 = vmax.bf16 %v542_v23, %v510_v25 }
  0x6d   :  { %v511_v30 = vmax.bf16 %v479_v26, %v447_v27 }
  0x6e   :  { %606 = vst [vmem:[%s1631_s9 + $0xf0] sm:$0x33] %v574_v28 }
  0x6f   :  { %v575_v31 = vmax.bf16 %v543_v29, %v511_v30 }
  0x71   :  { %607 = vst [vmem:[%s1631_s9 + $0xf8] sm:$0x33] %v575_v31 }

// kernel: net_forward.10
= control target key start
LH: loop header
LB: loop body
LE: loop exit
PB: predicated region body
PF: predicated region fallthrough
CT: control target
= control target key end

     0   :  { %s3877_s12 = smov 0   ;;  %s3879_s13 = smov 0   ;;  %s4397_s0 = inlined_call_operand.vmem [shape: bf16[2,150,3600], index: 0, kind: input, shape index: {}]   ;;  %s4398_s1 = inlined_call_operand.vmem [shape: bf16[16,150], index: 1, kind: input, shape index: {}]   ;;  %s4399_s2 = inlined_call_operand.vmem [shape: f32[16,1], index: 2, kind: input, shape index: {}]   ;;  %s4400_s3 = inlined_call_operand.vmem [shape: bf16[2,16,3600], index: 3, kind: output, shape index: {}]  }
   0x1   :  { %s3881_s14 = smov 0  }
   0x2 LB: > { %s25_s15 = sadd.s32 1, %s3850_s13  ;;  %p2997_p0 = scmp.ge.s32.totalorder %s3854_s14, 1  ;;  %s3854_s14 = sphi %s3881_s14, %s13_s14   ;;  %s3850_s13 = sphi %s3879_s13, %s4402_s13   ;;  %s3846_s12 = sphi %s3877_s12, %s4401_s12  }
   0x3   : > { %p27_p1 = scmp.ge.s32.totalorder %s25_s15, 2  ;;  %p158_p2 = scmp.lt.s32.totalorder %s3854_s14, 3 }
   0x5   : > { %s4404_s15 = smov (%p27_p1, %s25_s15), 0  ;;  %p159_p3 = pnand %p2997_p0, %p158_p2 }
   0x6   : > { %p191_p4 = scmp.lt.s32.totalorder (!%p159_p3), %s3846_s12, 1 }
   0x7   : > { %162 = sbr.rel (%p159_p3) target bundleno = 541 (0x21d), region = 32 }
   0xc   : > { %v3898_v0 = vld [vmem:[%s4398_s1 + $0x4] ss:$8 sps:$4 sm:$0xff]   ;;  %vm1906_vm0 = vcmask 179200   ;;  %s4406_s12 = smov (!%p191_p4, %s3846_s12), 1  ;;  %v3856_v2 = vmov 0   ;;  %vm1910_vm1 = vcmask 1042432  }
   0xd   : > { %v498_v1 = vld [vmem:[%s4399_s2] sm:$0xff]  ;;  %3293 = vmatprep.mubr.msk.bf16.mxu0 %vm1906_vm0, %v3898_v0  ;;  %3295 = vmatprep.mubr.msk.bf16.mxu1 %vm1906_vm0, %v3898_v0  ;;  %s3383_s20 = smul.u32 2204, %s4406_s12  ;;  %v499_v3 = vld [vmem:[%s4399_s2 + $0x8] sm:$0xff]  ;;  %vm2889_vm2 = vcmask 125952  }
   0xe   : > { %3410 = vset.pattern.permute.xlu0 %v3856_v2  ;;  %v3960_v43 = vld [vmem:[%s4398_s1] ss:$8 sps:$4 sm:$0xff]   ;;  %s3384_s5 = smul.u32 232, %s4406_s12 }
   0xf   : > { %502 = vperm.xlu0 %3410, %v498_v1   ;;  %s3917_s25 = scalar_lea.vmem %s4397_s0, %s3383_s20 }
  0x10   : > { %v3411_v4 = vld [vmem:[%s3917_s25 + $0x65c] ss:$116 sps:$4 sm:$0xff]   ;;  %v3413_v5 = vld [vmem:[%s3917_s25 + $0x658] ss:$116 sps:$4 sm:$0xff]   ;;  %v3414_v6 = vld [vmem:[%s3917_s25 + $0x574] ss:$116 sps:$4 sm:$0xff]   ;;  %s4225_s8 = scalar_lea.vmem %s4400_s3, %s3384_s5 }
  0x11   : > { %1998 = vmatprep.subr.bf16.mxu0 %v3411_v4  ;;  %v3416_v7 = vld [vmem:[%s3917_s25 + $0x570] ss:$116 sps:$4 sm:$0xff]   ;;  %v3417_v8 = vld [vmem:[%s3917_s25 + $0x48c] ss:$116 sps:$4 sm:$0xff]   ;;  %v3419_v9 = vld [vmem:[%s3917_s25 + $0x488] ss:$116 sps:$4 sm:$0xff]  }
  0x12   : > { %1999 = vmatpush1.bf16.msra.mxu0 %v3413_v5  ;;  %v3420_v10 = vld [vmem:[%s3917_s25 + $0x3a4] ss:$116 sps:$4 sm:$0xff]   ;;  %v3422_v11 = vld [vmem:[%s3917_s25 + $0x3a0] ss:$116 sps:$4 sm:$0xff]   ;;  %v3423_v12 = vld [vmem:[%s3917_s25 + $0x2bc] ss:$116 sps:$4 sm:$0xff]  }
  0x13   : > { %507 = vperm.xlu0 %3410, %v499_v3   ;;  %2000 = vmatprep.subr.bf16.mxu0 %v3414_v6  ;;  %v3436_v13 = vld [vmem:[%s3917_s25 + $0x664] ss:$116 sps:$4 sm:$0xff]   ;;  %v3439_v14 = vld [vmem:[%s3917_s25 + $0x660] ss:$116 sps:$4 sm:$0xff]   ;;  %v3442_v16 = vld [vmem:[%s3917_s25 + $0x57c] ss:$116 sps:$4 sm:$0xff]  }
  0x14   : > { %2041 = vmatprep.subr.bf16.mxu1 %v3436_v13  ;;  %v3425_v15 = vld [vmem:[%s3917_s25 + $0x2b8] ss:$116 sps:$4 sm:$0xff]   ;;  %v3449_v18 = vld [vmem:[%s3917_s25 + $0x494] ss:$116 sps:$4 sm:$0xff]   ;;  %v3454_v20 = vld [vmem:[%s3917_s25 + $0x490] ss:$116 sps:$4 sm:$0xff]  }
  0x15   : > { %2042 = vmatpush1.bf16.msra.mxu1 %v3439_v14  ;;  %v3445_v17 = vld [vmem:[%s3917_s25 + $0x578] ss:$116 sps:$4 sm:$0xff]   ;;  %v3426_v19 = vld [vmem:[%s3917_s25 + $0x1d4] ss:$116 sps:$4 sm:$0xff]   ;;  %v3428_v21 = vld [vmem:[%s3917_s25 + $0x1d0] ss:$116 sps:$4 sm:$0xff]  }
  0x16   : > { %2001 = vmatpush1.bf16.msra.mxu0 %v3416_v7  ;;  %2043 = vmatprep.subr.bf16.mxu1 %v3442_v16  ;;  %v3455_v22 = vld [vmem:[%s3917_s25 + $0x3ac] ss:$116 sps:$4 sm:$0xff]   ;;  %v3431_v24 = vld [vmem:[%s3917_s25 + $0xe8] ss:$116 sps:$4 sm:$0xff]   ;;  %v3461_v26 = vld [vmem:[%s3917_s25 + $0x2c4] ss:$116 sps:$4 sm:$0xff]  }
  0x17   : > { %2002 = vmatprep.subr.bf16.mxu0 %v3417_v8  ;;  %v3429_v23 = vld [vmem:[%s3917_s25 + $0xec] ss:$116 sps:$4 sm:$0xff]   ;;  %v3460_v25 = vld [vmem:[%s3917_s25 + $0x3a8] ss:$116 sps:$4 sm:$0xff]   ;;  %v3432_v27 = vld [vmem:[%s3917_s25 + $0x4] ss:$116 sps:$4 sm:$0xff]  }
  0x18   : > { %v483_v28 = vld [vmem:[%s3917_s25 + $0x828] sm:$0x77]  ;;  %v3466_v29 = vld [vmem:[%s3917_s25 + $0x2c0] ss:$116 sps:$4 sm:$0xff]   ;;  %v3467_v31 = vld [vmem:[%s3917_s25 + $0x1dc] ss:$116 sps:$4 sm:$0xff]  }
  0x19   : > { %2044 = vmatpush1.bf16.msra.mxu1 %v3445_v17  ;;  %v3434_v30 = vld [vmem:[%s3917_s25] ss:$116 sps:$4 sm:$0xff]   ;;  %v3264_v32 = vcombine.high %v483_v28, %v483_v28  ;;  %v3263_v33 = vcombine.low %v483_v28, %v483_v28  ;;  %v3472_v34 = vld [vmem:[%s3917_s25 + $0x1d8] ss:$116 sps:$4 sm:$0xff]   ;;  %v3478_v38 = vld [vmem:[%s3917_s25 + $0xf0] ss:$116 sps:$4 sm:$0xff]  }
  0x1a   : > { %2003 = vmatpush1.bf16.msra.mxu0 %v3419_v9  ;;  %2045 = vmatprep.subr.bf16.mxu1 %v3449_v18  ;;  %v3473_v35 = vld [vmem:[%s3917_s25 + $0xf4] ss:$116 sps:$4 sm:$0xff]   ;;  %v3440_v37 = vld [vmem:[%s3917_s25 + $0x744] ss:$116 sps:$4 sm:$0xff]   ;;  %v3479_v40 = vld [vmem:[%s3917_s25 + $0xc] ss:$116 sps:$4 sm:$0xff]  }
  0x1b   : > { %2004 = vmatprep.subr.bf16.mxu0 %v3420_v10  ;;  %v1912_v36 = vsel %vm1910_vm1, %v3263_v33, 0  ;;  %v3444_v39 = vld [vmem:[%s3917_s25 + $0x740] ss:$116 sps:$4 sm:$0xff]   ;;  %v3484_v44 = vld [vmem:[%s3917_s25 + $0x8] ss:$116 sps:$4 sm:$0xff]  }
  0x1c   : > { %v3453_v41 = vld [vmem:[%s3917_s25 + $0x66c] ss:$116 sps:$4 sm:$0xff]   ;;  %v484_v42 = vld [vmem:[%s3917_s25 + $0x830] sm:$0x77]  ;;  %v3451_v45 = vld [vmem:[%s3917_s25 + $0x668] ss:$116 sps:$4 sm:$0xff]  }
  0x1d   : > { %2046 = vmatpush1.bf16.msra.mxu1 %v3454_v20  ;;  %v3266_v46 = vcombine.high %v484_v42, %v484_v42  ;;  %v3265_v47 = vcombine.low %v484_v42, %v484_v42  ;;  %v3459_v48 = vld [vmem:[%s3917_s25 + $0x584] ss:$116 sps:$4 sm:$0xff]   ;;  %v3457_v49 = vld [vmem:[%s3917_s25 + $0x580] ss:$116 sps:$4 sm:$0xff]   ;;  %v3465_v52 = vld [vmem:[%s3917_s25 + $0x49c] ss:$116 sps:$4 sm:$0xff]  }
  0x1e   : > { %2005 = vmatpush1.bf16.msra.mxu0 %v3422_v11  ;;  %2047 = vmatprep.subr.bf16.mxu1 %v3455_v22  ;;  %v3490_v51 = vld [vmem:[%s3917_s25 + $0x74c] ss:$116 sps:$4 sm:$0xff]   ;;  %v3495_v53 = vld [vmem:[%s3917_s25 + $0x748] ss:$116 sps:$4 sm:$0xff]   ;;  %v3497_v57 = vld [vmem:[%s3917_s25 + $0x670] ss:$116 sps:$4 sm:$0xff]  }
  0x1f   : > { %2006 = vmatprep.subr.bf16.mxu0 %v3423_v12  ;;  %v1918_v50 = vsel %vm1910_vm1, %v3265_v47, 0  ;;  %v3463_v54 = vld [vmem:[%s3917_s25 + $0x498] ss:$116 sps:$4 sm:$0xff]   ;;  %v3499_v55 = vld [vmem:[%s3917_s25 + $0x674] ss:$116 sps:$4 sm:$0xff]  }
  0x20   : > { %v3471_v56 = vld [vmem:[%s3917_s25 + $0x3b4] ss:$116 sps:$4 sm:$0xff]   ;;  %v3469_v58 = vld [vmem:[%s3917_s25 + $0x3b0] ss:$116 sps:$4 sm:$0xff]   ;;  %v3506_v59 = vld [vmem:[%s3917_s25 + $0x58c] ss:$116 sps:$4 sm:$0xff]  }
  0x21   : > { %2048 = vmatpush1.bf16.msra.mxu1 %v3460_v25  ;;  %v3477_v60 = vld [vmem:[%s3917_s25 + $0x2cc] ss:$116 sps:$4 sm:$0xff]   ;;  %v3504_v61 = vld [vmem:[%s3917_s25 + $0x588] ss:$116 sps:$4 sm:$0xff]   ;;  %v3509_v63 = vld [vmem:[%s3917_s25 + $0x4a4] ss:$116 sps:$4 sm:$0xff]  }
  0x22   : > { %2007 = vmatpush1.bf16.msra.mxu0 %v3425_v15  ;;  %2049 = vmatprep.subr.bf16.mxu1 %v3461_v26  ;;  %v3475_v62 = vld [vmem:[%s3917_s25 + $0x2c8] ss:$116 sps:$4 sm:$0xff]   ;;  %v3483_v1 = vld [vmem:[%s3917_s25 + $0x1e4] ss:$116 sps:$4 sm:$0xff]   ;;  %v3507_v3 = vld [vmem:[%s3917_s25 + $0x4a0] ss:$116 sps:$4 sm:$0xff]  }
  0x23   : > { %2008 = vmatprep.subr.bf16.mxu0 %v3426_v19  ;;  %v3481_v4 = vld [vmem:[%s3917_s25 + $0x1e0] ss:$116 sps:$4 sm:$0xff]   ;;  %v3515_v5 = vld [vmem:[%s3917_s25 + $0x3bc] ss:$116 sps:$4 sm:$0xff]   ;;  %v3486_v7 = vld [vmem:[%s3917_s25 + $0xf8] ss:$116 sps:$4 sm:$0xff]  }
  0x24   : > { %v3488_v6 = vld [vmem:[%s3917_s25 + $0xfc] ss:$116 sps:$4 sm:$0xff]   ;;  %v3513_v8 = vld [vmem:[%s3917_s25 + $0x3b8] ss:$116 sps:$4 sm:$0xff]   ;;  %v3521_v9 = vld [vmem:[%s3917_s25 + $0x2d4] ss:$116 sps:$4 sm:$0xff]  }
  0x25   : > { %2050 = vmatpush1.bf16.msra.mxu1 %v3466_v29  ;;  %v3494_v10 = vld [vmem:[%s3917_s25 + $0x14] ss:$116 sps:$4 sm:$0xff]   ;;  %v485_v11 = vld [vmem:[%s3917_s25 + $0x838] sm:$0x77]  ;;  %v3492_v12 = vld [vmem:[%s3917_s25 + $0x10] ss:$116 sps:$4 sm:$0xff]  }
  0x26   : > { %2009 = vmatpush1.bf16.msra.mxu0 %v3428_v21  ;;  %2051 = vmatprep.subr.bf16.mxu1 %v3467_v31  ;;  %v3519_v13 = vld [vmem:[%s3917_s25 + $0x2d0] ss:$116 sps:$4 sm:$0xff]   ;;  %v3527_v14 = vld [vmem:[%s3917_s25 + $0x1ec] ss:$116 sps:$4 sm:$0xff]   ;;  %v3268_v15 = vcombine.high %v485_v11, %v485_v11  ;;  %v3267_v16 = vcombine.low %v485_v11, %v485_v11  ;;  %v3525_v17 = vld [vmem:[%s3917_s25 + $0x1e8] ss:$116 sps:$4 sm:$0xff]  }
  0x27   : > { %2010 = vmatprep.subr.bf16.mxu0 %v3429_v23  ;;  %v3533_v18 = vld [vmem:[%s3917_s25 + $0x104] ss:$116 sps:$4 sm:$0xff]   ;;  %v3503_v20 = vld [vmem:[%s3917_s25 + $0x754] ss:$116 sps:$4 sm:$0xff]   ;;  %v3512_v22 = vld [vmem:[%s3917_s25 + $0x67c] ss:$116 sps:$4 sm:$0xff]  }
  0x28   : > { %v1924_v19 = vsel %vm1910_vm1, %v3267_v16, 0  ;;  %v3501_v21 = vld [vmem:[%s3917_s25 + $0x750] ss:$116 sps:$4 sm:$0xff]   ;;  %v3531_v23 = vld [vmem:[%s3917_s25 + $0x100] ss:$116 sps:$4 sm:$0xff]  }
  0x29   : > { %2052 = vmatpush1.bf16.msra.mxu1 %v3472_v34  ;;  %v486_v25 = vld [vmem:[%s3917_s25 + $0x840] sm:$0x77]  ;;  %v3537_v26 = vld [vmem:[%s3917_s25 + $0x18] ss:$116 sps:$4 sm:$0xff]   ;;  %v3550_v33 = vld [vmem:[%s3917_s25 + $0x75c] ss:$116 sps:$4 sm:$0xff]  }
  0x2a   : > { %2011 = vmatpush1.bf16.msra.mxu0 %v3431_v24  ;;  %2053 = vmatprep.subr.bf16.mxu1 %v3473_v35  ;;  %v3539_v24 = vld [vmem:[%s3917_s25 + $0x1c] ss:$116 sps:$4 sm:$0xff]   ;;  %v3270_v28 = vcombine.high %v486_v25, %v486_v25  ;;  %v3269_v29 = vcombine.low %v486_v25, %v486_v25  ;;  %v3524_v34 = vld [vmem:[%s3917_s25 + $0x4ac] ss:$116 sps:$4 sm:$0xff]   ;;  %v3542_v47 = vld [vmem:[%s3917_s25 + $0x1f4] ss:$116 sps:$4 sm:$0xff]  }
  0x2b   : > { %2012 = vmatprep.subr.bf16.mxu0 %v3432_v27  ;;  %v3510_v27 = vld [vmem:[%s3917_s25 + $0x678] ss:$116 sps:$4 sm:$0xff]   ;;  %v3516_v31 = vld [vmem:[%s3917_s25 + $0x590] ss:$116 sps:$4 sm:$0xff]  }
  0x2c   : > { %v3548_v35 = vld [vmem:[%s3917_s25 + $0x758] ss:$116 sps:$4 sm:$0xff]   ;;  %v3536_v42 = vld [vmem:[%s3917_s25 + $0x2dc] ss:$116 sps:$4 sm:$0xff]  }
  0x2d   : > { %2054 = vmatpush1.bf16.msra.mxu1 %v3478_v38  ;;  %v3530_v38 = vld [vmem:[%s3917_s25 + $0x3c4] ss:$116 sps:$4 sm:$0xff]   ;;  %v3608_v16 = vld [vmem:[%s3917_s25 + $0x76c] ss:$116 sps:$4 sm:$0xff]  }
  0x2e   : > { %2013 = vmatpush1.bf16.msra.mxu0 %v3434_v30  ;;  %2055 = vmatprep.subr.bf16.mxu1 %v3479_v40  ;;  %v3518_v30 = vld [vmem:[%s3917_s25 + $0x594] ss:$116 sps:$4 sm:$0xff]   ;;  %v3594_v25 = vld [vmem:[%s3917_s25 + $0x2ec] ss:$116 sps:$4 sm:$0xff]  }
  0x2f   : > { %3292 = vmatprep.subr.msk.bf16.mxu0 %vm1910_vm1, %v3264_v32  ;;  %v1930_v32 = vsel %vm1910_vm1, %v3269_v29, 0  ;;  %v3528_v40 = vld [vmem:[%s3917_s25 + $0x3c0] ss:$116 sps:$4 sm:$0xff]   ;;  %v3600_v29 = vld [vmem:[%s3917_s25 + $0x204] ss:$116 sps:$4 sm:$0xff]  }
  0x31   : > { %2056 = vmatpush1.bf16.msra.mxu1 %v3484_v44  ;;  %v3562_v44 = vld [vmem:[%s3917_s25 + $0x598] ss:$116 sps:$4 sm:$0xff]  }
  0x32   : > { %2027 = vmatpush2.bf16.msra.mxu0 %v1912_v36  ;;  %3294 = vmatprep.subr.msk.bf16.mxu1 %vm1910_vm1, %v3266_v46  ;;  %v3522_v36 = vld [vmem:[%s3917_s25 + $0x4a8] ss:$116 sps:$4 sm:$0xff]  }
  0x33   : > { %2028 = vmatprep.subr.bf16.mxu0 %v3440_v37  ;;  %v3557_v37 = vld [vmem:[%s3917_s25 + $0x684] ss:$116 sps:$4 sm:$0xff]   ;;  %v3567_v46 = vld [vmem:[%s3917_s25 + $0x4b4] ss:$116 sps:$4 sm:$0xff]  }
  0x35   : > { %2070 = vmatpush2.bf16.msra.mxu1 %v1918_v50  ;;  %v3573_v50 = vld [vmem:[%s3917_s25 + $0x3cc] ss:$116 sps:$4 sm:$0xff]  }
  0x36   : > { %2029 = vmatpush2.bf16.msra.mxu0 %v3444_v39  ;;  %2071 = vmatprep.subr.bf16.mxu1 %v3490_v51  ;;  %v3555_v39 = vld [vmem:[%s3917_s25 + $0x680] ss:$116 sps:$4 sm:$0xff]  }
  0x37   : > { %2084 = vmatprep.subr.bf16.mxu0 %v3453_v41  ;;  %v3564_v41 = vld [vmem:[%s3917_s25 + $0x59c] ss:$116 sps:$4 sm:$0xff]   ;;  %v3546_v51 = vld [vmem:[%s3917_s25 + $0x10c] ss:$116 sps:$4 sm:$0xff]  }
  0x39   : > { %2031 = vmatmul.mubr.bf16.vlgmr.msra.gmra.mxu0 %v3960_v43  ;;  %2072 = vmatpush2.bf16.msra.mxu1 %v3495_v53  ;;  %v3544_v53 = vld [vmem:[%s3917_s25 + $0x108] ss:$116 sps:$4 sm:$0xff]  }
  0x3a   : > { %2085 = vmatpush1.bf16.msra.mxu0 %v3451_v45  ;;  %3297 = vmatprep.mubr.msk.bf16.mxu0 %vm1906_vm0, %v3898_v0  ;;  %v3534_v45 = vld [vmem:[%s3917_s25 + $0x2d8] ss:$116 sps:$4 sm:$0xff]  }
  0x3b   : > { %2086 = vmatprep.subr.bf16.mxu0 %v3459_v48  ;;  %2127 = vmatprep.subr.bf16.mxu1 %v3499_v55  ;;  %v3565_v48 = vld [vmem:[%s3917_s25 + $0x4b0] ss:$116 sps:$4 sm:$0xff]  }
  0x3c   : > { %2074 = vmatmul.mubr.bf16.vlgmr.msra.gmra.mxu1 %v3960_v43  ;;  %v3553_v55 = vld [vmem:[%s3917_s25 + $0x24] ss:$116 sps:$4 sm:$0xff]  }
  0x3d   : > { %2128 = vmatpush1.bf16.msra.mxu1 %v3497_v57  ;;  %3299 = vmatprep.mubr.msk.bf16.mxu1 %vm1906_vm0, %v3898_v0  ;;  %v3577_v57 = vld [vmem:[%s3917_s25 + $0x2e0] ss:$116 sps:$4 sm:$0xff]  }
  0x3e   : > { %2087 = vmatpush1.bf16.msra.mxu0 %v3457_v49  ;;  %2129 = vmatprep.subr.bf16.mxu1 %v3506_v59  ;;  %v3540_v49 = vld [vmem:[%s3917_s25 + $0x1f0] ss:$116 sps:$4 sm:$0xff]  }
  0x3f   : > { %2088 = vmatprep.subr.bf16.mxu0 %v3465_v52  ;;  %v3571_v52 = vld [vmem:[%s3917_s25 + $0x3c8] ss:$116 sps:$4 sm:$0xff]  }
  0x40   : > { %v3585_v59 = vld [vmem:[%s3917_s25 + $0x1fc] ss:$116 sps:$4 sm:$0xff]  }
  0x41   : > { %2130 = vmatpush1.bf16.msra.mxu1 %v3504_v61 }
  0x42   : > { %2089 = vmatpush1.bf16.msra.mxu0 %v3463_v54  ;;  %2131 = vmatprep.subr.bf16.mxu1 %v3509_v63  ;;  %v3579_v54 = vld [vmem:[%s3917_s25 + $0x2e4] ss:$116 sps:$4 sm:$0xff]   ;;  %v3591_v63 = vld [vmem:[%s3917_s25 + $0x114] ss:$116 sps:$4 sm:$0xff]  }
  0x43   : > { %2090 = vmatprep.subr.bf16.mxu0 %v3471_v56  ;;  %v487_v56 = vld [vmem:[%s3917_s25 + $0x848] sm:$0x77] }
  0x44   : > { %v3271_v61 = vcombine.low %v487_v56, %v487_v56 }
  0x45   : > { %2132 = vmatpush1.bf16.msra.mxu1 %v3507_v3  ;;  %v3561_v3 = vld [vmem:[%s3917_s25 + $0x764] ss:$116 sps:$4 sm:$0xff]  }
  0x46   : > { %2091 = vmatpush1.bf16.msra.mxu0 %v3469_v58  ;;  %2133 = vmatprep.subr.bf16.mxu1 %v3515_v5  ;;  %v3551_v58 = vld [vmem:[%s3917_s25 + $0x20] ss:$116 sps:$4 sm:$0xff]  }
  0x47   : > { %2092 = vmatprep.subr.bf16.mxu0 %v3477_v60  ;;  %v3272_v60 = vcombine.high %v487_v56, %v487_v56  ;;  %v3570_v5 = vld [vmem:[%s3917_s25 + $0x68c] ss:$116 sps:$4 sm:$0xff]  }
  0x49   : > { %2134 = vmatpush1.bf16.msra.mxu1 %v3513_v8  ;;  %v488_v8 = vld [vmem:[%s3917_s25 + $0x850] sm:$0x77] }
  0x4a   : > { %2093 = vmatpush1.bf16.msra.mxu0 %v3475_v62  ;;  %2135 = vmatprep.subr.bf16.mxu1 %v3521_v9  ;;  %v3583_v62 = vld [vmem:[%s3917_s25 + $0x1f8] ss:$116 sps:$4 sm:$0xff]   ;;  %v3595_v9 = vld [vmem:[%s3917_s25 + $0x28] ss:$116 sps:$4 sm:$0xff]   ;;  %v3274_v11 = vcombine.high %v488_v8, %v488_v8 }
  0x4b   : > { %2094 = vmatprep.subr.bf16.mxu0 %v3483_v1  ;;  %v1936_v1 = vsel %vm1910_vm1, %v3271_v61, 0  ;;  %v3640_v61 = vld [vmem:[%s3917_s25 + $0x4cc] ss:$116 sps:$4 sm:$0xff]  }
  0x4d   : > { %2136 = vmatpush1.bf16.msra.mxu1 %v3519_v13  ;;  %v3576_v13 = vld [vmem:[%s3917_s25 + $0x5a4] ss:$116 sps:$4 sm:$0xff]  }
  0x4e   : > { %2095 = vmatpush1.bf16.msra.mxu0 %v3481_v4  ;;  %2137 = vmatprep.subr.bf16.mxu1 %v3527_v14  ;;  %v3559_v4 = vld [vmem:[%s3917_s25 + $0x760] ss:$116 sps:$4 sm:$0xff]  }
  0x4f   : > { %2096 = vmatprep.subr.bf16.mxu0 %v3488_v6  ;;  %v3589_v6 = vld [vmem:[%s3917_s25 + $0x110] ss:$116 sps:$4 sm:$0xff]   ;;  %v3574_v14 = vld [vmem:[%s3917_s25 + $0x5a0] ss:$116 sps:$4 sm:$0xff]  }
  0x51   : > { %2138 = vmatpush1.bf16.msra.mxu1 %v3525_v17  ;;  %v3582_v17 = vld [vmem:[%s3917_s25 + $0x4bc] ss:$116 sps:$4 sm:$0xff]  }
  0x52   : > { %2097 = vmatpush1.bf16.msra.mxu0 %v3486_v7  ;;  %2139 = vmatprep.subr.bf16.mxu1 %v3533_v18  ;;  %v3597_v7 = vld [vmem:[%s3917_s25 + $0x2c] ss:$116 sps:$4 sm:$0xff]  }
  0x53   : > { %2098 = vmatprep.subr.bf16.mxu0 %v3494_v10  ;;  %v3568_v10 = vld [vmem:[%s3917_s25 + $0x688] ss:$116 sps:$4 sm:$0xff]   ;;  %v3580_v18 = vld [vmem:[%s3917_s25 + $0x4b8] ss:$116 sps:$4 sm:$0xff]  }
  0x55   : > { %2140 = vmatpush1.bf16.msra.mxu1 %v3531_v23  ;;  %v3613_v23 = vld [vmem:[%s3917_s25 + $0x690] ss:$116 sps:$4 sm:$0xff]  }
  0x56   : > { %2099 = vmatpush1.bf16.msra.mxu0 %v3492_v12  ;;  %2141 = vmatprep.subr.bf16.mxu1 %v3539_v24  ;;  %v3273_v12 = vcombine.low %v488_v8, %v488_v8  ;;  %v3622_v24 = vld [vmem:[%s3917_s25 + $0x5ac] ss:$116 sps:$4 sm:$0xff]   ;;  %v3652_v8 = vld [vmem:[%s3917_s25 + $0x2fc] ss:$116 sps:$4 sm:$0xff]  }
  0x57   : > { %3296 = vmatprep.subr.msk.bf16.mxu0 %vm1910_vm1, %v3268_v15 }
  0x58   : > { %v1942_v15 = vsel %vm1910_vm1, %v3273_v12, 0  ;;  %v3658_v12 = vld [vmem:[%s3917_s25 + $0x214] ss:$116 sps:$4 sm:$0xff]  }
  0x59   : > { %2142 = vmatpush1.bf16.msra.mxu1 %v3537_v26  ;;  %v3620_v26 = vld [vmem:[%s3917_s25 + $0x5a8] ss:$116 sps:$4 sm:$0xff]  }
  0x5a   : > { %2113 = vmatpush2.bf16.msra.mxu0 %v1924_v19  ;;  %3298 = vmatprep.subr.msk.bf16.mxu1 %vm1910_vm1, %v3270_v28  ;;  %v3606_v19 = vld [vmem:[%s3917_s25 + $0x768] ss:$116 sps:$4 sm:$0xff]   ;;  %v3625_v28 = vld [vmem:[%s3917_s25 + $0x4c4] ss:$116 sps:$4 sm:$0xff]  }
  0x5b   : > { %2114 = vmatprep.subr.bf16.mxu0 %v3503_v20  ;;  %v3615_v20 = vld [vmem:[%s3917_s25 + $0x694] ss:$116 sps:$4 sm:$0xff]  }
  0x5d   : > { %2156 = vmatpush2.bf16.msra.mxu1 %v1930_v32  ;;  %v3631_v32 = vld [vmem:[%s3917_s25 + $0x3dc] ss:$116 sps:$4 sm:$0xff]  }
  0x5e   : > { %2115 = vmatpush2.bf16.msra.mxu0 %v3501_v21  ;;  %2157 = vmatprep.subr.bf16.mxu1 %v3550_v33  ;;  %v3588_v21 = vld [vmem:[%s3917_s25 + $0x3d4] ss:$116 sps:$4 sm:$0xff]   ;;  %v3629_v33 = vld [vmem:[%s3917_s25 + $0x3d8] ss:$116 sps:$4 sm:$0xff]  }
  0x5f   : > { %2170 = vmatprep.subr.bf16.mxu0 %v3512_v22  ;;  %v3586_v22 = vld [vmem:[%s3917_s25 + $0x3d0] ss:$116 sps:$4 sm:$0xff]  }
  0x61   : > { %2117 = vmatmul.mubr.bf16.vlgmr.msra.gmra.mxu0 %v3960_v43  ;;  %2158 = vmatpush2.bf16.msra.mxu1 %v3548_v35  ;;  %v3637_v35 = vld [vmem:[%s3917_s25 + $0x2f4] ss:$116 sps:$4 sm:$0xff]  }
  0x62   : > { %2171 = vmatpush1.bf16.msra.mxu0 %v3510_v27  ;;  %3301 = vmatprep.mubr.msk.bf16.mxu0 %vm1906_vm0, %v3898_v0  ;;  %v3592_v27 = vld [vmem:[%s3917_s25 + $0x2e8] ss:$116 sps:$4 sm:$0xff]  }
  0x63   : > { %2172 = vmatprep.subr.bf16.mxu0 %v3518_v30  ;;  %2213 = vmatprep.subr.bf16.mxu1 %v3557_v37  ;;  %v3623_v30 = vld [vmem:[%s3917_s25 + $0x4c0] ss:$116 sps:$4 sm:$0xff]   ;;  %v489_v37 = vld [vmem:[%s3917_s25 + $0x858] sm:$0x77] }
  0x64   : > { %2160 = vmatmul.mubr.bf16.vlgmr.msra.gmra.mxu1 %v3960_v43 }
  0x65   : > { %2214 = vmatpush1.bf16.msra.mxu1 %v3555_v39  ;;  %3303 = vmatprep.mubr.msk.bf16.mxu1 %vm1906_vm0, %v3898_v0  ;;  %v3609_v39 = vld [vmem:[%s3917_s25 + $0x30] ss:$116 sps:$4 sm:$0xff]  }
  0x66   : > { %2173 = vmatpush1.bf16.msra.mxu0 %v3516_v31  ;;  %2215 = vmatprep.subr.bf16.mxu1 %v3564_v41  ;;  %v3598_v31 = vld [vmem:[%s3917_s25 + $0x200] ss:$116 sps:$4 sm:$0xff]   ;;  %v3276_v41 = vcombine.high %v489_v37, %v489_v37 }
  0x67   : > { %2174 = vmatprep.subr.bf16.mxu0 %v3524_v34  ;;  %v3602_v34 = vld [vmem:[%s3917_s25 + $0x118] ss:$116 sps:$4 sm:$0xff]  }
  0x69   : > { %2216 = vmatpush1.bf16.msra.mxu1 %v3562_v44  ;;  %v3641_v44 = vld [vmem:[%s3917_s25 + $0x208] ss:$116 sps:$4 sm:$0xff]  }
  0x6a   : > { %2175 = vmatpush1.bf16.msra.mxu0 %v3522_v36  ;;  %2217 = vmatprep.subr.bf16.mxu1 %v3567_v46  ;;  %v3611_v36 = vld [vmem:[%s3917_s25 + $0x34] ss:$116 sps:$4 sm:$0xff]  }
  0x6b   : > { %2176 = vmatprep.subr.bf16.mxu0 %v3530_v38  ;;  %v3635_v38 = vld [vmem:[%s3917_s25 + $0x2f0] ss:$116 sps:$4 sm:$0xff]  }
  0x6d   : > { %2218 = vmatpush1.bf16.msra.mxu1 %v3565_v48  ;;  %v3617_v48 = vld [vmem:[%s3917_s25 + $0x770] ss:$116 sps:$4 sm:$0xff]  }
  0x6e   : > { %2177 = vmatpush1.bf16.msra.mxu0 %v3528_v40  ;;  %2219 = vmatprep.subr.bf16.mxu1 %v3573_v50  ;;  %v3643_v40 = vld [vmem:[%s3917_s25 + $0x20c] ss:$116 sps:$4 sm:$0xff]   ;;  %v3628_v50 = vld [vmem:[%s3917_s25 + $0x69c] ss:$116 sps:$4 sm:$0xff]  }
  0x6f   : > { %2178 = vmatprep.subr.bf16.mxu0 %v3536_v42  ;;  %v3275_v42 = vcombine.low %v489_v37, %v489_v37 }
  0x71   : > { %2220 = vmatpush1.bf16.msra.mxu1 %v3571_v52  ;;  %v1948_v46 = vsel %vm1910_vm1, %v3275_v42, 0  ;;  %v490_v52 = vld [vmem:[%s3917_s25 + $0x860] sm:$0x77] }
  0x72   : > { %2179 = vmatpush1.bf16.msra.mxu0 %v3534_v45  ;;  %2221 = vmatprep.subr.bf16.mxu1 %v3579_v54  ;;  %v3649_v45 = vld [vmem:[%s3917_s25 + $0x124] ss:$116 sps:$4 sm:$0xff]   ;;  %v3277_v56 = vcombine.low %v490_v52, %v490_v52  ;;  %v3724_v42 = vld [vmem:[%s3917_s25 + $0x78c] ss:$116 sps:$4 sm:$0xff]  }
  0x73   : > { %2180 = vmatprep.subr.bf16.mxu0 %v3542_v47  ;;  %v3619_v47 = vld [vmem:[%s3917_s25 + $0x774] ss:$116 sps:$4 sm:$0xff]   ;;  %v3626_v54 = vld [vmem:[%s3917_s25 + $0x698] ss:$116 sps:$4 sm:$0xff]  }
  0x75   : > { %2222 = vmatpush1.bf16.msra.mxu1 %v3577_v57  ;;  %v3634_v57 = vld [vmem:[%s3917_s25 + $0x5b4] ss:$116 sps:$4 sm:$0xff]  }
  0x76   : > { %2181 = vmatpush1.bf16.msra.mxu0 %v3540_v49  ;;  %2223 = vmatprep.subr.bf16.mxu1 %v3585_v59  ;;  %v3647_v49 = vld [vmem:[%s3917_s25 + $0x120] ss:$116 sps:$4 sm:$0xff]   ;;  %v1954_v59 = vsel %vm1910_vm1, %v3277_v56, 0  ;;  %v3716_v56 = vld [vmem:[%s3917_s25 + $0x224] ss:$116 sps:$4 sm:$0xff]  }
  0x77   : > { %2182 = vmatprep.subr.bf16.mxu0 %v3546_v51  ;;  %v3655_v51 = vld [vmem:[%s3917_s25 + $0x3c] ss:$116 sps:$4 sm:$0xff]  }
  0x79   : > { %2224 = vmatpush1.bf16.msra.mxu1 %v3583_v62  ;;  %v4118_v62 = vld [vmem:[%s4398_s1 + $0x4] ss:$8 sps:$4 sm:$0xff]  }
  0x7a   : > { %2183 = vmatpush1.bf16.msra.mxu0 %v3544_v53  ;;  %2225 = vmatprep.subr.bf16.mxu1 %v3591_v63  ;;  %v3653_v53 = vld [vmem:[%s3917_s25 + $0x38] ss:$116 sps:$4 sm:$0xff]   ;;  %v3638_v63 = vld [vmem:[%s3917_s25 + $0x4c8] ss:$116 sps:$4 sm:$0xff]  }
  0x7b   : > { %2184 = vmatprep.subr.bf16.mxu0 %v3553_v55  ;;  %v3278_v55 = vcombine.high %v490_v52, %v490_v52  ;;  %v3710_v52 = vld [vmem:[%s3917_s25 + $0x30c] ss:$116 sps:$4 sm:$0xff]  }
  0x7d   : > { %2226 = vmatpush1.bf16.msra.mxu1 %v3589_v6  ;;  %v3671_v6 = vld [vmem:[%s3917_s25 + $0x6a0] ss:$116 sps:$4 sm:$0xff]  }
  0x7e   : > { %2185 = vmatpush1.bf16.msra.mxu0 %v3551_v58  ;;  %2227 = vmatprep.subr.bf16.mxu1 %v3597_v7  ;;  %v3632_v58 = vld [vmem:[%s3917_s25 + $0x5b0] ss:$116 sps:$4 sm:$0xff]  }
  0x7f   : > { %3300 = vmatprep.subr.msk.bf16.mxu0 %vm1910_vm1, %v3272_v60  ;;  %v3666_v60 = vld [vmem:[%s3917_s25 + $0x77c] ss:$116 sps:$4 sm:$0xff]  }
  0x80   : > { %v3680_v7 = vld [vmem:[%s3917_s25 + $0x5bc] ss:$116 sps:$4 sm:$0xff]  }
  0x81   : > { %2228 = vmatpush1.bf16.msra.mxu1 %v3595_v9  ;;  %v3678_v9 = vld [vmem:[%s3917_s25 + $0x5b8] ss:$116 sps:$4 sm:$0xff]  }
  0x82   : > { %2199 = vmatpush2.bf16.msra.mxu0 %v1936_v1  ;;  %3302 = vmatprep.subr.msk.bf16.mxu1 %vm1910_vm1, %v3274_v11  ;;  %v3664_v1 = vld [vmem:[%s3917_s25 + $0x778] ss:$116 sps:$4 sm:$0xff]   ;;  %v3683_v11 = vld [vmem:[%s3917_s25 + $0x4d4] ss:$116 sps:$4 sm:$0xff]  }
  0x83   : > { %2200 = vmatprep.subr.bf16.mxu0 %v3561_v3  ;;  %v3673_v3 = vld [vmem:[%s3917_s25 + $0x6a4] ss:$116 sps:$4 sm:$0xff]  }
  0x85   : > { %2242 = vmatpush2.bf16.msra.mxu1 %v1942_v15  ;;  %v3662_v15 = vld [vmem:[%s3917_s25 + $0x12c] ss:$116 sps:$4 sm:$0xff]  }
  0x86   : > { %2201 = vmatpush2.bf16.msra.mxu0 %v3559_v4  ;;  %2243 = vmatprep.subr.bf16.mxu1 %v3608_v16  ;;  %v3646_v4 = vld [vmem:[%s3917_s25 + $0x3e4] ss:$116 sps:$4 sm:$0xff]   ;;  %v3687_v16 = vld [vmem:[%s3917_s25 + $0x3e8] ss:$116 sps:$4 sm:$0xff]  }
  0x87   : > { %2256 = vmatprep.subr.bf16.mxu0 %v3570_v5  ;;  %v3644_v5 = vld [vmem:[%s3917_s25 + $0x3e0] ss:$116 sps:$4 sm:$0xff]  }
  0x89   : > { %2203 = vmatmul.mubr.bf16.vlgmr.msra.gmra.mxu0 %v3960_v43  ;;  %2244 = vmatpush2.bf16.msra.mxu1 %v3606_v19  ;;  %v3669_v19 = vld [vmem:[%s3917_s25 + $0x44] ss:$116 sps:$4 sm:$0xff]  }
  0x8a   : > { %2257 = vmatpush1.bf16.msra.mxu0 %v3568_v10  ;;  %3305 = vmatprep.mubr.msk.bf16.mxu0 %vm1906_vm0, %v3898_v0  ;;  %v3650_v10 = vld [vmem:[%s3917_s25 + $0x2f8] ss:$116 sps:$4 sm:$0xff]  }
  0x8b   : > { %2258 = vmatprep.subr.bf16.mxu0 %v3576_v13  ;;  %2299 = vmatprep.subr.bf16.mxu1 %v3615_v20  ;;  %v3681_v13 = vld [vmem:[%s3917_s25 + $0x4d0] ss:$116 sps:$4 sm:$0xff]   ;;  %v491_v20 = vld [vmem:[%s3917_s25 + $0x868] sm:$0x77] }
  0x8c   : > { %2246 = vmatmul.mubr.bf16.vlgmr.msra.gmra.mxu1 %v3960_v43 }
  0x8d   : > { %2300 = vmatpush1.bf16.msra.mxu1 %v3613_v23  ;;  %3307 = vmatprep.mubr.msk.bf16.mxu1 %vm1906_vm0, %v3898_v0  ;;  %v3604_v0 = vld [vmem:[%s3917_s25 + $0x11c] ss:$116 sps:$4 sm:$0xff]  }
  0x8e   : > { %2259 = vmatpush1.bf16.msra.mxu0 %v3574_v14  ;;  %2301 = vmatprep.subr.bf16.mxu1 %v3622_v24  ;;  %v3689_v14 = vld [vmem:[%s3917_s25 + $0x3ec] ss:$116 sps:$4 sm:$0xff]   ;;  %v3701_v23 = vld [vmem:[%s3917_s25 + $0x21c] ss:$116 sps:$4 sm:$0xff]   ;;  %v3280_v24 = vcombine.high %v491_v20, %v491_v20 }
  0x8f   : > { %2260 = vmatprep.subr.bf16.mxu0 %v3582_v17  ;;  %v3660_v17 = vld [vmem:[%s3917_s25 + $0x128] ss:$116 sps:$4 sm:$0xff]  }
  0x91   : > { %2302 = vmatpush1.bf16.msra.mxu1 %v3620_v26  ;;  %v3699_v26 = vld [vmem:[%s3917_s25 + $0x218] ss:$116 sps:$4 sm:$0xff]  }
  0x92   : > { %2261 = vmatpush1.bf16.msra.mxu0 %v3580_v18  ;;  %2303 = vmatprep.subr.bf16.mxu1 %v3625_v28  ;;  %v3695_v18 = vld [vmem:[%s3917_s25 + $0x304] ss:$116 sps:$4 sm:$0xff]  }
  0x93   : > { %2262 = vmatprep.subr.bf16.mxu0 %v3588_v21  ;;  %v3693_v21 = vld [vmem:[%s3917_s25 + $0x300] ss:$116 sps:$4 sm:$0xff]  }
  0x95   : > { %2304 = vmatpush1.bf16.msra.mxu1 %v3623_v30  ;;  %v3705_v30 = vld [vmem:[%s3917_s25 + $0x130] ss:$116 sps:$4 sm:$0xff]  }
  0x96   : > { %2263 = vmatpush1.bf16.msra.mxu0 %v3586_v22  ;;  %2305 = vmatprep.subr.bf16.mxu1 %v3631_v32  ;;  %v3667_v22 = vld [vmem:[%s3917_s25 + $0x40] ss:$116 sps:$4 sm:$0xff]  }
  0x97   : > { %2264 = vmatprep.subr.bf16.mxu0 %v3594_v25  ;;  %v3279_v25 = vcombine.low %v491_v20, %v491_v20  ;;  %v3713_v32 = vld [vmem:[%s3917_s25 + $0x4c] ss:$116 sps:$4 sm:$0xff]  }
  0x99   : > { %2306 = vmatpush1.bf16.msra.mxu1 %v3629_v33  ;;  %v1960_v28 = vsel %vm1910_vm1, %v3279_v25, 0  ;;  %v492_v33 = vld [vmem:[%s3917_s25 + $0x870] sm:$0x77] }
  0x9a   : > { %2265 = vmatpush1.bf16.msra.mxu0 %v3592_v27  ;;  %2307 = vmatprep.subr.bf16.mxu1 %v3637_v35  ;;  %v3707_v27 = vld [vmem:[%s3917_s25 + $0x134] ss:$116 sps:$4 sm:$0xff]   ;;  %v3281_v37 = vcombine.low %v492_v33, %v492_v33 }
  0x9b   : > { %2266 = vmatprep.subr.bf16.mxu0 %v3600_v29  ;;  %v3677_v29 = vld [vmem:[%s3917_s25 + $0x784] ss:$116 sps:$4 sm:$0xff]   ;;  %v3684_v35 = vld [vmem:[%s3917_s25 + $0x6a8] ss:$116 sps:$4 sm:$0xff]  }
  0x9d   : > { %2308 = vmatpush1.bf16.msra.mxu1 %v3635_v38  ;;  %v3692_v38 = vld [vmem:[%s3917_s25 + $0x5c4] ss:$116 sps:$4 sm:$0xff]  }
  0x9e   : > { %2267 = vmatpush1.bf16.msra.mxu0 %v3598_v31  ;;  %2309 = vmatprep.subr.bf16.mxu1 %v3643_v40  ;;  %v3675_v31 = vld [vmem:[%s3917_s25 + $0x780] ss:$116 sps:$4 sm:$0xff]  }
  0x9f   : > { %2268 = vmatprep.subr.bf16.mxu0 %v3604_v0  ;;  %v3686_v0 = vld [vmem:[%s3917_s25 + $0x6ac] ss:$116 sps:$4 sm:$0xff]  }
  0xa0   : > { %v3690_v40 = vld [vmem:[%s3917_s25 + $0x5c0] ss:$116 sps:$4 sm:$0xff]  }
  0xa1   : > { %2310 = vmatpush1.bf16.msra.mxu1 %v3641_v44  ;;  %v3698_v44 = vld [vmem:[%s3917_s25 + $0x4dc] ss:$116 sps:$4 sm:$0xff]  }
  0xa2   : > { %2269 = vmatpush1.bf16.msra.mxu0 %v3602_v34  ;;  %2311 = vmatprep.subr.bf16.mxu1 %v3649_v45  ;;  %v3711_v34 = vld [vmem:[%s3917_s25 + $0x48] ss:$116 sps:$4 sm:$0xff]  }
  0xa3   : > { %2270 = vmatprep.subr.bf16.mxu0 %v3611_v36  ;;  %v3282_v36 = vcombine.high %v492_v33, %v492_v33  ;;  %v3722_v45 = vld [vmem:[%s3917_s25 + $0x788] ss:$116 sps:$4 sm:$0xff]  }
  0xa5   : > { %2312 = vmatpush1.bf16.msra.mxu1 %v3647_v49  ;;  %v3729_v49 = vld [vmem:[%s3917_s25 + $0x6b0] ss:$116 sps:$4 sm:$0xff]  }
  0xa6   : > { %2271 = vmatpush1.bf16.msra.mxu0 %v3609_v39  ;;  %2313 = vmatprep.subr.bf16.mxu1 %v3655_v51  ;;  %v4165_v39 = vld [vmem:[%s4398_s1] ss:$8 sps:$4 sm:$0xff]  }
  0xa7   : > { %3304 = vmatprep.subr.msk.bf16.mxu0 %vm1910_vm1, %v3276_v41  ;;  %v1966_v41 = vsel %vm1910_vm1, %v3281_v37, 0  ;;  %v3738_v51 = vld [vmem:[%s3917_s25 + $0x5cc] ss:$116 sps:$4 sm:$0xff]  }
  0xa9   : > { %2314 = vmatpush1.bf16.msra.mxu1 %v3653_v53  ;;  %v3736_v53 = vld [vmem:[%s3917_s25 + $0x5c8] ss:$116 sps:$4 sm:$0xff]  }
  0xaa   : > { %2285 = vmatpush2.bf16.msra.mxu0 %v1948_v46  ;;  %3306 = vmatprep.subr.msk.bf16.mxu1 %vm1910_vm1, %v3278_v55  ;;  %v3696_v46 = vld [vmem:[%s3917_s25 + $0x4d8] ss:$116 sps:$4 sm:$0xff]  }
  0xab   : > { %2286 = vmatprep.subr.bf16.mxu0 %v3619_v47  ;;  %v3731_v47 = vld [vmem:[%s3917_s25 + $0x6b4] ss:$116 sps:$4 sm:$0xff]   ;;  %v3741_v55 = vld [vmem:[%s3917_s25 + $0x4e4] ss:$116 sps:$4 sm:$0xff]  }
  0xad   : > { %2328 = vmatpush2.bf16.msra.mxu1 %v1954_v59  ;;  %v3747_v59 = vld [vmem:[%s3917_s25 + $0x3fc] ss:$116 sps:$4 sm:$0xff]  }
  0xae   : > { %2287 = vmatpush2.bf16.msra.mxu0 %v3617_v48  ;;  %2329 = vmatprep.subr.bf16.mxu1 %v3666_v60  ;;  %v3704_v48 = vld [vmem:[%s3917_s25 + $0x3f4] ss:$116 sps:$4 sm:$0xff]   ;;  %v3720_v60 = vld [vmem:[%s3917_s25 + $0x13c] ss:$116 sps:$4 sm:$0xff]  }
  0xaf   : > { %2342 = vmatprep.subr.bf16.mxu0 %v3628_v50  ;;  %v3702_v50 = vld [vmem:[%s3917_s25 + $0x3f0] ss:$116 sps:$4 sm:$0xff]  }
  0xb1   : > { %2289 = vmatmul.mubr.bf16.vlgmr.msra.gmra.mxu0 %v3960_v43  ;;  %2330 = vmatpush2.bf16.msra.mxu1 %v3664_v1  ;;  %v3753_v1 = vld [vmem:[%s3917_s25 + $0x314] ss:$116 sps:$4 sm:$0xff]  }
  0xb2   : > { %2343 = vmatpush1.bf16.msra.mxu0 %v3626_v54  ;;  %3309 = vmatprep.mubr.msk.bf16.mxu0 %vm1906_vm0, %v4118_v62  ;;  %v3708_v54 = vld [vmem:[%s3917_s25 + $0x308] ss:$116 sps:$4 sm:$0xff]  }
  0xb3   : > { %2344 = vmatprep.subr.bf16.mxu0 %v3634_v57  ;;  %2385 = vmatprep.subr.bf16.mxu1 %v3673_v3  ;;  %v3739_v57 = vld [vmem:[%s3917_s25 + $0x4e0] ss:$116 sps:$4 sm:$0xff]  }
  0xb4   : > { %2332 = vmatmul.mubr.bf16.vlgmr.msra.gmra.mxu1 %v3960_v43  ;;  %v3656_v43 = vld [vmem:[%s3917_s25 + $0x210] ss:$116 sps:$4 sm:$0xff]   ;;  %v3727_v3 = vld [vmem:[%s3917_s25 + $0x54] ss:$116 sps:$4 sm:$0xff]  }
  0xb5   : > { %2386 = vmatpush1.bf16.msra.mxu1 %v3671_v6  ;;  %3311 = vmatprep.mubr.msk.bf16.mxu1 %vm1906_vm0, %v4118_v62  ;;  %v3725_v6 = vld [vmem:[%s3917_s25 + $0x50] ss:$116 sps:$4 sm:$0xff]  }
  0xb6   : > { %2345 = vmatpush1.bf16.msra.mxu0 %v3632_v58  ;;  %2387 = vmatprep.subr.bf16.mxu1 %v3680_v7  ;;  %v3714_v58 = vld [vmem:[%s3917_s25 + $0x220] ss:$116 sps:$4 sm:$0xff]  }
  0xb7   : > { %2346 = vmatprep.subr.bf16.mxu0 %v3640_v61  ;;  %v3745_v61 = vld [vmem:[%s3917_s25 + $0x3f8] ss:$116 sps:$4 sm:$0xff]  }
  0xb8   : > { %v3759_v7 = vld [vmem:[%s3917_s25 + $0x22c] ss:$116 sps:$4 sm:$0xff]  }
  0xb9   : > { %2388 = vmatpush1.bf16.msra.mxu1 %v3678_v9 }
  0xba   : > { %2347 = vmatpush1.bf16.msra.mxu0 %v3638_v63  ;;  %2389 = vmatprep.subr.bf16.mxu1 %v3683_v11  ;;  %v3718_v63 = vld [vmem:[%s3917_s25 + $0x138] ss:$116 sps:$4 sm:$0xff]   ;;  %v3757_v11 = vld [vmem:[%s3917_s25 + $0x228] ss:$116 sps:$4 sm:$0xff]  }
  0xbb   : > { %2348 = vmatprep.subr.bf16.mxu0 %v3646_v4  ;;  %v493_v4 = vld [vmem:[%s3917_s25 + $0x878] sm:$0x77] }
  0xbc   : > { %v3283_v9 = vcombine.low %v493_v4, %v493_v4 }
  0xbd   : > { %2390 = vmatpush1.bf16.msra.mxu1 %v3681_v13 }
  0xbe   : > { %2349 = vmatpush1.bf16.msra.mxu0 %v3644_v5  ;;  %2391 = vmatprep.subr.bf16.mxu1 %v3689_v14  ;;  %v3751_v5 = vld [vmem:[%s3917_s25 + $0x310] ss:$116 sps:$4 sm:$0xff]   ;;  %v1972_v13 = vsel %vm1910_vm1, %v3283_v9, 0 }
  0xbf   : > { %2350 = vmatprep.subr.bf16.mxu0 %v3652_v8  ;;  %v3284_v8 = vcombine.high %v493_v4, %v493_v4  ;;  %v3794_v4 = vld [vmem:[%s3917_s25 + $0x5d8] ss:$116 sps:$4 sm:$0xff]   ;;  %v3797_v9 = vld [vmem:[%s3917_s25 + $0x4f0] ss:$116 sps:$4 sm:$0xff]  }
  0xc1   : > { %2392 = vmatpush1.bf16.msra.mxu1 %v3687_v16 }
  0xc2   : > { %2351 = vmatpush1.bf16.msra.mxu0 %v3650_v10  ;;  %2393 = vmatprep.subr.bf16.mxu1 %v3695_v18  ;;  %v4202_v10 = vpop.permute.xlu0 %502  ;;  %v3771_v18 = vld [vmem:[%s3917_s25 + $0x5c] ss:$116 sps:$4 sm:$0xff]  }
  0xc3   : > { %2352 = vmatprep.subr.bf16.mxu0 %v3658_v12  ;;  %v3765_v12 = vld [vmem:[%s3917_s25 + $0x144] ss:$116 sps:$4 sm:$0xff]  }
  0xc5   : > { %2394 = vmatpush1.bf16.msra.mxu1 %v3693_v21  ;;  %v3744_v21 = vld [vmem:[%s3917_s25 + $0x6bc] ss:$116 sps:$4 sm:$0xff]  }
  0xc6   : > { %2353 = vmatpush1.bf16.msra.mxu0 %v3656_v43  ;;  %2395 = vmatprep.subr.bf16.mxu1 %v3701_v23  ;;  %v3735_v43 = vld [vmem:[%s3917_s25 + $0x794] ss:$116 sps:$4 sm:$0xff]   ;;  %v4214_v20 = vpop.permute.xlu0 %507 }
  0xc7   : > { %2354 = vmatprep.subr.bf16.mxu0 %v3662_v15  ;;  %v3763_v15 = vld [vmem:[%s3917_s25 + $0x140] ss:$116 sps:$4 sm:$0xff]  }
  0xc9   : > { %2396 = vmatpush1.bf16.msra.mxu1 %v3699_v26  ;;  %v3769_v26 = vld [vmem:[%s3917_s25 + $0x58] ss:$116 sps:$4 sm:$0xff]  }
  0xca   : > { %2355 = vmatpush1.bf16.msra.mxu0 %v3660_v17  ;;  %2397 = vmatprep.subr.bf16.mxu1 %v3707_v27  ;;  %v3733_v17 = vld [vmem:[%s3917_s25 + $0x790] ss:$116 sps:$4 sm:$0xff]  }
  0xcb   : > { %2356 = vmatprep.subr.bf16.mxu0 %v3669_v19 }
  0xcd   : > { %2398 = vmatpush1.bf16.msra.mxu1 %v3705_v30 }
  0xce   : > { %2357 = vmatpush1.bf16.msra.mxu0 %v3667_v22  ;;  %2399 = vmatprep.subr.bf16.mxu1 %v3713_v32  ;;  %v494_v22 = vld [vmem:[%s3917_s25 + $0x880] sm:$0x77] }
  0xcf   : > { %3308 = vmatprep.subr.msk.bf16.mxu0 %vm1910_vm1, %v3280_v24  ;;  %v3286_v30 = vcombine.high %v494_v22, %v494_v22 }
  0xd1   : > { %2400 = vmatpush1.bf16.msra.mxu1 %v3711_v34 }
  0xd2   : > { %2371 = vmatpush2.bf16.msra.mxu0 %v1960_v28  ;;  %3310 = vmatprep.subr.msk.bf16.mxu1 %vm1910_vm1, %v3282_v36 }
  0xd3   : > { %2372 = vmatprep.subr.bf16.mxu0 %v3677_v29  ;;  %v3742_v29 = vld [vmem:[%s3917_s25 + $0x6b8] ss:$116 sps:$4 sm:$0xff]  }
  0xd5   : > { %2414 = vmatpush2.bf16.msra.mxu1 %v1966_v41  ;;  %v3756_v41 = vld [vmem:[%s3917_s25 + $0x4ec] ss:$116 sps:$4 sm:$0xff]  }
  0xd6   : > { %2373 = vmatpush2.bf16.msra.mxu0 %v3675_v31  ;;  %2415 = vmatprep.subr.bf16.mxu1 %v3724_v42  ;;  %v3285_v31 = vcombine.low %v494_v22, %v494_v22 }
  0xd7   : > { %2428 = vmatprep.subr.bf16.mxu0 %v3686_v0  ;;  %v3750_v0 = vld [vmem:[%s3917_s25 + $0x5d4] ss:$116 sps:$4 sm:$0xff]  }
  0xd9   : > { %2375 = vmatmul.mubr.bf16.vlgmr.msra.gmra.mxu0 %v4165_v39  ;;  %2416 = vmatpush2.bf16.msra.mxu1 %v3722_v45 }
  0xda   : > { %2429 = vmatpush1.bf16.msra.mxu0 %v3684_v35  ;;  %3313 = vmatprep.mubr.msk.bf16.mxu0 %vm1906_vm0, %v4118_v62  ;;  %v3748_v35 = vld [vmem:[%s3917_s25 + $0x5d0] ss:$116 sps:$4 sm:$0xff]  }
  0xdb   : > { %2430 = vmatprep.subr.bf16.mxu0 %v3692_v38  ;;  %2471 = vmatprep.subr.bf16.mxu1 %v3731_v47  ;;  %v1978_v38 = vsel %vm1910_vm1, %v3285_v31, 0  ;;  %v3754_v47 = vld [vmem:[%s3917_s25 + $0x4e8] ss:$116 sps:$4 sm:$0xff]   ;;  %v3791_v31 = vld [vmem:[%s3917_s25 + $0x7a0] ss:$116 sps:$4 sm:$0xff]  }
  0xdc   : > { %2418 = vmatmul.mubr.bf16.vlgmr.msra.gmra.mxu1 %v4165_v39 }
  0xdd   : > { %2472 = vmatpush1.bf16.msra.mxu1 %v3729_v49  ;;  %3315 = vmatprep.mubr.msk.bf16.mxu1 %vm1906_vm0, %v4118_v62  ;;  %v3789_v49 = vld [vmem:[%s3917_s25 + $0x6c4] ss:$116 sps:$4 sm:$0xff]  }
  0xde   : > { %2431 = vmatpush1.bf16.msra.mxu0 %v3690_v40  ;;  %2473 = vmatprep.subr.bf16.mxu1 %v3738_v51  ;;  %v3782_v40 = vld [vmem:[%s3917_s25 + $0x79c] ss:$116 sps:$4 sm:$0xff]  }
  0xdf   : > { %2432 = vmatprep.subr.bf16.mxu0 %v3698_v44 }
  0xe1   : > { %2474 = vmatpush1.bf16.msra.mxu1 %v3736_v53 }
  0xe2   : > { %2433 = vmatpush1.bf16.msra.mxu0 %v3696_v46  ;;  %2475 = vmatprep.subr.bf16.mxu1 %v3741_v55  ;;  %v3780_v46 = vld [vmem:[%s3917_s25 + $0x798] ss:$116 sps:$4 sm:$0xff]  }
  0xe3   : > { %2434 = vmatprep.subr.bf16.mxu0 %v3704_v48 }
  0xe5   : > { %2476 = vmatpush1.bf16.msra.mxu1 %v3739_v57  ;;  %v3760_v57 = vld [vmem:[%s3917_s25 + $0x400] ss:$116 sps:$4 sm:$0xff]  }
  0xe6   : > { %2435 = vmatpush1.bf16.msra.mxu0 %v3702_v50  ;;  %2477 = vmatprep.subr.bf16.mxu1 %v3747_v59  ;;  %v3762_v50 = vld [vmem:[%s3917_s25 + $0x404] ss:$116 sps:$4 sm:$0xff]   ;;  %v3796_v59 = vld [vmem:[%s3917_s25 + $0x5dc] ss:$116 sps:$4 sm:$0xff]  }
  0xe7   : > { %2436 = vmatprep.subr.bf16.mxu0 %v3710_v52 }
  0xe9   : > { %2478 = vmatpush1.bf16.msra.mxu1 %v3745_v61 }
  0xea   : > { %2437 = vmatpush1.bf16.msra.mxu0 %v3708_v54  ;;  %2479 = vmatprep.subr.bf16.mxu1 %v3753_v1 }
  0xeb   : > { %2438 = vmatprep.subr.bf16.mxu0 %v3716_v56  ;;  %v3787_v56 = vld [vmem:[%s3917_s25 + $0x6c0] ss:$116 sps:$4 sm:$0xff]  }
  0xed   : > { %2480 = vmatpush1.bf16.msra.mxu1 %v3751_v5  ;;  %v3766_v5 = vld [vmem:[%s3917_s25 + $0x318] ss:$116 sps:$4 sm:$0xff]  }
  0xee   : > { %2439 = vmatpush1.bf16.msra.mxu0 %v3714_v58  ;;  %2481 = vmatprep.subr.bf16.mxu1 %v3759_v7  ;;  %v3774_v7 = vld [vmem:[%s3917_s25 + $0x234] ss:$116 sps:$4 sm:$0xff]  }
  0xef   : > { %2440 = vmatprep.subr.bf16.mxu0 %v3720_v60  ;;  %v3768_v60 = vld [vmem:[%s3917_s25 + $0x31c] ss:$116 sps:$4 sm:$0xff]  }
  0xf1   : > { %2482 = vmatpush1.bf16.msra.mxu1 %v3757_v11  ;;  %v3772_v11 = vld [vmem:[%s3917_s25 + $0x230] ss:$116 sps:$4 sm:$0xff]  }
  0xf2   : > { %2441 = vmatpush1.bf16.msra.mxu0 %v3718_v63  ;;  %2483 = vmatprep.subr.bf16.mxu1 %v3765_v12  ;;  %v3803_v12 = vld [vmem:[%s3917_s25 + $0x40c] ss:$116 sps:$4 sm:$0xff]  }
  0xf3   : > { %2442 = vmatprep.subr.bf16.mxu0 %v3727_v3 }
  0xf5   : > { %2484 = vmatpush1.bf16.msra.mxu1 %v3763_v15  ;;  %v3807_v15 = vld [vmem:[%s3917_s25 + $0x324] ss:$116 sps:$4 sm:$0xff]  }
  0xf6   : > { %2443 = vmatpush1.bf16.msra.mxu0 %v3725_v6  ;;  %2485 = vmatprep.subr.bf16.mxu1 %v3771_v18  ;;  %v3799_v6 = vld [vmem:[%s3917_s25 + $0x4f4] ss:$116 sps:$4 sm:$0xff]  }
  0xf7   : > { %3312 = vmatprep.subr.msk.bf16.mxu0 %vm1910_vm1, %v3284_v8  ;;  %v3805_v18 = vld [vmem:[%s3917_s25 + $0x320] ss:$116 sps:$4 sm:$0xff]  }
  0xf9   : > { %v2032_v14 = vpop.f32.mrf.mxu0  ;;  %2486 = vmatpush1.bf16.msra.mxu1 %v3769_v26 }
  0xfa   : > { %v2033_v16 = vadd.f32 %v2032_v14, %v4202_v10  ;;  %2457 = vmatpush2.bf16.msra.mxu0 %v1972_v13  ;;  %3314 = vmatprep.subr.msk.bf16.mxu1 %vm1910_vm1, %v3286_v30  ;;  %v3778_v13 = vld [vmem:[%s3917_s25 + $0x14c] ss:$116 sps:$4 sm:$0xff]   ;;  %v3776_v14 = vld [vmem:[%s3917_s25 + $0x148] ss:$116 sps:$4 sm:$0xff]  }
  0xfb   : > { %v2034_v19 = vpop.f32.mrf.mxu0  ;;  %2458 = vmatprep.subr.bf16.mxu0 %v3735_v43  ;;  %v3801_v43 = vld [vmem:[%s3917_s25 + $0x408] ss:$116 sps:$4 sm:$0xff]  }
  0xfc   : > { %v2641_v23 = vmax.f32 %v2033_v16, 0.0  ;;  %v2035_v24 = vadd.f32 %v2034_v19, %v4202_v10  ;;  %v2075_v44 = vpop.f32.mrf.mxu1  ;;  %v3785_v16 = vld [vmem:[%s3917_s25 + $0x64] ss:$116 sps:$4 sm:$0xff]   ;;  %v3783_v19 = vld [vmem:[%s3917_s25 + $0x60] ss:$116 sps:$4 sm:$0xff]  }
  0xfd   : > { %v2036_v25 = vpop.f32.mrf.mxu0  ;;  %v2076_v45 = vadd.f32 %v2075_v44, %v4202_v10  ;;  %2500 = vmatpush2.bf16.msra.mxu1 %v1978_v38 }
  0xfe   : > { %v2642_v27 = vmax.f32 %v2035_v24, 0.0  ;;  %v2037_v28 = vadd.f32 %v2036_v25, %v4214_v20  ;;  %2459 = vmatpush2.bf16.msra.mxu0 %v3733_v17  ;;  %v2077_v48 = vpop.f32.mrf.mxu1  ;;  %2501 = vmatprep.subr.bf16.mxu1 %v3782_v40  ;;  %v495_v17 = vld [vmem:[%s3917_s25 + $0x888] sm:$0x77] }
  0xff   : > { %v2038_v32 = vpop.f32.mrf.mxu0  ;;  %2514 = vmatprep.subr.bf16.mxu0 %v3744_v21  ;;  %v2643_v51 = vmax.f32 %v2076_v45, 0.0  ;;  %v2078_v52 = vadd.f32 %v2077_v48, %v4202_v10  ;;  %v3811_v21 = vld [vmem:[%s3917_s25 + $0x23c] ss:$116 sps:$4 sm:$0xff]   ;;  %v3288_v22 = vcombine.high %v495_v17, %v495_v17  ;;  %v3809_v24 = vld [vmem:[%s3917_s25 + $0x238] ss:$116 sps:$4 sm:$0xff]  }
 0x100   : > { %v3353_v33 = vpack.c.bf16 %v2642_v27, %v2641_v23  ;;  %v2039_v34 = vadd.f32 %v2038_v32, %v4214_v20  ;;  %v2670_v36 = vmax.f32 %v2037_v28, 0.0  ;;  %v2079_v53 = vpop.f32.mrf.mxu1  ;;  %v3287_v23 = vcombine.low %v495_v17, %v495_v17  ;;  %v3815_v25 = vld [vmem:[%s3917_s25 + $0x154] ss:$116 sps:$4 sm:$0xff]   ;;  %v3793_v27 = vld [vmem:[%s3917_s25 + $0x7a4] ss:$116 sps:$4 sm:$0xff]  }
 0x101   : > { %2461 = vmatmul.mubr.bf16.vlgmr.msra.gmra.mxu0 %v4165_v39  ;;  %v2644_v54 = vmax.f32 %v2078_v52, 0.0  ;;  %v2080_v55 = vadd.f32 %v2079_v53, %v4214_v20  ;;  %2502 = vmatpush2.bf16.msra.mxu1 %v3780_v46  ;;  %v3819_v32 = vld [vmem:[%s3917_s25 + $0x6c] ss:$116 sps:$4 sm:$0xff]   ;;  %v3829_v17 = vld [vmem:[%s3917_s25 + $0x7b0] ss:$116 sps:$4 sm:$0xff]  }
 0x102   : > { %2875 = vst [vmem:[%s4225_s8] sm:$0xff] %v3353_v33  ;;  %v2671_v37 = vmax.f32 %v2039_v34, 0.0  ;;  %2515 = vmatpush1.bf16.msra.mxu0 %v3742_v29  ;;  %3317 = vmatprep.mubr.msk.bf16.mxu0 %vm1906_vm0, %v4118_v62  ;;  %v2081_v58 = vpop.f32.mrf.mxu1  ;;  %v1984_v26 = vsel %vm1910_vm1, %v3287_v23, 0  ;;  %v3813_v29 = vld [vmem:[%s3917_s25 + $0x150] ss:$116 sps:$4 sm:$0xff]   ;;  %v3804_v48 = vld [vmem:[%s3917_s25 + $0x5e0] ss:$116 sps:$4 sm:$0xff]  }
 0x103   : > { %2516 = vmatprep.subr.bf16.mxu0 %v3750_v0  ;;  %2557 = vmatprep.subr.bf16.mxu1 %v3789_v49  ;;  %v3354_v61 = vpack.c.bf16 %v2644_v54, %v2643_v51  ;;  %v2672_v63 = vmax.f32 %v2080_v55, 0.0  ;;  %v2082_v1 = vadd.f32 %v2081_v58, %v4214_v20  ;;  %v496_v33 = vld [vmem:[%s3917_s25 + $0x890] sm:$0x77]  ;;  %v3826_v52 = vld [vmem:[%s3917_s25 + $0x7ac] ss:$116 sps:$4 sm:$0xff]  }
 0x104   : > { %v3368_v42 = vpack.c.bf16 %v2671_v37, %v2670_v36  ;;  %2504 = vmatmul.mubr.bf16.vlgmr.msra.gmra.mxu1 %v4165_v39  ;;  %v3817_v37 = vld [vmem:[%s3917_s25 + $0x68] ss:$116 sps:$4 sm:$0xff]   ;;  %v3289_v44 = vcombine.low %v496_v33, %v496_v33 }
 0x105   : > { %2876 = vst [vmem:[%s4225_s8 + $0x8] sm:$0xff] %v3354_v61  ;;  %v2673_v3 = vmax.f32 %v2082_v1, 0.0  ;;  %2558 = vmatpush1.bf16.msra.mxu1 %v3787_v56  ;;  %3319 = vmatprep.mubr.msk.bf16.mxu1 %vm1906_vm0, %v4118_v62  ;;  %v3824_v56 = vld [vmem:[%s3917_s25 + $0x7a8] ss:$116 sps:$4 sm:$0xff]   ;;  %v3812_v1 = vld [vmem:[%s3917_s25 + $0x410] ss:$116 sps:$4 sm:$0xff]  }
 0x106   : > { %2891 = vst [vmem:[%s4225_s8 + $0x74] sm:$0xff] %v3368_v42  ;;  %2517 = vmatpush1.bf16.msra.mxu0 %v3748_v35  ;;  %2559 = vmatprep.subr.bf16.mxu1 %v3796_v59  ;;  %v3290_v42 = vcombine.high %v496_v33, %v496_v33  ;;  %v1990_v51 = vsel %vm1910_vm1, %v3289_v44, 0 }
 0x107   : > { %2518 = vmatprep.subr.bf16.mxu0 %v3756_v41  ;;  %v3369_v8 = vpack.c.bf16 %v2673_v3, %v2672_v63  ;;  %v3800_v41 = vld [vmem:[%s3917_s25 + $0x6c8] ss:$116 sps:$4 sm:$0xff]  }
 0x109   : > { %2892 = vst [vmem:[%s4225_s8 + $0x7c] sm:$0xff] %v3369_v8  ;;  %2560 = vmatpush1.bf16.msra.mxu1 %v3794_v4  ;;  %v3816_v8 = vld [vmem:[%s3917_s25 + $0x328] ss:$116 sps:$4 sm:$0xff]  }
 0x10a   : > { %2519 = vmatpush1.bf16.msra.mxu0 %v3754_v47  ;;  %2561 = vmatprep.subr.bf16.mxu1 %v3799_v6 }
 0x10b   : > { %2520 = vmatprep.subr.bf16.mxu0 %v3762_v50 }
 0x10d   : > { %2562 = vmatpush1.bf16.msra.mxu1 %v3797_v9 }
 0x10e   : > { %2521 = vmatpush1.bf16.msra.mxu0 %v3760_v57  ;;  %2563 = vmatprep.subr.bf16.mxu1 %v3803_v12  ;;  %v3808_v57 = vld [vmem:[%s3917_s25 + $0x4f8] ss:$116 sps:$4 sm:$0xff]  }
 0x10f   : > { %2522 = vmatprep.subr.bf16.mxu0 %v3768_v60  ;;  %v3823_v12 = vld [vmem:[%s3917_s25 + $0x158] ss:$116 sps:$4 sm:$0xff]  }
 0x111   : > { %2564 = vmatpush1.bf16.msra.mxu1 %v3801_v43  ;;  %v3828_v43 = vld [vmem:[%s3917_s25 + $0x898] ss:$0 sps:$4 sm:$0x77]  }
 0x112   : > { %2523 = vmatpush1.bf16.msra.mxu0 %v3766_v5  ;;  %2565 = vmatprep.subr.bf16.mxu1 %v3807_v15 }
 0x113   : > { %2524 = vmatprep.subr.bf16.mxu0 %v3774_v7 }
 0x115   : > { %2566 = vmatpush1.bf16.msra.mxu1 %v3805_v18 }
 0x116   : > { %2525 = vmatpush1.bf16.msra.mxu0 %v3772_v11  ;;  %2567 = vmatprep.subr.bf16.mxu1 %v3811_v21  ;;  %v3820_v11 = vld [vmem:[%s3917_s25 + $0x240] ss:$116 sps:$4 sm:$0xff]  }
 0x117   : > { %2526 = vmatprep.subr.bf16.mxu0 %v3778_v13  ;;  %v3827_v13 = vld [vmem:[%s3917_s25 + $0x70] ss:$116 sps:$4 sm:$0xff]  }
 0x119   : > { %2568 = vmatpush1.bf16.msra.mxu1 %v3809_v24 }
 0x11a   : > { %2527 = vmatpush1.bf16.msra.mxu0 %v3776_v14  ;;  %2569 = vmatprep.subr.bf16.mxu1 %v3815_v25  ;;  %v1996_v14 = vsel %vm1910_vm1, %v3828_v43, 0 }
 0x11b   : > { %2528 = vmatprep.subr.bf16.mxu0 %v3785_v16 }
 0x11d   : > { %2570 = vmatpush1.bf16.msra.mxu1 %v3813_v29 }
 0x11e   : > { %2529 = vmatpush1.bf16.msra.mxu0 %v3783_v19  ;;  %2571 = vmatprep.subr.bf16.mxu1 %v3819_v32 }
 0x11f   : > { %3316 = vmatprep.subr.msk.bf16.mxu0 %vm1910_vm1, %v3288_v22 }
 0x121   : > { %v2118_v28 = vpop.f32.mrf.mxu0  ;;  %2572 = vmatpush1.bf16.msra.mxu1 %v3817_v37 }
 0x122   : > { %v2119_v30 = vadd.f32 %v2118_v28, %v4202_v10  ;;  %2543 = vmatpush2.bf16.msra.mxu0 %v1984_v26  ;;  %3318 = vmatprep.subr.msk.bf16.mxu1 %vm1910_vm1, %v3290_v42 }
 0x123   : > { %v2120_v0 = vpop.f32.mrf.mxu0  ;;  %2544 = vmatprep.subr.bf16.mxu0 %v3793_v27 }
 0x124   : > { %v2645_v34 = vmax.f32 %v2119_v30, 0.0  ;;  %v2121_v35 = vadd.f32 %v2120_v0, %v4202_v10  ;;  %v2161_v54 = vpop.f32.mrf.mxu1 }
 0x125   : > { %v2122_v36 = vpop.f32.mrf.mxu0  ;;  %v2162_v55 = vadd.f32 %v2161_v54, %v4202_v10  ;;  %2586 = vmatpush2.bf16.msra.mxu1 %v1990_v51 }
 0x126   : > { %v2646_v38 = vmax.f32 %v2121_v35, 0.0  ;;  %v2123_v40 = vadd.f32 %v2122_v36, %v4214_v20  ;;  %2545 = vmatpush2.bf16.msra.mxu0 %v3791_v31  ;;  %v2163_v58 = vpop.f32.mrf.mxu1  ;;  %2587 = vmatprep.subr.bf16.mxu1 %v3826_v52 }
 0x127   : > { %v2124_v45 = vpop.f32.mrf.mxu0  ;;  %2600 = vmatprep.subr.bf16.mxu0 %v3856_v2  ;;  %v2647_v59 = vmax.f32 %v2162_v55, 0.0  ;;  %v2164_v60 = vadd.f32 %v2163_v58, %v4202_v10 }
 0x128   : > { %v3355_v46 = vpack.c.bf16 %v2646_v38, %v2645_v34  ;;  %v2125_v47 = vadd.f32 %v2124_v45, %v4214_v20  ;;  %v2674_v49 = vmax.f32 %v2123_v40, 0.0 }
 0x129   : > { %2547 = vmatmul.mubr.bf16.vlgmr.msra.gmra.mxu0 %v4165_v39  ;;  %v2648_v61 = vmax.f32 %v2164_v60, 0.0  ;;  %2588 = vmatpush2.bf16.msra.mxu1 %v3824_v56 }
 0x12a   : > { %2877 = vst [vmem:[%s4225_s8 + $0x10] sm:$0xff] %v3355_v46  ;;  %v2675_v50 = vmax.f32 %v2125_v47, 0.0  ;;  %2601 = vmatpush1.bf16.msra.mxu0 %v3800_v41  ;;  %3320 = vmatprep.mubr.msk.bf16.mxu0 %vm1906_vm0, %v4118_v62  ;;  %v2165_v62 = vpop.f32.mrf.mxu1 }
 0x12b   : > { %2602 = vmatprep.subr.bf16.mxu0 %v3856_v2  ;;  %v2166_v63 = vadd.f32 %v2165_v62, %v4214_v20  ;;  %v3356_v4 = vpack.c.bf16 %v2648_v61, %v2647_v59 }
 0x12c   : > { %v3370_v53 = vpack.c.bf16 %v2675_v50, %v2674_v49  ;;  %v2167_v3 = vpop.f32.mrf.mxu1  ;;  %2590 = vmatmul.mubr.bf16.vlgmr.msra.gmra.mxu1 %v4165_v39 }
 0x12d   : > { %v2676_v5 = vmax.f32 %v2166_v63, 0.0  ;;  %v2168_v6 = vadd.f32 %v2167_v3, %v4214_v20  ;;  %2878 = vst [vmem:[%s4225_s8 + $0x18] sm:$0xff] %v3356_v4 }
 0x12e   : > { %2893 = vst [vmem:[%s4225_s8 + $0x84] sm:$0xff] %v3370_v53  ;;  %2603 = vmatpush1.bf16.msra.mxu0 %v3804_v48 }
 0x12f   : > { %2604 = vmatprep.subr.bf16.mxu0 %v3856_v2  ;;  %v2677_v7 = vmax.f32 %v2168_v6, 0.0 }
 0x131   : > { %v3371_v9 = vpack.c.bf16 %v2677_v7, %v2676_v5 }
 0x132   : > { %2605 = vmatpush1.bf16.msra.mxu0 %v3808_v57 }
 0x133   : > { %2606 = vmatprep.subr.bf16.mxu0 %v3856_v2  ;;  %2894 = vst [vmem:[%s4225_s8 + $0x8c] sm:$0xff] %v3371_v9 }
 0x136   : > { %2607 = vmatpush1.bf16.msra.mxu0 %v3812_v1 }
 0x137   : > { %2608 = vmatprep.subr.bf16.mxu0 %v3856_v2 }
 0x13a   : > { %2609 = vmatpush1.bf16.msra.mxu0 %v3816_v8 }
 0x13b   : > { %2610 = vmatprep.subr.bf16.mxu0 %v3856_v2 }
 0x13e   : > { %2611 = vmatpush1.bf16.msra.mxu0 %v3820_v11 }
 0x13f   : > { %2612 = vmatprep.subr.bf16.mxu0 %v3856_v2 }
 0x142   : > { %2613 = vmatpush1.bf16.msra.mxu0 %v3823_v12 }
 0x143   : > { %2614 = vmatprep.subr.bf16.mxu0 %v3856_v2 }
 0x146   : > { %2615 = vmatpush1.bf16.msra.mxu0 %v3827_v13 }
 0x147   : > { %2628 = vmatprep.subr.bf16.mxu0 %v3856_v2 }
 0x149   : > { %v2204_v15 = vpop.f32.mrf.mxu0 }
 0x14a   : > { %v2205_v16 = vadd.f32 %v2204_v15, %v4202_v10  ;;  %2629 = vmatpush2.bf16.msra.mxu0 %v1996_v14 }
 0x14b   : > { %v2206_v18 = vpop.f32.mrf.mxu0  ;;  %2630 = vmatprep.subr.bf16.mxu0 %v3856_v2 }
 0x14c   : > { %v2649_v19 = vmax.f32 %v2205_v16, 0.0  ;;  %v2207_v21 = vadd.f32 %v2206_v18, %v4202_v10  ;;  %v2247_v30 = vpop.f32.mrf.mxu1 }
 0x14d   : > { %v2208_v22 = vpop.f32.mrf.mxu0  ;;  %v2248_v31 = vadd.f32 %v2247_v30, %v4202_v10 }
 0x14e   : > { %v2650_v23 = vmax.f32 %v2207_v21, 0.0  ;;  %v2209_v24 = vadd.f32 %v2208_v22, %v4214_v20  ;;  %2631 = vmatpush2.bf16.msra.mxu0 %v3829_v17  ;;  %v2249_v32 = vpop.f32.mrf.mxu1 }
 0x14f   : > { %v2210_v25 = vpop.f32.mrf.mxu0  ;;  %v2651_v0 = vmax.f32 %v2248_v31, 0.0  ;;  %v2250_v33 = vadd.f32 %v2249_v32, %v4202_v10 }
 0x150   : > { %v3357_v26 = vpack.c.bf16 %v2650_v23, %v2649_v19  ;;  %v2211_v27 = vadd.f32 %v2210_v25, %v4214_v20  ;;  %v2678_v28 = vmax.f32 %v2209_v24, 0.0  ;;  %v2251_v34 = vpop.f32.mrf.mxu1 }
 0x151   : > { %2633 = vmatmul.mubr.bf16.vlgmr.msra.gmra.mxu0 %v4165_v39  ;;  %v2652_v35 = vmax.f32 %v2250_v33, 0.0  ;;  %v2252_v36 = vadd.f32 %v2251_v34, %v4214_v20 }
 0x152   : > { %2879 = vst [vmem:[%s4225_s8 + $0x20] sm:$0xff] %v3357_v26  ;;  %v2679_v29 = vmax.f32 %v2211_v27, 0.0  ;;  %v2253_v37 = vpop.f32.mrf.mxu1 }
 0x153   : > { %v3358_v39 = vpack.c.bf16 %v2652_v35, %v2651_v0  ;;  %v2680_v38 = vmax.f32 %v2252_v36, 0.0  ;;  %v2254_v40 = vadd.f32 %v2253_v37, %v4214_v20 }
 0x154   : > { %v3372_v2 = vpack.c.bf16 %v2679_v29, %v2678_v28 }
 0x155   : > { %2880 = vst [vmem:[%s4225_s8 + $0x28] sm:$0xff] %v3358_v39  ;;  %v2681_v41 = vmax.f32 %v2254_v40, 0.0 }
 0x156   : > { %2895 = vst [vmem:[%s4225_s8 + $0x94] sm:$0xff] %v3372_v2 }
 0x157   : > { %v3373_v42 = vpack.c.bf16 %v2681_v41, %v2680_v38 }
 0x159   : > { %2896 = vst [vmem:[%s4225_s8 + $0x9c] sm:$0xff] %v3373_v42 }
 0x171   : > { %v2290_v44 = vpop.f32.mrf.mxu0 }
 0x172   : > { %v2291_v45 = vadd.f32 %v2290_v44, %v4202_v10 }
 0x173   : > { %v2292_v46 = vpop.f32.mrf.mxu0 }
 0x174   : > { %v2653_v47 = vmax.f32 %v2291_v45, 0.0  ;;  %v2293_v48 = vadd.f32 %v2292_v46, %v4202_v10  ;;  %v2333_v58 = vpop.f32.mrf.mxu1 }
 0x175   : > { %v2294_v49 = vpop.f32.mrf.mxu0  ;;  %v2334_v59 = vadd.f32 %v2333_v58, %v4202_v10 }
 0x176   : > { %v2654_v50 = vmax.f32 %v2293_v48, 0.0  ;;  %v2295_v51 = vadd.f32 %v2294_v49, %v4214_v20  ;;  %v2335_v60 = vpop.f32.mrf.mxu1 }
 0x177   : > { %v2296_v52 = vpop.f32.mrf.mxu0  ;;  %v2655_v62 = vmax.f32 %v2334_v59, 0.0  ;;  %v2336_v61 = vadd.f32 %v2335_v60, %v4202_v10 }
 0x178   : > { %v3359_v53 = vpack.c.bf16 %v2654_v50, %v2653_v47  ;;  %v2297_v54 = vadd.f32 %v2296_v52, %v4214_v20  ;;  %v2682_v55 = vmax.f32 %v2295_v51, 0.0  ;;  %v2337_v63 = vpop.f32.mrf.mxu1 }
 0x179   : > { %v2656_v1 = vmax.f32 %v2336_v61, 0.0  ;;  %v2338_v3 = vadd.f32 %v2337_v63, %v4214_v20 }
 0x17a   : > { %2881 = vst [vmem:[%s4225_s8 + $0x30] sm:$0xff] %v3359_v53  ;;  %v2683_v56 = vmax.f32 %v2297_v54, 0.0  ;;  %v2339_v4 = vpop.f32.mrf.mxu1 }
 0x17b   : > { %v3360_v5 = vpack.c.bf16 %v2656_v1, %v2655_v62  ;;  %v2684_v6 = vmax.f32 %v2338_v3, 0.0  ;;  %v2340_v7 = vadd.f32 %v2339_v4, %v4214_v20 }
 0x17c   : > { %v3374_v57 = vpack.c.bf16 %v2683_v56, %v2682_v55 }
 0x17d   : > { %2882 = vst [vmem:[%s4225_s8 + $0x38] sm:$0xff] %v3360_v5  ;;  %v2685_v8 = vmax.f32 %v2340_v7, 0.0 }
 0x17e   : > { %2897 = vst [vmem:[%s4225_s8 + $0xa4] sm:$0xff] %v3374_v57 }
 0x17f   : > { %v3375_v9 = vpack.c.bf16 %v2685_v8, %v2684_v6 }
 0x181   : > { %2898 = vst [vmem:[%s4225_s8 + $0xac] sm:$0xff] %v3375_v9 }
 0x199   : > { %v2376_v11 = vpop.f32.mrf.mxu0 }
 0x19a   : > { %v2377_v12 = vadd.f32 %v2376_v11, %v4202_v10 }
 0x19b   : > { %v2378_v13 = vpop.f32.mrf.mxu0 }
 0x19c   : > { %v2657_v43 = vmax.f32 %v2377_v12, 0.0  ;;  %v2379_v14 = vadd.f32 %v2378_v13, %v4202_v10  ;;  %v2419_v25 = vpop.f32.mrf.mxu1 }
 0x19d   : > { %v2380_v15 = vpop.f32.mrf.mxu0  ;;  %v2420_v26 = vadd.f32 %v2419_v25, %v4202_v10 }
 0x19e   : > { %v2658_v16 = vmax.f32 %v2379_v14, 0.0  ;;  %v2381_v17 = vadd.f32 %v2380_v15, %v4214_v20  ;;  %v2421_v27 = vpop.f32.mrf.mxu1 }
 0x19f   : > { %v2382_v18 = vpop.f32.mrf.mxu0  ;;  %v2659_v28 = vmax.f32 %v2420_v26, 0.0  ;;  %v2422_v29 = vadd.f32 %v2421_v27, %v4202_v10 }
 0x1a0   : > { %v3361_v19 = vpack.c.bf16 %v2658_v16, %v2657_v43  ;;  %v2383_v21 = vadd.f32 %v2382_v18, %v4214_v20  ;;  %v2686_v22 = vmax.f32 %v2381_v17, 0.0  ;;  %v2423_v2 = vpop.f32.mrf.mxu1 }
 0x1a1   : > { %v2660_v30 = vmax.f32 %v2422_v29, 0.0  ;;  %v2424_v31 = vadd.f32 %v2423_v2, %v4214_v20 }
 0x1a2   : > { %2883 = vst [vmem:[%s4225_s8 + $0x40] sm:$0xff] %v3361_v19  ;;  %v2687_v23 = vmax.f32 %v2383_v21, 0.0  ;;  %v2425_v32 = vpop.f32.mrf.mxu1 }
 0x1a3   : > { %v3362_v0 = vpack.c.bf16 %v2660_v30, %v2659_v28  ;;  %v2688_v33 = vmax.f32 %v2424_v31, 0.0  ;;  %v2426_v34 = vadd.f32 %v2425_v32, %v4214_v20 }
 0x1a4   : > { %v3376_v24 = vpack.c.bf16 %v2687_v23, %v2686_v22 }
 0x1a5   : > { %2884 = vst [vmem:[%s4225_s8 + $0x48] sm:$0xff] %v3362_v0  ;;  %v2689_v35 = vmax.f32 %v2426_v34, 0.0 }
 0x1a6   : > { %2899 = vst [vmem:[%s4225_s8 + $0xb4] sm:$0xff] %v3376_v24 }
 0x1a7   : > { %v3377_v36 = vpack.c.bf16 %v2689_v35, %v2688_v33 }
 0x1a9   : > { %2900 = vst [vmem:[%s4225_s8 + $0xbc] sm:$0xff] %v3377_v36 }
 0x1c1   : > { %v2462_v37 = vpop.f32.mrf.mxu0 }
 0x1c2   : > { %v2463_v39 = vadd.f32 %v2462_v37, %v4202_v10 }
 0x1c3   : > { %v2464_v38 = vpop.f32.mrf.mxu0 }
 0x1c4   : > { %v2661_v40 = vmax.f32 %v2463_v39, 0.0  ;;  %v2465_v41 = vadd.f32 %v2464_v38, %v4202_v10  ;;  %v2505_v52 = vpop.f32.mrf.mxu1 }
 0x1c5   : > { %v2466_v42 = vpop.f32.mrf.mxu0  ;;  %v2506_v53 = vadd.f32 %v2505_v52, %v4202_v10 }
 0x1c6   : > { %v2662_v44 = vmax.f32 %v2465_v41, 0.0  ;;  %v2467_v45 = vadd.f32 %v2466_v42, %v4214_v20  ;;  %v2507_v54 = vpop.f32.mrf.mxu1 }
 0x1c7   : > { %v2468_v46 = vpop.f32.mrf.mxu0  ;;  %v2663_v55 = vmax.f32 %v2506_v53, 0.0  ;;  %v2508_v56 = vadd.f32 %v2507_v54, %v4202_v10 }
 0x1c8   : > { %v3363_v47 = vpack.c.bf16 %v2662_v44, %v2661_v40  ;;  %v2469_v48 = vadd.f32 %v2468_v46, %v4214_v20  ;;  %v2690_v49 = vmax.f32 %v2467_v45, 0.0  ;;  %v2509_v57 = vpop.f32.mrf.mxu1 }
 0x1c9   : > { %v2664_v58 = vmax.f32 %v2508_v56, 0.0  ;;  %v2510_v59 = vadd.f32 %v2509_v57, %v4214_v20 }
 0x1ca   : > { %2885 = vst [vmem:[%s4225_s8 + $0x50] sm:$0xff] %v3363_v47  ;;  %v2691_v50 = vmax.f32 %v2469_v48, 0.0  ;;  %v2511_v60 = vpop.f32.mrf.mxu1 }
 0x1cb   : > { %v3364_v62 = vpack.c.bf16 %v2664_v58, %v2663_v55  ;;  %v2692_v61 = vmax.f32 %v2510_v59, 0.0  ;;  %v2512_v63 = vadd.f32 %v2511_v60, %v4214_v20 }
 0x1cc   : > { %v3378_v51 = vpack.c.bf16 %v2691_v50, %v2690_v49 }
 0x1cd   : > { %2886 = vst [vmem:[%s4225_s8 + $0x58] sm:$0xff] %v3364_v62  ;;  %v2693_v1 = vmax.f32 %v2512_v63, 0.0 }
 0x1ce   : > { %2901 = vst [vmem:[%s4225_s8 + $0xc4] sm:$0xff] %v3378_v51 }
 0x1cf   : > { %v3379_v3 = vpack.c.bf16 %v2693_v1, %v2692_v61 }
 0x1d1   : > { %2902 = vst [vmem:[%s4225_s8 + $0xcc] sm:$0xff] %v3379_v3 }
 0x1e9   : > { %v2548_v4 = vpop.f32.mrf.mxu0 }
 0x1ea   : > { %v2549_v5 = vadd.f32 %v2548_v4, %v4202_v10 }
 0x1eb   : > { %v2550_v6 = vpop.f32.mrf.mxu0 }
 0x1ec   : > { %v2665_v7 = vmax.f32 %v2549_v5, 0.0  ;;  %v2551_v8 = vadd.f32 %v2550_v6, %v4202_v10  ;;  %v2591_v18 = vpop.f32.mrf.mxu1 }
 0x1ed   : > { %v2552_v9 = vpop.f32.mrf.mxu0  ;;  %v2592_v19 = vadd.f32 %v2591_v18, %v4202_v10 }
 0x1ee   : > { %v2666_v11 = vmax.f32 %v2551_v8, 0.0  ;;  %v2553_v12 = vadd.f32 %v2552_v9, %v4214_v20  ;;  %v2593_v21 = vpop.f32.mrf.mxu1 }
 0x1ef   : > { %v2554_v13 = vpop.f32.mrf.mxu0  ;;  %v2667_v22 = vmax.f32 %v2592_v19, 0.0  ;;  %v2594_v23 = vadd.f32 %v2593_v21, %v4202_v10 }
 0x1f0   : > { %v3365_v43 = vpack.c.bf16 %v2666_v11, %v2665_v7  ;;  %v2555_v14 = vadd.f32 %v2554_v13, %v4214_v20  ;;  %v2694_v15 = vmax.f32 %v2553_v12, 0.0  ;;  %v2595_v24 = vpop.f32.mrf.mxu1 }
 0x1f1   : > { %v2668_v25 = vmax.f32 %v2594_v23, 0.0  ;;  %v2596_v26 = vadd.f32 %v2595_v24, %v4214_v20 }
 0x1f2   : > { %2887 = vst [vmem:[%s4225_s8 + $0x60] sm:$0xff] %v3365_v43  ;;  %v2695_v16 = vmax.f32 %v2555_v14, 0.0  ;;  %v2597_v27 = vpop.f32.mrf.mxu1 }
 0x1f3   : > { %v3366_v28 = vpack.c.bf16 %v2668_v25, %v2667_v22  ;;  %v2696_v29 = vmax.f32 %v2596_v26, 0.0  ;;  %v2598_v2 = vadd.f32 %v2597_v27, %v4214_v20 }
 0x1f4   : > { %v3380_v17 = vpack.c.bf16 %v2695_v16, %v2694_v15 }
 0x1f5   : > { %2888 = vst [vmem:[%s4225_s8 + $0x68] sm:$0xff] %v3366_v28  ;;  %v2697_v30 = vmax.f32 %v2598_v2, 0.0 }
 0x1f6   : > { %2903 = vst [vmem:[%s4225_s8 + $0xd4] sm:$0xff] %v3380_v17 }
 0x1f7   : > { %v3381_v31 = vpack.c.bf16 %v2697_v30, %v2696_v29 }
 0x1f9   : > { %2904 = vst [vmem:[%s4225_s8 + $0xdc] sm:$0xff] %v3381_v31 }
 0x211   : > { %v2634_v32 = vpop.f32.mrf.mxu0 }
 0x212   : > { %v2635_v0 = vadd.f32 %v2634_v32, %v4202_v10 }
 0x213   : > { %v2636_v33 = vpop.f32.mrf.mxu0 }
 0x214   : > { %v2669_v34 = vmax.f32 %v2635_v0, 0.0 }
 0x215   : > { %v2637_v35 = vpop.f32.mrf.mxu0 }
 0x216   : > { %v3367_v36 = vpack.c.bf16 %v2669_v34, %v2669_v34  ;;  %v2638_v37 = vadd.f32 %v2637_v35, %v4214_v20 }
 0x217   : > { %v2639_v39 = vpop.f32.mrf.mxu0 }
 0x218   : > { %2890 = vst.msk [vmem:[%s4225_s8 + $0x70] sm:$0xf] %vm2889_vm2, %v3367_v36  ;;  %v2698_v38 = vmax.f32 %v2638_v37, 0.0 }
 0x21a   : > { %v3382_v40 = vpack.c.bf16 %v2698_v38, %v2698_v38 }
 0x21c   : > { %2905 = vst.msk [vmem:[%s4225_s8 + $0xe4] sm:$0xf] %vm2889_vm2, %v3382_v40 }
 0x21d PF: > { %s13_s14 = sadd.s32 1, %s3854_s14   ;;  %s4401_s12 = smov %s3850_s13 }
 0x21e   : > { %p10_p5 = scmp.ge.s32.totalorder %s13_s14, 4   ;;  %s4402_s13 = smov %s4404_s15 }
 0x220   :  { %12 = sbr.rel (!%p10_p5) target bundleno = 2 (0x2), region = 62 }

// kernel: net_forward.11
= control target key start
LH: loop header
LB: loop body
LE: loop exit
PB: predicated region body
PF: predicated region fallthrough
CT: control target
= control target key end

     0   :  { %vm169_vm0 = vcmask 1043456   ;;  %vm170_vm1 = vcmask 130052   ;;  %s487_s0 = inlined_call_operand.vmem [shape: bf16[32,400], index: 0, kind: input, shape index: {}]   ;;  %s488_s1 = inlined_call_operand.vmem [shape: bf16[32,400], index: 1, kind: input, shape index: {}]   ;;  %s489_s2 = inlined_call_operand.vmem [shape: bf16[32,400], index: 2, kind: input, shape index: {}]   ;;  %s490_s3 = inlined_call_operand.vmem [shape: bf16[32,400], index: 3, kind: input, shape index: {}]   ;;  %s491_s4 = inlined_call_operand.vmem [shape: bf16[32,400], index: 4, kind: input, shape index: {}]   ;;  %s492_s5 = inlined_call_operand.vmem [shape: bf16[32,400], index: 5, kind: input, shape index: {}]   ;;  %s493_s6 = inlined_call_operand.vmem [shape: bf16[32,400], index: 6, kind: input, shape index: {}]   ;;  %s494_s7 = inlined_call_operand.vmem [shape: bf16[32,400], index: 7, kind: input, shape index: {}]   ;;  %s495_s8 = inlined_call_operand.vmem [shape: bf16[32,400], index: 8, kind: input, shape index: {}]   ;;  %s496_s9 = inlined_call_operand.vmem [shape: bf16[32,400], index: 9, kind: output, shape index: {}]  }
   0x1   :  { %v32_v0 = vld [vmem:[%s487_s0] sm:$0xff]  ;;  %v33_v6 = vld [vmem:[%s487_s0 + $0x8] sm:$0xff]  ;;  %v34_v15 = vld [vmem:[%s487_s0 + $0x10] sm:$0xff] }
   0x2   :  { %v40_v1 = vld [vmem:[%s488_s1] sm:$0xff]  ;;  %v41_v7 = vld [vmem:[%s488_s1 + $0x8] sm:$0xff]  ;;  %v42_v16 = vld [vmem:[%s488_s1 + $0x10] sm:$0xff] }
   0x3   :  { %v56_v2 = vld [vmem:[%s489_s2] sm:$0xff]  ;;  %v48_v3 = vmax.bf16 %v40_v1, %v32_v0  ;;  %v57_v8 = vld [vmem:[%s489_s2 + $0x8] sm:$0xff]  ;;  %v49_v10 = vmax.bf16 %v41_v7, %v33_v6  ;;  %v50_v19 = vmax.bf16 %v42_v16, %v34_v15  ;;  %v58_v20 = vld [vmem:[%s489_s2 + $0x10] sm:$0xff] }
   0x4   :  { %v72_v4 = vld [vmem:[%s490_s3] sm:$0xff]  ;;  %v73_v12 = vld [vmem:[%s490_s3 + $0x8] sm:$0xff]  ;;  %v74_v24 = vld [vmem:[%s490_s3 + $0x10] sm:$0xff] }
   0x5   :  { %v64_v5 = vmax.bf16 %v56_v2, %v48_v3  ;;  %v88_v9 = vld [vmem:[%s491_s4] sm:$0xff]  ;;  %v65_v14 = vmax.bf16 %v57_v8, %v49_v10  ;;  %v89_v18 = vld [vmem:[%s491_s4 + $0x8] sm:$0xff]  ;;  %v66_v27 = vmax.bf16 %v58_v20, %v50_v19  ;;  %v35_v28 = vld [vmem:[%s487_s0 + $0x18] sm:$0xff] }
   0x6   :  { %v104_v13 = vld [vmem:[%s492_s5] sm:$0xff]  ;;  %v105_v26 = vld [vmem:[%s492_s5 + $0x8] sm:$0xff]  ;;  %v43_v29 = vld [vmem:[%s488_s1 + $0x18] sm:$0xff] }
   0x7   :  { %v80_v11 = vmax.bf16 %v72_v4, %v64_v5  ;;  %v120_v21 = vld [vmem:[%s493_s6] sm:$0xff]  ;;  %v81_v23 = vmax.bf16 %v73_v12, %v65_v14  ;;  %v90_v32 = vld [vmem:[%s491_s4 + $0x10] sm:$0xff]  ;;  %v51_v33 = vmax.bf16 %v43_v29, %v35_v28  ;;  %v59_v34 = vld [vmem:[%s489_s2 + $0x18] sm:$0xff]  ;;  %v82_v38 = vmax.bf16 %v74_v24, %v66_v27 }
   0x8   :  { %v136_v22 = vld [vmem:[%s494_s7] sm:$0xff]  ;;  %v121_v36 = vld [vmem:[%s493_s6 + $0x8] sm:$0xff]  ;;  %v75_v39 = vld [vmem:[%s490_s3 + $0x18] sm:$0xff] }
   0x9   :  { %v96_v17 = vmax.bf16 %v88_v9, %v80_v11  ;;  %v152_v30 = vld [vmem:[%s495_s8] sm:$0xff]  ;;  %v97_v31 = vmax.bf16 %v89_v18, %v81_v23  ;;  %v137_v37 = vld [vmem:[%s494_s7 + $0x8] sm:$0xff]  ;;  %v106_v41 = vld [vmem:[%s492_s5 + $0x10] sm:$0xff]  ;;  %v67_v42 = vmax.bf16 %v59_v34, %v51_v33  ;;  %v98_v47 = vmax.bf16 %v90_v32, %v82_v38 }
   0xa   :  { %v36_v43 = vld [vmem:[%s487_s0 + $0x20] sm:$0xff]  ;;  %v153_v46 = vld [vmem:[%s495_s8 + $0x8] sm:$0xff]  ;;  %v91_v48 = vld [vmem:[%s491_s4 + $0x18] sm:$0xff] }
   0xb   :  { %v112_v25 = vmax.bf16 %v104_v13, %v96_v17  ;;  %v113_v40 = vmax.bf16 %v105_v26, %v97_v31  ;;  %v44_v44 = vld [vmem:[%s488_s1 + $0x20] sm:$0xff]  ;;  %vm331_vm2 = vmor %vm170_vm1, %vm169_vm0  ;;  %v122_v53 = vld [vmem:[%s493_s6 + $0x10] sm:$0xff]  ;;  %v83_v54 = vmax.bf16 %v75_v39, %v67_v42  ;;  %v114_v57 = vmax.bf16 %v106_v41, %v98_v47 }
   0xc   :  { %v52_v49 = vmax.bf16 %v44_v44, %v36_v43  ;;  %v60_v50 = vld [vmem:[%s489_s2 + $0x20] sm:$0xff]  ;;  %v107_v58 = vld [vmem:[%s492_s5 + $0x18] sm:$0xff]  ;;  %v37_v60 = vld [vmem:[%s487_s0 + $0x28] sm:$0xff] }
   0xd   :  { %v128_v35 = vmax.bf16 %v120_v21, %v112_v25  ;;  %v129_v51 = vmax.bf16 %v121_v36, %v113_v40  ;;  %v76_v55 = vld [vmem:[%s490_s3 + $0x20] sm:$0xff]  ;;  %v45_v61 = vld [vmem:[%s488_s1 + $0x28] sm:$0xff]  ;;  %v138_v63 = vld [vmem:[%s494_s7 + $0x10] sm:$0xff]  ;;  %v99_v0 = vmax.bf16 %v91_v48, %v83_v54  ;;  %v130_v4 = vmax.bf16 %v122_v53, %v114_v57 }
   0xe   :  { %v68_v59 = vmax.bf16 %v60_v50, %v52_v49  ;;  %v92_v1 = vld [vmem:[%s491_s4 + $0x20] sm:$0xff]  ;;  %v53_v2 = vmax.bf16 %v45_v61, %v37_v60  ;;  %v61_v3 = vld [vmem:[%s489_s2 + $0x28] sm:$0xff]  ;;  %v154_v5 = vld [vmem:[%s495_s8 + $0x10] sm:$0xff] }
   0xf   :  { %v144_v45 = vmax.bf16 %v136_v22, %v128_v35  ;;  %v145_v62 = vmax.bf16 %v137_v37, %v129_v51  ;;  %v123_v6 = vld [vmem:[%s493_s6 + $0x18] sm:$0xff]  ;;  %v77_v8 = vld [vmem:[%s490_s3 + $0x28] sm:$0xff]  ;;  %v115_v10 = vmax.bf16 %v107_v58, %v99_v0  ;;  %v108_v11 = vld [vmem:[%s492_s5 + $0x20] sm:$0xff]  ;;  %v146_v15 = vmax.bf16 %v138_v63, %v130_v4 }
  0x10   :  { %v84_v7 = vmax.bf16 %v76_v55, %v68_v59  ;;  %v69_v12 = vmax.bf16 %v61_v3, %v53_v2  ;;  %v38_v13 = vld [vmem:[%s487_s0 + $0x30] sm:$0xff]  ;;  %v139_v16 = vld [vmem:[%s494_s7 + $0x18] sm:$0xff]  ;;  %v93_v18 = vld [vmem:[%s491_s4 + $0x28] sm:$0xff] }
  0x11   :  { %v160_v56 = vmax.bf16 %v152_v30, %v144_v45  ;;  %v161_v9 = vmax.bf16 %v153_v46, %v145_v62  ;;  %v46_v14 = vld [vmem:[%s488_s1 + $0x30] sm:$0xff]  ;;  %v131_v21 = vmax.bf16 %v123_v6, %v115_v10  ;;  %v155_v22 = vld [vmem:[%s495_s8 + $0x18] sm:$0xff]  ;;  %v124_v23 = vld [vmem:[%s493_s6 + $0x20] sm:$0xff]  ;;  %v162_v26 = vmax.bf16 %v154_v5, %v146_v15 }
  0x12   :  { %v100_v17 = vmax.bf16 %v92_v1, %v84_v7  ;;  %v54_v19 = vmax.bf16 %v46_v14, %v38_v13  ;;  %v62_v20 = vld [vmem:[%s489_s2 + $0x30] sm:$0xff]  ;;  %v85_v24 = vmax.bf16 %v77_v8, %v69_v12  ;;  %v109_v28 = vld [vmem:[%s492_s5 + $0x28] sm:$0xff]  ;;  %v39_v30 = vld [vmem:[%s487_s0 + $0x38] sm:$0xff] }
  0x13   :  { %168 = vst [vmem:[%s496_s9] sm:$0xff] %v160_v56  ;;  %172 = vst.msk [vmem:[%s496_s9 + $0x8] sm:$0xff] %vm331_vm2, %v161_v9  ;;  %v78_v25 = vld [vmem:[%s490_s3 + $0x30] sm:$0xff]  ;;  %v47_v31 = vld [vmem:[%s488_s1 + $0x38] sm:$0xff]  ;;  %v147_v32 = vmax.bf16 %v139_v16, %v131_v21 }
  0x14   :  { %v116_v27 = vmax.bf16 %v108_v11, %v100_v17  ;;  %v70_v29 = vmax.bf16 %v62_v20, %v54_v19  ;;  %v140_v33 = vld [vmem:[%s494_s7 + $0x20] sm:$0xff]  ;;  %v101_v34 = vmax.bf16 %v93_v18, %v85_v24  ;;  %v94_v35 = vld [vmem:[%s491_s4 + $0x30] sm:$0xff]  ;;  %v55_v36 = vmax.bf16 %v47_v31, %v39_v30  ;;  %v63_v37 = vld [vmem:[%s489_s2 + $0x38] sm:$0xff]  ;;  %173 = vst [vmem:[%s496_s9 + $0x10] sm:$0xff] %v162_v26 }
  0x15   :  { %v125_v39 = vld [vmem:[%s493_s6 + $0x28] sm:$0xff]  ;;  %v79_v41 = vld [vmem:[%s490_s3 + $0x38] sm:$0xff]  ;;  %v163_v42 = vmax.bf16 %v155_v22, %v147_v32  ;;  %v156_v43 = vld [vmem:[%s495_s8 + $0x20] sm:$0xff] }
  0x16   :  { %v132_v38 = vmax.bf16 %v124_v23, %v116_v27  ;;  %v86_v40 = vmax.bf16 %v78_v25, %v70_v29  ;;  %v117_v44 = vmax.bf16 %v109_v28, %v101_v34  ;;  %v110_v45 = vld [vmem:[%s492_s5 + $0x30] sm:$0xff]  ;;  %v71_v46 = vmax.bf16 %v63_v37, %v55_v36  ;;  %v141_v48 = vld [vmem:[%s494_s7 + $0x28] sm:$0xff]  ;;  %v95_v50 = vld [vmem:[%s491_s4 + $0x38] sm:$0xff] }
  0x17   :  { %174 = vst.msk [vmem:[%s496_s9 + $0x18] sm:$0xff] %vm331_vm2, %v163_v42  ;;  %v126_v53 = vld [vmem:[%s493_s6 + $0x30] sm:$0xff]  ;;  %v157_v56 = vld [vmem:[%s495_s8 + $0x28] sm:$0xff]  ;;  %v111_v58 = vld [vmem:[%s492_s5 + $0x38] sm:$0xff] }
  0x18   :  { %v148_v47 = vmax.bf16 %v140_v33, %v132_v38  ;;  %v102_v49 = vmax.bf16 %v94_v35, %v86_v40  ;;  %v133_v51 = vmax.bf16 %v125_v39, %v117_v44  ;;  %v87_v54 = vmax.bf16 %v79_v41, %v71_v46  ;;  %v142_v60 = vld [vmem:[%s494_s7 + $0x30] sm:$0xff]  ;;  %v127_v63 = vld [vmem:[%s493_s6 + $0x38] sm:$0xff] }
  0x19   :  { %v158_v1 = vld [vmem:[%s495_s8 + $0x30] sm:$0xff]  ;;  %v143_v4 = vld [vmem:[%s494_s7 + $0x38] sm:$0xff] }
  0x1a   :  { %v164_v55 = vmax.bf16 %v156_v43, %v148_v47  ;;  %v118_v57 = vmax.bf16 %v110_v45, %v102_v49  ;;  %v149_v59 = vmax.bf16 %v141_v48, %v133_v51  ;;  %v103_v61 = vmax.bf16 %v95_v50, %v87_v54  ;;  %v159_v7 = vld [vmem:[%s495_s8 + $0x38] sm:$0xff] }
  0x1c   :  { %175 = vst [vmem:[%s496_s9 + $0x20] sm:$0xff] %v164_v55  ;;  %v134_v62 = vmax.bf16 %v126_v53, %v118_v57  ;;  %v165_v0 = vmax.bf16 %v157_v56, %v149_v59  ;;  %v119_v2 = vmax.bf16 %v111_v58, %v103_v61 }
  0x1e   :  { %v150_v3 = vmax.bf16 %v142_v60, %v134_v62  ;;  %176 = vst.msk [vmem:[%s496_s9 + $0x28] sm:$0xff] %vm331_vm2, %v165_v0  ;;  %v135_v5 = vmax.bf16 %v127_v63, %v119_v2 }
  0x20   :  { %v166_v6 = vmax.bf16 %v158_v1, %v150_v3  ;;  %v151_v8 = vmax.bf16 %v143_v4, %v135_v5 }
  0x22   :  { %177 = vst [vmem:[%s496_s9 + $0x30] sm:$0xff] %v166_v6  ;;  %v167_v9 = vmax.bf16 %v159_v7, %v151_v8 }
  0x24   :  { %178 = vst.msk [vmem:[%s496_s9 + $0x38] sm:$0xff] %vm331_vm2, %v167_v9 }

// kernel: net_forward.12
= control target key start
LH: loop header
LB: loop body
LE: loop exit
PB: predicated region body
PF: predicated region fallthrough
CT: control target
= control target key end

     0   :  { %s870_s12 = smov 0   ;;  %s872_s13 = smov 0   ;;  %s989_s0 = inlined_call_operand.vmem [shape: bf16[2,144,324], index: 0, kind: input, shape index: {}]   ;;  %s990_s1 = inlined_call_operand.vmem [shape: bf16[32,144], index: 1, kind: input, shape index: {}]   ;;  %s991_s2 = inlined_call_operand.vmem [shape: f32[32,1], index: 2, kind: input, shape index: {}]   ;;  %s992_s3 = inlined_call_operand.vmem [shape: bf16[2,32,324], index: 3, kind: output, shape index: {}]  }
   0x1   :  { %s874_s14 = smov 0  }
   0x2 LB: > { %s25_s15 = sadd.s32 1, %s843_s13  ;;  %p698_p0 = scmp.ge.s32.totalorder %s847_s14, 1  ;;  %s847_s14 = sphi %s874_s14, %s13_s14   ;;  %s843_s13 = sphi %s872_s13, %s994_s13   ;;  %s839_s12 = sphi %s870_s12, %s993_s12  }
   0x3   : > { %p27_p1 = scmp.ge.s32.totalorder %s25_s15, 2  ;;  %p158_p2 = scmp.lt.s32.totalorder %s847_s14, 3 }
   0x5   : > { %s996_s15 = smov (%p27_p1, %s25_s15), 0  ;;  %p159_p3 = pnand %p698_p0, %p158_p2 }
   0x6   : > { %p191_p4 = scmp.lt.s32.totalorder (!%p159_p3), %s839_s12, 1 }
   0x7   : > { %162 = sbr.rel (%p159_p3) target bundleno = 267 (0x10b), region = 32 }
   0xc   : > { %v849_v0 = vmov 0   ;;  %v821_v1 = vld [vmem:[%s990_s1 + $0x4] ss:$8 sps:$4 sm:$0xff]   ;;  %vm437_vm0 = vcmask 130048   ;;  %s998_s12 = smov (!%p191_p4, %s839_s12), 1  ;;  %v253_v3 = vld [vmem:[%s991_s2 + $0x10] sm:$0xff] }
   0xd   : > { %497 = vmatprep.subr.bf16.mxu1 %v849_v0  ;;  %781 = vset.pattern.permute.xlu0 %v849_v0  ;;  %v251_v2 = vld [vmem:[%s991_s2] sm:$0xff]  ;;  %s754_s22 = smul.u32 216, %s998_s12  ;;  %v252_v4 = vld [vmem:[%s991_s2 + $0x8] sm:$0xff]  ;;  %v254_v5 = vld [vmem:[%s991_s2 + $0x18] sm:$0xff]  ;;  %vm599_vm1 = vcmask 551936  }
   0xe   : > { %782 = vset.pattern.permute.xlu1 %v849_v0  ;;  %734 = vmatprep.mubr.msk.bf16.mxu1 %vm437_vm0, %v821_v1  ;;  %v819_v33 = vld [vmem:[%s990_s1] ss:$8 sps:$4 sm:$0xff]   ;;  %v822_v34 = vld [vmem:[%s990_s1 + $0x14] ss:$8 sps:$4 sm:$0xff]   ;;  %v824_v35 = vld [vmem:[%s990_s1 + $0x10] ss:$8 sps:$4 sm:$0xff]  }
   0xf   : > { %732 = vmatprep.mubr.msk.bf16.mxu0 %vm437_vm0, %v821_v1  ;;  %257 = vperm.xlu0 %781, %v251_v2   ;;  %s914_s29 = scalar_lea.vmem %s989_s0, %s754_s22  ;;  %s755_s9 = smul.u32 48, %s998_s12 }
  0x10   : > { %267 = vperm.xlu1 %782, %v253_v3   ;;  %v783_v6 = vld [vmem:[%s914_s29 + $0xac] ss:$12 sps:$4 sm:$0xff]   ;;  %v785_v7 = vld [vmem:[%s914_s29 + $0xb0] ss:$12 sps:$4 sm:$0xff]   ;;  %v786_v8 = vld [vmem:[%s914_s29 + $0xa8] ss:$12 sps:$4 sm:$0xff]  }
  0x11   : > { %444 = vmatprep.subr.bf16.mxu0 %v783_v6  ;;  %498 = vmatpush1.bf16.msra.mxu1 %v785_v7  ;;  %v787_v9 = vld [vmem:[%s914_s29 + $0x94] ss:$12 sps:$4 sm:$0xff]   ;;  %v789_v10 = vld [vmem:[%s914_s29 + $0x98] ss:$12 sps:$4 sm:$0xff]   ;;  %v790_v11 = vld [vmem:[%s914_s29 + $0x90] ss:$12 sps:$4 sm:$0xff]   ;;  %s966_s16 = scalar_lea.vmem %s992_s3, %s755_s9 }
  0x12   : > { %445 = vmatpush1.bf16.msra.mxu0 %v786_v8  ;;  %499 = vmatprep.subr.bf16.mxu1 %v849_v0  ;;  %v791_v12 = vld [vmem:[%s914_s29 + $0x7c] ss:$12 sps:$4 sm:$0xff]   ;;  %v793_v13 = vld [vmem:[%s914_s29 + $0x80] ss:$12 sps:$4 sm:$0xff]   ;;  %v794_v14 = vld [vmem:[%s914_s29 + $0x78] ss:$12 sps:$4 sm:$0xff]  }
  0x13   : > { %262 = vperm.xlu0 %781, %v252_v4   ;;  %446 = vmatprep.subr.bf16.mxu0 %v787_v9  ;;  %v795_v15 = vld [vmem:[%s914_s29 + $0x64] ss:$12 sps:$4 sm:$0xff]   ;;  %v797_v16 = vld [vmem:[%s914_s29 + $0x68] ss:$12 sps:$4 sm:$0xff]   ;;  %v798_v17 = vld [vmem:[%s914_s29 + $0x60] ss:$12 sps:$4 sm:$0xff]  }
  0x14   : > { %272 = vperm.xlu1 %782, %v254_v5   ;;  %v799_v18 = vld [vmem:[%s914_s29 + $0x4c] ss:$12 sps:$4 sm:$0xff]   ;;  %v801_v19 = vld [vmem:[%s914_s29 + $0x50] ss:$12 sps:$4 sm:$0xff]   ;;  %v802_v20 = vld [vmem:[%s914_s29 + $0x48] ss:$12 sps:$4 sm:$0xff]  }
  0x15   : > { %500 = vmatpush1.bf16.msra.mxu1 %v789_v10  ;;  %v803_v21 = vld [vmem:[%s914_s29 + $0x34] ss:$12 sps:$4 sm:$0xff]   ;;  %v805_v22 = vld [vmem:[%s914_s29 + $0x38] ss:$12 sps:$4 sm:$0xff]   ;;  %v806_v23 = vld [vmem:[%s914_s29 + $0x30] ss:$12 sps:$4 sm:$0xff]  }
  0x16   : > { %447 = vmatpush1.bf16.msra.mxu0 %v790_v11  ;;  %501 = vmatprep.subr.bf16.mxu1 %v849_v0  ;;  %v807_v24 = vld [vmem:[%s914_s29 + $0x1c] ss:$12 sps:$4 sm:$0xff]   ;;  %v809_v25 = vld [vmem:[%s914_s29 + $0x20] ss:$12 sps:$4 sm:$0xff]   ;;  %v810_v26 = vld [vmem:[%s914_s29 + $0x18] ss:$12 sps:$4 sm:$0xff]  }
  0x17   : > { %448 = vmatprep.subr.bf16.mxu0 %v791_v12  ;;  %v811_v27 = vld [vmem:[%s914_s29 + $0x4] ss:$12 sps:$4 sm:$0xff]   ;;  %v813_v28 = vld [vmem:[%s914_s29 + $0x8] ss:$12 sps:$4 sm:$0xff]   ;;  %v814_v29 = vld [vmem:[%s914_s29] ss:$12 sps:$4 sm:$0xff]  }
  0x18   : > { %v815_v30 = vld [vmem:[%s914_s29 + $0xc4] ss:$12 sps:$4 sm:$0xff]   ;;  %v817_v31 = vld [vmem:[%s914_s29 + $0xc8] ss:$12 sps:$4 sm:$0xff]   ;;  %v818_v32 = vld [vmem:[%s914_s29 + $0xc0] ss:$12 sps:$4 sm:$0xff]  }
  0x19   : > { %502 = vmatpush1.bf16.msra.mxu1 %v793_v13 }
  0x1a   : > { %449 = vmatpush1.bf16.msra.mxu0 %v794_v14  ;;  %503 = vmatprep.subr.bf16.mxu1 %v849_v0 }
  0x1b   : > { %450 = vmatprep.subr.bf16.mxu0 %v795_v15 }
  0x1d   : > { %504 = vmatpush1.bf16.msra.mxu1 %v797_v16 }
  0x1e   : > { %451 = vmatpush1.bf16.msra.mxu0 %v798_v17  ;;  %505 = vmatprep.subr.bf16.mxu1 %v849_v0 }
  0x1f   : > { %452 = vmatprep.subr.bf16.mxu0 %v799_v18 }
  0x21   : > { %506 = vmatpush1.bf16.msra.mxu1 %v801_v19 }
  0x22   : > { %453 = vmatpush1.bf16.msra.mxu0 %v802_v20  ;;  %507 = vmatprep.subr.bf16.mxu1 %v849_v0 }
  0x23   : > { %454 = vmatprep.subr.bf16.mxu0 %v803_v21 }
  0x25   : > { %508 = vmatpush1.bf16.msra.mxu1 %v805_v22 }
  0x26   : > { %455 = vmatpush1.bf16.msra.mxu0 %v806_v23  ;;  %509 = vmatprep.subr.bf16.mxu1 %v849_v0 }
  0x27   : > { %456 = vmatprep.subr.bf16.mxu0 %v807_v24 }
  0x29   : > { %510 = vmatpush1.bf16.msra.mxu1 %v809_v25 }
  0x2a   : > { %457 = vmatpush1.bf16.msra.mxu0 %v810_v26  ;;  %511 = vmatprep.subr.bf16.mxu1 %v849_v0 }
  0x2b   : > { %458 = vmatprep.subr.bf16.mxu0 %v811_v27 }
  0x2d   : > { %512 = vmatpush1.bf16.msra.mxu1 %v813_v28 }
  0x2e   : > { %459 = vmatpush1.bf16.msra.mxu0 %v814_v29  ;;  %527 = vmatprep.subr.bf16.mxu1 %v849_v0 }
  0x2f   : > { %474 = vmatprep.subr.bf16.mxu0 %v815_v30 }
  0x31   : > { %528 = vmatpush2.bf16.msra.mxu1 %v817_v31 }
  0x32   : > { %475 = vmatpush2.bf16.msra.mxu0 %v818_v32 }
  0x34   : > { %530 = vmatmul.mubr.bf16.vlgmr.msra.gmra.mxu1 %v819_v33 }
  0x35   : > { %477 = vmatmul.mubr.bf16.vlgmr.msra.gmra.mxu0 %v819_v33  ;;  %735 = vmatprep.mubr.msk.bf16.mxu1 %vm437_vm0, %v822_v34 }
  0x36   : > { %733 = vmatprep.mubr.msk.bf16.mxu0 %vm437_vm0, %v822_v34 }
  0x3c   : > { %538 = vmatmul.mubr.bf16.gmra.mxu1 %v824_v35 }
  0x3d   : > { %487 = vmatmul.mubr.bf16.gmra.mxu0 %v824_v35 }
  0x8a   : > { %v258_v36 = vpop.permute.xlu0 %257 }
  0x8b   : > { %v268_v47 = vpop.permute.xlu1 %267 }
  0x8e   : > { %v263_v42 = vpop.permute.xlu0 %262 }
  0x8f   : > { %v273_v3 = vpop.permute.xlu1 %272 }
  0xf4   : > { %v531_v37 = vpop.f32.mrf.mxu1 }
  0xf5   : > { %v532_v38 = vadd.f32 %v531_v37, %v258_v36  ;;  %v478_v39 = vpop.f32.mrf.mxu0 }
  0xf6   : > { %v479_v40 = vadd.f32 %v478_v39, %v258_v36  ;;  %v533_v41 = vpop.f32.mrf.mxu1 }
  0xf7   : > { %v548_v43 = vmax.f32 %v532_v38, 0.0  ;;  %v480_v44 = vpop.f32.mrf.mxu0 }
  0xf8   : > { %v481_v45 = vadd.f32 %v480_v44, %v258_v36  ;;  %v534_v46 = vpop.f32.mrf.mxu1  ;;  %v546_v51 = vmax.f32 %v479_v40, 0.0 }
  0xf9   : > { %v747_v48 = vpack.c.bf16 %v548_v43, %v548_v43  ;;  %v535_v49 = vadd.f32 %v534_v46, %v263_v42  ;;  %v482_v50 = vpop.f32.mrf.mxu0 }
  0xfa   : > { %v547_v52 = vmax.f32 %v481_v45, 0.0  ;;  %v483_v53 = vadd.f32 %v482_v50, %v263_v42  ;;  %v536_v54 = vpop.f32.mrf.mxu1 }
  0xfb   : > { %600 = vst.msk [vmem:[%s966_s16 + $0x8] sm:$0xf] %vm599_vm1, %v747_v48  ;;  %v551_v55 = vmax.f32 %v535_v49, 0.0  ;;  %v484_v56 = vpop.f32.mrf.mxu0 }
  0xfc   : > { %v746_v57 = vpack.c.bf16 %v547_v52, %v546_v51  ;;  %v485_v58 = vadd.f32 %v484_v56, %v263_v42  ;;  %v539_v59 = vpop.f32.mrf.mxu1  ;;  %v549_v63 = vmax.f32 %v483_v53, 0.0 }
  0xfd   : > { %v749_v60 = vpack.c.bf16 %v551_v55, %v551_v55  ;;  %v540_v61 = vadd.f32 %v539_v59, %v268_v47  ;;  %v488_v62 = vpop.f32.mrf.mxu0 }
  0xfe   : > { %598 = vst [vmem:[%s966_s16] sm:$0xff] %v746_v57  ;;  %v550_v0 = vmax.f32 %v485_v58, 0.0  ;;  %v489_v1 = vadd.f32 %v488_v62, %v268_v47  ;;  %v541_v2 = vpop.f32.mrf.mxu1 }
  0xff   : > { %602 = vst.msk [vmem:[%s966_s16 + $0x14] sm:$0xf] %vm599_vm1, %v749_v60  ;;  %v554_v4 = vmax.f32 %v540_v61, 0.0  ;;  %v490_v5 = vpop.f32.mrf.mxu0 }
 0x100   : > { %v748_v6 = vpack.c.bf16 %v550_v0, %v549_v63  ;;  %v491_v7 = vadd.f32 %v490_v5, %v268_v47  ;;  %v542_v8 = vpop.f32.mrf.mxu1  ;;  %v552_v12 = vmax.f32 %v489_v1, 0.0 }
 0x101   : > { %v751_v9 = vpack.c.bf16 %v554_v4, %v554_v4  ;;  %v543_v10 = vadd.f32 %v542_v8, %v273_v3  ;;  %v492_v11 = vpop.f32.mrf.mxu0 }
 0x102   : > { %601 = vst [vmem:[%s966_s16 + $0xc] sm:$0xff] %v748_v6  ;;  %v553_v13 = vmax.f32 %v491_v7, 0.0  ;;  %v493_v14 = vadd.f32 %v492_v11, %v273_v3  ;;  %v544_v15 = vpop.f32.mrf.mxu1 }
 0x103   : > { %604 = vst.msk [vmem:[%s966_s16 + $0x20] sm:$0xf] %vm599_vm1, %v751_v9  ;;  %v557_v16 = vmax.f32 %v543_v10, 0.0  ;;  %v494_v17 = vpop.f32.mrf.mxu0 }
 0x104   : > { %v750_v18 = vpack.c.bf16 %v553_v13, %v552_v12  ;;  %v495_v19 = vadd.f32 %v494_v17, %v273_v3  ;;  %v555_v21 = vmax.f32 %v493_v14, 0.0 }
 0x105   : > { %v753_v20 = vpack.c.bf16 %v557_v16, %v557_v16 }
 0x106   : > { %603 = vst [vmem:[%s966_s16 + $0x18] sm:$0xff] %v750_v18  ;;  %v556_v22 = vmax.f32 %v495_v19, 0.0 }
 0x107   : > { %606 = vst.msk [vmem:[%s966_s16 + $0x2c] sm:$0xf] %vm599_vm1, %v753_v20 }
 0x108   : > { %v752_v23 = vpack.c.bf16 %v556_v22, %v555_v21 }
 0x10a   : > { %605 = vst [vmem:[%s966_s16 + $0x24] sm:$0xff] %v752_v23 }
 0x10b PF: > { %s13_s14 = sadd.s32 1, %s847_s14   ;;  %s993_s12 = smov %s843_s13 }
 0x10c   : > { %p10_p5 = scmp.ge.s32.totalorder %s13_s14, 4   ;;  %s994_s13 = smov %s996_s15 }
 0x10e   :  { %12 = sbr.rel (!%p10_p5) target bundleno = 2 (0x2), region = 62 }

// kernel: net_forward.13
= control target key start
LH: loop header
LB: loop body
LE: loop exit
PB: predicated region body
PF: predicated region fallthrough
CT: control target
= control target key end

     0   :  { %vm168_vm0 = vcmask 289792   ;;  %s479_s0 = inlined_call_operand.vmem [shape: bf16[64,36], index: 0, kind: input, shape index: {}]   ;;  %s480_s1 = inlined_call_operand.vmem [shape: bf16[64,36], index: 1, kind: input, shape index: {}]   ;;  %s481_s2 = inlined_call_operand.vmem [shape: bf16[64,36], index: 2, kind: input, shape index: {}]   ;;  %s482_s3 = inlined_call_operand.vmem [shape: bf16[64,36], index: 3, kind: input, shape index: {}]   ;;  %s483_s4 = inlined_call_operand.vmem [shape: bf16[64,36], index: 4, kind: input, shape index: {}]   ;;  %s484_s5 = inlined_call_operand.vmem [shape: bf16[64,36], index: 5, kind: input, shape index: {}]   ;;  %s485_s6 = inlined_call_operand.vmem [shape: bf16[64,36], index: 6, kind: input, shape index: {}]   ;;  %s486_s7 = inlined_call_operand.vmem [shape: bf16[64,36], index: 7, kind: input, shape index: {}]   ;;  %s487_s8 = inlined_call_operand.vmem [shape: bf16[64,36], index: 8, kind: input, shape index: {}]   ;;  %s488_s9 = inlined_call_operand.vmem [shape: bf16[64,36], index: 9, kind: output, shape index: {}]  }
   0x1   :  { %v32_v0 = vld [vmem:[%s479_s0] sm:$0xf]  ;;  %v33_v6 = vld [vmem:[%s479_s0 + $0x4] sm:$0xf]  ;;  %v34_v15 = vld [vmem:[%s479_s0 + $0x8] sm:$0xf] }
   0x2   :  { %v40_v1 = vld [vmem:[%s480_s1] sm:$0xf]  ;;  %v41_v7 = vld [vmem:[%s480_s1 + $0x4] sm:$0xf]  ;;  %v42_v16 = vld [vmem:[%s480_s1 + $0x8] sm:$0xf] }
   0x3   :  { %v56_v2 = vld [vmem:[%s481_s2] sm:$0xf]  ;;  %v48_v3 = vmax.bf16 %v40_v1, %v32_v0  ;;  %v57_v8 = vld [vmem:[%s481_s2 + $0x4] sm:$0xf]  ;;  %v49_v10 = vmax.bf16 %v41_v7, %v33_v6  ;;  %v58_v17 = vld [vmem:[%s481_s2 + $0x8] sm:$0xf]  ;;  %v50_v20 = vmax.bf16 %v42_v16, %v34_v15 }
   0x4   :  { %v72_v4 = vld [vmem:[%s482_s3] sm:$0xf]  ;;  %v73_v13 = vld [vmem:[%s482_s3 + $0x4] sm:$0xf]  ;;  %v74_v24 = vld [vmem:[%s482_s3 + $0x8] sm:$0xf] }
   0x5   :  { %v64_v5 = vmax.bf16 %v56_v2, %v48_v3  ;;  %v88_v9 = vld [vmem:[%s483_s4] sm:$0xf]  ;;  %v65_v14 = vmax.bf16 %v57_v8, %v49_v10  ;;  %v89_v19 = vld [vmem:[%s483_s4 + $0x4] sm:$0xf]  ;;  %v66_v26 = vmax.bf16 %v58_v17, %v50_v20  ;;  %v35_v27 = vld [vmem:[%s479_s0 + $0xc] sm:$0xf] }
   0x6   :  { %v104_v12 = vld [vmem:[%s484_s5] sm:$0xf]  ;;  %v105_v23 = vld [vmem:[%s484_s5 + $0x4] sm:$0xf]  ;;  %v43_v28 = vld [vmem:[%s480_s1 + $0xc] sm:$0xf] }
   0x7   :  { %v80_v11 = vmax.bf16 %v72_v4, %v64_v5  ;;  %v120_v21 = vld [vmem:[%s485_s6] sm:$0xf]  ;;  %v81_v22 = vmax.bf16 %v73_v13, %v65_v14  ;;  %v59_v29 = vld [vmem:[%s481_s2 + $0xc] sm:$0xf]  ;;  %v90_v33 = vld [vmem:[%s483_s4 + $0x8] sm:$0xf]  ;;  %v51_v34 = vmax.bf16 %v43_v28, %v35_v27  ;;  %v82_v37 = vmax.bf16 %v74_v24, %v66_v26 }
   0x8   :  { %v136_v30 = vld [vmem:[%s486_s7] sm:$0xf]  ;;  %v121_v36 = vld [vmem:[%s485_s6 + $0x4] sm:$0xf]  ;;  %v106_v38 = vld [vmem:[%s484_s5 + $0x8] sm:$0xf] }
   0x9   :  { %v96_v18 = vmax.bf16 %v88_v9, %v80_v11  ;;  %v152_v31 = vld [vmem:[%s487_s8] sm:$0xf]  ;;  %v97_v32 = vmax.bf16 %v89_v19, %v81_v22  ;;  %v75_v39 = vld [vmem:[%s482_s3 + $0xc] sm:$0xf]  ;;  %v67_v41 = vmax.bf16 %v59_v29, %v51_v34  ;;  %v36_v42 = vld [vmem:[%s479_s0 + $0x10] sm:$0xf]  ;;  %v98_v48 = vmax.bf16 %v90_v33, %v82_v37 }
   0xa   :  { %v44_v43 = vld [vmem:[%s480_s1 + $0x10] sm:$0xf]  ;;  %v137_v46 = vld [vmem:[%s486_s7 + $0x4] sm:$0xf]  ;;  %v91_v49 = vld [vmem:[%s483_s4 + $0xc] sm:$0xf] }
   0xb   :  { %v112_v25 = vmax.bf16 %v104_v12, %v96_v18  ;;  %v113_v40 = vmax.bf16 %v105_v23, %v97_v32  ;;  %v60_v44 = vld [vmem:[%s481_s2 + $0x10] sm:$0xf]  ;;  %v153_v47 = vld [vmem:[%s487_s8 + $0x4] sm:$0xf]  ;;  %v52_v50 = vmax.bf16 %v44_v43, %v36_v42  ;;  %v122_v52 = vld [vmem:[%s485_s6 + $0x8] sm:$0xf]  ;;  %v83_v53 = vmax.bf16 %v75_v39, %v67_v41 }
   0xc   :  { %v107_v54 = vld [vmem:[%s484_s5 + $0xc] sm:$0xf]  ;;  %v76_v55 = vld [vmem:[%s482_s3 + $0x10] sm:$0xf]  ;;  %v114_v57 = vmax.bf16 %v106_v38, %v98_v48  ;;  %v37_v59 = vld [vmem:[%s479_s0 + $0x14] sm:$0xf] }
   0xd   :  { %v128_v35 = vmax.bf16 %v120_v21, %v112_v25  ;;  %v129_v51 = vmax.bf16 %v121_v36, %v113_v40  ;;  %v68_v58 = vmax.bf16 %v60_v44, %v52_v50  ;;  %v45_v60 = vld [vmem:[%s480_s1 + $0x14] sm:$0xf]  ;;  %v138_v63 = vld [vmem:[%s486_s7 + $0x8] sm:$0xf]  ;;  %v99_v1 = vmax.bf16 %v91_v49, %v83_v53  ;;  %v92_v2 = vld [vmem:[%s483_s4 + $0x10] sm:$0xf] }
   0xe   :  { %v61_v61 = vld [vmem:[%s481_s2 + $0x14] sm:$0xf]  ;;  %v154_v0 = vld [vmem:[%s487_s8 + $0x8] sm:$0xf]  ;;  %v53_v3 = vmax.bf16 %v45_v60, %v37_v59  ;;  %v130_v4 = vmax.bf16 %v122_v52, %v114_v57  ;;  %v123_v5 = vld [vmem:[%s485_s6 + $0xc] sm:$0xf] }
   0xf   :  { %v144_v45 = vmax.bf16 %v136_v30, %v128_v35  ;;  %v145_v62 = vmax.bf16 %v137_v46, %v129_v51  ;;  %v84_v6 = vmax.bf16 %v76_v55, %v68_v58  ;;  %v108_v7 = vld [vmem:[%s484_s5 + $0x10] sm:$0xf]  ;;  %v77_v8 = vld [vmem:[%s482_s3 + $0x14] sm:$0xf]  ;;  %v115_v10 = vmax.bf16 %v107_v54, %v99_v1  ;;  %v38_v12 = vld [vmem:[%s479_s0 + $0x18] sm:$0xf] }
  0x10   :  { %v69_v11 = vmax.bf16 %v61_v61, %v53_v3  ;;  %v46_v13 = vld [vmem:[%s480_s1 + $0x18] sm:$0xf]  ;;  %v146_v15 = vmax.bf16 %v138_v63, %v130_v4  ;;  %v139_v16 = vld [vmem:[%s486_s7 + $0xc] sm:$0xf]  ;;  %v93_v19 = vld [vmem:[%s483_s4 + $0x14] sm:$0xf] }
  0x11   :  { %v160_v56 = vmax.bf16 %v152_v31, %v144_v45  ;;  %v161_v9 = vmax.bf16 %v153_v47, %v145_v62  ;;  %v62_v14 = vld [vmem:[%s481_s2 + $0x18] sm:$0xf]  ;;  %v155_v17 = vld [vmem:[%s487_s8 + $0xc] sm:$0xf]  ;;  %v100_v18 = vmax.bf16 %v92_v2, %v84_v6  ;;  %v54_v20 = vmax.bf16 %v46_v13, %v38_v12  ;;  %v124_v22 = vld [vmem:[%s485_s6 + $0x10] sm:$0xf] }
  0x12   :  { %v131_v21 = vmax.bf16 %v123_v5, %v115_v10  ;;  %v85_v23 = vmax.bf16 %v77_v8, %v69_v11  ;;  %v109_v24 = vld [vmem:[%s484_s5 + $0x14] sm:$0xf]  ;;  %v78_v25 = vld [vmem:[%s482_s3 + $0x18] sm:$0xf]  ;;  %v162_v26 = vmax.bf16 %v154_v0, %v146_v15  ;;  %v39_v29 = vld [vmem:[%s479_s0 + $0x1c] sm:$0xf] }
  0x13   :  { %169 = vst.msk [vmem:[%s488_s9] sm:$0xf] %vm168_vm0, %v160_v56  ;;  %170 = vst.msk [vmem:[%s488_s9 + $0x4] sm:$0xf] %vm168_vm0, %v161_v9  ;;  %v116_v27 = vmax.bf16 %v108_v7, %v100_v18  ;;  %v70_v28 = vmax.bf16 %v62_v14, %v54_v20  ;;  %v47_v30 = vld [vmem:[%s480_s1 + $0x1c] sm:$0xf] }
  0x14   :  { %v63_v31 = vld [vmem:[%s481_s2 + $0x1c] sm:$0xf]  ;;  %v147_v32 = vmax.bf16 %v139_v16, %v131_v21  ;;  %v140_v33 = vld [vmem:[%s486_s7 + $0x10] sm:$0xf]  ;;  %v101_v34 = vmax.bf16 %v93_v19, %v85_v23  ;;  %v94_v35 = vld [vmem:[%s483_s4 + $0x18] sm:$0xf]  ;;  %v55_v36 = vmax.bf16 %v47_v30, %v39_v29 }
  0x15   :  { %171 = vst.msk [vmem:[%s488_s9 + $0x8] sm:$0xf] %vm168_vm0, %v162_v26  ;;  %v132_v37 = vmax.bf16 %v124_v22, %v116_v27  ;;  %v125_v38 = vld [vmem:[%s485_s6 + $0x14] sm:$0xf]  ;;  %v86_v39 = vmax.bf16 %v78_v25, %v70_v28  ;;  %v79_v40 = vld [vmem:[%s482_s3 + $0x1c] sm:$0xf] }
  0x16   :  { %v163_v41 = vmax.bf16 %v155_v17, %v147_v32  ;;  %v156_v42 = vld [vmem:[%s487_s8 + $0x10] sm:$0xf]  ;;  %v117_v43 = vmax.bf16 %v109_v24, %v101_v34  ;;  %v110_v44 = vld [vmem:[%s484_s5 + $0x18] sm:$0xf]  ;;  %v71_v45 = vmax.bf16 %v63_v31, %v55_v36  ;;  %v141_v47 = vld [vmem:[%s486_s7 + $0x14] sm:$0xf] }
  0x17   :  { %v148_v46 = vmax.bf16 %v140_v33, %v132_v37  ;;  %v102_v48 = vmax.bf16 %v94_v35, %v86_v39  ;;  %v95_v49 = vld [vmem:[%s483_s4 + $0x1c] sm:$0xf]  ;;  %v126_v51 = vld [vmem:[%s485_s6 + $0x18] sm:$0xf]  ;;  %v157_v54 = vld [vmem:[%s487_s8 + $0x14] sm:$0xf] }
  0x18   :  { %172 = vst.msk [vmem:[%s488_s9 + $0xc] sm:$0xf] %vm168_vm0, %v163_v41  ;;  %v133_v50 = vmax.bf16 %v125_v38, %v117_v43  ;;  %v87_v52 = vmax.bf16 %v79_v40, %v71_v45  ;;  %v111_v56 = vld [vmem:[%s484_s5 + $0x1c] sm:$0xf]  ;;  %v142_v58 = vld [vmem:[%s486_s7 + $0x18] sm:$0xf] }
  0x19   :  { %v164_v53 = vmax.bf16 %v156_v42, %v148_v46  ;;  %v118_v55 = vmax.bf16 %v110_v44, %v102_v48  ;;  %v127_v61 = vld [vmem:[%s485_s6 + $0x1c] sm:$0xf]  ;;  %v158_v63 = vld [vmem:[%s487_s8 + $0x18] sm:$0xf] }
  0x1a   :  { %v149_v57 = vmax.bf16 %v141_v47, %v133_v50  ;;  %v103_v59 = vmax.bf16 %v95_v49, %v87_v52  ;;  %v143_v2 = vld [vmem:[%s486_s7 + $0x1c] sm:$0xf] }
  0x1b   :  { %173 = vst.msk [vmem:[%s488_s9 + $0x10] sm:$0xf] %vm168_vm0, %v164_v53  ;;  %v134_v60 = vmax.bf16 %v126_v51, %v118_v55  ;;  %v159_v5 = vld [vmem:[%s487_s8 + $0x1c] sm:$0xf] }
  0x1c   :  { %v165_v62 = vmax.bf16 %v157_v54, %v149_v57  ;;  %v119_v0 = vmax.bf16 %v111_v56, %v103_v59 }
  0x1d   :  { %v150_v1 = vmax.bf16 %v142_v58, %v134_v60 }
  0x1e   :  { %174 = vst.msk [vmem:[%s488_s9 + $0x14] sm:$0xf] %vm168_vm0, %v165_v62  ;;  %v135_v3 = vmax.bf16 %v127_v61, %v119_v0 }
  0x1f   :  { %v166_v4 = vmax.bf16 %v158_v63, %v150_v1 }
  0x20   :  { %v151_v6 = vmax.bf16 %v143_v2, %v135_v3 }
  0x21   :  { %175 = vst.msk [vmem:[%s488_s9 + $0x18] sm:$0xf] %vm168_vm0, %v166_v4 }
  0x22   :  { %v167_v7 = vmax.bf16 %v159_v5, %v151_v6 }
  0x24   :  { %176 = vst.msk [vmem:[%s488_s9 + $0x1c] sm:$0xf] %vm168_vm0, %v167_v7 }

// kernel: net_forward.14
= control target key start
LH: loop header
LB: loop body
LE: loop exit
PB: predicated region body
PF: predicated region fallthrough
CT: control target
= control target key end

     0   :  { %s988_s12 = smov 0   ;;  %s990_s13 = smov 0   ;;  %s1127_s0 = inlined_call_operand.vmem [shape: bf16[2,288,16], index: 0, kind: input, shape index: {}]   ;;  %s1128_s1 = inlined_call_operand.vmem [shape: bf16[64,288], index: 1, kind: input, shape index: {}]   ;;  %s1129_s2 = inlined_call_operand.vmem [shape: f32[64,1], index: 2, kind: input, shape index: {}]   ;;  %s1130_s3 = inlined_call_operand.vmem [shape: bf16[2,64,16], index: 3, kind: output, shape index: {}]  }
   0x1   :  { %s992_s14 = smov 0  }
   0x2 LB: > { %s25_s15 = sadd.s32 1, %s961_s13  ;;  %p750_p0 = scmp.ge.s32.totalorder %s965_s14, 1  ;;  %s965_s14 = sphi %s992_s14, %s13_s14   ;;  %s961_s13 = sphi %s990_s13, %s1132_s13   ;;  %s957_s12 = sphi %s988_s12, %s1131_s12  }
   0x3   : > { %p27_p1 = scmp.ge.s32.totalorder %s25_s15, 2  ;;  %p156_p2 = scmp.lt.s32.totalorder %s965_s14, 3 }
   0x5   : > { %s1134_s15 = smov (%p27_p1, %s25_s15), 0  ;;  %p157_p3 = pnand %p750_p0, %p156_p2 }
   0x6   : > { %p186_p4 = scmp.lt.s32.totalorder (!%p157_p3), %s957_s12, 1 }
   0x7   : > { %160 = sbr.rel (%p157_p3) target bundleno = 275 (0x113), region = 32 }
   0xc   : > { %v927_v0 = vld [vmem:[%s1128_s1 + $0x4] ss:$12 sps:$4 sm:$0xff]   ;;  %s1136_s12 = smov (!%p186_p4, %s957_s12), 1  ;;  %v930_v1 = vld [vmem:[%s1128_s1 + $0x4c] ss:$12 sps:$4 sm:$0xff]   ;;  %v967_v2 = vmov 0  }
   0xd   : > { %907 = vset.pattern.permute.xlu0 %v967_v2  ;;  %908 = vset.pattern.permute.xlu1 %v967_v2  ;;  %s881_s20 = smul.u32 144, %s1136_s12  ;;  %v255_v16 = vld [vmem:[%s1129_s2] sm:$0xff]  ;;  %v257_v17 = vld [vmem:[%s1129_s2 + $0x10] sm:$0xff]  ;;  %v256_v18 = vld [vmem:[%s1129_s2 + $0x8] sm:$0xff]  ;;  %vm471_vm0 = vcmask 261120   ;;  %s798_s10 = sshll.u32 %s1136_s12, 5 }
   0xe   : > { %516 = vmatprep.mubr.bf16.mxu0 %v927_v0  ;;  %540 = vmatprep.mubr.bf16.mxu1 %v930_v1  ;;  %v258_v19 = vld [vmem:[%s1129_s2 + $0x18] sm:$0xff]  ;;  %v259_v22 = vld [vmem:[%s1129_s2 + $0x20] sm:$0xff]  ;;  %v260_v23 = vld [vmem:[%s1129_s2 + $0x28] sm:$0xff]  ;;  %s1100_s17 = scalar_lea.vmem %s1130_s3, %s798_s10  ;;  %vm654_vm1 = vcmask 125952  }
   0xf   : > { %s1018_s23 = scalar_lea.vmem %s1127_s0, %s881_s20  ;;  %265 = vperm.xlu0 %907, %v255_v16   ;;  %275 = vperm.xlu1 %908, %v257_v17   ;;  %v925_v26 = vld [vmem:[%s1128_s1] ss:$12 sps:$4 sm:$0xff]   ;;  %v928_v27 = vld [vmem:[%s1128_s1 + $0x48] ss:$12 sps:$4 sm:$0xff]   ;;  %v262_v29 = vld [vmem:[%s1129_s2 + $0x38] sm:$0xff] }
  0x10   : > { %v909_v3 = vld [vmem:[%s1018_s23 + $0x78] sm:$0xff]   ;;  %v911_v5 = vld [vmem:[%s1018_s23 + $0x70] sm:$0xff]   ;;  %v913_v7 = vld [vmem:[%s1018_s23 + $0x68] sm:$0xff]  }
  0x11   : > { %v910_v4 = vld [vmem:[%s1018_s23 + $0x38] sm:$0xff]   ;;  %807 = vmatprep.subr.bf16.mxu0 %v909_v3  ;;  %865 = vmatprep.subr.bf16.mxu1 %v909_v3  ;;  %v912_v6 = vld [vmem:[%s1018_s23 + $0x30] sm:$0xff]   ;;  %v914_v8 = vld [vmem:[%s1018_s23 + $0x28] sm:$0xff]  }
  0x12   : > { %808 = vmatpush3.bf16.msra.mxu0 %v910_v4  ;;  %873 = vmatpush3.bf16.msra.mxu1 %v910_v4  ;;  %v915_v9 = vld [vmem:[%s1018_s23 + $0x60] sm:$0xff]   ;;  %v917_v11 = vld [vmem:[%s1018_s23 + $0x58] sm:$0xff]   ;;  %v919_v13 = vld [vmem:[%s1018_s23 + $0x50] sm:$0xff]  }
  0x13   : > { %809 = vmatprep.subr.bf16.mxu0 %v911_v5  ;;  %866 = vmatprep.subr.bf16.mxu1 %v911_v5  ;;  %v916_v10 = vld [vmem:[%s1018_s23 + $0x20] sm:$0xff]   ;;  %v918_v12 = vld [vmem:[%s1018_s23 + $0x18] sm:$0xff]   ;;  %v920_v14 = vld [vmem:[%s1018_s23 + $0x10] sm:$0xff]  }
  0x14   : > { %v921_v15 = vld [vmem:[%s1018_s23 + $0x48] sm:$0xff]   ;;  %v923_v21 = vld [vmem:[%s1018_s23 + $0x40] sm:$0xff]   ;;  %270 = vperm.xlu0 %907, %v256_v18   ;;  %280 = vperm.xlu1 %908, %v258_v19   ;;  %v261_v28 = vld [vmem:[%s1129_s2 + $0x30] sm:$0xff] }
  0x15   : > { %v922_v20 = vld [vmem:[%s1018_s23 + $0x8] sm:$0xff]   ;;  %v924_v24 = vld [vmem:[%s1018_s23] sm:$0xff]   ;;  %v941_v37 = vld [vmem:[%s1128_s1 + $0x30] ss:$12 sps:$4 sm:$0xff]  }
  0x16   : > { %810 = vmatpush3.bf16.msra.mxu0 %v912_v6  ;;  %874 = vmatpush3.bf16.msra.mxu1 %v912_v6  ;;  %v931_v25 = vld [vmem:[%s1018_s23 + $0x88] sm:$0xff]   ;;  %v932_v31 = vld [vmem:[%s1018_s23 + $0x80] sm:$0xff]   ;;  %v942_v38 = vld [vmem:[%s1128_s1 + $0x50] ss:$12 sps:$4 sm:$0xff]  }
  0x17   : > { %811 = vmatprep.subr.bf16.mxu0 %v913_v7  ;;  %867 = vmatprep.subr.bf16.mxu1 %v913_v7  ;;  %v933_v30 = vld [vmem:[%s1128_s1 + $0x1c] ss:$12 sps:$4 sm:$0xff]   ;;  %v936_v33 = vld [vmem:[%s1128_s1 + $0x18] ss:$12 sps:$4 sm:$0xff]   ;;  %v937_v34 = vld [vmem:[%s1128_s1 + $0x20] ss:$12 sps:$4 sm:$0xff]  }
  0x18   : > { %285 = vperm.xlu0 %907, %v259_v22   ;;  %290 = vperm.xlu1 %908, %v260_v23   ;;  %v935_v32 = vld [vmem:[%s1128_s1 + $0x8] ss:$12 sps:$4 sm:$0xff]   ;;  %v940_v36 = vld [vmem:[%s1128_s1 + $0x38] ss:$12 sps:$4 sm:$0xff]  }
  0x19   : > { %v938_v35 = vld [vmem:[%s1128_s1 + $0x34] ss:$12 sps:$4 sm:$0xff]  }
  0x1a   : > { %812 = vmatpush3.bf16.msra.mxu0 %v914_v8  ;;  %875 = vmatpush3.bf16.msra.mxu1 %v914_v8 }
  0x1b   : > { %813 = vmatprep.subr.bf16.mxu0 %v915_v9  ;;  %868 = vmatprep.subr.bf16.mxu1 %v915_v9 }
  0x1c   : > { %295 = vperm.xlu0 %907, %v261_v28   ;;  %300 = vperm.xlu1 %908, %v262_v29  }
  0x1e   : > { %814 = vmatpush3.bf16.msra.mxu0 %v916_v10  ;;  %876 = vmatpush3.bf16.msra.mxu1 %v916_v10 }
  0x1f   : > { %815 = vmatprep.subr.bf16.mxu0 %v917_v11  ;;  %869 = vmatprep.subr.bf16.mxu1 %v917_v11 }
  0x22   : > { %816 = vmatpush3.bf16.msra.mxu0 %v918_v12  ;;  %877 = vmatpush3.bf16.msra.mxu1 %v918_v12 }
  0x23   : > { %817 = vmatprep.subr.bf16.mxu0 %v919_v13  ;;  %870 = vmatprep.subr.bf16.mxu1 %v919_v13 }
  0x26   : > { %818 = vmatpush3.bf16.msra.mxu0 %v920_v14  ;;  %878 = vmatpush3.bf16.msra.mxu1 %v920_v14 }
  0x27   : > { %819 = vmatprep.subr.bf16.mxu0 %v921_v15  ;;  %871 = vmatprep.subr.bf16.mxu1 %v921_v15 }
  0x2a   : > { %820 = vmatpush3.bf16.msra.mxu0 %v922_v20  ;;  %879 = vmatpush3.bf16.msra.mxu1 %v922_v20 }
  0x2b   : > { %821 = vmatprep.subr.bf16.mxu0 %v923_v21  ;;  %872 = vmatprep.subr.bf16.mxu1 %v923_v21 }
  0x2e   : > { %822 = vmatpush3.bf16.msra.mxu0 %v924_v24  ;;  %880 = vmatpush3.bf16.msra.mxu1 %v924_v24 }
  0x2f   : > { %853 = vmatprep.subr.bf16.mxu1 %v931_v25 }
  0x31   : > { %517 = vmatmul.mubr.bf16.vlgmr.msra.gmra.mxu0 %v925_v26  ;;  %541 = vmatmul.mubr.bf16.vlgmr.msra.gmra.mxu1 %v928_v27 }
  0x32   : > { %854 = vmatpush3.bf16.msra.mxu1 %v931_v25  ;;  %524 = vmatprep.mubr.bf16.mxu0 %v933_v30 }
  0x33   : > { %855 = vmatprep.subr.bf16.mxu1 %v932_v31  ;;  %857 = vmatprep.mubr.msk.bf16.mxu1 %vm471_vm0, %v935_v32 }
  0x36   : > { %856 = vmatpush3.bf16.msra.mxu1 %v932_v31 }
  0x39   : > { %525 = vmatmul.mubr.bf16.gmra.mxu0 %v936_v33  ;;  %858 = vmatmul.mubr.msk.bf16.vlgmr.msra.gmra.mxu1 %vm471_vm0, %v937_v34 }
  0x3a   : > { %532 = vmatprep.mubr.bf16.mxu0 %v938_v35  ;;  %861 = vmatprep.mubr.msk.bf16.mxu1 %vm471_vm0, %v940_v36 }
  0x41   : > { %533 = vmatmul.mubr.bf16.gmra.mxu0 %v941_v37  ;;  %862 = vmatmul.mubr.msk.bf16.gmra.mxu1 %vm471_vm0, %v942_v38 }
  0x8a   : > { %v266_v39 = vpop.permute.xlu0 %265  ;;  %v276_v40 = vpop.permute.xlu1 %275 }
  0x8f   : > { %v271_v41 = vpop.permute.xlu0 %270  ;;  %v281_v46 = vpop.permute.xlu1 %280 }
  0x93   : > { %v286_v49 = vpop.permute.xlu0 %285  ;;  %v291_v55 = vpop.permute.xlu1 %290 }
  0x97   : > { %v296_v61 = vpop.permute.xlu0 %295  ;;  %v301_v9 = vpop.permute.xlu1 %300 }
  0xf1   : > { %v823_v42 = vpop.f32.mrf.mxu0  ;;  %v841_v43 = vpop.f32.mrf.mxu1 }
  0xf3   : > { %v824_v44 = vpop.f32.mrf.mxu0  ;;  %v842_v45 = vpop.f32.mrf.mxu1 }
  0xf4   : > { %v825_v50 = vadd.f32 %v824_v44, %v823_v42  ;;  %v843_v58 = vadd.f32 %v842_v45, %v841_v43 }
  0xf5   : > { %v826_v47 = vpop.f32.mrf.mxu0  ;;  %v844_v48 = vpop.f32.mrf.mxu1 }
  0xf6   : > { %v519_v57 = vadd.f32 %v825_v50, %v266_v39  ;;  %v543_v5 = vadd.f32 %v843_v58, %v296_v61 }
  0xf7   : > { %v827_v51 = vpop.f32.mrf.mxu0  ;;  %v845_v52 = vpop.f32.mrf.mxu1 }
  0xf8   : > { %v828_v56 = vadd.f32 %v827_v51, %v826_v47  ;;  %v846_v6 = vadd.f32 %v845_v52, %v844_v48 }
  0xf9   : > { %v829_v53 = vpop.f32.mrf.mxu0  ;;  %v859_v54 = vpop.f32.mrf.mxu1 }
  0xfa   : > { %v522_v4 = vadd.f32 %v828_v56, %v271_v41  ;;  %v546_v20 = vadd.f32 %v846_v6, %v301_v9 }
  0xfb   : > { %v830_v59 = vpop.f32.mrf.mxu0  ;;  %v583_v60 = vpop.f32.mrf.mxu1 }
  0xfc   : > { %v831_v62 = vadd.f32 %v830_v59, %v829_v53  ;;  %v584_v63 = vadd.f32 %v583_v60, %v519_v57 }
  0xfd   : > { %v832_v0 = vpop.f32.mrf.mxu0  ;;  %v860_v1 = vpop.f32.mrf.mxu1 }
  0xfe   : > { %v527_v2 = vadd.f32 %v831_v62, %v276_v40  ;;  %v614_v3 = vmax.f32 %v584_v63, 0.0 }
  0xff   : > { %v833_v7 = vpop.f32.mrf.mxu0  ;;  %v586_v8 = vpop.f32.mrf.mxu1 }
 0x100   : > { %v592_v10 = vadd.f32 %v859_v54, %v527_v2  ;;  %v799_v11 = vpack.c.bf16 %v614_v3, %v614_v3  ;;  %v834_v12 = vadd.f32 %v833_v7, %v832_v0  ;;  %v587_v13 = vadd.f32 %v586_v8, %v522_v4 }
 0x101   : > { %v835_v14 = vpop.f32.mrf.mxu0  ;;  %v863_v15 = vpop.f32.mrf.mxu1 }
 0x102   : > { %v616_v16 = vmax.f32 %v592_v10, 0.0  ;;  %655 = vst.msk [vmem:[%s1100_s17] sm:$0xf] %vm654_vm1, %v799_v11  ;;  %v530_v17 = vadd.f32 %v834_v12, %v281_v46  ;;  %v615_v18 = vmax.f32 %v587_v13, 0.0  ;;  %v608_v19 = vadd.f32 %v863_v15, %v543_v5 }
 0x103   : > { %v836_v21 = vpop.f32.mrf.mxu0  ;;  %v599_v22 = vpop.f32.mrf.mxu1 }
 0x104   : > { %v801_v23 = vpack.c.bf16 %v616_v16, %v616_v16  ;;  %v595_v24 = vadd.f32 %v860_v1, %v530_v17  ;;  %v800_v25 = vpack.c.bf16 %v615_v18, %v615_v18  ;;  %v620_v26 = vmax.f32 %v608_v19, 0.0 }
 0x105   : > { %v837_v27 = vadd.f32 %v836_v21, %v835_v14  ;;  %v838_v28 = vpop.f32.mrf.mxu0  ;;  %v864_v29 = vpop.f32.mrf.mxu1 }
 0x106   : > { %657 = vst.msk [vmem:[%s1100_s17 + $0x8] sm:$0xf] %vm654_vm1, %v801_v23  ;;  %v617_v30 = vmax.f32 %v595_v24, 0.0  ;;  %656 = vst.msk [vmem:[%s1100_s17 + $0x4] sm:$0xf] %vm654_vm1, %v800_v25  ;;  %v805_v31 = vpack.c.bf16 %v620_v26, %v620_v26  ;;  %v611_v32 = vadd.f32 %v864_v29, %v546_v20 }
 0x107   : > { %v535_v33 = vadd.f32 %v837_v27, %v286_v49  ;;  %v839_v34 = vpop.f32.mrf.mxu0  ;;  %v602_v42 = vpop.f32.mrf.mxu1 }
 0x108   : > { %v802_v35 = vpack.c.bf16 %v617_v30, %v617_v30  ;;  %661 = vst.msk [vmem:[%s1100_s17 + $0x18] sm:$0xf] %vm654_vm1, %v805_v31  ;;  %v621_v36 = vmax.f32 %v611_v32, 0.0  ;;  %v840_v37 = vadd.f32 %v839_v34, %v838_v28 }
 0x109   : > { %v600_v38 = vadd.f32 %v599_v22, %v535_v33 }
 0x10a   : > { %658 = vst.msk [vmem:[%s1100_s17 + $0xc] sm:$0xf] %vm654_vm1, %v802_v35  ;;  %v806_v39 = vpack.c.bf16 %v621_v36, %v621_v36  ;;  %v538_v40 = vadd.f32 %v840_v37, %v291_v55 }
 0x10b   : > { %v618_v41 = vmax.f32 %v600_v38, 0.0 }
 0x10c   : > { %662 = vst.msk [vmem:[%s1100_s17 + $0x1c] sm:$0xf] %vm654_vm1, %v806_v39  ;;  %v603_v43 = vadd.f32 %v602_v42, %v538_v40 }
 0x10d   : > { %v803_v44 = vpack.c.bf16 %v618_v41, %v618_v41 }
 0x10e   : > { %v619_v45 = vmax.f32 %v603_v43, 0.0 }
 0x10f   : > { %659 = vst.msk [vmem:[%s1100_s17 + $0x10] sm:$0xf] %vm654_vm1, %v803_v44 }
 0x110   : > { %v804_v46 = vpack.c.bf16 %v619_v45, %v619_v45 }
 0x112   : > { %660 = vst.msk [vmem:[%s1100_s17 + $0x14] sm:$0xf] %vm654_vm1, %v804_v46 }
 0x113 PF: > { %s13_s14 = sadd.s32 1, %s965_s14   ;;  %s1131_s12 = smov %s961_s13 }
 0x114   : > { %p10_p5 = scmp.ge.s32.totalorder %s13_s14, 4   ;;  %s1132_s13 = smov %s1134_s15 }
 0x116   :  { %12 = sbr.rel (!%p10_p5) target bundleno = 2 (0x2), region = 62 }

// kernel: net_forward.15
= control target key start
LH: loop header
LB: loop body
LE: loop exit
PB: predicated region body
PF: predicated region fallthrough
CT: control target
= control target key end

     0   :  { %v172_v36 = vlaneseq  ;;  %v1871_v37 = vmov 1966171168   ;;  %vm1873_vm0 = vmmov 0   ;;  %vm1264_vm1 = vcmask 523264   ;;  %s2427_s1 = inlined_call_operand.vmem [shape: bf16[1024,256], index: 1, kind: input, shape index: {}]   ;;  %s2428_s0 = inlined_call_operand.vmem [shape: bf16[2,1024], index: 0, kind: input, shape index: {}]   ;;  %s2429_s3 = inlined_call_operand.vmem [shape: bf16[256,64], index: 3, kind: input, shape index: {}]   ;;  %s2430_s5 = inlined_call_operand.vmem [shape: bf16[64,16], index: 5, kind: input, shape index: {}]   ;;  %s2431_s2 = inlined_call_operand.vmem [shape: f32[1,256], index: 2, kind: input, shape index: {}]   ;;  %s2432_s7 = inlined_call_operand.vmem [shape: bf16[16,4], index: 7, kind: input, shape index: {}]   ;;  %s2433_s4 = inlined_call_operand.vmem [shape: f32[1,64], index: 4, kind: input, shape index: {}]   ;;  %s2434_s6 = inlined_call_operand.vmem [shape: f32[1,16], index: 6, kind: input, shape index: {}]   ;;  %s2435_s9 = inlined_call_operand.vmem [shape: bf16[4,1], index: 9, kind: input, shape index: {}]   ;;  %s2436_s10 = inlined_call_operand.<no memory space> [shape: f32[1,1], index: 10, kind: input, shape index: {}]   ;;  %s2437_s8 = inlined_call_operand.vmem [shape: f32[1,4], index: 8, kind: input, shape index: {}]   ;;  %s2438_s11 = inlined_call_operand.vmem [shape: f32[2,1], index: 11, kind: output, shape index: {}]  }
   0x1   :  { %v1653_v0 = vld [vmem:[%s2427_s1 + $0x74] ss:$8 sps:$4 sm:$0xff]   ;;  %v1657_v2 = vld [vmem:[%s2427_s1 + $0x70] ss:$8 sps:$4 sm:$0xff]   ;;  %v1659_v4 = vld [vmem:[%s2427_s1 + $0x64] ss:$8 sps:$4 sm:$0xff]   ;;  %v185_v38 = vunpack.c.l.s4 %v1871_v37 }
   0x2   :  { %v1655_v1 = vld [vmem:[%s2427_s1 + $0x174] ss:$8 sps:$4 sm:$0xff]   ;;  %880 = vmatprep.subr.bf16.mxu0 %v1653_v0  ;;  %v1658_v3 = vld [vmem:[%s2427_s1 + $0x170] ss:$8 sps:$4 sm:$0xff]   ;;  %v1661_v5 = vld [vmem:[%s2427_s1 + $0x164] ss:$8 sps:$4 sm:$0xff]  }
   0x3   :  { %921 = vmatprep.subr.bf16.mxu1 %v1655_v1  ;;  %881 = vmatpush1.bf16.msra.mxu0 %v1657_v2  ;;  %v1663_v6 = vld [vmem:[%s2427_s1 + $0x60] ss:$8 sps:$4 sm:$0xff]   ;;  %v1665_v8 = vld [vmem:[%s2427_s1 + $0x54] ss:$8 sps:$4 sm:$0xff]   ;;  %v1669_v10 = vld [vmem:[%s2427_s1 + $0x50] ss:$8 sps:$4 sm:$0xff]   ;;  %v186_v43 = vunpack.c.0.s8 %v185_v38 }
   0x4   :  { %922 = vmatpush1.bf16.msra.mxu1 %v1658_v3  ;;  %882 = vmatprep.subr.bf16.mxu0 %v1659_v4  ;;  %v1664_v7 = vld [vmem:[%s2427_s1 + $0x160] ss:$8 sps:$4 sm:$0xff]   ;;  %v1667_v9 = vld [vmem:[%s2427_s1 + $0x154] ss:$8 sps:$4 sm:$0xff]   ;;  %v1670_v11 = vld [vmem:[%s2427_s1 + $0x150] ss:$8 sps:$4 sm:$0xff]  }
   0x5   :  { %923 = vmatprep.subr.bf16.mxu1 %v1661_v5  ;;  %v1671_v12 = vld [vmem:[%s2427_s1 + $0x44] ss:$8 sps:$4 sm:$0xff]   ;;  %v1675_v14 = vld [vmem:[%s2427_s1 + $0x40] ss:$8 sps:$4 sm:$0xff]   ;;  %v1677_v16 = vld [vmem:[%s2427_s1 + $0x34] ss:$8 sps:$4 sm:$0xff]  }
   0x6   :  { %v1673_v13 = vld [vmem:[%s2427_s1 + $0x144] ss:$8 sps:$4 sm:$0xff]   ;;  %v1676_v15 = vld [vmem:[%s2427_s1 + $0x140] ss:$8 sps:$4 sm:$0xff]   ;;  %v1679_v17 = vld [vmem:[%s2427_s1 + $0x134] ss:$8 sps:$4 sm:$0xff]  }
   0x7   :  { %883 = vmatpush1.bf16.msra.mxu0 %v1663_v6  ;;  %v1681_v18 = vld [vmem:[%s2427_s1 + $0x30] ss:$8 sps:$4 sm:$0xff]   ;;  %v1683_v20 = vld [vmem:[%s2427_s1 + $0x24] ss:$8 sps:$4 sm:$0xff]   ;;  %v1687_v22 = vld [vmem:[%s2427_s1 + $0x20] ss:$8 sps:$4 sm:$0xff]  }
   0x8   :  { %924 = vmatpush1.bf16.msra.mxu1 %v1664_v7  ;;  %884 = vmatprep.subr.bf16.mxu0 %v1665_v8  ;;  %v1682_v19 = vld [vmem:[%s2427_s1 + $0x130] ss:$8 sps:$4 sm:$0xff]   ;;  %v1685_v21 = vld [vmem:[%s2427_s1 + $0x124] ss:$8 sps:$4 sm:$0xff]   ;;  %v1688_v23 = vld [vmem:[%s2427_s1 + $0x120] ss:$8 sps:$4 sm:$0xff]  }
   0x9   :  { %925 = vmatprep.subr.bf16.mxu1 %v1667_v9  ;;  %v1689_v24 = vld [vmem:[%s2427_s1 + $0x14] ss:$8 sps:$4 sm:$0xff]   ;;  %v1693_v26 = vld [vmem:[%s2427_s1 + $0x10] ss:$8 sps:$4 sm:$0xff]   ;;  %v1695_v28 = vld [vmem:[%s2427_s1 + $0x4] ss:$8 sps:$4 sm:$0xff]  }
   0xa   :  { %v1691_v25 = vld [vmem:[%s2427_s1 + $0x114] ss:$8 sps:$4 sm:$0xff]   ;;  %v1694_v27 = vld [vmem:[%s2427_s1 + $0x110] ss:$8 sps:$4 sm:$0xff]   ;;  %v1697_v29 = vld [vmem:[%s2427_s1 + $0x104] ss:$8 sps:$4 sm:$0xff]  }
   0xb   :  { %885 = vmatpush1.bf16.msra.mxu0 %v1669_v10  ;;  %v1699_v30 = vld [vmem:[%s2427_s1] ss:$8 sps:$4 sm:$0xff]   ;;  %v1701_v32 = vld [vmem:[%s2427_s1 + $0xf4] ss:$8 sps:$4 sm:$0xff]   ;;  %v1705_v34 = vld [vmem:[%s2427_s1 + $0xf0] ss:$8 sps:$4 sm:$0xff]  }
   0xc   :  { %926 = vmatpush1.bf16.msra.mxu1 %v1670_v11  ;;  %886 = vmatprep.subr.bf16.mxu0 %v1671_v12  ;;  %v1700_v31 = vld [vmem:[%s2427_s1 + $0x100] ss:$8 sps:$4 sm:$0xff]   ;;  %v1703_v33 = vld [vmem:[%s2427_s1 + $0x1f4] ss:$8 sps:$4 sm:$0xff]   ;;  %v1706_v35 = vld [vmem:[%s2427_s1 + $0x1f0] ss:$8 sps:$4 sm:$0xff]  }
   0xd   :  { %927 = vmatprep.subr.bf16.mxu1 %v1673_v13  ;;  %v1707_v39 = vld [vmem:[%s2427_s1 + $0xe4] ss:$8 sps:$4 sm:$0xff]   ;;  %v1711_v41 = vld [vmem:[%s2427_s1 + $0xe0] ss:$8 sps:$4 sm:$0xff]   ;;  %v2051_v42 = vshrl.u32 %v172_v36, 7  ;;  %vm1383_vm2 = vcmask 1041408  }
   0xe   :  { %v1709_v40 = vld [vmem:[%s2427_s1 + $0x1e4] ss:$8 sps:$4 sm:$0xff]   ;;  %v1712_v44 = vld [vmem:[%s2427_s1 + $0x1e0] ss:$8 sps:$4 sm:$0xff]   ;;  %v1713_v45 = vld [vmem:[%s2427_s1 + $0xd4] ss:$8 sps:$4 sm:$0xff]  }
   0xf   :  { %887 = vmatpush1.bf16.msra.mxu0 %v1675_v14  ;;  %v1715_v46 = vld [vmem:[%s2427_s1 + $0x1d4] ss:$8 sps:$4 sm:$0xff]   ;;  %v1717_v47 = vld [vmem:[%s2427_s1 + $0xd0] ss:$8 sps:$4 sm:$0xff]   ;;  %v189_v49 = vsub.s32 %v186_v43, %v2051_v42  ;;  %v1719_v50 = vld [vmem:[%s2427_s1 + $0xc4] ss:$8 sps:$4 sm:$0xff]  }
  0x10   :  { %928 = vmatpush1.bf16.msra.mxu1 %v1676_v15  ;;  %888 = vmatprep.subr.bf16.mxu0 %v1677_v16  ;;  %v1718_v48 = vld [vmem:[%s2427_s1 + $0x1d0] ss:$8 sps:$4 sm:$0xff]   ;;  %v1721_v51 = vld [vmem:[%s2427_s1 + $0x1c4] ss:$8 sps:$4 sm:$0xff]   ;;  %v1723_v53 = vld [vmem:[%s2427_s1 + $0xc0] ss:$8 sps:$4 sm:$0xff]  }
  0x11   :  { %929 = vmatprep.subr.bf16.mxu1 %v1679_v17  ;;  %v41_v52 = vld [vmem:[%s2428_s0] sm:$0xff]  ;;  %v1725_v57 = vld [vmem:[%s2427_s1 + $0xb4] ss:$8 sps:$4 sm:$0xff]   ;;  %v1729_v61 = vld [vmem:[%s2427_s1 + $0xb0] ss:$8 sps:$4 sm:$0xff]   ;;  %vm1325_vm3 = vcmask 130048  }
  0x12   :  { %v183_v54 = vcombine.high %v41_v52, %v41_v52  ;;  %v190_v55 = vrot.slane %v41_v52, %v189_v49  ;;  %v1724_v56 = vld [vmem:[%s2427_s1 + $0x1c0] ss:$8 sps:$4 sm:$0xff]   ;;  %v1727_v58 = vld [vmem:[%s2427_s1 + $0x1b4] ss:$8 sps:$4 sm:$0xff]   ;;  %v1730_v0 = vld [vmem:[%s2427_s1 + $0x1b0] ss:$8 sps:$4 sm:$0xff]  }
  0x13   :  { %889 = vmatpush1.bf16.msra.mxu0 %v1681_v18  ;;  %v1731_v1 = vld [vmem:[%s2427_s1 + $0xa4] ss:$8 sps:$4 sm:$0xff]   ;;  %v1735_v4 = vld [vmem:[%s2427_s1 + $0xa0] ss:$8 sps:$4 sm:$0xff]   ;;  %v1737_v6 = vld [vmem:[%s2427_s1 + $0x94] ss:$8 sps:$4 sm:$0xff]  }
  0x14   :  { %930 = vmatpush1.bf16.msra.mxu1 %v1682_v19  ;;  %890 = vmatprep.subr.bf16.mxu0 %v1683_v20  ;;  %v198_v59 = vcombine.high %v190_v55, %v190_v55  ;;  %v197_v60 = vrot.slane %v183_v54, %v189_v49  ;;  %v1733_v2 = vld [vmem:[%s2427_s1 + $0x1a4] ss:$8 sps:$4 sm:$0xff]   ;;  %v1736_v5 = vld [vmem:[%s2427_s1 + $0x1a0] ss:$8 sps:$4 sm:$0xff]   ;;  %v1739_v7 = vld [vmem:[%s2427_s1 + $0x194] ss:$8 sps:$4 sm:$0xff]   ;;  %v206_v14 = vrot.slane %v190_v55, %v189_v49 }
  0x15   :  { %931 = vmatprep.subr.bf16.mxu1 %v1685_v21  ;;  %v1741_v8 = vld [vmem:[%s2427_s1 + $0x90] ss:$8 sps:$4 sm:$0xff]   ;;  %v1743_v10 = vld [vmem:[%s2427_s1 + $0x84] ss:$8 sps:$4 sm:$0xff]   ;;  %v1747_v13 = vld [vmem:[%s2427_s1 + $0x80] ss:$8 sps:$4 sm:$0xff]  }
  0x16   :  { %v220_v62 = vrot.slane %v198_v59, %v189_v49  ;;  %v2093_v63 = vrot.slane %v197_v60, %v189_v49  ;;  %v1742_v9 = vld [vmem:[%s2427_s1 + $0x190] ss:$8 sps:$4 sm:$0xff]   ;;  %v1745_v11 = vld [vmem:[%s2427_s1 + $0x184] ss:$8 sps:$4 sm:$0xff]   ;;  %v199_v12 = vcombine.high %v197_v60, %v197_v60  ;;  %v1748_v15 = vld [vmem:[%s2427_s1 + $0x180] ss:$8 sps:$4 sm:$0xff]   ;;  %v228_v19 = vcombine.high %v206_v14, %v206_v14 }
  0x17   :  { %891 = vmatpush1.bf16.msra.mxu0 %v1687_v22  ;;  %v1752_v16 = vld [vmem:[%s2427_s1 + $0x274] ss:$8 sps:$4 sm:$0xff]   ;;  %v1750_v20 = vld [vmem:[%s2427_s1 + $0x270] ss:$8 sps:$4 sm:$0xff]   ;;  %v1758_v22 = vld [vmem:[%s2427_s1 + $0x264] ss:$8 sps:$4 sm:$0xff]  }
  0x18   :  { %932 = vmatpush1.bf16.msra.mxu1 %v1688_v23  ;;  %892 = vmatprep.subr.bf16.mxu0 %v1689_v24  ;;  %v230_v3 = vcombine.high %v220_v62, %v220_v62  ;;  %v1755_v17 = vld [vmem:[%s2427_s1 + $0x374] ss:$8 sps:$4 sm:$0xff]   ;;  %v227_v18 = vrot.slane %v199_v12, %v189_v49  ;;  %v1753_v21 = vld [vmem:[%s2427_s1 + $0x370] ss:$8 sps:$4 sm:$0xff]   ;;  %v1761_v23 = vld [vmem:[%s2427_s1 + $0x364] ss:$8 sps:$4 sm:$0xff]  }
  0x19   :  { %933 = vmatprep.subr.bf16.mxu1 %v1691_v25  ;;  %912 = vmatprep.mubr.bf16.mxu0 %v220_v62  ;;  %v1756_v25 = vld [vmem:[%s2427_s1 + $0x260] ss:$8 sps:$4 sm:$0xff]   ;;  %v1779_v36 = vld [vmem:[%s2427_s1 + $0x334] ss:$8 sps:$4 sm:$0xff]   ;;  %v1774_v37 = vld [vmem:[%s2427_s1 + $0x230] ss:$8 sps:$4 sm:$0xff]  }
  0x1a   :  { %953 = vmatprep.mubr.bf16.mxu1 %v230_v3  ;;  %v231_v24 = vcombine.high %v227_v18, %v227_v18  ;;  %v1777_v38 = vld [vmem:[%s2427_s1 + $0x330] ss:$8 sps:$4 sm:$0xff]   ;;  %v1783_v43 = vld [vmem:[%s2427_s1 + $0x320] ss:$8 sps:$4 sm:$0xff]   ;;  %v1797_v49 = vld [vmem:[%s2427_s1 + $0x304] ss:$8 sps:$4 sm:$0xff]  }
  0x1b   :  { %893 = vmatpush1.bf16.msra.mxu0 %v1693_v26  ;;  %v1759_v26 = vld [vmem:[%s2427_s1 + $0x360] ss:$8 sps:$4 sm:$0xff]   ;;  %v1800_v52 = vld [vmem:[%s2427_s1 + $0x2f4] ss:$8 sps:$4 sm:$0xff]   ;;  %v1798_v54 = vld [vmem:[%s2427_s1 + $0x2f0] ss:$8 sps:$4 sm:$0xff]  }
  0x1c   :  { %934 = vmatpush1.bf16.msra.mxu1 %v1694_v27  ;;  %894 = vmatprep.subr.bf16.mxu0 %v1695_v28  ;;  %v1764_v27 = vld [vmem:[%s2427_s1 + $0x254] ss:$8 sps:$4 sm:$0xff]   ;;  %v1801_v55 = vld [vmem:[%s2427_s1 + $0x3f0] ss:$8 sps:$4 sm:$0xff]   ;;  %v1807_v59 = vld [vmem:[%s2427_s1 + $0x3e0] ss:$8 sps:$4 sm:$0xff]  }
  0x1d   :  { %935 = vmatprep.subr.bf16.mxu1 %v1697_v29  ;;  %v1767_v28 = vld [vmem:[%s2427_s1 + $0x354] ss:$8 sps:$4 sm:$0xff]   ;;  %v1762_v29 = vld [vmem:[%s2427_s1 + $0x250] ss:$8 sps:$4 sm:$0xff]   ;;  %v1816_v3 = vld [vmem:[%s2427_s1 + $0x2c0] ss:$8 sps:$4 sm:$0xff]  }
  0x1e   :  { %v1812_v60 = vld [vmem:[%s2427_s1 + $0x2d4] ss:$8 sps:$4 sm:$0xff]   ;;  %v1810_v62 = vld [vmem:[%s2427_s1 + $0x2d0] ss:$8 sps:$4 sm:$0xff]   ;;  %v1831_v12 = vld [vmem:[%s2427_s1 + $0x3a0] ss:$8 sps:$4 sm:$0xff]  }
  0x1f   :  { %895 = vmatpush1.bf16.msra.mxu0 %v1699_v30  ;;  %v1765_v30 = vld [vmem:[%s2427_s1 + $0x350] ss:$8 sps:$4 sm:$0xff]   ;;  %vm1379_vm4 = vcmask 31744   ;;  %vm1433_vm5 = vcmask 1024  }
  0x20   :  { %936 = vmatpush1.bf16.msra.mxu1 %v1700_v31  ;;  %896 = vmatprep.subr.bf16.mxu0 %v1701_v32  ;;  %v1770_v31 = vld [vmem:[%s2427_s1 + $0x244] ss:$8 sps:$4 sm:$0xff]  }
  0x21   :  { %937 = vmatprep.subr.bf16.mxu1 %v1703_v33  ;;  %v1773_v32 = vld [vmem:[%s2427_s1 + $0x344] ss:$8 sps:$4 sm:$0xff]   ;;  %v1768_v33 = vld [vmem:[%s2427_s1 + $0x240] ss:$8 sps:$4 sm:$0xff]  }
  0x23   :  { %897 = vmatpush2.bf16.msra.mxu0 %v1705_v34  ;;  %v1771_v34 = vld [vmem:[%s2427_s1 + $0x340] ss:$8 sps:$4 sm:$0xff]  }
  0x24   :  { %938 = vmatpush2.bf16.msra.mxu1 %v1706_v35  ;;  %898 = vmatprep.subr.bf16.mxu0 %v1707_v39  ;;  %v1776_v35 = vld [vmem:[%s2427_s1 + $0x234] ss:$8 sps:$4 sm:$0xff]   ;;  %v1782_v39 = vld [vmem:[%s2427_s1 + $0x224] ss:$8 sps:$4 sm:$0xff]  }
  0x25   :  { %939 = vmatprep.subr.bf16.mxu1 %v1709_v40  ;;  %v1785_v40 = vld [vmem:[%s2427_s1 + $0x324] ss:$8 sps:$4 sm:$0xff]  }
  0x27   :  { %899 = vmatpush2.bf16.msra.mxu0 %v1711_v41  ;;  %v1780_v41 = vld [vmem:[%s2427_s1 + $0x220] ss:$8 sps:$4 sm:$0xff]  }
  0x28   :  { %940 = vmatpush2.bf16.msra.mxu1 %v1712_v44  ;;  %900 = vmatprep.subr.bf16.mxu0 %v1713_v45  ;;  %v1788_v44 = vld [vmem:[%s2427_s1 + $0x214] ss:$8 sps:$4 sm:$0xff]  }
  0x29   :  { %941 = vmatprep.subr.bf16.mxu1 %v1715_v46  ;;  %v1791_v45 = vld [vmem:[%s2427_s1 + $0x314] ss:$8 sps:$4 sm:$0xff]   ;;  %v1786_v46 = vld [vmem:[%s2427_s1 + $0x210] ss:$8 sps:$4 sm:$0xff]  }
  0x2b   :  { %901 = vmatpush2.bf16.msra.mxu0 %v1717_v47  ;;  %v1789_v47 = vld [vmem:[%s2427_s1 + $0x310] ss:$8 sps:$4 sm:$0xff]  }
  0x2c   :  { %942 = vmatpush2.bf16.msra.mxu1 %v1718_v48  ;;  %902 = vmatprep.subr.bf16.mxu0 %v1719_v50  ;;  %v1794_v48 = vld [vmem:[%s2427_s1 + $0x204] ss:$8 sps:$4 sm:$0xff]   ;;  %v1792_v50 = vld [vmem:[%s2427_s1 + $0x200] ss:$8 sps:$4 sm:$0xff]  }
  0x2d   :  { %943 = vmatprep.subr.bf16.mxu1 %v1721_v51  ;;  %v1795_v51 = vld [vmem:[%s2427_s1 + $0x300] ss:$8 sps:$4 sm:$0xff]  }
  0x2f   :  { %903 = vmatpush2.bf16.msra.mxu0 %v1723_v53  ;;  %v1803_v53 = vld [vmem:[%s2427_s1 + $0x3f4] ss:$8 sps:$4 sm:$0xff]  }
  0x30   :  { %944 = vmatpush2.bf16.msra.mxu1 %v1724_v56  ;;  %904 = vmatprep.subr.bf16.mxu0 %v1725_v57  ;;  %v1806_v56 = vld [vmem:[%s2427_s1 + $0x2e4] ss:$8 sps:$4 sm:$0xff]  }
  0x31   :  { %945 = vmatprep.subr.bf16.mxu1 %v1727_v58  ;;  %v1809_v57 = vld [vmem:[%s2427_s1 + $0x3e4] ss:$8 sps:$4 sm:$0xff]   ;;  %v1804_v58 = vld [vmem:[%s2427_s1 + $0x2e0] ss:$8 sps:$4 sm:$0xff]  }
  0x33   :  { %905 = vmatpush2.bf16.msra.mxu0 %v1729_v61  ;;  %v1815_v61 = vld [vmem:[%s2427_s1 + $0x3d4] ss:$8 sps:$4 sm:$0xff]  }
  0x34   :  { %946 = vmatpush2.bf16.msra.mxu1 %v1730_v0  ;;  %906 = vmatprep.subr.bf16.mxu0 %v1731_v1  ;;  %v1813_v0 = vld [vmem:[%s2427_s1 + $0x3d0] ss:$8 sps:$4 sm:$0xff]   ;;  %v1818_v1 = vld [vmem:[%s2427_s1 + $0x2c4] ss:$8 sps:$4 sm:$0xff]  }
  0x35   :  { %947 = vmatprep.subr.bf16.mxu1 %v1733_v2  ;;  %v1821_v2 = vld [vmem:[%s2427_s1 + $0x3c4] ss:$8 sps:$4 sm:$0xff]  }
  0x37   :  { %907 = vmatpush2.bf16.msra.mxu0 %v1735_v4  ;;  %v1819_v4 = vld [vmem:[%s2427_s1 + $0x3c0] ss:$8 sps:$4 sm:$0xff]  }
  0x38   :  { %948 = vmatpush2.bf16.msra.mxu1 %v1736_v5  ;;  %908 = vmatprep.subr.bf16.mxu0 %v1737_v6  ;;  %v1824_v5 = vld [vmem:[%s2427_s1 + $0x2b4] ss:$8 sps:$4 sm:$0xff]  }
  0x39   :  { %949 = vmatprep.subr.bf16.mxu1 %v1739_v7  ;;  %v1827_v6 = vld [vmem:[%s2427_s1 + $0x3b4] ss:$8 sps:$4 sm:$0xff]   ;;  %v1822_v7 = vld [vmem:[%s2427_s1 + $0x2b0] ss:$8 sps:$4 sm:$0xff]  }
  0x3b   :  { %909 = vmatpush2.bf16.msra.mxu0 %v1741_v8  ;;  %v1825_v8 = vld [vmem:[%s2427_s1 + $0x3b0] ss:$8 sps:$4 sm:$0xff]  }
  0x3c   :  { %950 = vmatpush2.bf16.msra.mxu1 %v1742_v9  ;;  %910 = vmatprep.subr.bf16.mxu0 %v1743_v10  ;;  %v1830_v9 = vld [vmem:[%s2427_s1 + $0x2a4] ss:$8 sps:$4 sm:$0xff]  }
  0x3d   :  { %951 = vmatprep.subr.bf16.mxu1 %v1745_v11  ;;  %v1833_v10 = vld [vmem:[%s2427_s1 + $0x3a4] ss:$8 sps:$4 sm:$0xff]   ;;  %v1828_v11 = vld [vmem:[%s2427_s1 + $0x2a0] ss:$8 sps:$4 sm:$0xff]  }
  0x3f   :  { %911 = vmatpush2.bf16.msra.mxu0 %v1747_v13  ;;  %v1836_v13 = vld [vmem:[%s2427_s1 + $0x294] ss:$8 sps:$4 sm:$0xff]  }
  0x40   :  { %952 = vmatpush2.bf16.msra.mxu1 %v1748_v15  ;;  %962 = vmatprep.subr.bf16.mxu0 %v1752_v16  ;;  %v1834_v15 = vld [vmem:[%s2427_s1 + $0x290] ss:$8 sps:$4 sm:$0xff]  }
  0x41   :  { %1003 = vmatprep.subr.bf16.mxu1 %v1755_v17  ;;  %v1837_v16 = vld [vmem:[%s2427_s1 + $0x390] ss:$8 sps:$4 sm:$0xff]   ;;  %v1842_v17 = vld [vmem:[%s2427_s1 + $0x284] ss:$8 sps:$4 sm:$0xff]  }
  0x42   :  { %913 = vmatmul.mubr.bf16.vlgmr.msra.gmra.mxu0 %v206_v14  ;;  %v1839_v14 = vld [vmem:[%s2427_s1 + $0x394] ss:$8 sps:$4 sm:$0xff]  }
  0x43   :  { %954 = vmatmul.mubr.bf16.vlgmr.msra.gmra.mxu1 %v228_v19  ;;  %963 = vmatpush1.bf16.msra.mxu0 %v1750_v20  ;;  %v1840_v19 = vld [vmem:[%s2427_s1 + $0x280] ss:$8 sps:$4 sm:$0xff]  }
  0x44   :  { %1004 = vmatpush1.bf16.msra.mxu1 %v1753_v21  ;;  %964 = vmatprep.subr.bf16.mxu0 %v1758_v22  ;;  %v1843_v20 = vld [vmem:[%s2427_s1 + $0x380] ss:$8 sps:$4 sm:$0xff]   ;;  %v229_v21 = vcombine.high %v2093_v63, %v2093_v63  ;;  %v1846_v22 = vld [vmem:[%s2429_s3 + $0x78] sm:$0xff]  }
  0x45   :  { %1005 = vmatprep.subr.bf16.mxu1 %v1761_v23  ;;  %994 = vmatprep.mubr.bf16.mxu0 %v227_v18  ;;  %v1845_v18 = vld [vmem:[%s2427_s1 + $0x384] ss:$8 sps:$4 sm:$0xff]   ;;  %v1847_v23 = vld [vmem:[%s2429_s3 + $0x38] sm:$0xff]  }
  0x46   :  { %1035 = vmatprep.mubr.bf16.mxu1 %v231_v24  ;;  %v1848_v24 = vld [vmem:[%s2429_s3 + $0x70] sm:$0xff]  }
  0x47   :  { %965 = vmatpush1.bf16.msra.mxu0 %v1756_v25  ;;  %v1849_v25 = vld [vmem:[%s2429_s3 + $0x30] sm:$0xff]  }
  0x48   :  { %1006 = vmatpush1.bf16.msra.mxu1 %v1759_v26  ;;  %966 = vmatprep.subr.bf16.mxu0 %v1764_v27  ;;  %v1851_v26 = vld [vmem:[%s2429_s3 + $0x28] sm:$0xff]   ;;  %v1852_v27 = vld [vmem:[%s2429_s3 + $0x60] sm:$0xff]  }
  0x49   :  { %1007 = vmatprep.subr.bf16.mxu1 %v1767_v28  ;;  %v1853_v28 = vld [vmem:[%s2429_s3 + $0x20] sm:$0xff]  }
  0x4b   :  { %967 = vmatpush1.bf16.msra.mxu0 %v1762_v29  ;;  %v1854_v29 = vld [vmem:[%s2429_s3 + $0x58] sm:$0xff]  }
  0x4c   :  { %1008 = vmatpush1.bf16.msra.mxu1 %v1765_v30  ;;  %968 = vmatprep.subr.bf16.mxu0 %v1770_v31  ;;  %v1855_v30 = vld [vmem:[%s2429_s3 + $0x18] sm:$0xff]   ;;  %v1856_v31 = vld [vmem:[%s2429_s3 + $0x50] sm:$0xff]  }
  0x4d   :  { %1009 = vmatprep.subr.bf16.mxu1 %v1773_v32  ;;  %v1857_v32 = vld [vmem:[%s2429_s3 + $0x10] sm:$0xff]  }
  0x4f   :  { %969 = vmatpush1.bf16.msra.mxu0 %v1768_v33  ;;  %v1858_v33 = vld [vmem:[%s2429_s3 + $0x48] sm:$0xff]  }
  0x50   :  { %1010 = vmatpush1.bf16.msra.mxu1 %v1771_v34  ;;  %970 = vmatprep.subr.bf16.mxu0 %v1776_v35  ;;  %v1859_v34 = vld [vmem:[%s2429_s3 + $0x8] sm:$0xff]   ;;  %v1860_v35 = vld [vmem:[%s2429_s3 + $0x40] sm:$0xff]  }
  0x51   :  { %1011 = vmatprep.subr.bf16.mxu1 %v1779_v36  ;;  %v1861_v36 = vld [vmem:[%s2429_s3] sm:$0xff]  }
  0x53   :  { %971 = vmatpush1.bf16.msra.mxu0 %v1774_v37  ;;  %v1872_v37 = vmov 0.0  }
  0x54   :  { %1012 = vmatpush1.bf16.msra.mxu1 %v1777_v38  ;;  %972 = vmatprep.subr.bf16.mxu0 %v1782_v39  ;;  %v1862_v38 = vld [vmem:[%s2430_s5 + $0x18] sm:$0xff]  }
  0x55   :  { %1013 = vmatprep.subr.bf16.mxu1 %v1785_v40 }
  0x57   :  { %973 = vmatpush1.bf16.msra.mxu0 %v1780_v41 }
  0x58   :  { %1014 = vmatpush1.bf16.msra.mxu1 %v1783_v43  ;;  %974 = vmatprep.subr.bf16.mxu0 %v1788_v44 }
  0x59   :  { %1015 = vmatprep.subr.bf16.mxu1 %v1791_v45 }
  0x5b   :  { %975 = vmatpush1.bf16.msra.mxu0 %v1786_v46 }
  0x5c   :  { %1016 = vmatpush1.bf16.msra.mxu1 %v1789_v47  ;;  %976 = vmatprep.subr.bf16.mxu0 %v1794_v48  ;;  %v174_v48 = vsub.s32 0, %v2051_v42 }
  0x5d   :  { %1017 = vmatprep.subr.bf16.mxu1 %v1797_v49  ;;  %v170_v49 = vld [vmem:[%s2431_s2] sm:$0x3] }
  0x5f   :  { %977 = vmatpush1.bf16.msra.mxu0 %v1792_v50  ;;  %v178_v50 = vsub.s32 1, %v2051_v42 }
  0x60   :  { %1018 = vmatpush1.bf16.msra.mxu1 %v1795_v51  ;;  %978 = vmatprep.subr.bf16.mxu0 %v1800_v52  ;;  %v175_v51 = vrot.slane %v170_v49, %v174_v48 }
  0x61   :  { %1019 = vmatprep.subr.bf16.mxu1 %v1803_v53  ;;  %v179_v52 = vrot.slane %v170_v49, %v178_v50 }
  0x63   :  { %979 = vmatpush2.bf16.msra.mxu0 %v1798_v54 }
  0x64   :  { %1020 = vmatpush2.bf16.msra.mxu1 %v1801_v55  ;;  %980 = vmatprep.subr.bf16.mxu0 %v1806_v56 }
  0x65   :  { %1021 = vmatprep.subr.bf16.mxu1 %v1809_v57 }
  0x67   :  { %981 = vmatpush2.bf16.msra.mxu0 %v1804_v58 }
  0x68   :  { %1022 = vmatpush2.bf16.msra.mxu1 %v1807_v59  ;;  %982 = vmatprep.subr.bf16.mxu0 %v1812_v60 }
  0x69   :  { %1023 = vmatprep.subr.bf16.mxu1 %v1815_v61 }
  0x6b   :  { %983 = vmatpush2.bf16.msra.mxu0 %v1810_v62 }
  0x6c   :  { %1024 = vmatpush2.bf16.msra.mxu1 %v1813_v0  ;;  %984 = vmatprep.subr.bf16.mxu0 %v1818_v1 }
  0x6d   :  { %1025 = vmatprep.subr.bf16.mxu1 %v1821_v2 }
  0x6f   :  { %985 = vmatpush2.bf16.msra.mxu0 %v1816_v3 }
  0x70   :  { %1026 = vmatpush2.bf16.msra.mxu1 %v1819_v4  ;;  %986 = vmatprep.subr.bf16.mxu0 %v1824_v5 }
  0x71   :  { %1027 = vmatprep.subr.bf16.mxu1 %v1827_v6 }
  0x73   :  { %987 = vmatpush2.bf16.msra.mxu0 %v1822_v7 }
  0x74   :  { %1028 = vmatpush2.bf16.msra.mxu1 %v1825_v8  ;;  %988 = vmatprep.subr.bf16.mxu0 %v1830_v9  ;;  %v1863_v9 = vld [vmem:[%s2430_s5 + $0x10] sm:$0xff]  }
  0x75   :  { %1029 = vmatprep.subr.bf16.mxu1 %v1833_v10  ;;  %v1864_v10 = vld [vmem:[%s2430_s5 + $0x8] sm:$0xff]  }
  0x77   :  { %989 = vmatpush2.bf16.msra.mxu0 %v1828_v11  ;;  %v1865_v11 = vld [vmem:[%s2430_s5] sm:$0xff]  }
  0x78   :  { %1030 = vmatpush2.bf16.msra.mxu1 %v1831_v12  ;;  %990 = vmatprep.subr.bf16.mxu0 %v1836_v13  ;;  %v1567_v13 = vld [vmem:[%s2433_s4] ss:$0 sm:$0xff] }
  0x79   :  { %1031 = vmatprep.subr.bf16.mxu1 %v1839_v14 }
  0x7b   :  { %991 = vmatpush2.bf16.msra.mxu0 %v1834_v15 }
  0x7c   :  { %1032 = vmatpush2.bf16.msra.mxu1 %v1837_v16  ;;  %992 = vmatprep.subr.bf16.mxu0 %v1842_v17 }
  0x7d   :  { %1033 = vmatprep.subr.bf16.mxu1 %v1845_v18 }
  0x7f   :  { %993 = vmatpush2.bf16.msra.mxu0 %v1840_v19 }
  0x80   :  { %1034 = vmatpush2.bf16.msra.mxu1 %v1843_v20  ;;  %1595 = vmatprep.subr.bf16.mxu0 %v1846_v22  ;;  %v1866_v20 = vld [vmem:[%s2432_s7] sm:$0xff]  }
  0x81   :  { %1626 = vmatprep.subr.bf16.mxu1 %v1872_v37  ;;  %v1584_v22 = vld [vmem:[%s2434_s6] ss:$0 sm:$0xff] }
  0x82   :  { %995 = vmatmul.mubr.bf16.vlgmr.msra.gmra.mxu0 %v2093_v63  ;;  %v1850_v63 = vld [vmem:[%s2429_s3 + $0x68] sm:$0xff]  }
  0x83   :  { %1036 = vmatmul.mubr.bf16.vlgmr.msra.gmra.mxu1 %v229_v21  ;;  %1596 = vmatpush3.bf16.msra.mxu0 %v1847_v23 }
  0x84   :  { %1597 = vmatprep.subr.bf16.mxu0 %v1848_v24  ;;  %1627 = vmatpush3.bf16.msra.mxu1 %v1862_v38 }
  0x85   :  { %1628 = vmatprep.subr.bf16.mxu1 %v1872_v37  ;;  %1634 = vmatprep.mubr.msk.bf16.mxu1 %vm1873_vm0, %v1872_v37 }
  0x87   :  { %1598 = vmatpush3.bf16.msra.mxu0 %v1849_v25 }
  0x88   :  { %1599 = vmatprep.subr.bf16.mxu0 %v1850_v63  ;;  %1629 = vmatpush3.bf16.msra.mxu1 %v1863_v9  ;;  %v1371_v63 = vld [vmem:[%s2435_s9] sm:$0x3] }
  0x89   :  { %1630 = vmatprep.subr.bf16.mxu1 %v1872_v37 }
  0x8b   :  { %1600 = vmatpush3.bf16.msra.mxu0 %v1851_v26 }
  0x8c   :  { %1601 = vmatprep.subr.bf16.mxu0 %v1852_v27  ;;  %1631 = vmatpush3.bf16.msra.mxu1 %v1864_v10 }
  0x8d   :  { %1632 = vmatprep.subr.bf16.mxu1 %v1872_v37 }
  0x8f   :  { %1602 = vmatpush3.bf16.msra.mxu0 %v1853_v28 }
  0x90   :  { %1603 = vmatprep.subr.bf16.mxu0 %v1854_v29  ;;  %1633 = vmatpush3.bf16.msra.mxu1 %v1865_v11  ;;  %v1385_v29 = vsel %vm1383_vm2, %v1371_v63, 0 }
  0x91   :  { %1638 = vmatprep.subr.bf16.mxu1 %v1872_v37 }
  0x93   :  { %1604 = vmatpush3.bf16.msra.mxu0 %v1855_v30 }
  0x94   :  { %1605 = vmatprep.subr.bf16.mxu0 %v1856_v31  ;;  %v16_v31 = vstv %s2436_s10 }
  0x95   :  { %17 = vst [vmem:[#allocation2] sm:$0x1] %v16_v31 }
  0x97   :  { %1606 = vmatpush3.bf16.msra.mxu0 %v1857_v32  ;;  %v1590_v32 = vld [vmem:[%s2437_s8] ss:$0 sm:$0xff] }
  0x98   :  { %1607 = vmatprep.subr.bf16.mxu0 %v1858_v33 }
  0x9b   :  { %1608 = vmatpush3.bf16.msra.mxu0 %v1859_v34 }
  0x9c   :  { %1609 = vmatprep.subr.bf16.mxu0 %v1860_v35 }
  0x9f   :  { %1610 = vmatpush3.bf16.msra.mxu0 %v1861_v36 }
 0x102   :  { %v914_v39 = vpop.f32.mrf.mxu0 }
 0x103   :  { %v955_v40 = vpop.f32.mrf.mxu1  ;;  %v915_v53 = vadd.f32 %v914_v39, %v175_v51 }
 0x104   :  { %v916_v41 = vpop.f32.mrf.mxu0 }
 0x105   :  { %v957_v43 = vpop.f32.mrf.mxu1  ;;  %v917_v54 = vadd.f32 %v916_v41, %v179_v52  ;;  %v956_v55 = vadd.f32 %v955_v40, %v915_v53  ;;  %v1593_v41 = vld [vmem:[#allocation2] ss:$0 sm:$0xff] }
 0x106   :  { %v918_v44 = vpop.f32.mrf.mxu0 }
 0x107   :  { %v959_v45 = vpop.f32.mrf.mxu1  ;;  %v958_v58 = vadd.f32 %v957_v43, %v917_v54 }
 0x108   :  { %v919_v46 = vpop.f32.mrf.mxu0 }
 0x109   :  { %v960_v47 = vpop.f32.mrf.mxu1 }
 0x142   :  { %v996_v56 = vpop.f32.mrf.mxu0 }
 0x143   :  { %v1037_v57 = vpop.f32.mrf.mxu1  ;;  %v997_v59 = vadd.f32 %v996_v56, %v956_v55 }
 0x144   :  { %v998_v60 = vpop.f32.mrf.mxu0 }
 0x145   :  { %v1039_v61 = vpop.f32.mrf.mxu1  ;;  %v1038_v62 = vadd.f32 %v1037_v57, %v997_v59  ;;  %v999_v0 = vadd.f32 %v998_v60, %v958_v58 }
 0x146   :  { %v1000_v1 = vpop.f32.mrf.mxu0 }
 0x147   :  { %v1041_v2 = vpop.f32.mrf.mxu1  ;;  %v1040_v3 = vadd.f32 %v1039_v61, %v999_v0  ;;  %v1044_v4 = vmax.f32 %v1038_v62, 0.0 }
 0x148   :  { %v1001_v5 = vpop.f32.mrf.mxu0 }
 0x149   :  { %v1042_v6 = vpop.f32.mrf.mxu1  ;;  %v1045_v42 = vmax.f32 %v1040_v3, 0.0  ;;  %v1046_v8 = vpack.c.bf16 %v1044_v4, %v1044_v4 }
 0x14b   :  { %v1047_v7 = vpack.c.bf16 %v1045_v42, %v1045_v42 }
 0x14d   :  { %1215 = vmatprep.mubr.bf16.mxu0 %v1047_v7 }
 0x14e   :  { %1216 = vmatmul.mubr.bf16.vlgmr.msra.gmra.mxu0 %v1046_v8 }
 0x20e   :  { %v1611_v12 = vpop.f32.mrf.mxu0 }
 0x210   :  { %v1612_v14 = vpop.f32.mrf.mxu0 }
 0x211   :  { %v1613_v15 = vadd.f32 %v1612_v14, %v1611_v12 }
 0x212   :  { %v1614_v16 = vpop.f32.mrf.mxu0 }
 0x213   :  { %v1218_v17 = vadd.f32 %v1613_v15, %v1567_v13 }
 0x214   :  { %v1615_v18 = vpop.f32.mrf.mxu0 }
 0x215   :  { %v1223_v19 = vmax.f32 %v1218_v17, 0.0 }
 0x217   :  { %v1224_v21 = vpack.c.bf16 %v1223_v19, %v1223_v19 }
 0x219   :  { %1635 = vmatmul.mubr.msk.bf16.vlgmr.msra.gmra.mxu1 %vm1264_vm1, %v1224_v21 }
 0x21a   :  { %1639 = vmatpush3.bf16.msra.mxu1 %v1866_v20  ;;  %1640 = vmatprep.mubr.msk.bf16.mxu1 %vm1873_vm0, %v1872_v37 }
 0x21b   :  { %1644 = vmatprep.subr.bf16.mxu1 %v1872_v37 }
 0x2d9   :  { %v1302_v23 = vpop.f32.mrf.mxu1 }
 0x2da   :  { %v1303_v24 = vadd.f32 %v1584_v22, %v1302_v23 }
 0x2db   :  { %v1636_v25 = vpop.f32.mrf.mxu1 }
 0x2dc   :  { %v1308_v26 = vmax.f32 %v1303_v24, 0.0 }
 0x2dd   :  { %v1305_v27 = vpop.f32.mrf.mxu1 }
 0x2de   :  { %v1309_v28 = vpack.c.bf16 %v1308_v26, %v1308_v26 }
 0x2df   :  { %v1637_v30 = vpop.f32.mrf.mxu1 }
 0x2e0   :  { %1641 = vmatmul.mubr.msk.bf16.vlgmr.msra.gmra.mxu1 %vm1325_vm3, %v1309_v28 }
 0x2e1   :  { %1645 = vmatpush3.bf16.msra.mxu1 %v1385_v29  ;;  %1646 = vmatprep.mubr.msk.bf16.mxu1 %vm1873_vm0, %v1872_v37 }
 0x3a0   :  { %v1363_v33 = vpop.f32.mrf.mxu1 }
 0x3a1   :  { %v1364_v34 = vadd.f32 %v1590_v32, %v1363_v33 }
 0x3a2   :  { %v1642_v35 = vpop.f32.mrf.mxu1 }
 0x3a3   :  { %v1369_v36 = vmax.f32 %v1364_v34, 0.0 }
 0x3a4   :  { %v1366_v38 = vpop.f32.mrf.mxu1 }
 0x3a5   :  { %v1370_v39 = vpack.c.bf16 %v1369_v36, %v1369_v36 }
 0x3a6   :  { %v1643_v40 = vpop.f32.mrf.mxu1 }
 0x3a7   :  { %1647 = vmatmul.mubr.msk.bf16.vlgmr.msra.gmra.mxu1 %vm1379_vm4, %v1370_v39 }
 0x467   :  { %v1421_v37 = vpop.f32.mrf.mxu1 }
 0x468   :  { %v1422_v43 = vadd.f32 %v1593_v41, %v1421_v37 }
 0x469   :  { %v1648_v44 = vpop.f32.mrf.mxu1 }
 0x46a   :  { %v1427_v45 = vsub.f32 0.0, %v1422_v43 }
 0x46b   :  { %v1424_v46 = vpop.f32.mrf.mxu1 }
 0x46c   :  { %v1428_v47 = vmul.f32 1.442695, %v1427_v45 }
 0x46d   :  { %v1649_v48 = vpop.f32.mrf.mxu1 }
 0x46e   :  { %1867 = vpow2.f32 %v1428_v47 }
 0x47b   :  { %v1868_v49 = vpop.eup %1867 }
 0x47c   :  { %v1430_v50 = vadd.f32 1.0, %v1868_v49 }
 0x47e   :  { %1869 = vrcp.f32 %v1430_v50 }
 0x48b   :  { %v1870_v51 = vpop.eup %1869 }
 0x48c   :  { %1434 = vst.msk [vmem:[%s2438_s11] sm:$0x3] %vm1433_vm5, %v1870_v51 }

</bundles_post_ra>
